<compile_context>
chip_gen: v5e
topology: v5e:2x2
jax: 0.10.0
libtpu: 0.0.40
codegen_flags: <defaults>
</compile_context>

<pallas_src>
import functools

import numpy as np
import jax
import jax.numpy as jnp
from jax.experimental import pallas as pl
from jax.experimental.pallas import tpu as pltpu

LEAKY_SLOPE = 0.01  # nn.LeakyReLU default


# ----------------------------------------------------------------------------
# Host-side constant: 0/1 selection matrix for horizontal stride-2
# ----------------------------------------------------------------------------
def _host_col_select(ho, w, wo):
    # Output row p = (i*wo + j) picks full-width row r = i*w + 2*j.
    sel = np.zeros((ho * wo, ho * w), np.float32)
    p = np.arange(ho * wo)
    sel[p, (p // wo) * w + 2 * (p % wo)] = 1.0
    return jnp.asarray(sel)


# ----------------------------------------------------------------------------
# In-kernel helpers (operate on VMEM-resident values; traced once)
# ----------------------------------------------------------------------------
def _leaky(v):
    # leaky_relu(v) == max(v, 0.01*v): one VPU max instead of cmp + select.
    return jnp.maximum(v, LEAKY_SLOPE * v)


def _conv3x3(v2, h, w, w9_ref, b_ref, *, stride=1, leaky=False, sel_ref=None):
    """3x3 conv, pad=1, as a single im2col matmul.

    v2: (h*w, cin) f32.  w9_ref: (9*cin, cout) im2col weights (kh,kw,cin rows).
    Returns ((ho*wo, cout), ho, wo).
    """
    cin = v2.shape[1]
    x3 = v2.reshape(h, w, cin)

    # In-kernel zero halo (pad=1): no HBM padding pass.
    zr = jnp.zeros((1, w, cin), jnp.float32)
    xp = jnp.concatenate([zr, x3, zr], axis=0)                 # (h+2, w, cin)
    zc = jnp.zeros((h + 2, 1, cin), jnp.float32)
    xp = jnp.concatenate([zc, xp, zc], axis=1)                 # (h+2, w+2, cin)

    ho, wo = h // stride, w // stride
    taps = []
    for kh in range(3):
        if stride == 1:
            rows = xp[kh:kh + h]                               # (h, w+2, cin)
        else:
            # rows (2*i + kh) of the padded input via a free leading-dim split
            rows = xp[kh:kh + 2 * ho].reshape(ho, 2, w + 2, cin)[:, 0]
        for kw in range(3):
            taps.append(rows[:, kw:kw + w, :])                 # (ho, w, cin)
    patch = jnp.concatenate(taps, axis=2)                      # (ho, w, 9*cin)
    patch = patch.reshape(ho * w, 9 * cin)

    y = jnp.dot(patch, w9_ref[...], preferred_element_type=jnp.float32)
    if stride != 1:
        # Horizontal stride 2: keep columns 2*j with a small precomputed
        # selection matmul (host constant, MXU slot).
        y = jnp.dot(sel_ref[...], y, preferred_element_type=jnp.float32)
    y = y + b_ref[...]
    if leaky:
        y = _leaky(y)
    return y, ho, wo


def _conv1x1_stride2(v2, h, w, ws_ref, bs_ref, sel_ref):
    cin = v2.shape[1]
    ho, wo = h // 2, w // 2
    rows = v2.reshape(ho, 2, w, cin)[:, 0]                     # even image rows
    xf = rows.reshape(ho * w, cin)
    # Apply the column selection before the 1x1 matmul: cin <= cout here, so
    # selecting on the narrow operand is the cheaper order.
    xf = jnp.dot(sel_ref[...], xf, preferred_element_type=jnp.float32)
    return jnp.dot(xf, ws_ref[...], preferred_element_type=jnp.float32) + bs_ref[...]


def _residual_block(v2, h, w, p):
    y, _, _ = _conv3x3(v2, h, w, p["w1"], p["b1"], leaky=True)
    y, _, _ = _conv3x3(y, h, w, p["w2"], p["b2"], leaky=True)
    if "ws" in p:
        ident = jnp.dot(v2, p["ws"][...], preferred_element_type=jnp.float32) + p["bs"][...]
    else:
        ident = v2
    return y + ident


def _residual_block_with_stride(v2, h, w, p):
    sel = p["sel"]
    y, ho, wo = _conv3x3(v2, h, w, p["w1"], p["b1"], stride=2, leaky=True, sel_ref=sel)
    y, _, _ = _conv3x3(y, ho, wo, p["w2"], p["b2"], leaky=False)
    # GDN: y * rsqrt(y^2 @ gamma + beta)  (rsqrt -> EUP slot, not a VPU divide)
    norm = jnp.dot(y * y, p["gamma"][...], preferred_element_type=jnp.float32) + p["beta"][...]
    y = y * jax.lax.rsqrt(norm)
    ident = _conv1x1_stride2(v2, h, w, p["ws"], p["bs"], sel)
    return y + ident, ho, wo


def _af_module(v2, p, s0, s1, s2):
    n, _ = v2.shape
    ctx = jnp.sum(v2, axis=0, keepdims=True) * (1.0 / float(n))   # (1, c)
    w1s = p["w1s"][...]                                           # (3, c)
    hvec = jnp.dot(ctx, p["w1x"][...], preferred_element_type=jnp.float32)
    hvec = hvec + s0 * w1s[0:1, :] + s1 * w1s[1:2, :] + s2 * w1s[2:3, :] + p["b1"][...]
    hvec = _leaky(hvec)
    a = jnp.dot(hvec, p["w2"][...], preferred_element_type=jnp.float32) + p["b2"][...]
    a = jax.nn.sigmoid(a)                                         # (1, c)
    return v2 * a


# ----------------------------------------------------------------------------
# Fused kernel: one grid step per batch element, whole network in VMEM
# ----------------------------------------------------------------------------
def _encoder_kernel(*refs, treedef, n_leaves, height, width):
    snr_ref, x_ref = refs[0], refs[1]
    w_refs = refs[2:2 + n_leaves]
    o_ref = refs[2 + n_leaves]
    P = jax.tree_util.tree_unflatten(treedef, list(w_refs))

    b = pl.program_id(0)
    s0 = snr_ref[b, 0]
    s1 = snr_ref[b, 1]
    s2 = snr_ref[b, 2]

    h, w = height, width
    cin = x_ref.shape[3]
    v = x_ref[0].reshape(h * w, cin)

    v, h, w = _residual_block_with_stride(v, h, w, P["rbws1"])
    v = _residual_block(v, h, w, P["rb1"])
    v = _af_module(v, P["af1"], s0, s1, s2)
    v = _residual_block(v, h, w, P["rbws2"])     # plain ResidualBlock despite the name
    v = _residual_block(v, h, w, P["rb2"])
    v = _af_module(v, P["af2"], s0, s1, s2)
    v, h, w = _residual_block_with_stride(v, h, w, P["rbws3"])
    v = _af_module(v, P["af3"], s0, s1, s2)
    v = _residual_block(v, h, w, P["rbws4"])     # ResidualBlock(c_feat, c_out)
    v = _af_module(v, P["af4"], s0, s1, s2)

    cout = v.shape[1]
    # Single tiny store at the end of the fused kernel (2 KB for the demo
    # shapes), so lane-density of this one store is immaterial.
    o_ref[...] = v.reshape(1, h, w, cout)


def encoder_cell_forward(params, x_nhwc, snr):
    B, H, W, Cin = x_nhwc.shape
    assert H % 4 == 0 and W % 4 == 0, "stride-2 path assumes even spatial dims"
    snr_b = snr.shape[0]
    assert B % snr_b == 0
    snr_full = jnp.repeat(snr, B // snr_b, axis=0).astype(jnp.float32)  # (B, 3)

    # Inject host-precomputed stride-selection matrices next to the weights of
    # the two strided blocks (fetched once; constant index_map like weights).
    consts = {k: dict(v) for k, v in params.items()}
    consts["rbws1"]["sel"] = _host_col_select(H // 2, W, W // 2)
    consts["rbws3"]["sel"] = _host_col_select(H // 4, W // 2, W // 4)

    flat, treedef = jax.tree_util.tree_flatten(consts)
    n_leaves = len(flat)
    c_out = params["af4"]["b2"].shape[1]
    Ho, Wo = H // 4, W // 4

    kernel = functools.partial(_encoder_kernel, treedef=treedef,
                               n_leaves=n_leaves, height=H, width=W)

    def _whole(shape):
        nd = len(shape)
        return pl.BlockSpec(shape, lambda b_, _nd=nd: (0,) * _nd)

    in_specs = [
        # snr scalars live in SMEM (scalar path) -- no padded VMEM tile / DMA.
        pl.BlockSpec(memory_space=pltpu.MemorySpace.SMEM),
        pl.BlockSpec((1, H, W, Cin), lambda b_: (b_, 0, 0, 0)),
    ]
    # Weights + selection constants: constant block index -> fetched once,
    # reused every grid step.
    in_specs += [_whole(leaf.shape) for leaf in flat]

    return pl.pallas_call(
        kernel,
        grid=(B,),
        in_specs=in_specs,
        out_specs=pl.BlockSpec((1, Ho, Wo, c_out), lambda b_: (b_, 0, 0, 0)),
        out_shape=jax.ShapeDtypeStruct((B, Ho, Wo, c_out), jnp.float32),
        compiler_params=pltpu.CompilerParams(
            dimension_semantics=("parallel",),   # batch across v7x TensorCores
            vmem_limit_bytes=32 * 1024 * 1024,   # headroom on v5e's 16 MiB default
        ),
    )(snr_full, x_nhwc, *flat)


# ----------------------------------------------------------------------------
# Deterministic synthetic parameters (conv weights stored in im2col layout)
# ----------------------------------------------------------------------------
def init_params(key, c_in, c_feat, c_out):
    keys = iter(jax.random.split(key, 128))

    def conv_w(cin, cout, scale=0.1):
        w = scale * jax.random.normal(next(keys), (3, 3, cin, cout), jnp.float32)
        return w.reshape(9 * cin, cout)          # im2col rows ordered (kh, kw, cin)

    def mat(cin, cout, scale=0.1):
        return scale * jax.random.normal(next(keys), (cin, cout), jnp.float32)

    def bias(c, scale=0.01):
        return scale * jax.random.normal(next(keys), (1, c), jnp.float32)

    def rb(cin, cout):
        p = {"w1": conv_w(cin, cout), "b1": bias(cout),
             "w2": conv_w(cout, cout), "b2": bias(cout)}
        if cin != cout:
            p["ws"] = mat(cin, cout)
            p["bs"] = bias(cout)
        return p

    def rbws(cin, cout):
        return {"w1": conv_w(cin, cout), "b1": bias(cout),
                "w2": conv_w(cout, cout), "b2": bias(cout),
                "ws": mat(cin, cout), "bs": bias(cout),
                # GDN effective init (CompressAI): gamma = 0.1*I, beta = 1
                "gamma": 0.1 * jnp.eye(cout, dtype=jnp.float32),
                "beta": jnp.ones((1, cout), jnp.float32)}

    def af(c):
        return {"w1x": mat(c, c), "w1s": mat(3, c), "b1": bias(c),
                "w2": mat(c, c), "b2": bias(c)}

    return {
        "rbws1": rbws(c_in, c_feat),
        "rb1": rb(c_feat, c_feat),
        "af1": af(c_feat),
        "rbws2": rb(c_feat, c_feat),
        "rb2": rb(c_feat, c_feat),
        "af2": af(c_feat),
        "rbws3": rbws(c_feat, c_feat),
        "af3": af(c_feat),
        "rbws4": rb(c_feat, c_out),
        "af4": af(c_out),
    }


# ----------------------------------------------------------------------------
# Pure-JAX reference (XLA ops) for a numerical cross-check
# ----------------------------------------------------------------------------
def encoder_cell_reference(params, x_nhwc, snr):
    B = x_nhwc.shape[0]
    snr_full = jnp.repeat(snr, B // snr.shape[0], axis=0)

    def conv3(x, w9, b, stride=1):
        cin, cout = x.shape[-1], w9.shape[-1]
        w = w9.reshape(3, 3, cin, cout)
        y = jax.lax.conv_general_dilated(
            x, w, window_strides=(stride, stride), padding=((1, 1), (1, 1)),
            dimension_numbers=("NHWC", "HWIO", "NHWC"))
        return y + b.reshape(1, 1, 1, cout)

    def lrelu(v):
        return jnp.where(v > 0, v, LEAKY_SLOPE * v)

    def lin(x, w, b):
        return jnp.einsum("bhwc,cd->bhwd", x, w) + b.reshape(1, 1, 1, -1)

    def rb(x, p):
        y = lrelu(conv3(x, p["w1"], p["b1"]))
        y = lrelu(conv3(y, p["w2"], p["b2"]))
        ident = lin(x, p["ws"], p["bs"]) if "ws" in p else x
        return y + ident

    def rbws(x, p):
        y = lrelu(conv3(x, p["w1"], p["b1"], stride=2))
        y = conv3(y, p["w2"], p["b2"])
        norm = lin(y * y, p["gamma"], p["beta"])
        y = y / jnp.sqrt(norm)
        ident = lin(x[:, ::2, ::2, :], p["ws"], p["bs"])
        return y + ident

    def af(x, p):
        ctx = jnp.mean(x, axis=(1, 2))                            # (B, C)
        h = ctx @ p["w1x"] + snr_full @ p["w1s"] + p["b1"]
        a = jax.nn.sigmoid(lrelu(h) @ p["w2"] + p["b2"])
        return x * a[:, None, None, :]

    x = rbws(x_nhwc, params["rbws1"])
    x = rb(x, params["rb1"]); x = af(x, params["af1"])
    x = rb(x, params["rbws2"]); x = rb(x, params["rb2"]); x = af(x, params["af2"])
    x = rbws(x, params["rbws3"]); x = af(x, params["af3"])
    x = rb(x, params["rbws4"]); x = af(x, params["af4"])
    return x


if __name__ == "__main__":
    key = jax.random.PRNGKey(0)
    kx, ks, kp = jax.random.split(key, 3)

    B, C_IN, C_FEAT, C_OUT, H, W = 2, 4, 32, 16, 16, 16
    x_nchw = jax.random.normal(kx, (B, C_IN, H, W), jnp.float32)   # PyTorch NCHW input
    snr = jax.random.normal(ks, (1, 3), jnp.float32)               # (snr_B=1, 3)
    params = init_params(kp, C_IN, C_FEAT, C_OUT)

    x_nhwc = jnp.transpose(x_nchw, (0, 2, 3, 1))                   # NCHW -> NHWC
    fwd = jax.jit(encoder_cell_forward)
    out_nhwc = fwd(params, x_nhwc, snr)
    jax.block_until_ready(out_nhwc)
    out_nchw = jnp.transpose(out_nhwc, (0, 3, 1, 2))               # back to NCHW

    assert out_nchw.shape == (B, C_OUT, H // 4, W // 4), out_nchw.shape
    assert bool(jnp.all(jnp.isfinite(out_nchw)))

    # Numerical cross-check against a pure-JAX reference of the same forward.
    with jax.default_matmul_precision("highest"):
        ref = jax.jit(encoder_cell_reference)(params, x_nhwc, snr)
    err = float(jnp.max(jnp.abs(ref - out_nhwc)))
    tol = 3e-2 * (1.0 + float(jnp.max(jnp.abs(ref))))
    assert err < tol, f"mismatch vs reference: {err} (tol {tol})"

    print("KERNEL_OK")
</pallas_src>

<mosaic_0001>
module attributes {stable_mosaic.version = 11 : i64} {
  func.func @_encoder_kernel(%arg0: i32, %arg1: memref<2x3xf32, #tpu.memory_space<smem>>, %arg2: memref<1x16x16x4xf32, #tpu.memory_space<vmem>>, %arg3: memref<1x32xf32, #tpu.memory_space<vmem>>, %arg4: memref<1x32xf32, #tpu.memory_space<vmem>>, %arg5: memref<3x32xf32, #tpu.memory_space<vmem>>, %arg6: memref<32x32xf32, #tpu.memory_space<vmem>>, %arg7: memref<32x32xf32, #tpu.memory_space<vmem>>, %arg8: memref<1x32xf32, #tpu.memory_space<vmem>>, %arg9: memref<1x32xf32, #tpu.memory_space<vmem>>, %arg10: memref<3x32xf32, #tpu.memory_space<vmem>>, %arg11: memref<32x32xf32, #tpu.memory_space<vmem>>, %arg12: memref<32x32xf32, #tpu.memory_space<vmem>>, %arg13: memref<1x32xf32, #tpu.memory_space<vmem>>, %arg14: memref<1x32xf32, #tpu.memory_space<vmem>>, %arg15: memref<3x32xf32, #tpu.memory_space<vmem>>, %arg16: memref<32x32xf32, #tpu.memory_space<vmem>>, %arg17: memref<32x32xf32, #tpu.memory_space<vmem>>, %arg18: memref<1x16xf32, #tpu.memory_space<vmem>>, %arg19: memref<1x16xf32, #tpu.memory_space<vmem>>, %arg20: memref<3x16xf32, #tpu.memory_space<vmem>>, %arg21: memref<16x16xf32, #tpu.memory_space<vmem>>, %arg22: memref<16x16xf32, #tpu.memory_space<vmem>>, %arg23: memref<1x32xf32, #tpu.memory_space<vmem>>, %arg24: memref<1x32xf32, #tpu.memory_space<vmem>>, %arg25: memref<288x32xf32, #tpu.memory_space<vmem>>, %arg26: memref<288x32xf32, #tpu.memory_space<vmem>>, %arg27: memref<1x32xf32, #tpu.memory_space<vmem>>, %arg28: memref<1x32xf32, #tpu.memory_space<vmem>>, %arg29: memref<288x32xf32, #tpu.memory_space<vmem>>, %arg30: memref<288x32xf32, #tpu.memory_space<vmem>>, %arg31: memref<1x32xf32, #tpu.memory_space<vmem>>, %arg32: memref<1x32xf32, #tpu.memory_space<vmem>>, %arg33: memref<1x32xf32, #tpu.memory_space<vmem>>, %arg34: memref<1x32xf32, #tpu.memory_space<vmem>>, %arg35: memref<32x32xf32, #tpu.memory_space<vmem>>, %arg36: memref<64x128xf32, #tpu.memory_space<vmem>>, %arg37: memref<36x32xf32, #tpu.memory_space<vmem>>, %arg38: memref<288x32xf32, #tpu.memory_space<vmem>>, %arg39: memref<4x32xf32, #tpu.memory_space<vmem>>, %arg40: memref<1x32xf32, #tpu.memory_space<vmem>>, %arg41: memref<1x32xf32, #tpu.memory_space<vmem>>, %arg42: memref<288x32xf32, #tpu.memory_space<vmem>>, %arg43: memref<288x32xf32, #tpu.memory_space<vmem>>, %arg44: memref<1x32xf32, #tpu.memory_space<vmem>>, %arg45: memref<1x32xf32, #tpu.memory_space<vmem>>, %arg46: memref<1x32xf32, #tpu.memory_space<vmem>>, %arg47: memref<1x32xf32, #tpu.memory_space<vmem>>, %arg48: memref<32x32xf32, #tpu.memory_space<vmem>>, %arg49: memref<16x32xf32, #tpu.memory_space<vmem>>, %arg50: memref<288x32xf32, #tpu.memory_space<vmem>>, %arg51: memref<288x32xf32, #tpu.memory_space<vmem>>, %arg52: memref<32x32xf32, #tpu.memory_space<vmem>>, %arg53: memref<1x16xf32, #tpu.memory_space<vmem>>, %arg54: memref<1x16xf32, #tpu.memory_space<vmem>>, %arg55: memref<1x16xf32, #tpu.memory_space<vmem>>, %arg56: memref<288x16xf32, #tpu.memory_space<vmem>>, %arg57: memref<144x16xf32, #tpu.memory_space<vmem>>, %arg58: memref<32x16xf32, #tpu.memory_space<vmem>>, %arg59: memref<1x4x4x16xf32, #tpu.memory_space<vmem>>) attributes {dimension_semantics = [#tpu.dimension_semantics<parallel>], iteration_bounds = array<i64: 2>, scalar_prefetch = 0 : i64, scratch_operands = 0 : i64, tpu.core_type = #tpu.core_type<tc>, window_params = [{transform_indices = @transform_0, window_bounds = array<i64: 2, 3>}, {transform_indices = @transform_1, window_bounds = array<i64: 1, 16, 16, 4>}, {pipeline_mode = #tpu.pipeline_mode<synchronous>, transform_indices = @transform_2, window_bounds = array<i64: 1, 32>}, {pipeline_mode = #tpu.pipeline_mode<synchronous>, transform_indices = @transform_3, window_bounds = array<i64: 1, 32>}, {pipeline_mode = #tpu.pipeline_mode<synchronous>, transform_indices = @transform_4, window_bounds = array<i64: 3, 32>}, {pipeline_mode = #tpu.pipeline_mode<synchronous>, transform_indices = @transform_5, window_bounds = array<i64: 32, 32>}, {pipeline_mode = #tpu.pipeline_mode<synchronous>, transform_indices = @transform_6, window_bounds = array<i64: 32, 32>}, {pipeline_mode = #tpu.pipeline_mode<synchronous>, transform_indices = @transform_7, window_bounds = array<i64: 1, 32>}, {pipeline_mode = #tpu.pipeline_mode<synchronous>, transform_indices = @transform_8, window_bounds = array<i64: 1, 32>}, {pipeline_mode = #tpu.pipeline_mode<synchronous>, transform_indices = @transform_9, window_bounds = array<i64: 3, 32>}, {pipeline_mode = #tpu.pipeline_mode<synchronous>, transform_indices = @transform_10, window_bounds = array<i64: 32, 32>}, {pipeline_mode = #tpu.pipeline_mode<synchronous>, transform_indices = @transform_11, window_bounds = array<i64: 32, 32>}, {pipeline_mode = #tpu.pipeline_mode<synchronous>, transform_indices = @transform_12, window_bounds = array<i64: 1, 32>}, {pipeline_mode = #tpu.pipeline_mode<synchronous>, transform_indices = @transform_13, window_bounds = array<i64: 1, 32>}, {pipeline_mode = #tpu.pipeline_mode<synchronous>, transform_indices = @transform_14, window_bounds = array<i64: 3, 32>}, {pipeline_mode = #tpu.pipeline_mode<synchronous>, transform_indices = @transform_15, window_bounds = array<i64: 32, 32>}, {pipeline_mode = #tpu.pipeline_mode<synchronous>, transform_indices = @transform_16, window_bounds = array<i64: 32, 32>}, {pipeline_mode = #tpu.pipeline_mode<synchronous>, transform_indices = @transform_17, window_bounds = array<i64: 1, 16>}, {pipeline_mode = #tpu.pipeline_mode<synchronous>, transform_indices = @transform_18, window_bounds = array<i64: 1, 16>}, {pipeline_mode = #tpu.pipeline_mode<synchronous>, transform_indices = @transform_19, window_bounds = array<i64: 3, 16>}, {pipeline_mode = #tpu.pipeline_mode<synchronous>, transform_indices = @transform_20, window_bounds = array<i64: 16, 16>}, {pipeline_mode = #tpu.pipeline_mode<synchronous>, transform_indices = @transform_21, window_bounds = array<i64: 16, 16>}, {pipeline_mode = #tpu.pipeline_mode<synchronous>, transform_indices = @transform_22, window_bounds = array<i64: 1, 32>}, {pipeline_mode = #tpu.pipeline_mode<synchronous>, transform_indices = @transform_23, window_bounds = array<i64: 1, 32>}, {pipeline_mode = #tpu.pipeline_mode<synchronous>, transform_indices = @transform_24, window_bounds = array<i64: 288, 32>}, {pipeline_mode = #tpu.pipeline_mode<synchronous>, transform_indices = @transform_25, window_bounds = array<i64: 288, 32>}, {pipeline_mode = #tpu.pipeline_mode<synchronous>, transform_indices = @transform_26, window_bounds = array<i64: 1, 32>}, {pipeline_mode = #tpu.pipeline_mode<synchronous>, transform_indices = @transform_27, window_bounds = array<i64: 1, 32>}, {pipeline_mode = #tpu.pipeline_mode<synchronous>, transform_indices = @transform_28, window_bounds = array<i64: 288, 32>}, {pipeline_mode = #tpu.pipeline_mode<synchronous>, transform_indices = @transform_29, window_bounds = array<i64: 288, 32>}, {pipeline_mode = #tpu.pipeline_mode<synchronous>, transform_indices = @transform_30, window_bounds = array<i64: 1, 32>}, {pipeline_mode = #tpu.pipeline_mode<synchronous>, transform_indices = @transform_31, window_bounds = array<i64: 1, 32>}, {pipeline_mode = #tpu.pipeline_mode<synchronous>, transform_indices = @transform_32, window_bounds = array<i64: 1, 32>}, {pipeline_mode = #tpu.pipeline_mode<synchronous>, transform_indices = @transform_33, window_bounds = array<i64: 1, 32>}, {pipeline_mode = #tpu.pipeline_mode<synchronous>, transform_indices = @transform_34, window_bounds = array<i64: 32, 32>}, {pipeline_mode = #tpu.pipeline_mode<synchronous>, transform_indices = @transform_35, window_bounds = array<i64: 64, 128>}, {pipeline_mode = #tpu.pipeline_mode<synchronous>, transform_indices = @transform_36, window_bounds = array<i64: 36, 32>}, {pipeline_mode = #tpu.pipeline_mode<synchronous>, transform_indices = @transform_37, window_bounds = array<i64: 288, 32>}, {pipeline_mode = #tpu.pipeline_mode<synchronous>, transform_indices = @transform_38, window_bounds = array<i64: 4, 32>}, {pipeline_mode = #tpu.pipeline_mode<synchronous>, transform_indices = @transform_39, window_bounds = array<i64: 1, 32>}, {pipeline_mode = #tpu.pipeline_mode<synchronous>, transform_indices = @transform_40, window_bounds = array<i64: 1, 32>}, {pipeline_mode = #tpu.pipeline_mode<synchronous>, transform_indices = @transform_41, window_bounds = array<i64: 288, 32>}, {pipeline_mode = #tpu.pipeline_mode<synchronous>, transform_indices = @transform_42, window_bounds = array<i64: 288, 32>}, {pipeline_mode = #tpu.pipeline_mode<synchronous>, transform_indices = @transform_43, window_bounds = array<i64: 1, 32>}, {pipeline_mode = #tpu.pipeline_mode<synchronous>, transform_indices = @transform_44, window_bounds = array<i64: 1, 32>}, {pipeline_mode = #tpu.pipeline_mode<synchronous>, transform_indices = @transform_45, window_bounds = array<i64: 1, 32>}, {pipeline_mode = #tpu.pipeline_mode<synchronous>, transform_indices = @transform_46, window_bounds = array<i64: 1, 32>}, {pipeline_mode = #tpu.pipeline_mode<synchronous>, transform_indices = @transform_47, window_bounds = array<i64: 32, 32>}, {pipeline_mode = #tpu.pipeline_mode<synchronous>, transform_indices = @transform_48, window_bounds = array<i64: 16, 32>}, {pipeline_mode = #tpu.pipeline_mode<synchronous>, transform_indices = @transform_49, window_bounds = array<i64: 288, 32>}, {pipeline_mode = #tpu.pipeline_mode<synchronous>, transform_indices = @transform_50, window_bounds = array<i64: 288, 32>}, {pipeline_mode = #tpu.pipeline_mode<synchronous>, transform_indices = @transform_51, window_bounds = array<i64: 32, 32>}, {pipeline_mode = #tpu.pipeline_mode<synchronous>, transform_indices = @transform_52, window_bounds = array<i64: 1, 16>}, {pipeline_mode = #tpu.pipeline_mode<synchronous>, transform_indices = @transform_53, window_bounds = array<i64: 1, 16>}, {pipeline_mode = #tpu.pipeline_mode<synchronous>, transform_indices = @transform_54, window_bounds = array<i64: 1, 16>}, {pipeline_mode = #tpu.pipeline_mode<synchronous>, transform_indices = @transform_55, window_bounds = array<i64: 288, 16>}, {pipeline_mode = #tpu.pipeline_mode<synchronous>, transform_indices = @transform_56, window_bounds = array<i64: 144, 16>}, {pipeline_mode = #tpu.pipeline_mode<synchronous>, transform_indices = @transform_57, window_bounds = array<i64: 32, 16>}, {transform_indices = @transform_58, window_bounds = array<i64: 1, 4, 4, 16>}]} {
    %0 = arith.index_cast %arg0 : i32 to index
    %c0 = arith.constant 0 : index
    %1 = memref.load %arg1[%0, %c0] : memref<2x3xf32, #tpu.memory_space<smem>>
    %2 = arith.index_cast %arg0 : i32 to index
    %c1 = arith.constant 1 : index
    %3 = memref.load %arg1[%2, %c1] : memref<2x3xf32, #tpu.memory_space<smem>>
    %4 = arith.index_cast %arg0 : i32 to index
    %c2 = arith.constant 2 : index
    %5 = memref.load %arg1[%4, %c2] : memref<2x3xf32, #tpu.memory_space<smem>>
    %c0_0 = arith.constant 0 : index
    %c0_1 = arith.constant 0 : index
    %c0_2 = arith.constant 0 : index
    %c0_3 = arith.constant 0 : index
    %6 = vector.load %arg2[%c0_0, %c0_1, %c0_2, %c0_3] : memref<1x16x16x4xf32, #tpu.memory_space<vmem>>, vector<1x16x16x4xf32>
    %7 = vector.shape_cast %6 : vector<1x16x16x4xf32> to vector<16x16x4xf32>
    %8 = vector.shape_cast %7 : vector<16x16x4xf32> to vector<256x4xf32>
    %9 = vector.shape_cast %8 : vector<256x4xf32> to vector<16x16x4xf32>
    %cst = arith.constant 0.000000e+00 : f32
    %10 = vector.broadcast %cst : f32 to vector<1x16x4xf32>
    %11 = tpu.concatenate %10, %9, %10 in 0 : vector<1x16x4xf32>, vector<16x16x4xf32>, vector<1x16x4xf32> -> vector<18x16x4xf32>
    %cst_4 = arith.constant 0.000000e+00 : f32
    %12 = vector.broadcast %cst_4 : f32 to vector<18x1x4xf32>
    %13 = tpu.concatenate %12, %11, %12 in 1 : vector<18x1x4xf32>, vector<18x16x4xf32>, vector<18x1x4xf32> -> vector<18x18x4xf32>
    %14 = vector.extract_strided_slice %13 {offsets = [0, 0, 0], sizes = [16, 18, 4], strides = [1, 1, 1]} : vector<18x18x4xf32> to vector<16x18x4xf32>
    %15 = vector.shape_cast %14 : vector<16x18x4xf32> to vector<8x2x18x4xf32>
    %16 = vector.extract_strided_slice %15 {offsets = [0, 0, 0, 0], sizes = [8, 1, 18, 4], strides = [1, 1, 1, 1]} : vector<8x2x18x4xf32> to vector<8x1x18x4xf32>
    %17 = vector.shape_cast %16 : vector<8x1x18x4xf32> to vector<8x18x4xf32>
    %18 = vector.extract_strided_slice %17 {offsets = [0, 0, 0], sizes = [8, 16, 4], strides = [1, 1, 1]} : vector<8x18x4xf32> to vector<8x16x4xf32>
    %19 = vector.extract_strided_slice %17 {offsets = [0, 1, 0], sizes = [8, 16, 4], strides = [1, 1, 1]} : vector<8x18x4xf32> to vector<8x16x4xf32>
    %20 = vector.extract_strided_slice %17 {offsets = [0, 2, 0], sizes = [8, 16, 4], strides = [1, 1, 1]} : vector<8x18x4xf32> to vector<8x16x4xf32>
    %21 = vector.extract_strided_slice %13 {offsets = [1, 0, 0], sizes = [16, 18, 4], strides = [1, 1, 1]} : vector<18x18x4xf32> to vector<16x18x4xf32>
    %22 = vector.shape_cast %21 : vector<16x18x4xf32> to vector<8x2x18x4xf32>
    %23 = vector.extract_strided_slice %22 {offsets = [0, 0, 0, 0], sizes = [8, 1, 18, 4], strides = [1, 1, 1, 1]} : vector<8x2x18x4xf32> to vector<8x1x18x4xf32>
    %24 = vector.shape_cast %23 : vector<8x1x18x4xf32> to vector<8x18x4xf32>
    %25 = vector.extract_strided_slice %24 {offsets = [0, 0, 0], sizes = [8, 16, 4], strides = [1, 1, 1]} : vector<8x18x4xf32> to vector<8x16x4xf32>
    %26 = vector.extract_strided_slice %24 {offsets = [0, 1, 0], sizes = [8, 16, 4], strides = [1, 1, 1]} : vector<8x18x4xf32> to vector<8x16x4xf32>
    %27 = vector.extract_strided_slice %24 {offsets = [0, 2, 0], sizes = [8, 16, 4], strides = [1, 1, 1]} : vector<8x18x4xf32> to vector<8x16x4xf32>
    %28 = vector.extract_strided_slice %13 {offsets = [2, 0, 0], sizes = [16, 18, 4], strides = [1, 1, 1]} : vector<18x18x4xf32> to vector<16x18x4xf32>
    %29 = vector.shape_cast %28 : vector<16x18x4xf32> to vector<8x2x18x4xf32>
    %30 = vector.extract_strided_slice %29 {offsets = [0, 0, 0, 0], sizes = [8, 1, 18, 4], strides = [1, 1, 1, 1]} : vector<8x2x18x4xf32> to vector<8x1x18x4xf32>
    %31 = vector.shape_cast %30 : vector<8x1x18x4xf32> to vector<8x18x4xf32>
    %32 = vector.extract_strided_slice %31 {offsets = [0, 0, 0], sizes = [8, 16, 4], strides = [1, 1, 1]} : vector<8x18x4xf32> to vector<8x16x4xf32>
    %33 = vector.extract_strided_slice %31 {offsets = [0, 1, 0], sizes = [8, 16, 4], strides = [1, 1, 1]} : vector<8x18x4xf32> to vector<8x16x4xf32>
    %34 = vector.extract_strided_slice %31 {offsets = [0, 2, 0], sizes = [8, 16, 4], strides = [1, 1, 1]} : vector<8x18x4xf32> to vector<8x16x4xf32>
    %35 = tpu.concatenate %18, %19, %20, %25, %26, %27, %32, %33, %34 in 2 : vector<8x16x4xf32>, vector<8x16x4xf32>, vector<8x16x4xf32>, vector<8x16x4xf32>, vector<8x16x4xf32>, vector<8x16x4xf32>, vector<8x16x4xf32>, vector<8x16x4xf32>, vector<8x16x4xf32> -> vector<8x16x36xf32>
    %36 = vector.shape_cast %35 : vector<8x16x36xf32> to vector<128x36xf32>
    %c0_5 = arith.constant 0 : index
    %c0_6 = arith.constant 0 : index
    %37 = vector.load %arg37[%c0_5, %c0_6] : memref<36x32xf32, #tpu.memory_space<vmem>>, vector<36x32xf32>
    %cst_7 = arith.constant dense<0.000000e+00> : vector<128x32xf32>
    %38 = tpu.matmul %36, %37, %cst_7 {dimension_numbers = #tpu.dot_dimension_numbers<[1], [0], [0], [1], [0, 0, 1, 1], [], []>} : vector<128x36xf32>, vector<36x32xf32>, vector<128x32xf32> -> vector<128x32xf32>
    %c0_8 = arith.constant 0 : index
    %c0_9 = arith.constant 0 : index
    %39 = vector.load %arg36[%c0_8, %c0_9] : memref<64x128xf32, #tpu.memory_space<vmem>>, vector<64x128xf32>
    %cst_10 = arith.constant dense<0.000000e+00> : vector<64x32xf32>
    %40 = tpu.matmul %39, %38, %cst_10 {dimension_numbers = #tpu.dot_dimension_numbers<[1], [0], [0], [1], [0, 0, 1, 1], [], []>} : vector<64x128xf32>, vector<128x32xf32>, vector<64x32xf32> -> vector<64x32xf32>
    %c0_11 = arith.constant 0 : index
    %c0_12 = arith.constant 0 : index
    %41 = vector.load %arg31[%c0_11, %c0_12] : memref<1x32xf32, #tpu.memory_space<vmem>>, vector<1x32xf32>
    %42 = vector.broadcast %41 : vector<1x32xf32> to vector<64x32xf32>
    %43 = arith.addf %40, %42 : vector<64x32xf32>
    %cst_13 = arith.constant 0.00999999977 : f32
    %44 = vector.broadcast %cst_13 : f32 to vector<64x32xf32>
    %45 = arith.mulf %44, %43 : vector<64x32xf32>
    %46 = arith.maximumf %43, %45 : vector<64x32xf32>
    %47 = vector.shape_cast %46 : vector<64x32xf32> to vector<8x8x32xf32>
    %cst_14 = arith.constant 0.000000e+00 : f32
    %48 = vector.broadcast %cst_14 : f32 to vector<1x8x32xf32>
    %49 = tpu.concatenate %48, %47, %48 in 0 : vector<1x8x32xf32>, vector<8x8x32xf32>, vector<1x8x32xf32> -> vector<10x8x32xf32>
    %cst_15 = arith.constant 0.000000e+00 : f32
    %50 = vector.broadcast %cst_15 : f32 to vector<10x1x32xf32>
    %51 = tpu.concatenate %50, %49, %50 in 1 : vector<10x1x32xf32>, vector<10x8x32xf32>, vector<10x1x32xf32> -> vector<10x10x32xf32>
    %52 = vector.extract_strided_slice %51 {offsets = [0, 0, 0], sizes = [8, 10, 32], strides = [1, 1, 1]} : vector<10x10x32xf32> to vector<8x10x32xf32>
    %53 = vector.extract_strided_slice %52 {offsets = [0, 0, 0], sizes = [8, 8, 32], strides = [1, 1, 1]} : vector<8x10x32xf32> to vector<8x8x32xf32>
    %54 = vector.extract_strided_slice %52 {offsets = [0, 1, 0], sizes = [8, 8, 32], strides = [1, 1, 1]} : vector<8x10x32xf32> to vector<8x8x32xf32>
    %55 = vector.extract_strided_slice %52 {offsets = [0, 2, 0], sizes = [8, 8, 32], strides = [1, 1, 1]} : vector<8x10x32xf32> to vector<8x8x32xf32>
    %56 = vector.extract_strided_slice %51 {offsets = [1, 0, 0], sizes = [8, 10, 32], strides = [1, 1, 1]} : vector<10x10x32xf32> to vector<8x10x32xf32>
    %57 = vector.extract_strided_slice %56 {offsets = [0, 0, 0], sizes = [8, 8, 32], strides = [1, 1, 1]} : vector<8x10x32xf32> to vector<8x8x32xf32>
    %58 = vector.extract_strided_slice %56 {offsets = [0, 1, 0], sizes = [8, 8, 32], strides = [1, 1, 1]} : vector<8x10x32xf32> to vector<8x8x32xf32>
    %59 = vector.extract_strided_slice %56 {offsets = [0, 2, 0], sizes = [8, 8, 32], strides = [1, 1, 1]} : vector<8x10x32xf32> to vector<8x8x32xf32>
    %60 = vector.extract_strided_slice %51 {offsets = [2, 0, 0], sizes = [8, 10, 32], strides = [1, 1, 1]} : vector<10x10x32xf32> to vector<8x10x32xf32>
    %61 = vector.extract_strided_slice %60 {offsets = [0, 0, 0], sizes = [8, 8, 32], strides = [1, 1, 1]} : vector<8x10x32xf32> to vector<8x8x32xf32>
    %62 = vector.extract_strided_slice %60 {offsets = [0, 1, 0], sizes = [8, 8, 32], strides = [1, 1, 1]} : vector<8x10x32xf32> to vector<8x8x32xf32>
    %63 = vector.extract_strided_slice %60 {offsets = [0, 2, 0], sizes = [8, 8, 32], strides = [1, 1, 1]} : vector<8x10x32xf32> to vector<8x8x32xf32>
    %64 = tpu.concatenate %53, %54, %55, %57, %58, %59, %61, %62, %63 in 2 : vector<8x8x32xf32>, vector<8x8x32xf32>, vector<8x8x32xf32>, vector<8x8x32xf32>, vector<8x8x32xf32>, vector<8x8x32xf32>, vector<8x8x32xf32>, vector<8x8x32xf32>, vector<8x8x32xf32> -> vector<8x8x288xf32>
    %65 = vector.shape_cast %64 : vector<8x8x288xf32> to vector<64x288xf32>
    %c0_16 = arith.constant 0 : index
    %c0_17 = arith.constant 0 : index
    %66 = vector.load %arg38[%c0_16, %c0_17] : memref<288x32xf32, #tpu.memory_space<vmem>>, vector<288x32xf32>
    %cst_18 = arith.constant dense<0.000000e+00> : vector<64x32xf32>
    %67 = tpu.matmul %65, %66, %cst_18 {dimension_numbers = #tpu.dot_dimension_numbers<[1], [0], [0], [1], [0, 0, 1, 1], [], []>} : vector<64x288xf32>, vector<288x32xf32>, vector<64x32xf32> -> vector<64x32xf32>
    %c0_19 = arith.constant 0 : index
    %c0_20 = arith.constant 0 : index
    %68 = vector.load %arg32[%c0_19, %c0_20] : memref<1x32xf32, #tpu.memory_space<vmem>>, vector<1x32xf32>
    %69 = vector.broadcast %68 : vector<1x32xf32> to vector<64x32xf32>
    %70 = arith.addf %67, %69 : vector<64x32xf32>
    %71 = arith.mulf %70, %70 : vector<64x32xf32>
    %c0_21 = arith.constant 0 : index
    %c0_22 = arith.constant 0 : index
    %72 = vector.load %arg35[%c0_21, %c0_22] : memref<32x32xf32, #tpu.memory_space<vmem>>, vector<32x32xf32>
    %cst_23 = arith.constant dense<0.000000e+00> : vector<64x32xf32>
    %73 = tpu.matmul %71, %72, %cst_23 {dimension_numbers = #tpu.dot_dimension_numbers<[1], [0], [0], [1], [0, 0, 1, 1], [], []>} : vector<64x32xf32>, vector<32x32xf32>, vector<64x32xf32> -> vector<64x32xf32>
    %c0_24 = arith.constant 0 : index
    %c0_25 = arith.constant 0 : index
    %74 = vector.load %arg33[%c0_24, %c0_25] : memref<1x32xf32, #tpu.memory_space<vmem>>, vector<1x32xf32>
    %75 = vector.broadcast %74 : vector<1x32xf32> to vector<64x32xf32>
    %76 = arith.addf %73, %75 : vector<64x32xf32>
    %77 = math.rsqrt %76 : vector<64x32xf32>
    %78 = arith.mulf %70, %77 : vector<64x32xf32>
    %79 = vector.shape_cast %8 : vector<256x4xf32> to vector<8x2x16x4xf32>
    %80 = vector.extract_strided_slice %79 {offsets = [0, 0, 0, 0], sizes = [8, 1, 16, 4], strides = [1, 1, 1, 1]} : vector<8x2x16x4xf32> to vector<8x1x16x4xf32>
    %81 = vector.shape_cast %80 : vector<8x1x16x4xf32> to vector<8x16x4xf32>
    %82 = vector.shape_cast %81 : vector<8x16x4xf32> to vector<128x4xf32>
    %c0_26 = arith.constant 0 : index
    %c0_27 = arith.constant 0 : index
    %83 = vector.load %arg36[%c0_26, %c0_27] : memref<64x128xf32, #tpu.memory_space<vmem>>, vector<64x128xf32>
    %cst_28 = arith.constant dense<0.000000e+00> : vector<64x4xf32>
    %84 = tpu.matmul %83, %82, %cst_28 {dimension_numbers = #tpu.dot_dimension_numbers<[1], [0], [0], [1], [0, 0, 1, 1], [], []>} : vector<64x128xf32>, vector<128x4xf32>, vector<64x4xf32> -> vector<64x4xf32>
    %c0_29 = arith.constant 0 : index
    %c0_30 = arith.constant 0 : index
    %85 = vector.load %arg39[%c0_29, %c0_30] : memref<4x32xf32, #tpu.memory_space<vmem>>, vector<4x32xf32>
    %cst_31 = arith.constant dense<0.000000e+00> : vector<64x32xf32>
    %86 = tpu.matmul %84, %85, %cst_31 {dimension_numbers = #tpu.dot_dimension_numbers<[1], [0], [0], [1], [0, 0, 1, 1], [], []>} : vector<64x4xf32>, vector<4x32xf32>, vector<64x32xf32> -> vector<64x32xf32>
    %c0_32 = arith.constant 0 : index
    %c0_33 = arith.constant 0 : index
    %87 = vector.load %arg34[%c0_32, %c0_33] : memref<1x32xf32, #tpu.memory_space<vmem>>, vector<1x32xf32>
    %88 = vector.broadcast %87 : vector<1x32xf32> to vector<64x32xf32>
    %89 = arith.addf %86, %88 : vector<64x32xf32>
    %90 = arith.addf %78, %89 : vector<64x32xf32>
    %91 = vector.shape_cast %90 : vector<64x32xf32> to vector<8x8x32xf32>
    %cst_34 = arith.constant 0.000000e+00 : f32
    %92 = vector.broadcast %cst_34 : f32 to vector<1x8x32xf32>
    %93 = tpu.concatenate %92, %91, %92 in 0 : vector<1x8x32xf32>, vector<8x8x32xf32>, vector<1x8x32xf32> -> vector<10x8x32xf32>
    %cst_35 = arith.constant 0.000000e+00 : f32
    %94 = vector.broadcast %cst_35 : f32 to vector<10x1x32xf32>
    %95 = tpu.concatenate %94, %93, %94 in 1 : vector<10x1x32xf32>, vector<10x8x32xf32>, vector<10x1x32xf32> -> vector<10x10x32xf32>
    %96 = vector.extract_strided_slice %95 {offsets = [0, 0, 0], sizes = [8, 10, 32], strides = [1, 1, 1]} : vector<10x10x32xf32> to vector<8x10x32xf32>
    %97 = vector.extract_strided_slice %96 {offsets = [0, 0, 0], sizes = [8, 8, 32], strides = [1, 1, 1]} : vector<8x10x32xf32> to vector<8x8x32xf32>
    %98 = vector.extract_strided_slice %96 {offsets = [0, 1, 0], sizes = [8, 8, 32], strides = [1, 1, 1]} : vector<8x10x32xf32> to vector<8x8x32xf32>
    %99 = vector.extract_strided_slice %96 {offsets = [0, 2, 0], sizes = [8, 8, 32], strides = [1, 1, 1]} : vector<8x10x32xf32> to vector<8x8x32xf32>
    %100 = vector.extract_strided_slice %95 {offsets = [1, 0, 0], sizes = [8, 10, 32], strides = [1, 1, 1]} : vector<10x10x32xf32> to vector<8x10x32xf32>
    %101 = vector.extract_strided_slice %100 {offsets = [0, 0, 0], sizes = [8, 8, 32], strides = [1, 1, 1]} : vector<8x10x32xf32> to vector<8x8x32xf32>
    %102 = vector.extract_strided_slice %100 {offsets = [0, 1, 0], sizes = [8, 8, 32], strides = [1, 1, 1]} : vector<8x10x32xf32> to vector<8x8x32xf32>
    %103 = vector.extract_strided_slice %100 {offsets = [0, 2, 0], sizes = [8, 8, 32], strides = [1, 1, 1]} : vector<8x10x32xf32> to vector<8x8x32xf32>
    %104 = vector.extract_strided_slice %95 {offsets = [2, 0, 0], sizes = [8, 10, 32], strides = [1, 1, 1]} : vector<10x10x32xf32> to vector<8x10x32xf32>
    %105 = vector.extract_strided_slice %104 {offsets = [0, 0, 0], sizes = [8, 8, 32], strides = [1, 1, 1]} : vector<8x10x32xf32> to vector<8x8x32xf32>
    %106 = vector.extract_strided_slice %104 {offsets = [0, 1, 0], sizes = [8, 8, 32], strides = [1, 1, 1]} : vector<8x10x32xf32> to vector<8x8x32xf32>
    %107 = vector.extract_strided_slice %104 {offsets = [0, 2, 0], sizes = [8, 8, 32], strides = [1, 1, 1]} : vector<8x10x32xf32> to vector<8x8x32xf32>
    %108 = tpu.concatenate %97, %98, %99, %101, %102, %103, %105, %106, %107 in 2 : vector<8x8x32xf32>, vector<8x8x32xf32>, vector<8x8x32xf32>, vector<8x8x32xf32>, vector<8x8x32xf32>, vector<8x8x32xf32>, vector<8x8x32xf32>, vector<8x8x32xf32>, vector<8x8x32xf32> -> vector<8x8x288xf32>
    %109 = vector.shape_cast %108 : vector<8x8x288xf32> to vector<64x288xf32>
    %c0_36 = arith.constant 0 : index
    %c0_37 = arith.constant 0 : index
    %110 = vector.load %arg25[%c0_36, %c0_37] : memref<288x32xf32, #tpu.memory_space<vmem>>, vector<288x32xf32>
    %cst_38 = arith.constant dense<0.000000e+00> : vector<64x32xf32>
    %111 = tpu.matmul %109, %110, %cst_38 {dimension_numbers = #tpu.dot_dimension_numbers<[1], [0], [0], [1], [0, 0, 1, 1], [], []>} : vector<64x288xf32>, vector<288x32xf32>, vector<64x32xf32> -> vector<64x32xf32>
    %c0_39 = arith.constant 0 : index
    %c0_40 = arith.constant 0 : index
    %112 = vector.load %arg23[%c0_39, %c0_40] : memref<1x32xf32, #tpu.memory_space<vmem>>, vector<1x32xf32>
    %113 = vector.broadcast %112 : vector<1x32xf32> to vector<64x32xf32>
    %114 = arith.addf %111, %113 : vector<64x32xf32>
    %cst_41 = arith.constant 0.00999999977 : f32
    %115 = vector.broadcast %cst_41 : f32 to vector<64x32xf32>
    %116 = arith.mulf %115, %114 : vector<64x32xf32>
    %117 = arith.maximumf %114, %116 : vector<64x32xf32>
    %118 = vector.shape_cast %117 : vector<64x32xf32> to vector<8x8x32xf32>
    %cst_42 = arith.constant 0.000000e+00 : f32
    %119 = vector.broadcast %cst_42 : f32 to vector<1x8x32xf32>
    %120 = tpu.concatenate %119, %118, %119 in 0 : vector<1x8x32xf32>, vector<8x8x32xf32>, vector<1x8x32xf32> -> vector<10x8x32xf32>
    %cst_43 = arith.constant 0.000000e+00 : f32
    %121 = vector.broadcast %cst_43 : f32 to vector<10x1x32xf32>
    %122 = tpu.concatenate %121, %120, %121 in 1 : vector<10x1x32xf32>, vector<10x8x32xf32>, vector<10x1x32xf32> -> vector<10x10x32xf32>
    %123 = vector.extract_strided_slice %122 {offsets = [0, 0, 0], sizes = [8, 10, 32], strides = [1, 1, 1]} : vector<10x10x32xf32> to vector<8x10x32xf32>
    %124 = vector.extract_strided_slice %123 {offsets = [0, 0, 0], sizes = [8, 8, 32], strides = [1, 1, 1]} : vector<8x10x32xf32> to vector<8x8x32xf32>
    %125 = vector.extract_strided_slice %123 {offsets = [0, 1, 0], sizes = [8, 8, 32], strides = [1, 1, 1]} : vector<8x10x32xf32> to vector<8x8x32xf32>
    %126 = vector.extract_strided_slice %123 {offsets = [0, 2, 0], sizes = [8, 8, 32], strides = [1, 1, 1]} : vector<8x10x32xf32> to vector<8x8x32xf32>
    %127 = vector.extract_strided_slice %122 {offsets = [1, 0, 0], sizes = [8, 10, 32], strides = [1, 1, 1]} : vector<10x10x32xf32> to vector<8x10x32xf32>
    %128 = vector.extract_strided_slice %127 {offsets = [0, 0, 0], sizes = [8, 8, 32], strides = [1, 1, 1]} : vector<8x10x32xf32> to vector<8x8x32xf32>
    %129 = vector.extract_strided_slice %127 {offsets = [0, 1, 0], sizes = [8, 8, 32], strides = [1, 1, 1]} : vector<8x10x32xf32> to vector<8x8x32xf32>
    %130 = vector.extract_strided_slice %127 {offsets = [0, 2, 0], sizes = [8, 8, 32], strides = [1, 1, 1]} : vector<8x10x32xf32> to vector<8x8x32xf32>
    %131 = vector.extract_strided_slice %122 {offsets = [2, 0, 0], sizes = [8, 10, 32], strides = [1, 1, 1]} : vector<10x10x32xf32> to vector<8x10x32xf32>
    %132 = vector.extract_strided_slice %131 {offsets = [0, 0, 0], sizes = [8, 8, 32], strides = [1, 1, 1]} : vector<8x10x32xf32> to vector<8x8x32xf32>
    %133 = vector.extract_strided_slice %131 {offsets = [0, 1, 0], sizes = [8, 8, 32], strides = [1, 1, 1]} : vector<8x10x32xf32> to vector<8x8x32xf32>
    %134 = vector.extract_strided_slice %131 {offsets = [0, 2, 0], sizes = [8, 8, 32], strides = [1, 1, 1]} : vector<8x10x32xf32> to vector<8x8x32xf32>
    %135 = tpu.concatenate %124, %125, %126, %128, %129, %130, %132, %133, %134 in 2 : vector<8x8x32xf32>, vector<8x8x32xf32>, vector<8x8x32xf32>, vector<8x8x32xf32>, vector<8x8x32xf32>, vector<8x8x32xf32>, vector<8x8x32xf32>, vector<8x8x32xf32>, vector<8x8x32xf32> -> vector<8x8x288xf32>
    %136 = vector.shape_cast %135 : vector<8x8x288xf32> to vector<64x288xf32>
    %c0_44 = arith.constant 0 : index
    %c0_45 = arith.constant 0 : index
    %137 = vector.load %arg26[%c0_44, %c0_45] : memref<288x32xf32, #tpu.memory_space<vmem>>, vector<288x32xf32>
    %cst_46 = arith.constant dense<0.000000e+00> : vector<64x32xf32>
    %138 = tpu.matmul %136, %137, %cst_46 {dimension_numbers = #tpu.dot_dimension_numbers<[1], [0], [0], [1], [0, 0, 1, 1], [], []>} : vector<64x288xf32>, vector<288x32xf32>, vector<64x32xf32> -> vector<64x32xf32>
    %c0_47 = arith.constant 0 : index
    %c0_48 = arith.constant 0 : index
    %139 = vector.load %arg24[%c0_47, %c0_48] : memref<1x32xf32, #tpu.memory_space<vmem>>, vector<1x32xf32>
    %140 = vector.broadcast %139 : vector<1x32xf32> to vector<64x32xf32>
    %141 = arith.addf %138, %140 : vector<64x32xf32>
    %cst_49 = arith.constant 0.00999999977 : f32
    %142 = vector.broadcast %cst_49 : f32 to vector<64x32xf32>
    %143 = arith.mulf %142, %141 : vector<64x32xf32>
    %144 = arith.maximumf %141, %143 : vector<64x32xf32>
    %145 = arith.addf %144, %90 : vector<64x32xf32>
    %cst_50 = arith.constant dense<0.000000e+00> : vector<32xf32>
    %146 = vector.multi_reduction <add>, %145, %cst_50 [0] : vector<64x32xf32> to vector<32xf32>
    %147 = vector.shape_cast %146 : vector<32xf32> to vector<1x32xf32>
    %cst_51 = arith.constant 1.562500e-02 : f32
    %148 = vector.broadcast %cst_51 : f32 to vector<1x32xf32>
    %149 = arith.mulf %147, %148 : vector<1x32xf32>
    %c0_52 = arith.constant 0 : index
    %c0_53 = arith.constant 0 : index
    %150 = vector.load %arg5[%c0_52, %c0_53] : memref<3x32xf32, #tpu.memory_space<vmem>>, vector<3x32xf32>
    %c0_54 = arith.constant 0 : index
    %c0_55 = arith.constant 0 : index
    %151 = vector.load %arg6[%c0_54, %c0_55] : memref<32x32xf32, #tpu.memory_space<vmem>>, vector<32x32xf32>
    %cst_56 = arith.constant dense<0.000000e+00> : vector<1x32xf32>
    %152 = tpu.matmul %149, %151, %cst_56 {dimension_numbers = #tpu.dot_dimension_numbers<[1], [0], [0], [1], [0, 0, 1, 1], [], []>} : vector<1x32xf32>, vector<32x32xf32>, vector<1x32xf32> -> vector<1x32xf32>
    %153 = vector.extract_strided_slice %150 {offsets = [0, 0], sizes = [1, 32], strides = [1, 1]} : vector<3x32xf32> to vector<1x32xf32>
    %154 = vector.broadcast %1 : f32 to vector<1x32xf32>
    %155 = arith.mulf %154, %153 : vector<1x32xf32>
    %156 = arith.addf %152, %155 : vector<1x32xf32>
    %157 = vector.extract_strided_slice %150 {offsets = [1, 0], sizes = [1, 32], strides = [1, 1]} : vector<3x32xf32> to vector<1x32xf32>
    %158 = vector.broadcast %3 : f32 to vector<1x32xf32>
    %159 = arith.mulf %158, %157 : vector<1x32xf32>
    %160 = arith.addf %156, %159 : vector<1x32xf32>
    %161 = vector.extract_strided_slice %150 {offsets = [2, 0], sizes = [1, 32], strides = [1, 1]} : vector<3x32xf32> to vector<1x32xf32>
    %162 = vector.broadcast %5 : f32 to vector<1x32xf32>
    %163 = arith.mulf %162, %161 : vector<1x32xf32>
    %164 = arith.addf %160, %163 : vector<1x32xf32>
    %c0_57 = arith.constant 0 : index
    %c0_58 = arith.constant 0 : index
    %165 = vector.load %arg3[%c0_57, %c0_58] : memref<1x32xf32, #tpu.memory_space<vmem>>, vector<1x32xf32>
    %166 = arith.addf %164, %165 : vector<1x32xf32>
    %cst_59 = arith.constant 0.00999999977 : f32
    %167 = vector.broadcast %cst_59 : f32 to vector<1x32xf32>
    %168 = arith.mulf %167, %166 : vector<1x32xf32>
    %169 = arith.maximumf %166, %168 : vector<1x32xf32>
    %c0_60 = arith.constant 0 : index
    %c0_61 = arith.constant 0 : index
    %170 = vector.load %arg7[%c0_60, %c0_61] : memref<32x32xf32, #tpu.memory_space<vmem>>, vector<32x32xf32>
    %cst_62 = arith.constant dense<0.000000e+00> : vector<1x32xf32>
    %171 = tpu.matmul %169, %170, %cst_62 {dimension_numbers = #tpu.dot_dimension_numbers<[1], [0], [0], [1], [0, 0, 1, 1], [], []>} : vector<1x32xf32>, vector<32x32xf32>, vector<1x32xf32> -> vector<1x32xf32>
    %c0_63 = arith.constant 0 : index
    %c0_64 = arith.constant 0 : index
    %172 = vector.load %arg4[%c0_63, %c0_64] : memref<1x32xf32, #tpu.memory_space<vmem>>, vector<1x32xf32>
    %173 = arith.addf %171, %172 : vector<1x32xf32>
    %174 = arith.negf %173 : vector<1x32xf32>
    %175 = math.exp %174 : vector<1x32xf32>
    %cst_65 = arith.constant 1.000000e+00 : f32
    %176 = vector.broadcast %cst_65 : f32 to vector<1x32xf32>
    %177 = arith.addf %176, %175 : vector<1x32xf32>
    %178 = arith.divf %176, %177 : vector<1x32xf32>
    %179 = vector.broadcast %178 : vector<1x32xf32> to vector<64x32xf32>
    %180 = arith.mulf %145, %179 : vector<64x32xf32>
    %181 = vector.shape_cast %180 : vector<64x32xf32> to vector<8x8x32xf32>
    %cst_66 = arith.constant 0.000000e+00 : f32
    %182 = vector.broadcast %cst_66 : f32 to vector<1x8x32xf32>
    %183 = tpu.concatenate %182, %181, %182 in 0 : vector<1x8x32xf32>, vector<8x8x32xf32>, vector<1x8x32xf32> -> vector<10x8x32xf32>
    %cst_67 = arith.constant 0.000000e+00 : f32
    %184 = vector.broadcast %cst_67 : f32 to vector<10x1x32xf32>
    %185 = tpu.concatenate %184, %183, %184 in 1 : vector<10x1x32xf32>, vector<10x8x32xf32>, vector<10x1x32xf32> -> vector<10x10x32xf32>
    %186 = vector.extract_strided_slice %185 {offsets = [0, 0, 0], sizes = [8, 10, 32], strides = [1, 1, 1]} : vector<10x10x32xf32> to vector<8x10x32xf32>
    %187 = vector.extract_strided_slice %186 {offsets = [0, 0, 0], sizes = [8, 8, 32], strides = [1, 1, 1]} : vector<8x10x32xf32> to vector<8x8x32xf32>
    %188 = vector.extract_strided_slice %186 {offsets = [0, 1, 0], sizes = [8, 8, 32], strides = [1, 1, 1]} : vector<8x10x32xf32> to vector<8x8x32xf32>
    %189 = vector.extract_strided_slice %186 {offsets = [0, 2, 0], sizes = [8, 8, 32], strides = [1, 1, 1]} : vector<8x10x32xf32> to vector<8x8x32xf32>
    %190 = vector.extract_strided_slice %185 {offsets = [1, 0, 0], sizes = [8, 10, 32], strides = [1, 1, 1]} : vector<10x10x32xf32> to vector<8x10x32xf32>
    %191 = vector.extract_strided_slice %190 {offsets = [0, 0, 0], sizes = [8, 8, 32], strides = [1, 1, 1]} : vector<8x10x32xf32> to vector<8x8x32xf32>
    %192 = vector.extract_strided_slice %190 {offsets = [0, 1, 0], sizes = [8, 8, 32], strides = [1, 1, 1]} : vector<8x10x32xf32> to vector<8x8x32xf32>
    %193 = vector.extract_strided_slice %190 {offsets = [0, 2, 0], sizes = [8, 8, 32], strides = [1, 1, 1]} : vector<8x10x32xf32> to vector<8x8x32xf32>
    %194 = vector.extract_strided_slice %185 {offsets = [2, 0, 0], sizes = [8, 10, 32], strides = [1, 1, 1]} : vector<10x10x32xf32> to vector<8x10x32xf32>
    %195 = vector.extract_strided_slice %194 {offsets = [0, 0, 0], sizes = [8, 8, 32], strides = [1, 1, 1]} : vector<8x10x32xf32> to vector<8x8x32xf32>
    %196 = vector.extract_strided_slice %194 {offsets = [0, 1, 0], sizes = [8, 8, 32], strides = [1, 1, 1]} : vector<8x10x32xf32> to vector<8x8x32xf32>
    %197 = vector.extract_strided_slice %194 {offsets = [0, 2, 0], sizes = [8, 8, 32], strides = [1, 1, 1]} : vector<8x10x32xf32> to vector<8x8x32xf32>
    %198 = tpu.concatenate %187, %188, %189, %191, %192, %193, %195, %196, %197 in 2 : vector<8x8x32xf32>, vector<8x8x32xf32>, vector<8x8x32xf32>, vector<8x8x32xf32>, vector<8x8x32xf32>, vector<8x8x32xf32>, vector<8x8x32xf32>, vector<8x8x32xf32>, vector<8x8x32xf32> -> vector<8x8x288xf32>
    %199 = vector.shape_cast %198 : vector<8x8x288xf32> to vector<64x288xf32>
    %c0_68 = arith.constant 0 : index
    %c0_69 = arith.constant 0 : index
    %200 = vector.load %arg42[%c0_68, %c0_69] : memref<288x32xf32, #tpu.memory_space<vmem>>, vector<288x32xf32>
    %cst_70 = arith.constant dense<0.000000e+00> : vector<64x32xf32>
    %201 = tpu.matmul %199, %200, %cst_70 {dimension_numbers = #tpu.dot_dimension_numbers<[1], [0], [0], [1], [0, 0, 1, 1], [], []>} : vector<64x288xf32>, vector<288x32xf32>, vector<64x32xf32> -> vector<64x32xf32>
    %c0_71 = arith.constant 0 : index
    %c0_72 = arith.constant 0 : index
    %202 = vector.load %arg40[%c0_71, %c0_72] : memref<1x32xf32, #tpu.memory_space<vmem>>, vector<1x32xf32>
    %203 = vector.broadcast %202 : vector<1x32xf32> to vector<64x32xf32>
    %204 = arith.addf %201, %203 : vector<64x32xf32>
    %cst_73 = arith.constant 0.00999999977 : f32
    %205 = vector.broadcast %cst_73 : f32 to vector<64x32xf32>
    %206 = arith.mulf %205, %204 : vector<64x32xf32>
    %207 = arith.maximumf %204, %206 : vector<64x32xf32>
    %208 = vector.shape_cast %207 : vector<64x32xf32> to vector<8x8x32xf32>
    %cst_74 = arith.constant 0.000000e+00 : f32
    %209 = vector.broadcast %cst_74 : f32 to vector<1x8x32xf32>
    %210 = tpu.concatenate %209, %208, %209 in 0 : vector<1x8x32xf32>, vector<8x8x32xf32>, vector<1x8x32xf32> -> vector<10x8x32xf32>
    %cst_75 = arith.constant 0.000000e+00 : f32
    %211 = vector.broadcast %cst_75 : f32 to vector<10x1x32xf32>
    %212 = tpu.concatenate %211, %210, %211 in 1 : vector<10x1x32xf32>, vector<10x8x32xf32>, vector<10x1x32xf32> -> vector<10x10x32xf32>
    %213 = vector.extract_strided_slice %212 {offsets = [0, 0, 0], sizes = [8, 10, 32], strides = [1, 1, 1]} : vector<10x10x32xf32> to vector<8x10x32xf32>
    %214 = vector.extract_strided_slice %213 {offsets = [0, 0, 0], sizes = [8, 8, 32], strides = [1, 1, 1]} : vector<8x10x32xf32> to vector<8x8x32xf32>
    %215 = vector.extract_strided_slice %213 {offsets = [0, 1, 0], sizes = [8, 8, 32], strides = [1, 1, 1]} : vector<8x10x32xf32> to vector<8x8x32xf32>
    %216 = vector.extract_strided_slice %213 {offsets = [0, 2, 0], sizes = [8, 8, 32], strides = [1, 1, 1]} : vector<8x10x32xf32> to vector<8x8x32xf32>
    %217 = vector.extract_strided_slice %212 {offsets = [1, 0, 0], sizes = [8, 10, 32], strides = [1, 1, 1]} : vector<10x10x32xf32> to vector<8x10x32xf32>
    %218 = vector.extract_strided_slice %217 {offsets = [0, 0, 0], sizes = [8, 8, 32], strides = [1, 1, 1]} : vector<8x10x32xf32> to vector<8x8x32xf32>
    %219 = vector.extract_strided_slice %217 {offsets = [0, 1, 0], sizes = [8, 8, 32], strides = [1, 1, 1]} : vector<8x10x32xf32> to vector<8x8x32xf32>
    %220 = vector.extract_strided_slice %217 {offsets = [0, 2, 0], sizes = [8, 8, 32], strides = [1, 1, 1]} : vector<8x10x32xf32> to vector<8x8x32xf32>
    %221 = vector.extract_strided_slice %212 {offsets = [2, 0, 0], sizes = [8, 10, 32], strides = [1, 1, 1]} : vector<10x10x32xf32> to vector<8x10x32xf32>
    %222 = vector.extract_strided_slice %221 {offsets = [0, 0, 0], sizes = [8, 8, 32], strides = [1, 1, 1]} : vector<8x10x32xf32> to vector<8x8x32xf32>
    %223 = vector.extract_strided_slice %221 {offsets = [0, 1, 0], sizes = [8, 8, 32], strides = [1, 1, 1]} : vector<8x10x32xf32> to vector<8x8x32xf32>
    %224 = vector.extract_strided_slice %221 {offsets = [0, 2, 0], sizes = [8, 8, 32], strides = [1, 1, 1]} : vector<8x10x32xf32> to vector<8x8x32xf32>
    %225 = tpu.concatenate %214, %215, %216, %218, %219, %220, %222, %223, %224 in 2 : vector<8x8x32xf32>, vector<8x8x32xf32>, vector<8x8x32xf32>, vector<8x8x32xf32>, vector<8x8x32xf32>, vector<8x8x32xf32>, vector<8x8x32xf32>, vector<8x8x32xf32>, vector<8x8x32xf32> -> vector<8x8x288xf32>
    %226 = vector.shape_cast %225 : vector<8x8x288xf32> to vector<64x288xf32>
    %c0_76 = arith.constant 0 : index
    %c0_77 = arith.constant 0 : index
    %227 = vector.load %arg43[%c0_76, %c0_77] : memref<288x32xf32, #tpu.memory_space<vmem>>, vector<288x32xf32>
    %cst_78 = arith.constant dense<0.000000e+00> : vector<64x32xf32>
    %228 = tpu.matmul %226, %227, %cst_78 {dimension_numbers = #tpu.dot_dimension_numbers<[1], [0], [0], [1], [0, 0, 1, 1], [], []>} : vector<64x288xf32>, vector<288x32xf32>, vector<64x32xf32> -> vector<64x32xf32>
    %c0_79 = arith.constant 0 : index
    %c0_80 = arith.constant 0 : index
    %229 = vector.load %arg41[%c0_79, %c0_80] : memref<1x32xf32, #tpu.memory_space<vmem>>, vector<1x32xf32>
    %230 = vector.broadcast %229 : vector<1x32xf32> to vector<64x32xf32>
    %231 = arith.addf %228, %230 : vector<64x32xf32>
    %cst_81 = arith.constant 0.00999999977 : f32
    %232 = vector.broadcast %cst_81 : f32 to vector<64x32xf32>
    %233 = arith.mulf %232, %231 : vector<64x32xf32>
    %234 = arith.maximumf %231, %233 : vector<64x32xf32>
    %235 = arith.addf %234, %180 : vector<64x32xf32>
    %236 = vector.shape_cast %235 : vector<64x32xf32> to vector<8x8x32xf32>
    %cst_82 = arith.constant 0.000000e+00 : f32
    %237 = vector.broadcast %cst_82 : f32 to vector<1x8x32xf32>
    %238 = tpu.concatenate %237, %236, %237 in 0 : vector<1x8x32xf32>, vector<8x8x32xf32>, vector<1x8x32xf32> -> vector<10x8x32xf32>
    %cst_83 = arith.constant 0.000000e+00 : f32
    %239 = vector.broadcast %cst_83 : f32 to vector<10x1x32xf32>
    %240 = tpu.concatenate %239, %238, %239 in 1 : vector<10x1x32xf32>, vector<10x8x32xf32>, vector<10x1x32xf32> -> vector<10x10x32xf32>
    %241 = vector.extract_strided_slice %240 {offsets = [0, 0, 0], sizes = [8, 10, 32], strides = [1, 1, 1]} : vector<10x10x32xf32> to vector<8x10x32xf32>
    %242 = vector.extract_strided_slice %241 {offsets = [0, 0, 0], sizes = [8, 8, 32], strides = [1, 1, 1]} : vector<8x10x32xf32> to vector<8x8x32xf32>
    %243 = vector.extract_strided_slice %241 {offsets = [0, 1, 0], sizes = [8, 8, 32], strides = [1, 1, 1]} : vector<8x10x32xf32> to vector<8x8x32xf32>
    %244 = vector.extract_strided_slice %241 {offsets = [0, 2, 0], sizes = [8, 8, 32], strides = [1, 1, 1]} : vector<8x10x32xf32> to vector<8x8x32xf32>
    %245 = vector.extract_strided_slice %240 {offsets = [1, 0, 0], sizes = [8, 10, 32], strides = [1, 1, 1]} : vector<10x10x32xf32> to vector<8x10x32xf32>
    %246 = vector.extract_strided_slice %245 {offsets = [0, 0, 0], sizes = [8, 8, 32], strides = [1, 1, 1]} : vector<8x10x32xf32> to vector<8x8x32xf32>
    %247 = vector.extract_strided_slice %245 {offsets = [0, 1, 0], sizes = [8, 8, 32], strides = [1, 1, 1]} : vector<8x10x32xf32> to vector<8x8x32xf32>
    %248 = vector.extract_strided_slice %245 {offsets = [0, 2, 0], sizes = [8, 8, 32], strides = [1, 1, 1]} : vector<8x10x32xf32> to vector<8x8x32xf32>
    %249 = vector.extract_strided_slice %240 {offsets = [2, 0, 0], sizes = [8, 10, 32], strides = [1, 1, 1]} : vector<10x10x32xf32> to vector<8x10x32xf32>
    %250 = vector.extract_strided_slice %249 {offsets = [0, 0, 0], sizes = [8, 8, 32], strides = [1, 1, 1]} : vector<8x10x32xf32> to vector<8x8x32xf32>
    %251 = vector.extract_strided_slice %249 {offsets = [0, 1, 0], sizes = [8, 8, 32], strides = [1, 1, 1]} : vector<8x10x32xf32> to vector<8x8x32xf32>
    %252 = vector.extract_strided_slice %249 {offsets = [0, 2, 0], sizes = [8, 8, 32], strides = [1, 1, 1]} : vector<8x10x32xf32> to vector<8x8x32xf32>
    %253 = tpu.concatenate %242, %243, %244, %246, %247, %248, %250, %251, %252 in 2 : vector<8x8x32xf32>, vector<8x8x32xf32>, vector<8x8x32xf32>, vector<8x8x32xf32>, vector<8x8x32xf32>, vector<8x8x32xf32>, vector<8x8x32xf32>, vector<8x8x32xf32>, vector<8x8x32xf32> -> vector<8x8x288xf32>
    %254 = vector.shape_cast %253 : vector<8x8x288xf32> to vector<64x288xf32>
    %c0_84 = arith.constant 0 : index
    %c0_85 = arith.constant 0 : index
    %255 = vector.load %arg29[%c0_84, %c0_85] : memref<288x32xf32, #tpu.memory_space<vmem>>, vector<288x32xf32>
    %cst_86 = arith.constant dense<0.000000e+00> : vector<64x32xf32>
    %256 = tpu.matmul %254, %255, %cst_86 {dimension_numbers = #tpu.dot_dimension_numbers<[1], [0], [0], [1], [0, 0, 1, 1], [], []>} : vector<64x288xf32>, vector<288x32xf32>, vector<64x32xf32> -> vector<64x32xf32>
    %c0_87 = arith.constant 0 : index
    %c0_88 = arith.constant 0 : index
    %257 = vector.load %arg27[%c0_87, %c0_88] : memref<1x32xf32, #tpu.memory_space<vmem>>, vector<1x32xf32>
    %258 = vector.broadcast %257 : vector<1x32xf32> to vector<64x32xf32>
    %259 = arith.addf %256, %258 : vector<64x32xf32>
    %cst_89 = arith.constant 0.00999999977 : f32
    %260 = vector.broadcast %cst_89 : f32 to vector<64x32xf32>
    %261 = arith.mulf %260, %259 : vector<64x32xf32>
    %262 = arith.maximumf %259, %261 : vector<64x32xf32>
    %263 = vector.shape_cast %262 : vector<64x32xf32> to vector<8x8x32xf32>
    %cst_90 = arith.constant 0.000000e+00 : f32
    %264 = vector.broadcast %cst_90 : f32 to vector<1x8x32xf32>
    %265 = tpu.concatenate %264, %263, %264 in 0 : vector<1x8x32xf32>, vector<8x8x32xf32>, vector<1x8x32xf32> -> vector<10x8x32xf32>
    %cst_91 = arith.constant 0.000000e+00 : f32
    %266 = vector.broadcast %cst_91 : f32 to vector<10x1x32xf32>
    %267 = tpu.concatenate %266, %265, %266 in 1 : vector<10x1x32xf32>, vector<10x8x32xf32>, vector<10x1x32xf32> -> vector<10x10x32xf32>
    %268 = vector.extract_strided_slice %267 {offsets = [0, 0, 0], sizes = [8, 10, 32], strides = [1, 1, 1]} : vector<10x10x32xf32> to vector<8x10x32xf32>
    %269 = vector.extract_strided_slice %268 {offsets = [0, 0, 0], sizes = [8, 8, 32], strides = [1, 1, 1]} : vector<8x10x32xf32> to vector<8x8x32xf32>
    %270 = vector.extract_strided_slice %268 {offsets = [0, 1, 0], sizes = [8, 8, 32], strides = [1, 1, 1]} : vector<8x10x32xf32> to vector<8x8x32xf32>
    %271 = vector.extract_strided_slice %268 {offsets = [0, 2, 0], sizes = [8, 8, 32], strides = [1, 1, 1]} : vector<8x10x32xf32> to vector<8x8x32xf32>
    %272 = vector.extract_strided_slice %267 {offsets = [1, 0, 0], sizes = [8, 10, 32], strides = [1, 1, 1]} : vector<10x10x32xf32> to vector<8x10x32xf32>
    %273 = vector.extract_strided_slice %272 {offsets = [0, 0, 0], sizes = [8, 8, 32], strides = [1, 1, 1]} : vector<8x10x32xf32> to vector<8x8x32xf32>
    %274 = vector.extract_strided_slice %272 {offsets = [0, 1, 0], sizes = [8, 8, 32], strides = [1, 1, 1]} : vector<8x10x32xf32> to vector<8x8x32xf32>
    %275 = vector.extract_strided_slice %272 {offsets = [0, 2, 0], sizes = [8, 8, 32], strides = [1, 1, 1]} : vector<8x10x32xf32> to vector<8x8x32xf32>
    %276 = vector.extract_strided_slice %267 {offsets = [2, 0, 0], sizes = [8, 10, 32], strides = [1, 1, 1]} : vector<10x10x32xf32> to vector<8x10x32xf32>
    %277 = vector.extract_strided_slice %276 {offsets = [0, 0, 0], sizes = [8, 8, 32], strides = [1, 1, 1]} : vector<8x10x32xf32> to vector<8x8x32xf32>
    %278 = vector.extract_strided_slice %276 {offsets = [0, 1, 0], sizes = [8, 8, 32], strides = [1, 1, 1]} : vector<8x10x32xf32> to vector<8x8x32xf32>
    %279 = vector.extract_strided_slice %276 {offsets = [0, 2, 0], sizes = [8, 8, 32], strides = [1, 1, 1]} : vector<8x10x32xf32> to vector<8x8x32xf32>
    %280 = tpu.concatenate %269, %270, %271, %273, %274, %275, %277, %278, %279 in 2 : vector<8x8x32xf32>, vector<8x8x32xf32>, vector<8x8x32xf32>, vector<8x8x32xf32>, vector<8x8x32xf32>, vector<8x8x32xf32>, vector<8x8x32xf32>, vector<8x8x32xf32>, vector<8x8x32xf32> -> vector<8x8x288xf32>
    %281 = vector.shape_cast %280 : vector<8x8x288xf32> to vector<64x288xf32>
    %c0_92 = arith.constant 0 : index
    %c0_93 = arith.constant 0 : index
    %282 = vector.load %arg30[%c0_92, %c0_93] : memref<288x32xf32, #tpu.memory_space<vmem>>, vector<288x32xf32>
    %cst_94 = arith.constant dense<0.000000e+00> : vector<64x32xf32>
    %283 = tpu.matmul %281, %282, %cst_94 {dimension_numbers = #tpu.dot_dimension_numbers<[1], [0], [0], [1], [0, 0, 1, 1], [], []>} : vector<64x288xf32>, vector<288x32xf32>, vector<64x32xf32> -> vector<64x32xf32>
    %c0_95 = arith.constant 0 : index
    %c0_96 = arith.constant 0 : index
    %284 = vector.load %arg28[%c0_95, %c0_96] : memref<1x32xf32, #tpu.memory_space<vmem>>, vector<1x32xf32>
    %285 = vector.broadcast %284 : vector<1x32xf32> to vector<64x32xf32>
    %286 = arith.addf %283, %285 : vector<64x32xf32>
    %cst_97 = arith.constant 0.00999999977 : f32
    %287 = vector.broadcast %cst_97 : f32 to vector<64x32xf32>
    %288 = arith.mulf %287, %286 : vector<64x32xf32>
    %289 = arith.maximumf %286, %288 : vector<64x32xf32>
    %290 = arith.addf %289, %235 : vector<64x32xf32>
    %cst_98 = arith.constant dense<0.000000e+00> : vector<32xf32>
    %291 = vector.multi_reduction <add>, %290, %cst_98 [0] : vector<64x32xf32> to vector<32xf32>
    %292 = vector.shape_cast %291 : vector<32xf32> to vector<1x32xf32>
    %cst_99 = arith.constant 1.562500e-02 : f32
    %293 = vector.broadcast %cst_99 : f32 to vector<1x32xf32>
    %294 = arith.mulf %292, %293 : vector<1x32xf32>
    %c0_100 = arith.constant 0 : index
    %c0_101 = arith.constant 0 : index
    %295 = vector.load %arg10[%c0_100, %c0_101] : memref<3x32xf32, #tpu.memory_space<vmem>>, vector<3x32xf32>
    %c0_102 = arith.constant 0 : index
    %c0_103 = arith.constant 0 : index
    %296 = vector.load %arg11[%c0_102, %c0_103] : memref<32x32xf32, #tpu.memory_space<vmem>>, vector<32x32xf32>
    %cst_104 = arith.constant dense<0.000000e+00> : vector<1x32xf32>
    %297 = tpu.matmul %294, %296, %cst_104 {dimension_numbers = #tpu.dot_dimension_numbers<[1], [0], [0], [1], [0, 0, 1, 1], [], []>} : vector<1x32xf32>, vector<32x32xf32>, vector<1x32xf32> -> vector<1x32xf32>
    %298 = vector.extract_strided_slice %295 {offsets = [0, 0], sizes = [1, 32], strides = [1, 1]} : vector<3x32xf32> to vector<1x32xf32>
    %299 = vector.broadcast %1 : f32 to vector<1x32xf32>
    %300 = arith.mulf %299, %298 : vector<1x32xf32>
    %301 = arith.addf %297, %300 : vector<1x32xf32>
    %302 = vector.extract_strided_slice %295 {offsets = [1, 0], sizes = [1, 32], strides = [1, 1]} : vector<3x32xf32> to vector<1x32xf32>
    %303 = vector.broadcast %3 : f32 to vector<1x32xf32>
    %304 = arith.mulf %303, %302 : vector<1x32xf32>
    %305 = arith.addf %301, %304 : vector<1x32xf32>
    %306 = vector.extract_strided_slice %295 {offsets = [2, 0], sizes = [1, 32], strides = [1, 1]} : vector<3x32xf32> to vector<1x32xf32>
    %307 = vector.broadcast %5 : f32 to vector<1x32xf32>
    %308 = arith.mulf %307, %306 : vector<1x32xf32>
    %309 = arith.addf %305, %308 : vector<1x32xf32>
    %c0_105 = arith.constant 0 : index
    %c0_106 = arith.constant 0 : index
    %310 = vector.load %arg8[%c0_105, %c0_106] : memref<1x32xf32, #tpu.memory_space<vmem>>, vector<1x32xf32>
    %311 = arith.addf %309, %310 : vector<1x32xf32>
    %cst_107 = arith.constant 0.00999999977 : f32
    %312 = vector.broadcast %cst_107 : f32 to vector<1x32xf32>
    %313 = arith.mulf %312, %311 : vector<1x32xf32>
    %314 = arith.maximumf %311, %313 : vector<1x32xf32>
    %c0_108 = arith.constant 0 : index
    %c0_109 = arith.constant 0 : index
    %315 = vector.load %arg12[%c0_108, %c0_109] : memref<32x32xf32, #tpu.memory_space<vmem>>, vector<32x32xf32>
    %cst_110 = arith.constant dense<0.000000e+00> : vector<1x32xf32>
    %316 = tpu.matmul %314, %315, %cst_110 {dimension_numbers = #tpu.dot_dimension_numbers<[1], [0], [0], [1], [0, 0, 1, 1], [], []>} : vector<1x32xf32>, vector<32x32xf32>, vector<1x32xf32> -> vector<1x32xf32>
    %c0_111 = arith.constant 0 : index
    %c0_112 = arith.constant 0 : index
    %317 = vector.load %arg9[%c0_111, %c0_112] : memref<1x32xf32, #tpu.memory_space<vmem>>, vector<1x32xf32>
    %318 = arith.addf %316, %317 : vector<1x32xf32>
    %319 = arith.negf %318 : vector<1x32xf32>
    %320 = math.exp %319 : vector<1x32xf32>
    %cst_113 = arith.constant 1.000000e+00 : f32
    %321 = vector.broadcast %cst_113 : f32 to vector<1x32xf32>
    %322 = arith.addf %321, %320 : vector<1x32xf32>
    %323 = arith.divf %321, %322 : vector<1x32xf32>
    %324 = vector.broadcast %323 : vector<1x32xf32> to vector<64x32xf32>
    %325 = arith.mulf %290, %324 : vector<64x32xf32>
    %326 = vector.shape_cast %325 : vector<64x32xf32> to vector<8x8x32xf32>
    %cst_114 = arith.constant 0.000000e+00 : f32
    %327 = vector.broadcast %cst_114 : f32 to vector<1x8x32xf32>
    %328 = tpu.concatenate %327, %326, %327 in 0 : vector<1x8x32xf32>, vector<8x8x32xf32>, vector<1x8x32xf32> -> vector<10x8x32xf32>
    %cst_115 = arith.constant 0.000000e+00 : f32
    %329 = vector.broadcast %cst_115 : f32 to vector<10x1x32xf32>
    %330 = tpu.concatenate %329, %328, %329 in 1 : vector<10x1x32xf32>, vector<10x8x32xf32>, vector<10x1x32xf32> -> vector<10x10x32xf32>
    %331 = vector.extract_strided_slice %330 {offsets = [0, 0, 0], sizes = [8, 10, 32], strides = [1, 1, 1]} : vector<10x10x32xf32> to vector<8x10x32xf32>
    %332 = vector.shape_cast %331 : vector<8x10x32xf32> to vector<4x2x10x32xf32>
    %333 = vector.extract_strided_slice %332 {offsets = [0, 0, 0, 0], sizes = [4, 1, 10, 32], strides = [1, 1, 1, 1]} : vector<4x2x10x32xf32> to vector<4x1x10x32xf32>
    %334 = vector.shape_cast %333 : vector<4x1x10x32xf32> to vector<4x10x32xf32>
    %335 = vector.extract_strided_slice %334 {offsets = [0, 0, 0], sizes = [4, 8, 32], strides = [1, 1, 1]} : vector<4x10x32xf32> to vector<4x8x32xf32>
    %336 = vector.extract_strided_slice %334 {offsets = [0, 1, 0], sizes = [4, 8, 32], strides = [1, 1, 1]} : vector<4x10x32xf32> to vector<4x8x32xf32>
    %337 = vector.extract_strided_slice %334 {offsets = [0, 2, 0], sizes = [4, 8, 32], strides = [1, 1, 1]} : vector<4x10x32xf32> to vector<4x8x32xf32>
    %338 = vector.extract_strided_slice %330 {offsets = [1, 0, 0], sizes = [8, 10, 32], strides = [1, 1, 1]} : vector<10x10x32xf32> to vector<8x10x32xf32>
    %339 = vector.shape_cast %338 : vector<8x10x32xf32> to vector<4x2x10x32xf32>
    %340 = vector.extract_strided_slice %339 {offsets = [0, 0, 0, 0], sizes = [4, 1, 10, 32], strides = [1, 1, 1, 1]} : vector<4x2x10x32xf32> to vector<4x1x10x32xf32>
    %341 = vector.shape_cast %340 : vector<4x1x10x32xf32> to vector<4x10x32xf32>
    %342 = vector.extract_strided_slice %341 {offsets = [0, 0, 0], sizes = [4, 8, 32], strides = [1, 1, 1]} : vector<4x10x32xf32> to vector<4x8x32xf32>
    %343 = vector.extract_strided_slice %341 {offsets = [0, 1, 0], sizes = [4, 8, 32], strides = [1, 1, 1]} : vector<4x10x32xf32> to vector<4x8x32xf32>
    %344 = vector.extract_strided_slice %341 {offsets = [0, 2, 0], sizes = [4, 8, 32], strides = [1, 1, 1]} : vector<4x10x32xf32> to vector<4x8x32xf32>
    %345 = vector.extract_strided_slice %330 {offsets = [2, 0, 0], sizes = [8, 10, 32], strides = [1, 1, 1]} : vector<10x10x32xf32> to vector<8x10x32xf32>
    %346 = vector.shape_cast %345 : vector<8x10x32xf32> to vector<4x2x10x32xf32>
    %347 = vector.extract_strided_slice %346 {offsets = [0, 0, 0, 0], sizes = [4, 1, 10, 32], strides = [1, 1, 1, 1]} : vector<4x2x10x32xf32> to vector<4x1x10x32xf32>
    %348 = vector.shape_cast %347 : vector<4x1x10x32xf32> to vector<4x10x32xf32>
    %349 = vector.extract_strided_slice %348 {offsets = [0, 0, 0], sizes = [4, 8, 32], strides = [1, 1, 1]} : vector<4x10x32xf32> to vector<4x8x32xf32>
    %350 = vector.extract_strided_slice %348 {offsets = [0, 1, 0], sizes = [4, 8, 32], strides = [1, 1, 1]} : vector<4x10x32xf32> to vector<4x8x32xf32>
    %351 = vector.extract_strided_slice %348 {offsets = [0, 2, 0], sizes = [4, 8, 32], strides = [1, 1, 1]} : vector<4x10x32xf32> to vector<4x8x32xf32>
    %352 = tpu.concatenate %335, %336, %337, %342, %343, %344, %349, %350, %351 in 2 : vector<4x8x32xf32>, vector<4x8x32xf32>, vector<4x8x32xf32>, vector<4x8x32xf32>, vector<4x8x32xf32>, vector<4x8x32xf32>, vector<4x8x32xf32>, vector<4x8x32xf32>, vector<4x8x32xf32> -> vector<4x8x288xf32>
    %353 = vector.shape_cast %352 : vector<4x8x288xf32> to vector<32x288xf32>
    %c0_116 = arith.constant 0 : index
    %c0_117 = arith.constant 0 : index
    %354 = vector.load %arg50[%c0_116, %c0_117] : memref<288x32xf32, #tpu.memory_space<vmem>>, vector<288x32xf32>
    %cst_118 = arith.constant dense<0.000000e+00> : vector<32x32xf32>
    %355 = tpu.matmul %353, %354, %cst_118 {dimension_numbers = #tpu.dot_dimension_numbers<[1], [0], [0], [1], [0, 0, 1, 1], [], []>} : vector<32x288xf32>, vector<288x32xf32>, vector<32x32xf32> -> vector<32x32xf32>
    %c0_119 = arith.constant 0 : index
    %c0_120 = arith.constant 0 : index
    %356 = vector.load %arg49[%c0_119, %c0_120] : memref<16x32xf32, #tpu.memory_space<vmem>>, vector<16x32xf32>
    %cst_121 = arith.constant dense<0.000000e+00> : vector<16x32xf32>
    %357 = tpu.matmul %356, %355, %cst_121 {dimension_numbers = #tpu.dot_dimension_numbers<[1], [0], [0], [1], [0, 0, 1, 1], [], []>} : vector<16x32xf32>, vector<32x32xf32>, vector<16x32xf32> -> vector<16x32xf32>
    %c0_122 = arith.constant 0 : index
    %c0_123 = arith.constant 0 : index
    %358 = vector.load %arg44[%c0_122, %c0_123] : memref<1x32xf32, #tpu.memory_space<vmem>>, vector<1x32xf32>
    %359 = vector.broadcast %358 : vector<1x32xf32> to vector<16x32xf32>
    %360 = arith.addf %357, %359 : vector<16x32xf32>
    %cst_124 = arith.constant 0.00999999977 : f32
    %361 = vector.broadcast %cst_124 : f32 to vector<16x32xf32>
    %362 = arith.mulf %361, %360 : vector<16x32xf32>
    %363 = arith.maximumf %360, %362 : vector<16x32xf32>
    %364 = vector.shape_cast %363 : vector<16x32xf32> to vector<4x4x32xf32>
    %cst_125 = arith.constant 0.000000e+00 : f32
    %365 = vector.broadcast %cst_125 : f32 to vector<1x4x32xf32>
    %366 = tpu.concatenate %365, %364, %365 in 0 : vector<1x4x32xf32>, vector<4x4x32xf32>, vector<1x4x32xf32> -> vector<6x4x32xf32>
    %cst_126 = arith.constant 0.000000e+00 : f32
    %367 = vector.broadcast %cst_126 : f32 to vector<6x1x32xf32>
    %368 = tpu.concatenate %367, %366, %367 in 1 : vector<6x1x32xf32>, vector<6x4x32xf32>, vector<6x1x32xf32> -> vector<6x6x32xf32>
    %369 = vector.extract_strided_slice %368 {offsets = [0, 0, 0], sizes = [4, 6, 32], strides = [1, 1, 1]} : vector<6x6x32xf32> to vector<4x6x32xf32>
    %370 = vector.extract_strided_slice %369 {offsets = [0, 0, 0], sizes = [4, 4, 32], strides = [1, 1, 1]} : vector<4x6x32xf32> to vector<4x4x32xf32>
    %371 = vector.extract_strided_slice %369 {offsets = [0, 1, 0], sizes = [4, 4, 32], strides = [1, 1, 1]} : vector<4x6x32xf32> to vector<4x4x32xf32>
    %372 = vector.extract_strided_slice %369 {offsets = [0, 2, 0], sizes = [4, 4, 32], strides = [1, 1, 1]} : vector<4x6x32xf32> to vector<4x4x32xf32>
    %373 = vector.extract_strided_slice %368 {offsets = [1, 0, 0], sizes = [4, 6, 32], strides = [1, 1, 1]} : vector<6x6x32xf32> to vector<4x6x32xf32>
    %374 = vector.extract_strided_slice %373 {offsets = [0, 0, 0], sizes = [4, 4, 32], strides = [1, 1, 1]} : vector<4x6x32xf32> to vector<4x4x32xf32>
    %375 = vector.extract_strided_slice %373 {offsets = [0, 1, 0], sizes = [4, 4, 32], strides = [1, 1, 1]} : vector<4x6x32xf32> to vector<4x4x32xf32>
    %376 = vector.extract_strided_slice %373 {offsets = [0, 2, 0], sizes = [4, 4, 32], strides = [1, 1, 1]} : vector<4x6x32xf32> to vector<4x4x32xf32>
    %377 = vector.extract_strided_slice %368 {offsets = [2, 0, 0], sizes = [4, 6, 32], strides = [1, 1, 1]} : vector<6x6x32xf32> to vector<4x6x32xf32>
    %378 = vector.extract_strided_slice %377 {offsets = [0, 0, 0], sizes = [4, 4, 32], strides = [1, 1, 1]} : vector<4x6x32xf32> to vector<4x4x32xf32>
    %379 = vector.extract_strided_slice %377 {offsets = [0, 1, 0], sizes = [4, 4, 32], strides = [1, 1, 1]} : vector<4x6x32xf32> to vector<4x4x32xf32>
    %380 = vector.extract_strided_slice %377 {offsets = [0, 2, 0], sizes = [4, 4, 32], strides = [1, 1, 1]} : vector<4x6x32xf32> to vector<4x4x32xf32>
    %381 = tpu.concatenate %370, %371, %372, %374, %375, %376, %378, %379, %380 in 2 : vector<4x4x32xf32>, vector<4x4x32xf32>, vector<4x4x32xf32>, vector<4x4x32xf32>, vector<4x4x32xf32>, vector<4x4x32xf32>, vector<4x4x32xf32>, vector<4x4x32xf32>, vector<4x4x32xf32> -> vector<4x4x288xf32>
    %382 = vector.shape_cast %381 : vector<4x4x288xf32> to vector<16x288xf32>
    %c0_127 = arith.constant 0 : index
    %c0_128 = arith.constant 0 : index
    %383 = vector.load %arg51[%c0_127, %c0_128] : memref<288x32xf32, #tpu.memory_space<vmem>>, vector<288x32xf32>
    %cst_129 = arith.constant dense<0.000000e+00> : vector<16x32xf32>
    %384 = tpu.matmul %382, %383, %cst_129 {dimension_numbers = #tpu.dot_dimension_numbers<[1], [0], [0], [1], [0, 0, 1, 1], [], []>} : vector<16x288xf32>, vector<288x32xf32>, vector<16x32xf32> -> vector<16x32xf32>
    %c0_130 = arith.constant 0 : index
    %c0_131 = arith.constant 0 : index
    %385 = vector.load %arg45[%c0_130, %c0_131] : memref<1x32xf32, #tpu.memory_space<vmem>>, vector<1x32xf32>
    %386 = vector.broadcast %385 : vector<1x32xf32> to vector<16x32xf32>
    %387 = arith.addf %384, %386 : vector<16x32xf32>
    %388 = arith.mulf %387, %387 : vector<16x32xf32>
    %c0_132 = arith.constant 0 : index
    %c0_133 = arith.constant 0 : index
    %389 = vector.load %arg48[%c0_132, %c0_133] : memref<32x32xf32, #tpu.memory_space<vmem>>, vector<32x32xf32>
    %cst_134 = arith.constant dense<0.000000e+00> : vector<16x32xf32>
    %390 = tpu.matmul %388, %389, %cst_134 {dimension_numbers = #tpu.dot_dimension_numbers<[1], [0], [0], [1], [0, 0, 1, 1], [], []>} : vector<16x32xf32>, vector<32x32xf32>, vector<16x32xf32> -> vector<16x32xf32>
    %c0_135 = arith.constant 0 : index
    %c0_136 = arith.constant 0 : index
    %391 = vector.load %arg46[%c0_135, %c0_136] : memref<1x32xf32, #tpu.memory_space<vmem>>, vector<1x32xf32>
    %392 = vector.broadcast %391 : vector<1x32xf32> to vector<16x32xf32>
    %393 = arith.addf %390, %392 : vector<16x32xf32>
    %394 = math.rsqrt %393 : vector<16x32xf32>
    %395 = arith.mulf %387, %394 : vector<16x32xf32>
    %396 = vector.shape_cast %325 : vector<64x32xf32> to vector<4x2x8x32xf32>
    %397 = vector.extract_strided_slice %396 {offsets = [0, 0, 0, 0], sizes = [4, 1, 8, 32], strides = [1, 1, 1, 1]} : vector<4x2x8x32xf32> to vector<4x1x8x32xf32>
    %398 = vector.shape_cast %397 : vector<4x1x8x32xf32> to vector<4x8x32xf32>
    %399 = vector.shape_cast %398 : vector<4x8x32xf32> to vector<32x32xf32>
    %c0_137 = arith.constant 0 : index
    %c0_138 = arith.constant 0 : index
    %400 = vector.load %arg49[%c0_137, %c0_138] : memref<16x32xf32, #tpu.memory_space<vmem>>, vector<16x32xf32>
    %cst_139 = arith.constant dense<0.000000e+00> : vector<16x32xf32>
    %401 = tpu.matmul %400, %399, %cst_139 {dimension_numbers = #tpu.dot_dimension_numbers<[1], [0], [0], [1], [0, 0, 1, 1], [], []>} : vector<16x32xf32>, vector<32x32xf32>, vector<16x32xf32> -> vector<16x32xf32>
    %c0_140 = arith.constant 0 : index
    %c0_141 = arith.constant 0 : index
    %402 = vector.load %arg52[%c0_140, %c0_141] : memref<32x32xf32, #tpu.memory_space<vmem>>, vector<32x32xf32>
    %cst_142 = arith.constant dense<0.000000e+00> : vector<16x32xf32>
    %403 = tpu.matmul %401, %402, %cst_142 {dimension_numbers = #tpu.dot_dimension_numbers<[1], [0], [0], [1], [0, 0, 1, 1], [], []>} : vector<16x32xf32>, vector<32x32xf32>, vector<16x32xf32> -> vector<16x32xf32>
    %c0_143 = arith.constant 0 : index
    %c0_144 = arith.constant 0 : index
    %404 = vector.load %arg47[%c0_143, %c0_144] : memref<1x32xf32, #tpu.memory_space<vmem>>, vector<1x32xf32>
    %405 = vector.broadcast %404 : vector<1x32xf32> to vector<16x32xf32>
    %406 = arith.addf %403, %405 : vector<16x32xf32>
    %407 = arith.addf %395, %406 : vector<16x32xf32>
    %cst_145 = arith.constant dense<0.000000e+00> : vector<32xf32>
    %408 = vector.multi_reduction <add>, %407, %cst_145 [0] : vector<16x32xf32> to vector<32xf32>
    %409 = vector.shape_cast %408 : vector<32xf32> to vector<1x32xf32>
    %cst_146 = arith.constant 6.250000e-02 : f32
    %410 = vector.broadcast %cst_146 : f32 to vector<1x32xf32>
    %411 = arith.mulf %409, %410 : vector<1x32xf32>
    %c0_147 = arith.constant 0 : index
    %c0_148 = arith.constant 0 : index
    %412 = vector.load %arg15[%c0_147, %c0_148] : memref<3x32xf32, #tpu.memory_space<vmem>>, vector<3x32xf32>
    %c0_149 = arith.constant 0 : index
    %c0_150 = arith.constant 0 : index
    %413 = vector.load %arg16[%c0_149, %c0_150] : memref<32x32xf32, #tpu.memory_space<vmem>>, vector<32x32xf32>
    %cst_151 = arith.constant dense<0.000000e+00> : vector<1x32xf32>
    %414 = tpu.matmul %411, %413, %cst_151 {dimension_numbers = #tpu.dot_dimension_numbers<[1], [0], [0], [1], [0, 0, 1, 1], [], []>} : vector<1x32xf32>, vector<32x32xf32>, vector<1x32xf32> -> vector<1x32xf32>
    %415 = vector.extract_strided_slice %412 {offsets = [0, 0], sizes = [1, 32], strides = [1, 1]} : vector<3x32xf32> to vector<1x32xf32>
    %416 = vector.broadcast %1 : f32 to vector<1x32xf32>
    %417 = arith.mulf %416, %415 : vector<1x32xf32>
    %418 = arith.addf %414, %417 : vector<1x32xf32>
    %419 = vector.extract_strided_slice %412 {offsets = [1, 0], sizes = [1, 32], strides = [1, 1]} : vector<3x32xf32> to vector<1x32xf32>
    %420 = vector.broadcast %3 : f32 to vector<1x32xf32>
    %421 = arith.mulf %420, %419 : vector<1x32xf32>
    %422 = arith.addf %418, %421 : vector<1x32xf32>
    %423 = vector.extract_strided_slice %412 {offsets = [2, 0], sizes = [1, 32], strides = [1, 1]} : vector<3x32xf32> to vector<1x32xf32>
    %424 = vector.broadcast %5 : f32 to vector<1x32xf32>
    %425 = arith.mulf %424, %423 : vector<1x32xf32>
    %426 = arith.addf %422, %425 : vector<1x32xf32>
    %c0_152 = arith.constant 0 : index
    %c0_153 = arith.constant 0 : index
    %427 = vector.load %arg13[%c0_152, %c0_153] : memref<1x32xf32, #tpu.memory_space<vmem>>, vector<1x32xf32>
    %428 = arith.addf %426, %427 : vector<1x32xf32>
    %cst_154 = arith.constant 0.00999999977 : f32
    %429 = vector.broadcast %cst_154 : f32 to vector<1x32xf32>
    %430 = arith.mulf %429, %428 : vector<1x32xf32>
    %431 = arith.maximumf %428, %430 : vector<1x32xf32>
    %c0_155 = arith.constant 0 : index
    %c0_156 = arith.constant 0 : index
    %432 = vector.load %arg17[%c0_155, %c0_156] : memref<32x32xf32, #tpu.memory_space<vmem>>, vector<32x32xf32>
    %cst_157 = arith.constant dense<0.000000e+00> : vector<1x32xf32>
    %433 = tpu.matmul %431, %432, %cst_157 {dimension_numbers = #tpu.dot_dimension_numbers<[1], [0], [0], [1], [0, 0, 1, 1], [], []>} : vector<1x32xf32>, vector<32x32xf32>, vector<1x32xf32> -> vector<1x32xf32>
    %c0_158 = arith.constant 0 : index
    %c0_159 = arith.constant 0 : index
    %434 = vector.load %arg14[%c0_158, %c0_159] : memref<1x32xf32, #tpu.memory_space<vmem>>, vector<1x32xf32>
    %435 = arith.addf %433, %434 : vector<1x32xf32>
    %436 = arith.negf %435 : vector<1x32xf32>
    %437 = math.exp %436 : vector<1x32xf32>
    %cst_160 = arith.constant 1.000000e+00 : f32
    %438 = vector.broadcast %cst_160 : f32 to vector<1x32xf32>
    %439 = arith.addf %438, %437 : vector<1x32xf32>
    %440 = arith.divf %438, %439 : vector<1x32xf32>
    %441 = vector.broadcast %440 : vector<1x32xf32> to vector<16x32xf32>
    %442 = arith.mulf %407, %441 : vector<16x32xf32>
    %443 = vector.shape_cast %442 : vector<16x32xf32> to vector<4x4x32xf32>
    %cst_161 = arith.constant 0.000000e+00 : f32
    %444 = vector.broadcast %cst_161 : f32 to vector<1x4x32xf32>
    %445 = tpu.concatenate %444, %443, %444 in 0 : vector<1x4x32xf32>, vector<4x4x32xf32>, vector<1x4x32xf32> -> vector<6x4x32xf32>
    %cst_162 = arith.constant 0.000000e+00 : f32
    %446 = vector.broadcast %cst_162 : f32 to vector<6x1x32xf32>
    %447 = tpu.concatenate %446, %445, %446 in 1 : vector<6x1x32xf32>, vector<6x4x32xf32>, vector<6x1x32xf32> -> vector<6x6x32xf32>
    %448 = vector.extract_strided_slice %447 {offsets = [0, 0, 0], sizes = [4, 6, 32], strides = [1, 1, 1]} : vector<6x6x32xf32> to vector<4x6x32xf32>
    %449 = vector.extract_strided_slice %448 {offsets = [0, 0, 0], sizes = [4, 4, 32], strides = [1, 1, 1]} : vector<4x6x32xf32> to vector<4x4x32xf32>
    %450 = vector.extract_strided_slice %448 {offsets = [0, 1, 0], sizes = [4, 4, 32], strides = [1, 1, 1]} : vector<4x6x32xf32> to vector<4x4x32xf32>
    %451 = vector.extract_strided_slice %448 {offsets = [0, 2, 0], sizes = [4, 4, 32], strides = [1, 1, 1]} : vector<4x6x32xf32> to vector<4x4x32xf32>
    %452 = vector.extract_strided_slice %447 {offsets = [1, 0, 0], sizes = [4, 6, 32], strides = [1, 1, 1]} : vector<6x6x32xf32> to vector<4x6x32xf32>
    %453 = vector.extract_strided_slice %452 {offsets = [0, 0, 0], sizes = [4, 4, 32], strides = [1, 1, 1]} : vector<4x6x32xf32> to vector<4x4x32xf32>
    %454 = vector.extract_strided_slice %452 {offsets = [0, 1, 0], sizes = [4, 4, 32], strides = [1, 1, 1]} : vector<4x6x32xf32> to vector<4x4x32xf32>
    %455 = vector.extract_strided_slice %452 {offsets = [0, 2, 0], sizes = [4, 4, 32], strides = [1, 1, 1]} : vector<4x6x32xf32> to vector<4x4x32xf32>
    %456 = vector.extract_strided_slice %447 {offsets = [2, 0, 0], sizes = [4, 6, 32], strides = [1, 1, 1]} : vector<6x6x32xf32> to vector<4x6x32xf32>
    %457 = vector.extract_strided_slice %456 {offsets = [0, 0, 0], sizes = [4, 4, 32], strides = [1, 1, 1]} : vector<4x6x32xf32> to vector<4x4x32xf32>
    %458 = vector.extract_strided_slice %456 {offsets = [0, 1, 0], sizes = [4, 4, 32], strides = [1, 1, 1]} : vector<4x6x32xf32> to vector<4x4x32xf32>
    %459 = vector.extract_strided_slice %456 {offsets = [0, 2, 0], sizes = [4, 4, 32], strides = [1, 1, 1]} : vector<4x6x32xf32> to vector<4x4x32xf32>
    %460 = tpu.concatenate %449, %450, %451, %453, %454, %455, %457, %458, %459 in 2 : vector<4x4x32xf32>, vector<4x4x32xf32>, vector<4x4x32xf32>, vector<4x4x32xf32>, vector<4x4x32xf32>, vector<4x4x32xf32>, vector<4x4x32xf32>, vector<4x4x32xf32>, vector<4x4x32xf32> -> vector<4x4x288xf32>
    %461 = vector.shape_cast %460 : vector<4x4x288xf32> to vector<16x288xf32>
    %c0_163 = arith.constant 0 : index
    %c0_164 = arith.constant 0 : index
    %462 = vector.load %arg56[%c0_163, %c0_164] : memref<288x16xf32, #tpu.memory_space<vmem>>, vector<288x16xf32>
    %cst_165 = arith.constant dense<0.000000e+00> : vector<16x16xf32>
    %463 = tpu.matmul %461, %462, %cst_165 {dimension_numbers = #tpu.dot_dimension_numbers<[1], [0], [0], [1], [0, 0, 1, 1], [], []>} : vector<16x288xf32>, vector<288x16xf32>, vector<16x16xf32> -> vector<16x16xf32>
    %c0_166 = arith.constant 0 : index
    %c0_167 = arith.constant 0 : index
    %464 = vector.load %arg53[%c0_166, %c0_167] : memref<1x16xf32, #tpu.memory_space<vmem>>, vector<1x16xf32>
    %465 = vector.broadcast %464 : vector<1x16xf32> to vector<16x16xf32>
    %466 = arith.addf %463, %465 : vector<16x16xf32>
    %cst_168 = arith.constant 0.00999999977 : f32
    %467 = vector.broadcast %cst_168 : f32 to vector<16x16xf32>
    %468 = arith.mulf %467, %466 : vector<16x16xf32>
    %469 = arith.maximumf %466, %468 : vector<16x16xf32>
    %470 = vector.shape_cast %469 : vector<16x16xf32> to vector<4x4x16xf32>
    %cst_169 = arith.constant 0.000000e+00 : f32
    %471 = vector.broadcast %cst_169 : f32 to vector<1x4x16xf32>
    %472 = tpu.concatenate %471, %470, %471 in 0 : vector<1x4x16xf32>, vector<4x4x16xf32>, vector<1x4x16xf32> -> vector<6x4x16xf32>
    %cst_170 = arith.constant 0.000000e+00 : f32
    %473 = vector.broadcast %cst_170 : f32 to vector<6x1x16xf32>
    %474 = tpu.concatenate %473, %472, %473 in 1 : vector<6x1x16xf32>, vector<6x4x16xf32>, vector<6x1x16xf32> -> vector<6x6x16xf32>
    %475 = vector.extract_strided_slice %474 {offsets = [0, 0, 0], sizes = [4, 6, 16], strides = [1, 1, 1]} : vector<6x6x16xf32> to vector<4x6x16xf32>
    %476 = vector.extract_strided_slice %475 {offsets = [0, 0, 0], sizes = [4, 4, 16], strides = [1, 1, 1]} : vector<4x6x16xf32> to vector<4x4x16xf32>
    %477 = vector.extract_strided_slice %475 {offsets = [0, 1, 0], sizes = [4, 4, 16], strides = [1, 1, 1]} : vector<4x6x16xf32> to vector<4x4x16xf32>
    %478 = vector.extract_strided_slice %475 {offsets = [0, 2, 0], sizes = [4, 4, 16], strides = [1, 1, 1]} : vector<4x6x16xf32> to vector<4x4x16xf32>
    %479 = vector.extract_strided_slice %474 {offsets = [1, 0, 0], sizes = [4, 6, 16], strides = [1, 1, 1]} : vector<6x6x16xf32> to vector<4x6x16xf32>
    %480 = vector.extract_strided_slice %479 {offsets = [0, 0, 0], sizes = [4, 4, 16], strides = [1, 1, 1]} : vector<4x6x16xf32> to vector<4x4x16xf32>
    %481 = vector.extract_strided_slice %479 {offsets = [0, 1, 0], sizes = [4, 4, 16], strides = [1, 1, 1]} : vector<4x6x16xf32> to vector<4x4x16xf32>
    %482 = vector.extract_strided_slice %479 {offsets = [0, 2, 0], sizes = [4, 4, 16], strides = [1, 1, 1]} : vector<4x6x16xf32> to vector<4x4x16xf32>
    %483 = vector.extract_strided_slice %474 {offsets = [2, 0, 0], sizes = [4, 6, 16], strides = [1, 1, 1]} : vector<6x6x16xf32> to vector<4x6x16xf32>
    %484 = vector.extract_strided_slice %483 {offsets = [0, 0, 0], sizes = [4, 4, 16], strides = [1, 1, 1]} : vector<4x6x16xf32> to vector<4x4x16xf32>
    %485 = vector.extract_strided_slice %483 {offsets = [0, 1, 0], sizes = [4, 4, 16], strides = [1, 1, 1]} : vector<4x6x16xf32> to vector<4x4x16xf32>
    %486 = vector.extract_strided_slice %483 {offsets = [0, 2, 0], sizes = [4, 4, 16], strides = [1, 1, 1]} : vector<4x6x16xf32> to vector<4x4x16xf32>
    %487 = tpu.concatenate %476, %477, %478, %480, %481, %482, %484, %485, %486 in 2 : vector<4x4x16xf32>, vector<4x4x16xf32>, vector<4x4x16xf32>, vector<4x4x16xf32>, vector<4x4x16xf32>, vector<4x4x16xf32>, vector<4x4x16xf32>, vector<4x4x16xf32>, vector<4x4x16xf32> -> vector<4x4x144xf32>
    %488 = vector.shape_cast %487 : vector<4x4x144xf32> to vector<16x144xf32>
    %c0_171 = arith.constant 0 : index
    %c0_172 = arith.constant 0 : index
    %489 = vector.load %arg57[%c0_171, %c0_172] : memref<144x16xf32, #tpu.memory_space<vmem>>, vector<144x16xf32>
    %cst_173 = arith.constant dense<0.000000e+00> : vector<16x16xf32>
    %490 = tpu.matmul %488, %489, %cst_173 {dimension_numbers = #tpu.dot_dimension_numbers<[1], [0], [0], [1], [0, 0, 1, 1], [], []>} : vector<16x144xf32>, vector<144x16xf32>, vector<16x16xf32> -> vector<16x16xf32>
    %c0_174 = arith.constant 0 : index
    %c0_175 = arith.constant 0 : index
    %491 = vector.load %arg54[%c0_174, %c0_175] : memref<1x16xf32, #tpu.memory_space<vmem>>, vector<1x16xf32>
    %492 = vector.broadcast %491 : vector<1x16xf32> to vector<16x16xf32>
    %493 = arith.addf %490, %492 : vector<16x16xf32>
    %cst_176 = arith.constant 0.00999999977 : f32
    %494 = vector.broadcast %cst_176 : f32 to vector<16x16xf32>
    %495 = arith.mulf %494, %493 : vector<16x16xf32>
    %496 = arith.maximumf %493, %495 : vector<16x16xf32>
    %c0_177 = arith.constant 0 : index
    %c0_178 = arith.constant 0 : index
    %497 = vector.load %arg58[%c0_177, %c0_178] : memref<32x16xf32, #tpu.memory_space<vmem>>, vector<32x16xf32>
    %cst_179 = arith.constant dense<0.000000e+00> : vector<16x16xf32>
    %498 = tpu.matmul %442, %497, %cst_179 {dimension_numbers = #tpu.dot_dimension_numbers<[1], [0], [0], [1], [0, 0, 1, 1], [], []>} : vector<16x32xf32>, vector<32x16xf32>, vector<16x16xf32> -> vector<16x16xf32>
    %c0_180 = arith.constant 0 : index
    %c0_181 = arith.constant 0 : index
    %499 = vector.load %arg55[%c0_180, %c0_181] : memref<1x16xf32, #tpu.memory_space<vmem>>, vector<1x16xf32>
    %500 = vector.broadcast %499 : vector<1x16xf32> to vector<16x16xf32>
    %501 = arith.addf %498, %500 : vector<16x16xf32>
    %502 = arith.addf %496, %501 : vector<16x16xf32>
    %cst_182 = arith.constant dense<0.000000e+00> : vector<16xf32>
    %503 = vector.multi_reduction <add>, %502, %cst_182 [0] : vector<16x16xf32> to vector<16xf32>
    %504 = vector.shape_cast %503 : vector<16xf32> to vector<1x16xf32>
    %cst_183 = arith.constant 6.250000e-02 : f32
    %505 = vector.broadcast %cst_183 : f32 to vector<1x16xf32>
    %506 = arith.mulf %504, %505 : vector<1x16xf32>
    %c0_184 = arith.constant 0 : index
    %c0_185 = arith.constant 0 : index
    %507 = vector.load %arg20[%c0_184, %c0_185] : memref<3x16xf32, #tpu.memory_space<vmem>>, vector<3x16xf32>
    %c0_186 = arith.constant 0 : index
    %c0_187 = arith.constant 0 : index
    %508 = vector.load %arg21[%c0_186, %c0_187] : memref<16x16xf32, #tpu.memory_space<vmem>>, vector<16x16xf32>
    %cst_188 = arith.constant dense<0.000000e+00> : vector<1x16xf32>
    %509 = tpu.matmul %506, %508, %cst_188 {dimension_numbers = #tpu.dot_dimension_numbers<[1], [0], [0], [1], [0, 0, 1, 1], [], []>} : vector<1x16xf32>, vector<16x16xf32>, vector<1x16xf32> -> vector<1x16xf32>
    %510 = vector.extract_strided_slice %507 {offsets = [0, 0], sizes = [1, 16], strides = [1, 1]} : vector<3x16xf32> to vector<1x16xf32>
    %511 = vector.broadcast %1 : f32 to vector<1x16xf32>
    %512 = arith.mulf %511, %510 : vector<1x16xf32>
    %513 = arith.addf %509, %512 : vector<1x16xf32>
    %514 = vector.extract_strided_slice %507 {offsets = [1, 0], sizes = [1, 16], strides = [1, 1]} : vector<3x16xf32> to vector<1x16xf32>
    %515 = vector.broadcast %3 : f32 to vector<1x16xf32>
    %516 = arith.mulf %515, %514 : vector<1x16xf32>
    %517 = arith.addf %513, %516 : vector<1x16xf32>
    %518 = vector.extract_strided_slice %507 {offsets = [2, 0], sizes = [1, 16], strides = [1, 1]} : vector<3x16xf32> to vector<1x16xf32>
    %519 = vector.broadcast %5 : f32 to vector<1x16xf32>
    %520 = arith.mulf %519, %518 : vector<1x16xf32>
    %521 = arith.addf %517, %520 : vector<1x16xf32>
    %c0_189 = arith.constant 0 : index
    %c0_190 = arith.constant 0 : index
    %522 = vector.load %arg18[%c0_189, %c0_190] : memref<1x16xf32, #tpu.memory_space<vmem>>, vector<1x16xf32>
    %523 = arith.addf %521, %522 : vector<1x16xf32>
    %cst_191 = arith.constant 0.00999999977 : f32
    %524 = vector.broadcast %cst_191 : f32 to vector<1x16xf32>
    %525 = arith.mulf %524, %523 : vector<1x16xf32>
    %526 = arith.maximumf %523, %525 : vector<1x16xf32>
    %c0_192 = arith.constant 0 : index
    %c0_193 = arith.constant 0 : index
    %527 = vector.load %arg22[%c0_192, %c0_193] : memref<16x16xf32, #tpu.memory_space<vmem>>, vector<16x16xf32>
    %cst_194 = arith.constant dense<0.000000e+00> : vector<1x16xf32>
    %528 = tpu.matmul %526, %527, %cst_194 {dimension_numbers = #tpu.dot_dimension_numbers<[1], [0], [0], [1], [0, 0, 1, 1], [], []>} : vector<1x16xf32>, vector<16x16xf32>, vector<1x16xf32> -> vector<1x16xf32>
    %c0_195 = arith.constant 0 : index
    %c0_196 = arith.constant 0 : index
    %529 = vector.load %arg19[%c0_195, %c0_196] : memref<1x16xf32, #tpu.memory_space<vmem>>, vector<1x16xf32>
    %530 = arith.addf %528, %529 : vector<1x16xf32>
    %531 = arith.negf %530 : vector<1x16xf32>
    %532 = math.exp %531 : vector<1x16xf32>
    %cst_197 = arith.constant 1.000000e+00 : f32
    %533 = vector.broadcast %cst_197 : f32 to vector<1x16xf32>
    %534 = arith.addf %533, %532 : vector<1x16xf32>
    %535 = arith.divf %533, %534 : vector<1x16xf32>
    %536 = vector.broadcast %535 : vector<1x16xf32> to vector<16x16xf32>
    %537 = arith.mulf %502, %536 : vector<16x16xf32>
    %538 = vector.shape_cast %537 : vector<16x16xf32> to vector<1x4x4x16xf32>
    %c0_198 = arith.constant 0 : index
    %c0_199 = arith.constant 0 : index
    %c0_200 = arith.constant 0 : index
    %c0_201 = arith.constant 0 : index
    %539 = vector.load %arg59[%c0_198, %c0_199, %c0_200, %c0_201] : memref<1x4x4x16xf32, #tpu.memory_space<vmem>>, vector<1x4x4x16xf32>
    tpu.vector_store %arg59[%c0_198, %c0_199, %c0_200, %c0_201], %538 {strides = array<i32>} : memref<1x4x4x16xf32, #tpu.memory_space<vmem>>, vector<1x4x4x16xf32>,
    return
  }
  func.func @transform_0(%arg0: i32) -> (i32, i32) {
    %c0_i32 = arith.constant 0 : i32
    %c0_i32_0 = arith.constant 0 : i32
    %c0_i32_1 = arith.constant 0 : i32
    return %c0_i32, %c0_i32_0 : i32, i32
  }
  func.func @transform_1(%arg0: i32) -> (i32, i32, i32, i32) {
    %c0_i32 = arith.constant 0 : i32
    %c0_i32_0 = arith.constant 0 : i32
    %c0_i32_1 = arith.constant 0 : i32
    %c0_i32_2 = arith.constant 0 : i32
    return %arg0, %c0_i32, %c0_i32_0, %c0_i32_1 : i32, i32, i32, i32
  }
  func.func @transform_2(%arg0: i32) -> (i32, i32) {
    %c0_i32 = arith.constant 0 : i32
    %c0_i32_0 = arith.constant 0 : i32
    %c0_i32_1 = arith.constant 0 : i32
    return %c0_i32, %c0_i32_0 : i32, i32
  }
  func.func @transform_3(%arg0: i32) -> (i32, i32) {
    %c0_i32 = arith.constant 0 : i32
    %c0_i32_0 = arith.constant 0 : i32
    %c0_i32_1 = arith.constant 0 : i32
    return %c0_i32, %c0_i32_0 : i32, i32
  }
  func.func @transform_4(%arg0: i32) -> (i32, i32) {
    %c0_i32 = arith.constant 0 : i32
    %c0_i32_0 = arith.constant 0 : i32
    %c0_i32_1 = arith.constant 0 : i32
    return %c0_i32, %c0_i32_0 : i32, i32
  }
  func.func @transform_5(%arg0: i32) -> (i32, i32) {
    %c0_i32 = arith.constant 0 : i32
    %c0_i32_0 = arith.constant 0 : i32
    %c0_i32_1 = arith.constant 0 : i32
    return %c0_i32, %c0_i32_0 : i32, i32
  }
  func.func @transform_6(%arg0: i32) -> (i32, i32) {
    %c0_i32 = arith.constant 0 : i32
    %c0_i32_0 = arith.constant 0 : i32
    %c0_i32_1 = arith.constant 0 : i32
    return %c0_i32, %c0_i32_0 : i32, i32
  }
  func.func @transform_7(%arg0: i32) -> (i32, i32) {
    %c0_i32 = arith.constant 0 : i32
    %c0_i32_0 = arith.constant 0 : i32
    %c0_i32_1 = arith.constant 0 : i32
    return %c0_i32, %c0_i32_0 : i32, i32
  }
  func.func @transform_8(%arg0: i32) -> (i32, i32) {
    %c0_i32 = arith.constant 0 : i32
    %c0_i32_0 = arith.constant 0 : i32
    %c0_i32_1 = arith.constant 0 : i32
    return %c0_i32, %c0_i32_0 : i32, i32
  }
  func.func @transform_9(%arg0: i32) -> (i32, i32) {
    %c0_i32 = arith.constant 0 : i32
    %c0_i32_0 = arith.constant 0 : i32
    %c0_i32_1 = arith.constant 0 : i32
    return %c0_i32, %c0_i32_0 : i32, i32
  }
  func.func @transform_10(%arg0: i32) -> (i32, i32) {
    %c0_i32 = arith.constant 0 : i32
    %c0_i32_0 = arith.constant 0 : i32
    %c0_i32_1 = arith.constant 0 : i32
    return %c0_i32, %c0_i32_0 : i32, i32
  }
  func.func @transform_11(%arg0: i32) -> (i32, i32) {
    %c0_i32 = arith.constant 0 : i32
    %c0_i32_0 = arith.constant 0 : i32
    %c0_i32_1 = arith.constant 0 : i32
    return %c0_i32, %c0_i32_0 : i32, i32
  }
  func.func @transform_12(%arg0: i32) -> (i32, i32) {
    %c0_i32 = arith.constant 0 : i32
    %c0_i32_0 = arith.constant 0 : i32
    %c0_i32_1 = arith.constant 0 : i32
    return %c0_i32, %c0_i32_0 : i32, i32
  }
  func.func @transform_13(%arg0: i32) -> (i32, i32) {
    %c0_i32 = arith.constant 0 : i32
    %c0_i32_0 = arith.constant 0 : i32
    %c0_i32_1 = arith.constant 0 : i32
    return %c0_i32, %c0_i32_0 : i32, i32
  }
  func.func @transform_14(%arg0: i32) -> (i32, i32) {
    %c0_i32 = arith.constant 0 : i32
    %c0_i32_0 = arith.constant 0 : i32
    %c0_i32_1 = arith.constant 0 : i32
    return %c0_i32, %c0_i32_0 : i32, i32
  }
  func.func @transform_15(%arg0: i32) -> (i32, i32) {
    %c0_i32 = arith.constant 0 : i32
    %c0_i32_0 = arith.constant 0 : i32
    %c0_i32_1 = arith.constant 0 : i32
    return %c0_i32, %c0_i32_0 : i32, i32
  }
  func.func @transform_16(%arg0: i32) -> (i32, i32) {
    %c0_i32 = arith.constant 0 : i32
    %c0_i32_0 = arith.constant 0 : i32
    %c0_i32_1 = arith.constant 0 : i32
    return %c0_i32, %c0_i32_0 : i32, i32
  }
  func.func @transform_17(%arg0: i32) -> (i32, i32) {
    %c0_i32 = arith.constant 0 : i32
    %c0_i32_0 = arith.constant 0 : i32
    %c0_i32_1 = arith.constant 0 : i32
    return %c0_i32, %c0_i32_0 : i32, i32
  }
  func.func @transform_18(%arg0: i32) -> (i32, i32) {
    %c0_i32 = arith.constant 0 : i32
    %c0_i32_0 = arith.constant 0 : i32
    %c0_i32_1 = arith.constant 0 : i32
    return %c0_i32, %c0_i32_0 : i32, i32
  }
  func.func @transform_19(%arg0: i32) -> (i32, i32) {
    %c0_i32 = arith.constant 0 : i32
    %c0_i32_0 = arith.constant 0 : i32
    %c0_i32_1 = arith.constant 0 : i32
    return %c0_i32, %c0_i32_0 : i32, i32
  }
  func.func @transform_20(%arg0: i32) -> (i32, i32) {
    %c0_i32 = arith.constant 0 : i32
    %c0_i32_0 = arith.constant 0 : i32
    %c0_i32_1 = arith.constant 0 : i32
    return %c0_i32, %c0_i32_0 : i32, i32
  }
  func.func @transform_21(%arg0: i32) -> (i32, i32) {
    %c0_i32 = arith.constant 0 : i32
    %c0_i32_0 = arith.constant 0 : i32
    %c0_i32_1 = arith.constant 0 : i32
    return %c0_i32, %c0_i32_0 : i32, i32
  }
  func.func @transform_22(%arg0: i32) -> (i32, i32) {
    %c0_i32 = arith.constant 0 : i32
    %c0_i32_0 = arith.constant 0 : i32
    %c0_i32_1 = arith.constant 0 : i32
    return %c0_i32, %c0_i32_0 : i32, i32
  }
  func.func @transform_23(%arg0: i32) -> (i32, i32) {
    %c0_i32 = arith.constant 0 : i32
    %c0_i32_0 = arith.constant 0 : i32
    %c0_i32_1 = arith.constant 0 : i32
    return %c0_i32, %c0_i32_0 : i32, i32
  }
  func.func @transform_24(%arg0: i32) -> (i32, i32) {
    %c0_i32 = arith.constant 0 : i32
    %c0_i32_0 = arith.constant 0 : i32
    %c0_i32_1 = arith.constant 0 : i32
    return %c0_i32, %c0_i32_0 : i32, i32
  }
  func.func @transform_25(%arg0: i32) -> (i32, i32) {
    %c0_i32 = arith.constant 0 : i32
    %c0_i32_0 = arith.constant 0 : i32
    %c0_i32_1 = arith.constant 0 : i32
    return %c0_i32, %c0_i32_0 : i32, i32
  }
  func.func @transform_26(%arg0: i32) -> (i32, i32) {
    %c0_i32 = arith.constant 0 : i32
    %c0_i32_0 = arith.constant 0 : i32
    %c0_i32_1 = arith.constant 0 : i32
    return %c0_i32, %c0_i32_0 : i32, i32
  }
  func.func @transform_27(%arg0: i32) -> (i32, i32) {
    %c0_i32 = arith.constant 0 : i32
    %c0_i32_0 = arith.constant 0 : i32
    %c0_i32_1 = arith.constant 0 : i32
    return %c0_i32, %c0_i32_0 : i32, i32
  }
  func.func @transform_28(%arg0: i32) -> (i32, i32) {
    %c0_i32 = arith.constant 0 : i32
    %c0_i32_0 = arith.constant 0 : i32
    %c0_i32_1 = arith.constant 0 : i32
    return %c0_i32, %c0_i32_0 : i32, i32
  }
  func.func @transform_29(%arg0: i32) -> (i32, i32) {
    %c0_i32 = arith.constant 0 : i32
    %c0_i32_0 = arith.constant 0 : i32
    %c0_i32_1 = arith.constant 0 : i32
    return %c0_i32, %c0_i32_0 : i32, i32
  }
  func.func @transform_30(%arg0: i32) -> (i32, i32) {
    %c0_i32 = arith.constant 0 : i32
    %c0_i32_0 = arith.constant 0 : i32
    %c0_i32_1 = arith.constant 0 : i32
    return %c0_i32, %c0_i32_0 : i32, i32
  }
  func.func @transform_31(%arg0: i32) -> (i32, i32) {
    %c0_i32 = arith.constant 0 : i32
    %c0_i32_0 = arith.constant 0 : i32
    %c0_i32_1 = arith.constant 0 : i32
    return %c0_i32, %c0_i32_0 : i32, i32
  }
  func.func @transform_32(%arg0: i32) -> (i32, i32) {
    %c0_i32 = arith.constant 0 : i32
    %c0_i32_0 = arith.constant 0 : i32
    %c0_i32_1 = arith.constant 0 : i32
    return %c0_i32, %c0_i32_0 : i32, i32
  }
  func.func @transform_33(%arg0: i32) -> (i32, i32) {
    %c0_i32 = arith.constant 0 : i32
    %c0_i32_0 = arith.constant 0 : i32
    %c0_i32_1 = arith.constant 0 : i32
    return %c0_i32, %c0_i32_0 : i32, i32
  }
  func.func @transform_34(%arg0: i32) -> (i32, i32) {
    %c0_i32 = arith.constant 0 : i32
    %c0_i32_0 = arith.constant 0 : i32
    %c0_i32_1 = arith.constant 0 : i32
    return %c0_i32, %c0_i32_0 : i32, i32
  }
  func.func @transform_35(%arg0: i32) -> (i32, i32) {
    %c0_i32 = arith.constant 0 : i32
    %c0_i32_0 = arith.constant 0 : i32
    %c0_i32_1 = arith.constant 0 : i32
    return %c0_i32, %c0_i32_0 : i32, i32
  }
  func.func @transform_36(%arg0: i32) -> (i32, i32) {
    %c0_i32 = arith.constant 0 : i32
    %c0_i32_0 = arith.constant 0 : i32
    %c0_i32_1 = arith.constant 0 : i32
    return %c0_i32, %c0_i32_0 : i32, i32
  }
  func.func @transform_37(%arg0: i32) -> (i32, i32) {
    %c0_i32 = arith.constant 0 : i32
    %c0_i32_0 = arith.constant 0 : i32
    %c0_i32_1 = arith.constant 0 : i32
    return %c0_i32, %c0_i32_0 : i32, i32
  }
  func.func @transform_38(%arg0: i32) -> (i32, i32) {
    %c0_i32 = arith.constant 0 : i32
    %c0_i32_0 = arith.constant 0 : i32
    %c0_i32_1 = arith.constant 0 : i32
    return %c0_i32, %c0_i32_0 : i32, i32
  }
  func.func @transform_39(%arg0: i32) -> (i32, i32) {
    %c0_i32 = arith.constant 0 : i32
    %c0_i32_0 = arith.constant 0 : i32
    %c0_i32_1 = arith.constant 0 : i32
    return %c0_i32, %c0_i32_0 : i32, i32
  }
  func.func @transform_40(%arg0: i32) -> (i32, i32) {
    %c0_i32 = arith.constant 0 : i32
    %c0_i32_0 = arith.constant 0 : i32
    %c0_i32_1 = arith.constant 0 : i32
    return %c0_i32, %c0_i32_0 : i32, i32
  }
  func.func @transform_41(%arg0: i32) -> (i32, i32) {
    %c0_i32 = arith.constant 0 : i32
    %c0_i32_0 = arith.constant 0 : i32
    %c0_i32_1 = arith.constant 0 : i32
    return %c0_i32, %c0_i32_0 : i32, i32
  }
  func.func @transform_42(%arg0: i32) -> (i32, i32) {
    %c0_i32 = arith.constant 0 : i32
    %c0_i32_0 = arith.constant 0 : i32
    %c0_i32_1 = arith.constant 0 : i32
    return %c0_i32, %c0_i32_0 : i32, i32
  }
  func.func @transform_43(%arg0: i32) -> (i32, i32) {
    %c0_i32 = arith.constant 0 : i32
    %c0_i32_0 = arith.constant 0 : i32
    %c0_i32_1 = arith.constant 0 : i32
    return %c0_i32, %c0_i32_0 : i32, i32
  }
  func.func @transform_44(%arg0: i32) -> (i32, i32) {
    %c0_i32 = arith.constant 0 : i32
    %c0_i32_0 = arith.constant 0 : i32
    %c0_i32_1 = arith.constant 0 : i32
    return %c0_i32, %c0_i32_0 : i32, i32
  }
  func.func @transform_45(%arg0: i32) -> (i32, i32) {
    %c0_i32 = arith.constant 0 : i32
    %c0_i32_0 = arith.constant 0 : i32
    %c0_i32_1 = arith.constant 0 : i32
    return %c0_i32, %c0_i32_0 : i32, i32
  }
  func.func @transform_46(%arg0: i32) -> (i32, i32) {
    %c0_i32 = arith.constant 0 : i32
    %c0_i32_0 = arith.constant 0 : i32
    %c0_i32_1 = arith.constant 0 : i32
    return %c0_i32, %c0_i32_0 : i32, i32
  }
  func.func @transform_47(%arg0: i32) -> (i32, i32) {
    %c0_i32 = arith.constant 0 : i32
    %c0_i32_0 = arith.constant 0 : i32
    %c0_i32_1 = arith.constant 0 : i32
    return %c0_i32, %c0_i32_0 : i32, i32
  }
  func.func @transform_48(%arg0: i32) -> (i32, i32) {
    %c0_i32 = arith.constant 0 : i32
    %c0_i32_0 = arith.constant 0 : i32
    %c0_i32_1 = arith.constant 0 : i32
    return %c0_i32, %c0_i32_0 : i32, i32
  }
  func.func @transform_49(%arg0: i32) -> (i32, i32) {
    %c0_i32 = arith.constant 0 : i32
    %c0_i32_0 = arith.constant 0 : i32
    %c0_i32_1 = arith.constant 0 : i32
    return %c0_i32, %c0_i32_0 : i32, i32
  }
  func.func @transform_50(%arg0: i32) -> (i32, i32) {
    %c0_i32 = arith.constant 0 : i32
    %c0_i32_0 = arith.constant 0 : i32
    %c0_i32_1 = arith.constant 0 : i32
    return %c0_i32, %c0_i32_0 : i32, i32
  }
  func.func @transform_51(%arg0: i32) -> (i32, i32) {
    %c0_i32 = arith.constant 0 : i32
    %c0_i32_0 = arith.constant 0 : i32
    %c0_i32_1 = arith.constant 0 : i32
    return %c0_i32, %c0_i32_0 : i32, i32
  }
  func.func @transform_52(%arg0: i32) -> (i32, i32) {
    %c0_i32 = arith.constant 0 : i32
    %c0_i32_0 = arith.constant 0 : i32
    %c0_i32_1 = arith.constant 0 : i32
    return %c0_i32, %c0_i32_0 : i32, i32
  }
  func.func @transform_53(%arg0: i32) -> (i32, i32) {
    %c0_i32 = arith.constant 0 : i32
    %c0_i32_0 = arith.constant 0 : i32
    %c0_i32_1 = arith.constant 0 : i32
    return %c0_i32, %c0_i32_0 : i32, i32
  }
  func.func @transform_54(%arg0: i32) -> (i32, i32) {
    %c0_i32 = arith.constant 0 : i32
    %c0_i32_0 = arith.constant 0 : i32
    %c0_i32_1 = arith.constant 0 : i32
    return %c0_i32, %c0_i32_0 : i32, i32
  }
  func.func @transform_55(%arg0: i32) -> (i32, i32) {
    %c0_i32 = arith.constant 0 : i32
    %c0_i32_0 = arith.constant 0 : i32
    %c0_i32_1 = arith.constant 0 : i32
    return %c0_i32, %c0_i32_0 : i32, i32
  }
  func.func @transform_56(%arg0: i32) -> (i32, i32) {
    %c0_i32 = arith.constant 0 : i32
    %c0_i32_0 = arith.constant 0 : i32
    %c0_i32_1 = arith.constant 0 : i32
    return %c0_i32, %c0_i32_0 : i32, i32
  }
  func.func @transform_57(%arg0: i32) -> (i32, i32) {
    %c0_i32 = arith.constant 0 : i32
    %c0_i32_0 = arith.constant 0 : i32
    %c0_i32_1 = arith.constant 0 : i32
    return %c0_i32, %c0_i32_0 : i32, i32
  }
  func.func @transform_58(%arg0: i32) -> (i32, i32, i32, i32) {
    %c0_i32 = arith.constant 0 : i32
    %c0_i32_0 = arith.constant 0 : i32
    %c0_i32_1 = arith.constant 0 : i32
    %c0_i32_2 = arith.constant 0 : i32
    return %arg0, %c0_i32, %c0_i32_0, %c0_i32_1 : i32, i32, i32, i32
  }
}

</mosaic_0001>

<bundles_post_ra>
// kernel: encoder_cell_forward.1
= control target key start
LH: loop header
LB: loop body
LE: loop exit
PB: predicated region body
PF: predicated region fallthrough
CT: control target
= control target key end

     0   :  { %s10026_s6 = smov 1   ;;  %s10027_s10 = smov 2   ;;  %s14182_s0 = inlined_call_operand.smem [shape: u32[59], index: -1, kind: input, shape index: {}] }
   0x1   :  { %s10112_s5 = sld [smem:[%s14182_s0]]   ;;  %s10028_s14 = smov 3  }
   0x2   :  { %s10117_s9 = sld [smem:[%s14182_s0 + %s10026_s6]]   ;;  %s10029_s18 = smov 4  }
   0x3   :  { %s10122_s13 = sld [smem:[%s14182_s0 + %s10027_s10]]   ;;  %s10030_s22 = smov 5  }
   0x4   :  { %s10127_s17 = sld [smem:[%s14182_s0 + %s10028_s14]]   ;;  %s10031_s26 = smov 6  }
   0x5   :  { %s10132_s21 = sld [smem:[%s14182_s0 + %s10029_s18]]   ;;  %s10032_s30 = smov 7  }
   0x6   :  { %s10137_s25 = sld [smem:[%s14182_s0 + %s10030_s22]]   ;;  %s10033_s4 = smov 8  }
   0x7   :  { %14239 = sst [smem:[#allocation19_spill]] %s10112_s5  ;;  %s10034_s10 = smov 9  }
   0x8   :  { %14240 = sst [smem:[#allocation20_spill]] %s10117_s9  ;;  %s10035_s15 = smov 10  }
   0x9   :  { %14241 = sst [smem:[#allocation21_spill]] %s10122_s13  ;;  %s10036_s20 = smov 11  }
   0xa   :  { %14242 = sst [smem:[#allocation22_spill]] %s10127_s17  ;;  %s10038_s1 = smov 13  }
   0xb   :  { %14243 = sst [smem:[#allocation23_spill]] %s10132_s21  ;;  %s10039_s7 = smov 14  }
   0xc   :  { %14244 = sst [smem:[#allocation24_spill]] %s10137_s25  ;;  %s10041_s22 = smov 16  }
   0xd   :  { %s10142_s29 = sld [smem:[%s14182_s0 + %s10031_s26]]   ;;  %s10037_s26 = smov 12  }
   0xe   :  { %s10147_s3 = sld [smem:[%s14182_s0 + %s10032_s30]]   ;;  %s10042_s28 = smov 17  }
   0xf   :  { %s10152_s8 = sld [smem:[%s14182_s0 + %s10033_s4]]  }
  0x10   :  { %s10157_s14 = sld [smem:[%s14182_s0 + %s10034_s10]]  }
  0x11   :  { %s10162_s19 = sld [smem:[%s14182_s0 + %s10035_s15]]   ;;  %s10040_s15 = smov 15  }
  0x12   :  { %s10167_s24 = sld [smem:[%s14182_s0 + %s10036_s20]]  }
  0x13   :  { %14245 = sst [smem:[#allocation25_spill]] %s10142_s29 }
  0x14   :  { %14246 = sst [smem:[#allocation26_spill]] %s10147_s3 }
  0x15   :  { %14247 = sst [smem:[#allocation27_spill]] %s10152_s8 }
  0x16   :  { %14248 = sst [smem:[#allocation28_spill]] %s10157_s14 }
  0x17   :  { %14249 = sst [smem:[#allocation29_spill]] %s10162_s19 }
  0x18   :  { %14250 = sst [smem:[#allocation30_spill]] %s10167_s24 }
  0x19   :  { %s10172_s30 = sld [smem:[%s14182_s0 + %s10037_s26]]  }
  0x1a   :  { %s10177_s6 = sld [smem:[%s14182_s0 + %s10038_s1]]  }
  0x1b   :  { %s10182_s12 = sld [smem:[%s14182_s0 + %s10039_s7]]   ;;  %s10043_s7 = smov 18  }
  0x1c   :  { %s10187_s20 = sld [smem:[%s14182_s0 + %s10040_s15]]   ;;  %s10044_s15 = smov 19  }
  0x1d   :  { %s10192_s27 = sld [smem:[%s14182_s0 + %s10041_s22]]   ;;  %s10045_s22 = smov 20  }
  0x1e   :  { %s10197_s4 = sld [smem:[%s14182_s0 + %s10042_s28]]   ;;  %s10046_s28 = smov 21  }
  0x1f   :  { %14251 = sst [smem:[#allocation31_spill]] %s10172_s30 }
  0x20   :  { %14252 = sst [smem:[#allocation32_spill]] %s10177_s6 }
  0x21   :  { %14253 = sst [smem:[#allocation33_spill]] %s10182_s12 }
  0x22   :  { %14254 = sst [smem:[#allocation34_spill]] %s10187_s20 }
  0x23   :  { %14255 = sst [smem:[#allocation35_spill]] %s10192_s27 }
  0x24   :  { %14256 = sst [smem:[#allocation36_spill]] %s10197_s4 }
  0x25   :  { %s10202_s6 = sld [smem:[%s14182_s0 + %s10043_s7]]   ;;  %s10047_s7 = smov 22  }
  0x26   :  { %s10207_s30 = sld [smem:[%s14182_s0 + %s10044_s15]]   ;;  %s10048_s15 = smov 23  }
  0x27   :  { %s10212_s12 = sld [smem:[%s14182_s0 + %s10045_s22]]   ;;  %s10049_s22 = smov 24  }
  0x28   :  { %s10217_s4 = sld [smem:[%s14182_s0 + %s10046_s28]]   ;;  %s10050_s28 = smov 25  }
  0x2b   :  { %14257 = sst [smem:[#allocation37_spill]] %s10202_s6 }
  0x2c   :  { %14258 = sst [smem:[#allocation38_spill]] %s10207_s30 }
  0x2d   :  { %14259 = sst [smem:[#allocation39_spill]] %s10212_s12 }
  0x2e   :  { %14260 = sst [smem:[#allocation40_spill]] %s10217_s4 }
  0x2f   :  { %s10222_s6 = sld [smem:[%s14182_s0 + %s10047_s7]]   ;;  %s10051_s7 = smov 26  }
  0x30   :  { %s10227_s30 = sld [smem:[%s14182_s0 + %s10048_s15]]   ;;  %s10052_s15 = smov 27  }
  0x31   :  { %s10232_s12 = sld [smem:[%s14182_s0 + %s10049_s22]]   ;;  %s10053_s22 = smov 28  }
  0x32   :  { %s10237_s4 = sld [smem:[%s14182_s0 + %s10050_s28]]   ;;  %s10054_s28 = smov 29  }
  0x33   :  { %s10242_s27 = sld [smem:[%s14182_s0 + %s10051_s7]]   ;;  %s10055_s7 = smov 30  }
  0x34   :  { %s10247_s20 = sld [smem:[%s14182_s0 + %s10052_s15]]   ;;  %s10056_s15 = smov 31  }
  0x35   :  { %14261 = sst [smem:[#allocation41_spill]] %s10222_s6 }
  0x36   :  { %14262 = sst [smem:[#allocation42_spill]] %s10227_s30 }
  0x37   :  { %14263 = sst [smem:[#allocation43_spill]] %s10232_s12 }
  0x38   :  { %14264 = sst [smem:[#allocation44_spill]] %s10237_s4 }
  0x39   :  { %14265 = sst [smem:[#allocation45_spill]] %s10242_s27 }
  0x3a   :  { %14266 = sst [smem:[#allocation46_spill]] %s10247_s20 }
  0x3b   :  { %s10252_s8 = sld [smem:[%s14182_s0 + %s10053_s22]]   ;;  %s10057_s22 = smov 32  }
  0x3c   :  { %s10257_s3 = sld [smem:[%s14182_s0 + %s10054_s28]]   ;;  %s10058_s28 = smov 33  }
  0x3d   :  { %s10262_s14 = sld [smem:[%s14182_s0 + %s10055_s7]]   ;;  %s10059_s7 = smov 34  }
  0x3e   :  { %s10267_s24 = sld [smem:[%s14182_s0 + %s10056_s15]]   ;;  %s10060_s15 = smov 35  }
  0x3f   :  { %s10272_s20 = sld [smem:[%s14182_s0 + %s10057_s22]]   ;;  %s10061_s22 = smov 36  }
  0x40   :  { %s10277_s19 = sld [smem:[%s14182_s0 + %s10058_s28]]   ;;  %s10062_s28 = smov 37  }
  0x41   :  { %14267 = sst [smem:[#allocation47_spill]] %s10252_s8 }
  0x42   :  { %14268 = sst [smem:[#allocation48_spill]] %s10257_s3 }
  0x43   :  { %s10282_s3 = sld [smem:[%s14182_s0 + %s10059_s7]]   ;;  %s10063_s7 = smov 38  }
  0x44   :  { %s10287_s27 = sld [smem:[%s14182_s0 + %s10060_s15]]   ;;  %s10064_s15 = smov 39  }
  0x45   :  { %14269 = sst [smem:[#allocation49_spill]] %s10272_s20 }
  0x46   :  { %14270 = sst [smem:[#allocation50_spill]] %s10277_s19 }
  0x47   :  { %s10292_s8 = sld [smem:[%s14182_s0 + %s10061_s22]]   ;;  %s10065_s22 = smov 40  }
  0x48   :  { %s10297_s17 = sld [smem:[%s14182_s0 + %s10062_s28]]   ;;  %s10066_s28 = smov 41  }
  0x49   :  { %14271 = sst [smem:[#allocation51_spill]] %s10282_s3 }
  0x4a   :  { %s10302_s13 = sld [smem:[%s14182_s0 + %s10063_s7]]   ;;  %s10067_s7 = smov 42  }
  0x4b   :  { %s10307_s21 = sld [smem:[%s14182_s0 + %s10064_s15]]   ;;  %s10068_s15 = smov 43  }
  0x4c   :  { %s10312_s29 = sld [smem:[%s14182_s0 + %s10065_s22]]   ;;  %s10069_s22 = smov 44  }
  0x4d   :  { %14272 = sst [smem:[#allocation52_spill]] %s10292_s8 }
  0x4e   :  { %s10317_s30 = sld [smem:[%s14182_s0 + %s10066_s28]]   ;;  %s10070_s28 = smov 45  }
  0x4f   :  { %s10322_s25 = sld [smem:[%s14182_s0 + %s10067_s7]]   ;;  %s10071_s7 = smov 46  }
  0x51   :  { %14273 = sst [smem:[#allocation53_spill]] %s10307_s21 }
  0x52   :  { %14274 = sst [smem:[#allocation54_spill]] %s10312_s29 }
  0x53   :  { %s10327_s21 = sld [smem:[%s14182_s0 + %s10068_s15]]   ;;  %s10072_s15 = smov 47  }
  0x54   :  { %14275 = sst [smem:[#allocation55_spill]] %s10317_s30 }
  0x55   :  { %14276 = sst [smem:[#allocation56_spill]] %s10322_s25 }
  0x56   :  { %s10332_s29 = sld [smem:[%s14182_s0 + %s10069_s22]]   ;;  %s10073_s22 = smov 48  }
  0x57   :  { %s10337_s30 = sld [smem:[%s14182_s0 + %s10070_s28]]   ;;  %s10074_s28 = smov 49  }
  0x58   :  { %s10342_s25 = sld [smem:[%s14182_s0 + %s10071_s7]]   ;;  %s10075_s7 = smov 50  }
  0x59   :  { %14277 = sst [smem:[#allocation57_spill]] %s10327_s21 }
  0x5a   :  { %s10347_s21 = sld [smem:[%s14182_s0 + %s10072_s15]]   ;;  %s10076_s15 = smov 51  }
  0x5b   :  { %s10357_s6 = sld [smem:[%s14182_s0 + %s10074_s28]]   ;;  %s10078_s28 = smov 53  }
  0x5c   :  { %14278 = sst [smem:[#allocation58_spill]] %s10332_s29 }
  0x5d   :  { %s10352_s29 = sld [smem:[%s14182_s0 + %s10073_s22]]   ;;  %s10077_s22 = smov 52  }
  0x5e   :  { %s10362_s4 = sld [smem:[%s14182_s0 + %s10075_s7]]   ;;  %s10079_s7 = smov 54  }
  0x60   :  { %14279 = sst [smem:[#allocation59_spill]] %s10347_s21 }
  0x61   :  { %14281 = sst [smem:[#allocation61_spill]] %s10357_s6 }
  0x62   :  { %s10367_s21 = sld [smem:[%s14182_s0 + %s10076_s15]]   ;;  %s10080_s15 = smov 55  }
  0x63   :  { %14280 = sst [smem:[#allocation60_spill]] %s10352_s29 }
  0x64   :  { %14282 = sst [smem:[#allocation62_spill]] %s10362_s4 }
  0x65   :  { %s10372_s29 = sld [smem:[%s14182_s0 + %s10077_s22]]   ;;  %s10081_s22 = smov 56  }
  0x66   :  { %s10377_s6 = sld [smem:[%s14182_s0 + %s10078_s28]]   ;;  %s10082_s28 = smov 57  }
  0x67   :  { %s10382_s4 = sld [smem:[%s14182_s0 + %s10079_s7]]   ;;  %s10083_s7 = smov 58  }
  0x68   :  { %14283 = sst [smem:[#allocation63_spill]] %s10367_s21 }
  0x69   :  { %s10387_s21 = sld [smem:[%s14182_s0 + %s10080_s15]]  }
  0x6a   :  { %s10392_s19 = sld [smem:[%s14182_s0 + %s10081_s22]]  }
  0x6b   :  { %s10397_s12 = sld [smem:[%s14182_s0 + %s10082_s28]]  }
  0x6c   :  { %14284 = sst [smem:[#allocation64_spill]] %s10377_s6 }
  0x6d   :  { %14285 = sst [smem:[#allocation65_spill]] %s10382_s4 }
  0x6e   :  { %s10402_s20 = sld [smem:[%s14182_s0 + %s10083_s7]]  }
  0x74   :  { %14286 = sst [smem:[#allocation66_spill]] %s10402_s20 }
  0x75   :  { %122 = vsyncpa [#allocation5], 0 }
  0x76   :  { %123 = vsyncpa [#allocation3], 0 }
  0x77   :  { %124 = vsyncpa [#allocation8], 0 }
  0x78   :  { %125 = vsyncpa [#allocation11], 0 }
  0x79   :  { %126 = vsyncpa [#allocation4], 0 }
  0x7a   :  { %128 = vsyncpa [#allocation4 + $0x1], 0  ;;  %s10404_s15 = smov 0   ;;  %s10406_s16 = smov 0  }
  0x7b   :  { %s10408_s18 = smov 0   ;;  %s10410_s22 = smov 0  }
  0x7c LB: > { %s14287_s8 = sld [smem:[#allocation52_spill]]  ;;  %s10425_s0 = sadd.s32 4294967295, %s10024_s22   ;;  %s10012_s15 = sphi %s10404_s15, %s14381_s15   ;;  %s10024_s22 = sphi %s10410_s22, %s14380_s22   ;;  %s10020_s18 = sphi %s10408_s18, %s14383_s18   ;;  %s10016_s16 = sphi %s10406_s16, %s14382_s16  }
  0x7d   : > { %s14288_s6 = sld [smem:[#allocation64_spill]]  ;;  %s8612_s23 = sadd.s32 4294967294, %s10024_s22  }
  0x7e   : > { %s14289_s5 = sld [smem:[#allocation19_spill]]  ;;  %s10429_s26 = sadd.s32 1, %s10024_s22  }
  0x7f   : > { %s14290_s4 = sld [smem:[#allocation65_spill]]  ;;  %s1364_s28 = sadd.s32 1, %s10020_s18 }
  0x80   : > { %s14291_s3 = sld [smem:[#allocation51_spill]]  ;;  %s1361_s1 = ssub.s32 %s10024_s22, %s10429_s26 }
  0x81   : > { %14292 = sst [smem:[#allocation67_spill]] %s10012_s15  ;;  %p1374_p0 = scmp.ne.s32.totalorder %s10020_s18, %s10016_s16 }
  0x82   : > { %14293 = sst [smem:[#allocation68_spill]] %s10016_s16  ;;  %p1362_p1 = scmp.eq.s32.totalorder %s1361_s1, 0 }
  0x83   : > { %14294 = sst [smem:[#allocation69_spill]] %s10020_s18  ;;  %p1375_p2 = scmp.eq.s32.totalorder %s10425_s0, 1 }
  0x84   : > { %14295 = sst [smem:[#allocation70_spill]] %s10024_s22  ;;  %p1380_p3 = scmp.ne.s32.totalorder %s10016_s16, %s10012_s15 }
  0x85   : > { %14296 = sst [smem:[#allocation71_spill]] %s10429_s26  ;;  %p1381_p4 = scmp.eq.s32.totalorder %s8612_s23, 1 }
  0x86   : > { %s10440_s2 = scalar_select %p1362_p1, %s10020_s18, %s1364_s28  }
  0x87   : > { %p10442_p5 = por %p1375_p2, %p1374_p0  ;;  %p10446_p6 = por %p1381_p4, %p1380_p3 }
  0x88   : > { %14297 = sst [smem:[#allocation72_spill]] %s10440_s2  ;;  %p8613_p7 = scmp.ge.s32.totalorder %s10024_s22, 1 }
  0x89   : > { %s14298_s7 = scalar_select %p10442_p5, 1, 0 }
  0x8a   : > { %s14300_s10 = scalar_select %p10446_p6, 1, 0 }
  0x8b   : > { %14299 = sst [smem:[#allocation73_spill]] %s14298_s7  ;;  %p1388_p8 = scmp.lt.s32.totalorder %s10024_s22, 3 }
  0x8c   : > { %14301 = sst [smem:[#allocation74_spill]] %s14300_s10  ;;  %p8816_p9 = scmp.eq.s32.totalorder %s10425_s0, 0 }
  0x8d   : > { %p10453_p10 = pnand %p8613_p7, %p1388_p8  ;;  %s1551_s23 = sshll.u32 %s10342_s25, 4  ;;  %s1552_s23 = int_to_ptr.hbm [resolvable:$true] %s1551_s23 }
  0x8e   : > { %s10084_s28 = smov [#allocation7]   ;;  %s1590_s2 = sshll.u32 %s14288_s6, 4  ;;  %s10467_s2 = int_to_ptr.hbm [resolvable:$true] %s1590_s2 }
  0x8f   : > { %p8793_p11 = pneg %p10453_p10  ;;  %s1553_s1 = sshll.u32 %s10084_s28, 4  ;;  %s1554_s1 = int_to_ptr.vmem [resolvable:$true] %s1553_s1 }
  0x90   : > { %s1400_s26 = sshll.u32 %s14289_s5, 4  ;;  %s10085_s10 = smov [#allocation10]   ;;  %s1401_s26 = int_to_ptr.vmem [resolvable:$true] %s1400_s26 }
  0x91   : > { %p10463_p12 = pnand %p8816_p9, %p8793_p11  ;;  %s10470_s15 = sshll.u32 %s10085_s10, 4  ;;  %s1593_s15 = int_to_ptr.vmem [resolvable:$true] %s10470_s15 }
  0x92   : > { %s9781_s22 = sshra.s32 %s1552_s23, 4  ;;  %s9788_s20 = scalar_lea.hbm %s10342_s25, 1  ;;  %s9782_s22 = int_to_ptr.hbm [resolvable:$true] %s9781_s22 }
  0x93   : > { %s9783_s7 = scalar_lea.hbm %s9782_s22, 1  ;;  %p10474_p0 = pneg %p10463_p12 }
  0x94   : > { %p9784_p13 = scmp.ne.s32.totalorder %s9782_s22, %s9783_s7  ;;  %p9789_p3 = scmp.lt.s32.totalorder %s9782_s22, %s10342_s25 }
  0x95   : > { %p9790_p4 = scmp.lt.s32.totalorder %s9788_s20, %s9783_s7 }
  0x96   : > { %p9786_p1 = pnand %p10474_p0, %p9784_p13 }
  0x97   : > { %p9791_p7 = por %p9790_p4, %p9789_p3 }
  0x98   : > { %p9787_p2 = pneg %p9786_p1 }
  0x9a   : > { %p9792_p8 = pnand %p9791_p7, %p9787_p2 }
  0x9c   : > { %9795 = shalt.err (!%p9792_p8)
}
  0x9d   : > { %8802 = dma.hbm_to_vmem [thread:$0]  (!%p10463_p12), %s1552_s23, 16, %s1554_s1, [#allocation8]  }
  0x9e   : > { %s9811_s10 = sshra.s32 %s10467_s2, 4  ;;  %s9818_s20 = scalar_lea.hbm %s14288_s6, 1  ;;  %s9812_s10 = int_to_ptr.hbm [resolvable:$true] %s9811_s10 }
  0x9f   : > { %s9813_s16 = scalar_lea.hbm %s9812_s10, 1  ;;  %p9819_p2 = scmp.lt.s32.totalorder %s9812_s10, %s14288_s6 }
  0xa0   : > { %p9814_p11 = scmp.ne.s32.totalorder %s9812_s10, %s9813_s16  ;;  %p9820_p3 = scmp.lt.s32.totalorder %s9818_s20, %s9813_s16 }
  0xa2   : > { %p9816_p13 = pnand %p9814_p11, %p10474_p0  ;;  %p9821_p4 = por %p9820_p3, %p9819_p2 }
  0xa4   : > { %p9817_p1 = pneg %p9816_p13 }
  0xa6   : > { %p9822_p7 = pnand %p9821_p4, %p9817_p1 }
  0xa8   : > { %9825 = shalt.err (!%p9822_p7)
}
  0xa9   : > { %8808 = dma.hbm_to_vmem [thread:$0]  (!%p10463_p12), %s10467_s2, 16, %s1593_s15, [#allocation11]  }
  0xaa   : > { %s1539_s22 = sshll.u32 %s10337_s30, 4  ;;  %s9841_s7 = sshra.s32 %s1401_s26, 4  ;;  %s9842_s7 = int_to_ptr.vmem [resolvable:$true] %s9841_s7  ;;  %s1540_s22 = int_to_ptr.hbm [resolvable:$true] %s1539_s22 }
  0xab   : > { %s9843_s23 = scalar_lea.vmem %s9842_s7, 2  ;;  %s9848_s16 = scalar_lea.vmem %s14289_s5, 2 }
  0xac   : > { %p9844_p8 = scmp.ne.s32.totalorder %s9842_s7, %s9843_s23  ;;  %p9849_p2 = scmp.lt.s32.totalorder %s9842_s7, %s14289_s5 }
  0xad   : > { %p9850_p1 = scmp.lt.s32.totalorder %s9848_s16, %s9843_s23 }
  0xae   : > { %p9846_p11 = pnand %p9844_p8, %p10474_p0 }
  0xaf   : > { %p9851_p3 = por %p9850_p1, %p9849_p2 }
  0xb0   : > { %p9847_p13 = pneg %p9846_p11 }
  0xb2   : > { %p9852_p4 = pnand %p9851_p3, %p9847_p13 }
  0xb4   : > { %9855 = shalt.err (!%p9852_p4)
}
  0xb5   : > { %s10086_s1 = smov [#allocation2]   ;;  %s10087_s15 = smov [#allocation6]  }
  0xb6   : > { %8796 = dma.vmem_to_smem (!%p10463_p12), %s1401_s26, 32, %s10086_s1, [#allocation5]  }
  0xb7   : > { %s1541_s2 = sshll.u32 %s10087_s15, 4  ;;  %s1578_s10 = sshll.u32 %s10372_s29, 4  ;;  %s1542_s2 = int_to_ptr.vmem [resolvable:$true] %s1541_s2  ;;  %s10501_s10 = int_to_ptr.hbm [resolvable:$true] %s1578_s10 }
  0xb8   : > { %s9856_s20 = sshra.s32 %s1540_s22, 4  ;;  %s9863_s23 = scalar_lea.hbm %s10337_s30, 1  ;;  %s9857_s20 = int_to_ptr.hbm [resolvable:$true] %s9856_s20 }
  0xb9   : > { %s9858_s7 = scalar_lea.hbm %s9857_s20, 1  ;;  %p9864_p13 = scmp.lt.s32.totalorder %s9857_s20, %s10337_s30 }
  0xba   : > { %p9859_p7 = scmp.ne.s32.totalorder %s9857_s20, %s9858_s7  ;;  %p9865_p2 = scmp.lt.s32.totalorder %s9863_s23, %s9858_s7 }
  0xbc   : > { %p9861_p8 = pnand %p9859_p7, %p10474_p0  ;;  %p9866_p1 = por %p9865_p2, %p9864_p13 }
  0xbe   : > { %p9862_p11 = pneg %p9861_p8 }
  0xc0   : > { %p9867_p3 = pnand %p9866_p1, %p9862_p11 }
  0xc2   : > { %9870 = shalt.err (!%p9867_p3)
}
  0xc3   : > { %8799 = dma.hbm_to_vmem [thread:$0]  (!%p10463_p12), %s1540_s22, 16, %s1542_s2, [#allocation3]  }
  0xc4   : > { %s1602_s26 = sshll.u32 %s14290_s4, 4  ;;  %s10088_s16 = smov [#allocation9]   ;;  %s10510_s26 = int_to_ptr.hbm [resolvable:$true] %s1602_s26 }
  0xc5   : > { %s1580_s1 = sshll.u32 %s10088_s16, 4  ;;  %s9886_s15 = sshra.s32 %s10501_s10, 4  ;;  %s1581_s1 = int_to_ptr.vmem [resolvable:$true] %s1580_s1  ;;  %s9887_s15 = int_to_ptr.hbm [resolvable:$true] %s9886_s15 }
  0xc6   : > { %s9888_s20 = scalar_lea.hbm %s9887_s15, 1  ;;  %s9893_s7 = scalar_lea.hbm %s10372_s29, 1 }
  0xc7   : > { %p9889_p4 = scmp.ne.s32.totalorder %s9887_s15, %s9888_s20  ;;  %p9894_p11 = scmp.lt.s32.totalorder %s9887_s15, %s10372_s29 }
  0xc8   : > { %p9895_p13 = scmp.lt.s32.totalorder %s9893_s7, %s9888_s20 }
  0xc9   : > { %p9891_p7 = pnand %p9889_p4, %p10474_p0 }
  0xca   : > { %p9896_p2 = por %p9895_p13, %p9894_p11 }
  0xcb   : > { %p9892_p8 = pneg %p9891_p7 }
  0xcd   : > { %p9897_p1 = pnand %p9896_p2, %p9892_p8 }
  0xcf   : > { %9900 = shalt.err (!%p9897_p1)
}
  0xd0   : > { %8805 = dma.hbm_to_vmem [thread:$0]  (!%p10463_p12), %s10501_s10, 16, %s1581_s1, [#allocation8]  }
  0xd1   : > { %s10089_s22 = smov [#allocation12]   ;;  %s9916_s23 = sshra.s32 %s10510_s26, 4  ;;  %s9917_s23 = int_to_ptr.hbm [resolvable:$true] %s9916_s23 }
  0xd2   : > { %s1604_s2 = sshll.u32 %s10089_s22, 4  ;;  %s9918_s16 = scalar_lea.hbm %s9917_s23, 1  ;;  %s1605_s2 = int_to_ptr.vmem [resolvable:$true] %s1604_s2 }
  0xd3   : > { %p9919_p3 = scmp.ne.s32.totalorder %s9917_s23, %s9918_s16  ;;  %s9923_s15 = scalar_lea.hbm %s14290_s4, 1 }
  0xd4   : > { %p9924_p8 = scmp.lt.s32.totalorder %s9917_s23, %s14290_s4  ;;  %p9925_p11 = scmp.lt.s32.totalorder %s9923_s15, %s9918_s16 }
  0xd5   : > { %p9921_p4 = pnand %p9919_p3, %p10474_p0 }
  0xd6   : > { %p9926_p13 = por %p9925_p11, %p9924_p8 }
  0xd7   : > { %p9922_p7 = pneg %p9921_p4 }
  0xd9   : > { %p9927_p2 = pnand %p9926_p13, %p9922_p7 }
  0xdb   : > { %9930 = shalt.err (!%p9927_p2)
}
  0xdc   : > { %8811 = dma.hbm_to_vmem [thread:$0]  (!%p10463_p12), %s10510_s26, 16, %s1605_s2, [#allocation11]  }
  0xdd   : > { %1634 = sbr.rel (%p10453_p10) target bundleno = 6037 (0x1795), region = 252 }
  0xe2   : > { %9991 = dma.done.wait (%p8816_p9), [#allocation5], 32  }
  0xe3   : > { %9993 = vsyncadd (%p8816_p9), [#allocation5], 4294967264 }
  0xe4   : > { %9995 = dma.done.wait (%p8816_p9), [#allocation3], 16  }
  0xe5   : > { %9997 = vsyncadd (%p8816_p9), [#allocation3], 4294967280 }
  0xe6   : > { %9999 = dma.done.wait (%p8816_p9), [#allocation8], 32  }
  0xe7   : > { %10001 = vsyncadd (%p8816_p9), [#allocation8], 4294967264 }
  0xe8   : > { %10003 = dma.done.wait (%p8816_p9), [#allocation11], 32  }
  0xe9   : > { %10005 = vsyncadd (%p8816_p9), [#allocation11], 4294967264 }
  0xea   : > { %1666 = sfence }
  0xeb   : > { %vm1871_vm0 = vcmask 1040384   ;;  %s14305_s9 = sld [smem:[#allocation20_spill]]  ;;  %p1795_p10 = scmp.lt.s32.totalorder %s10425_s0, 1  ;;  %v10090_v0 = vmov 0.0   ;;  %vm2013_vm1 = vcmask 1046528   ;;  %vm2102_vm2 = vcmask 1045504  }
  0xec   : > { %v10547_v1 = vrot.slane %v10090_v0, 7  ;;  %s14212_s10 = smov 4   ;;  %s10092_s26 = smov 12   ;;  %vm2777_vm3 = vcmask 1043456   ;;  %vm2587_vm4 = vcmask 31744   ;;  %vm2604_vm5 = vcmask 64512  }
  0xed   : > { %s1796_s18 = scalar_select %p1795_p10, %s10425_s0, 1  ;;  %vm2621_vm6 = vcmask 97280   ;;  %vm2638_vm7 = vcmask 130048   ;;  %vm2655_vm8 = vcmask 162816   ;;  %vm2672_vm9 = vcmask 195584  }
  0xee   : > { %v10552_v2 = vsel %vm1871_vm0, 0.0, %v10547_v1  ;;  %v10556_v3 = vsel %vm1871_vm0, %v10547_v1, 0.0  ;;  %v2015_v4 = vrot.slane %v10547_v1, 1  ;;  %v2104_v13 = vrot.slane %v10547_v1, 2  ;;  %s10093_s1 = smov 24   ;;  %s10094_s20 = smov 8  }
  0xef   : > { %v2014_v5 = vrot.slane %v10552_v2, 1  ;;  %v2017_v6 = vrot.slane %v10556_v3, 1  ;;  %s8765_s11 = sshll.u32 %s1796_s18, 8  ;;  %v2106_v7 = vrot.slane %v10556_v3, 2  ;;  %v2103_v8 = vrot.slane %v10552_v2, 2  ;;  %s14213_s7 = smov 16  }
  0xf0   : > { %s10096_s22 = smov 20   ;;  %s10097_s2 = smov 28   ;;  %vm2689_vm10 = vcmask 228352   ;;  %vm2706_vm11 = vcmask 261120   ;;  %vm2728_vm12 = vcmask 293888   ;;  %vm3181_vm13 = vcmask 523264  }
  0xf1   : > { %s10563_s28 = scalar_lea.vmem %s14305_s9, %s8765_s11  ;;  %v2016_v9 = vsel %vm2013_vm1, %v2014_v5, %v2015_v4  ;;  %v2018_v10 = vsel %vm2013_vm1, %v2015_v4, %v2017_v6  ;;  %v10577_v18 = vsel %vm2102_vm2, %v2103_v8, %v2106_v7  ;;  %v2105_v23 = vsel %vm2102_vm2, %v2103_v8, %v2104_v13  ;;  %s14215_s23 = smov 32  }
  0xf2   : > { %v1806_v11 = vld [vmem:[%s10563_s28] sm:$0xff]  ;;  %v1807_v12 = vld [vmem:[%s10563_s28 + $0x8] sm:$0xff]  ;;  %v1808_v14 = vld [vmem:[%s10563_s28 + $0x10] sm:$0xff]  ;;  %v8939_v15 = vpack.i.bf16 %v2018_v10, %v2016_v9  ;;  %v2107_v24 = vsel %vm2102_vm2, %v2104_v13, %v2106_v7  ;;  %s14217_s16 = smov 64   ;;  %s14219_s15 = smov 96   ;;  %vm3190_vm14 = vcmask 785408  }
  0xf3   : > { %v1874_v16 = vrot.slane %v1806_v11, 7  ;;  %v1875_v17 = vrot.slane %v1807_v12, 7  ;;  %v1809_v19 = vld [vmem:[%s10563_s28 + $0x18] sm:$0xff]  ;;  %v1877_v20 = vrot.slane %v1808_v14, 7  ;;  %v8944_v30 = vpack.i.bf16 %v2107_v24, %v2105_v23  ;;  %v1810_v49 = vld [vmem:[%s10563_s28 + $0x20] sm:$0xff]  ;;  %v1811_v50 = vld [vmem:[%s10563_s28 + $0x28] sm:$0xff] }
  0xf4   : > { %8940 = vrot.lane.b32.xlu0 %v8939_v15, %s14212_s10  ;;  %v1878_v27 = vrot.slane %v1809_v19, 7  ;;  %v1880_v53 = vrot.slane %v1810_v49, 7  ;;  %v1881_v54 = vrot.slane %v1811_v50, 7  ;;  %v1812_v58 = vld [vmem:[%s10563_s28 + $0x30] sm:$0xff]  ;;  %v1813_v59 = vld [vmem:[%s10563_s28 + $0x38] sm:$0xff]  ;;  %s14306_s18 = sld [smem:[#allocation49_spill]] }
  0xf5   : > { %v1964_v21 = vsel %vm1871_vm0, 0.0, %v1874_v16  ;;  %v1876_v22 = vsel %vm1871_vm0, %v1874_v16, %v1875_v17  ;;  %v10587_v28 = vsel %vm1871_vm0, 0.0, %v1877_v20  ;;  %v1981_v41 = vsel %vm1871_vm0, %v1875_v17, 0.0  ;;  %s14307_s11 = sld [smem:[#allocation43_spill]] }
  0xf6   : > { %2199 = vrot.lane.b32.xlu1 %v1964_v21, %s10092_s26  ;;  %v2255_v25 = vrot.slane %v1964_v21, 1  ;;  %v2256_v26 = vrot.slane %v1876_v22, 1  ;;  %2432 = vrot.lane.b32.xlu2 %v10587_v28, %s10093_s1  ;;  %v2343_v29 = vrot.slane %v1964_v21, 2  ;;  %v10593_v32 = vsel %vm1871_vm0, %v1877_v20, %v1878_v27 }
  0xf7   : > { %v2344_v33 = vrot.slane %v1876_v22, 2  ;;  %v2019_v35 = vrot.slane %v10587_v28, 1  ;;  %v2020_v36 = vrot.slane %v10593_v32, 1  ;;  %v2108_v37 = vrot.slane %v10587_v28, 2 }
  0xf8   : > { %v2257_v31 = vsel %vm2013_vm1, %v2255_v25, %v2256_v26  ;;  %v2109_v38 = vrot.slane %v10593_v32, 2  ;;  %v2258_v42 = vrot.slane %v1981_v41, 1  ;;  %v2346_v43 = vrot.slane %v1981_v41, 2 }
  0xf9   : > { %v2345_v34 = vsel %vm2102_vm2, %v2343_v29, %v2344_v33  ;;  %v2021_v39 = vsel %vm2013_vm1, %v2019_v35, %v2020_v36  ;;  %v1982_v46 = vsel %vm1871_vm0, %v1878_v27, 0.0  ;;  %v1882_v55 = vsel %vm1871_vm0, %v1880_v53, %v1881_v54  ;;  %v1815_v27 = vld [vmem:[%s10563_s28 + $0x48] sm:$0xff]  ;;  %v1816_v35 = vld [vmem:[%s10563_s28 + $0x50] sm:$0xff] }
  0xfa   : > { %v2110_v40 = vsel %vm2102_vm2, %v2108_v37, %v2109_v38  ;;  %v2259_v44 = vsel %vm2013_vm1, %v2256_v26, %v2258_v42  ;;  %v2347_v45 = vsel %vm2102_vm2, %v2344_v33, %v2346_v43  ;;  %v2022_v47 = vrot.slane %v1982_v46, 1  ;;  %v1814_v26 = vld [vmem:[%s10563_s28 + $0x40] sm:$0xff] }
  0xfb   : > { %v2111_v48 = vrot.slane %v1982_v46, 2  ;;  %v1966_v56 = vsel %vm1871_vm0, 0.0, %v1880_v53  ;;  %v2261_v60 = vrot.slane %v1882_v55, 1  ;;  %v1883_v61 = vrot.slane %v1812_v58, 7 }
  0xfc   : > { %8945 = vrot.lane.b32.xlu0 %v8944_v30, %s10094_s20  ;;  %v2023_v51 = vsel %vm2013_vm1, %v2020_v36, %v2022_v47  ;;  %v2260_v57 = vrot.slane %v1966_v56, 1  ;;  %v1884_v62 = vrot.slane %v1813_v59, 7  ;;  %v2348_v0 = vrot.slane %v1966_v56, 2  ;;  %v1817_v36 = vld [vmem:[%s10563_s28 + $0x58] sm:$0xff]  ;;  %v2723_v59 = vld [vmem:[%s14287_s8] sm:$0xff] }
  0xfd   : > { %v2112_v52 = vsel %vm2102_vm2, %v2109_v38, %v2111_v48  ;;  %v2349_v4 = vrot.slane %v1882_v55, 2  ;;  %v10634_v8 = vsel %vm1871_vm0, 0.0, %v1883_v61  ;;  %v1983_v16 = vsel %vm1871_vm0, %v1881_v54, 0.0  ;;  %v2726_v54 = vld [vmem:[%s14287_s8 + $0x18] sm:$0xff] }
  0xfe   : > { %2295 = vrot.lane.b32.xlu1 %v2257_v31, %s14213_s7  ;;  %2383 = vrot.lane.b32.xlu2 %v2345_v34, %s10096_s22  ;;  %v2262_v63 = vsel %vm2013_vm1, %v2260_v57, %v2261_v60  ;;  %v10631_v7 = vsel %vm1871_vm0, %v1883_v61, %v1884_v62  ;;  %v2024_v10 = vrot.slane %v10634_v8, 1  ;;  %v2113_v13 = vrot.slane %v10634_v8, 2  ;;  %v2724_v57 = vld [vmem:[%s14287_s8 + $0x8] sm:$0xff] }
  0xff   : > { %v2025_v9 = vrot.slane %v10631_v7, 1  ;;  %v2350_v11 = vsel %vm2102_vm2, %v2348_v0, %v2349_v4  ;;  %v2114_v14 = vrot.slane %v10631_v7, 2  ;;  %v2263_v17 = vrot.slane %v1983_v16, 1 }
 0x100   : > { %v2351_v19 = vrot.slane %v1983_v16, 2  ;;  %v1984_v21 = vsel %vm1871_vm0, %v1884_v62, 0.0  ;;  %v1886_v30 = vrot.slane %v1814_v26, 7  ;;  %v1887_v31 = vrot.slane %v1815_v27, 7  ;;  %v10739_v26 = vld [vmem:[%s10563_s28 + $0x78] sm:$0xff] }
 0x101   : > { %v2026_v12 = vsel %vm2013_vm1, %v2024_v10, %v2025_v9  ;;  %v2115_v15 = vsel %vm2102_vm2, %v2113_v13, %v2114_v14  ;;  %v2264_v20 = vsel %vm2013_vm1, %v2261_v60, %v2263_v17  ;;  %v2027_v23 = vrot.slane %v1984_v21, 1 }
 0x102   : > { %v2116_v24 = vrot.slane %v1984_v21, 2  ;;  %v1888_v33 = vsel %vm1871_vm0, %v1886_v30, %v1887_v31  ;;  %v1968_v34 = vsel %vm1871_vm0, 0.0, %v1886_v30  ;;  %v1889_v41 = vrot.slane %v1816_v35, 7 }
 0x103   : > { %v2028_v25 = vsel %vm2013_vm1, %v2025_v9, %v2027_v23  ;;  %v2265_v37 = vrot.slane %v1968_v34, 1  ;;  %v2266_v38 = vrot.slane %v1888_v33, 1  ;;  %v1890_v42 = vrot.slane %v1817_v36, 7 }
 0x104   : > { %2486 = vrot.lane.b32.xlu0 %v2021_v39, %s10097_s2  ;;  %v2117_v29 = vsel %vm2102_vm2, %v2114_v14, %v2116_v24  ;;  %v10679_v46 = vsel %vm1871_vm0, 0.0, %v1889_v41  ;;  %v1985_v58 = vsel %vm1871_vm0, %v1887_v31, 0.0  ;;  %v1896_v35 = vrot.slane %v10739_v26, 7 }
 0x105   : > { %v2267_v43 = vsel %vm2013_vm1, %v2265_v37, %v2266_v38  ;;  %v2029_v47 = vrot.slane %v10679_v46, 1  ;;  %v2118_v49 = vrot.slane %v10679_v46, 2  ;;  %v2268_v60 = vrot.slane %v1985_v58, 1 }
 0x106   : > { %2539 = vrot.lane.b32.xlu1 %v2110_v40, %s14215_s23  ;;  %2201 = vrot.lane.b32.xlu2 %v1876_v22, %s10092_s26  ;;  %v2352_v22 = vsel %vm2102_vm2, %v2349_v4, %v2351_v19  ;;  %v1986_v0 = vsel %vm1871_vm0, %v1890_v42, 0.0 }
 0x107   : > { %v2269_v62 = vsel %vm2013_vm1, %v2266_v38, %v2268_v60  ;;  %v2032_v4 = vrot.slane %v1986_v0, 1  ;;  %v2121_v14 = vrot.slane %v1986_v0, 2 }
 0x10c   : > { %2297 = vrot.lane.b32.xlu0 %v2259_v44, %s14213_s7 }
 0x10e   : > { %2385 = vrot.lane.b32.xlu1 %v2347_v45, %s10096_s22  ;;  %2434 = vrot.lane.b32.xlu2 %v10593_v32, %s10093_s1  ;;  %v10676_v45 = vsel %vm1871_vm0, %v1889_v41, %v1890_v42 }
 0x10f   : > { %v2030_v48 = vrot.slane %v10676_v45, 1  ;;  %v2119_v50 = vrot.slane %v10676_v45, 2 }
 0x111   : > { %v10717_v13 = vsel %vm2013_vm1, %v2030_v48, %v2032_v4 }
 0x114   : > { %2488 = vrot.lane.b32.xlu0 %v2023_v51, %s10097_s2 }
 0x116   : > { %2541 = vrot.lane.b32.xlu1 %v2112_v52, %s14215_s23  ;;  %2058 = vrot.lane.b32.xlu2 %v2021_v39, %s14212_s10  ;;  %v2353_v39 = vrot.slane %v1968_v34, 2 }
 0x11c   : > { %2147 = vrot.lane.b32.xlu0 %v2110_v40, %s10094_s20  ;;  %v2354_v40 = vrot.slane %v1888_v33, 2 }
 0x11e   : > { %2203 = vrot.lane.b32.xlu1 %v1966_v56, %s10092_s26  ;;  %2299 = vrot.lane.b32.xlu2 %v2262_v63, %s14213_s7  ;;  %v2355_v44 = vsel %vm2102_vm2, %v2353_v39, %v2354_v40  ;;  %v2725_v56 = vld [vmem:[%s14287_s8 + $0x10] sm:$0xff]  ;;  %v2356_v63 = vrot.slane %v1985_v58, 2 }
 0x120   : > { %v2357_v9 = vsel %vm2102_vm2, %v2354_v40, %v2356_v63 }
 0x124   : > { %2387 = vrot.lane.b32.xlu0 %v2350_v11, %s10096_s22  ;;  %v1818_v11 = vld [vmem:[%s10563_s28 + $0x60] sm:$0xff] }
 0x125   : > { %v1892_v17 = vrot.slane %v1818_v11, 7 }
 0x126   : > { %2436 = vrot.lane.b32.xlu1 %v10634_v8, %s10093_s1  ;;  %2490 = vrot.lane.b32.xlu2 %v2026_v12, %s10097_s2 }
 0x127   : > { %v1970_v23 = vsel %vm1871_vm0, 0.0, %v1892_v17 }
 0x128   : > { %v2358_v37 = vrot.slane %v1970_v23, 2 }
 0x12c   : > { %2543 = vrot.lane.b32.xlu0 %v2115_v15, %s14215_s23 }
 0x12e   : > { %2060 = vrot.lane.b32.xlu1 %v2023_v51, %s14212_s10  ;;  %2149 = vrot.lane.b32.xlu2 %v2112_v52, %s10094_s20  ;;  %v2727_v51 = vld [vmem:[%s14287_s8 + $0x20] sm:$0xf]  ;;  %v2031_v52 = vsel %vm2013_vm1, %v2029_v47, %v2030_v48 }
 0x12f   : > { %8632 = vmatpush.msk.msra.mxu0 %vm2777_vm3, %v2727_v51 }
 0x131   : > { %2793 = vmatpush.msra.mxu0 %v2726_v54 }
 0x133   : > { %2794 = vmatpush.msra.mxu0 %v2725_v56 }
 0x134   : > { %2205 = vrot.lane.b32.xlu0 %v1882_v55, %s10092_s26  ;;  %v2120_v55 = vsel %vm2102_vm2, %v2118_v49, %v2119_v50 }
 0x135   : > { %2795 = vmatpush.msra.mxu0 %v2724_v57 }
 0x136   : > { %2301 = vrot.lane.b32.xlu1 %v2264_v20, %s14213_s7  ;;  %2389 = vrot.lane.b32.xlu2 %v2352_v22, %s10096_s22  ;;  %v10725_v20 = vsel %vm2102_vm2, %v2119_v50, %v2121_v14 }
 0x137   : > { %2796 = vmatpush.msra.mxu0 %v2723_v59 }
 0x13c   : > { %2438 = vrot.lane.b32.xlu0 %v10631_v7, %s10093_s1 }
 0x13e   : > { %2492 = vrot.lane.b32.xlu1 %v2028_v25, %s10097_s2  ;;  %2545 = vrot.lane.b32.xlu2 %v2117_v29, %s14215_s23 }
 0x144   : > { %2062 = vrot.lane.b32.xlu0 %v2026_v12, %s14212_s10  ;;  %v10714_v12 = vld [vmem:[%s10563_s28 + $0x68] sm:$0xff] }
 0x145   : > { %v1893_v19 = vrot.slane %v10714_v12, 7 }
 0x146   : > { %2151 = vrot.lane.b32.xlu1 %v2115_v15, %s10094_s20  ;;  %2207 = vrot.lane.b32.xlu2 %v1968_v34, %s10092_s26 }
 0x147   : > { %v10732_v22 = vsel %vm1871_vm0, %v1892_v17, %v1893_v19 }
 0x148   : > { %v2271_v30 = vrot.slane %v10732_v22, 1  ;;  %v2359_v38 = vrot.slane %v10732_v22, 2 }
 0x14a   : > { %v2360_v49 = vsel %vm2102_vm2, %v2358_v37, %v2359_v38  ;;  %v1823_v37 = vld [vmem:[%s10563_s28 + $0x88] sm:$0xff] }
 0x14c   : > { %2303 = vrot.lane.b32.xlu0 %v2267_v43, %s14213_s7 }
 0x14e   : > { %2391 = vrot.lane.b32.xlu1 %v2355_v44, %s10096_s22  ;;  %2440 = vrot.lane.b32.xlu2 %v10679_v46, %s10093_s1 }
 0x150   : > { %v10692_v53 = vpop.permute.xlu2 %2432 }
 0x154   : > { %2494 = vrot.lane.b32.xlu0 %v2031_v52, %s10097_s2 }
 0x156   : > { %2547 = vrot.lane.b32.xlu1 %v2120_v55, %s14215_s23  ;;  %2064 = vrot.lane.b32.xlu2 %v2028_v25, %s14212_s10  ;;  %v1820_v25 = vld [vmem:[%s10563_s28 + $0x70] sm:$0xff] }
 0x157   : > { %v1895_v34 = vrot.slane %v1820_v25, 7 }
 0x158   : > { %v2384_v61 = vpop.permute.xlu2 %2383 }
 0x159   : > { %v10759_v44 = vsel %vm1871_vm0, %v1895_v34, %v1896_v35  ;;  %v10762_v47 = vsel %vm1871_vm0, 0.0, %v1895_v34 }
 0x15a   : > { %v2035_v54 = vrot.slane %v10759_v44, 1  ;;  %v2124_v60 = vrot.slane %v10759_v44, 2 }
 0x15c   : > { %2153 = vrot.lane.b32.xlu0 %v2117_v29, %s10094_s20  ;;  %v2270_v29 = vrot.slane %v1970_v23, 1 }
 0x15e   : > { %2209 = vrot.lane.b32.xlu1 %v1888_v33, %s10092_s26  ;;  %2305 = vrot.lane.b32.xlu2 %v2269_v62, %s14213_s7  ;;  %v2272_v42 = vsel %vm2013_vm1, %v2270_v29, %v2271_v30 }
 0x160   : > { %v10709_v10 = vpop.permute.xlu2 %2201 }
 0x164   : > { %2393 = vrot.lane.b32.xlu0 %v2357_v9, %s10096_s22 }
 0x166   : > { %2442 = vrot.lane.b32.xlu1 %v10676_v45, %s10093_s1  ;;  %v8941_v15 = vpop.permute.xlu0 %8940  ;;  %2496 = vrot.lane.b32.xlu2 %v10717_v13, %s10097_s2 }
 0x167   : > { %v8942_v24 = vunpack.i.l.bf16 %v8941_v15 }
 0x168   : > { %v2200_v16 = vpop.permute.xlu1 %2199  ;;  %v10727_v21 = vpop.permute.xlu2 %2434 }
 0x169   : > { %v2588_v36 = vsel %vm2587_vm4, %v10552_v2, %v8942_v24 }
 0x16c   : > { %2549 = vrot.lane.b32.xlu0 %v10725_v20, %s14215_s23 }
 0x16e   : > { %2066 = vrot.lane.b32.xlu1 %v2031_v52, %s14212_s10  ;;  %v8946_v27 = vpop.permute.xlu0 %8945  ;;  %2155 = vrot.lane.b32.xlu2 %v2120_v55, %s10094_s20  ;;  %v2034_v52 = vrot.slane %v10762_v47, 1  ;;  %v8943_v55 = vunpack.i.h.bf16 %v8941_v15 }
 0x16f   : > { %v8947_v31 = vunpack.i.l.bf16 %v8946_v27  ;;  %v8948_v58 = vunpack.i.h.bf16 %v8946_v27 }
 0x170   : > { %v2296_v33 = vpop.permute.xlu1 %2295  ;;  %v10749_v40 = vpop.permute.xlu2 %2058  ;;  %v2036_v62 = vsel %vm2013_vm1, %v2034_v52, %v2035_v54  ;;  %v2589_v63 = vsel %vm2587_vm4, %v10547_v1, %v8943_v55  ;;  %v1987_v1 = vsel %vm1871_vm0, %v1893_v19, 0.0  ;;  %v1825_v55 = vld [vmem:[%s10563_s28 + $0x98] sm:$0xff] }
 0x171   : > { %v2605_v39 = vsel %vm2604_vm5, %v2588_v36, %v8947_v31  ;;  %v2606_v0 = vsel %vm2604_vm5, %v2589_v63, %v8948_v58  ;;  %v2361_v25 = vrot.slane %v1987_v1, 2 }
 0x172   : > { %v2622_v41 = vsel %vm2621_vm6, %v2605_v39, %v2200_v16  ;;  %v2623_v11 = vsel %vm2621_vm6, %v2606_v0, %v10709_v10 }
 0x173   : > { %v2639_v43 = vsel %vm2638_vm7, %v2622_v41, %v2296_v33 }
 0x174   : > { %v2656_v48 = vsel %vm2655_vm8, %v2639_v43, %v2384_v61  ;;  %2211 = vrot.lane.b32.xlu0 %v1970_v23, %s10092_s26  ;;  %v2273_v23 = vrot.slane %v1987_v1, 1 }
 0x175   : > { %v2673_v50 = vsel %vm2672_vm9, %v2656_v48, %v10692_v53  ;;  %v2123_v53 = vrot.slane %v10762_v47, 2 }
 0x176   : > { %2307 = vrot.lane.b32.xlu1 %v2272_v42, %s14213_s7  ;;  %v2487_v51 = vpop.permute.xlu0 %2486  ;;  %2395 = vrot.lane.b32.xlu2 %v2360_v49, %s10096_s22  ;;  %v1899_v42 = vrot.slane %v1823_v37, 7 }
 0x177   : > { %v2690_v56 = vsel %vm2689_vm10, %v2673_v50, %v2487_v51  ;;  %v2125_v4 = vsel %vm2102_vm2, %v2123_v53, %v2124_v60 }
 0x178   : > { %v2540_v57 = vpop.permute.xlu1 %2539  ;;  %v2300_v61 = vpop.permute.xlu2 %2299 }
 0x179   : > { %v2707_v59 = vsel %vm2706_vm11, %v2690_v56, %v2540_v57 }
 0x17a   : > { %8633 = vmatmul.msk.f32.vlgmr.msra.gmra.mxu0 %vm2728_vm12, %v2707_v59 }
 0x17c   : > { %2444 = vrot.lane.b32.xlu0 %v10762_v47, %s10093_s1 }
 0x17e   : > { %2498 = vrot.lane.b32.xlu1 %v2036_v62, %s10097_s2  ;;  %v2298_v9 = vpop.permute.xlu0 %2297  ;;  %2551 = vrot.lane.b32.xlu2 %v2125_v4, %s14215_s23 }
 0x17f   : > { %v2640_v15 = vsel %vm2638_vm7, %v2623_v11, %v2298_v9 }
 0x180   : > { %v2386_v14 = vpop.permute.xlu1 %2385  ;;  %v2491_v16 = vpop.permute.xlu2 %2490 }
 0x181   : > { %v2657_v17 = vsel %vm2655_vm8, %v2640_v15, %v2386_v14 }
 0x182   : > { %v2674_v10 = vsel %vm2672_vm9, %v2657_v17, %v10727_v21  ;;  %v1988_v21 = vsel %vm1871_vm0, %v1896_v35, 0.0 }
 0x183   : > { %v2037_v31 = vrot.slane %v1988_v21, 1  ;;  %v2126_v34 = vrot.slane %v1988_v21, 2 }
 0x184   : > { %2068 = vrot.lane.b32.xlu0 %v10717_v13, %s14212_s10  ;;  %v2274_v13 = vsel %vm2013_vm1, %v2271_v30, %v2273_v23  ;;  %v1822_v30 = vld [vmem:[%s10563_s28 + $0x80] sm:$0xff] }
 0x185   : > { %v2038_v35 = vsel %vm2013_vm1, %v2035_v54, %v2037_v31  ;;  %v2127_v39 = vsel %vm2102_vm2, %v2124_v60, %v2126_v34  ;;  %v1898_v41 = vrot.slane %v1822_v30, 7  ;;  %v1824_v54 = vld [vmem:[%s10563_s28 + $0x90] sm:$0xff]  ;;  %v1902_v60 = vrot.slane %v1825_v55, 7 }
 0x186   : > { %2157 = vrot.lane.b32.xlu1 %v10725_v20, %s10094_s20  ;;  %v2489_v24 = vpop.permute.xlu0 %2488  ;;  %2213 = vrot.lane.b32.xlu2 %v10732_v22, %s10092_s26  ;;  %v2362_v20 = vsel %vm2102_vm2, %v2359_v38, %v2361_v25  ;;  %v2590_v22 = vsel %vm2587_vm4, %v10587_v28, %v10749_v40  ;;  %v1901_v59 = vrot.slane %v1824_v54, 7  ;;  %v1989_v31 = vsel %vm1871_vm0, %v1899_v42, 0.0  ;;  %v1827_v54 = vld [vmem:[%s10563_s28 + $0xa8] sm:$0xff] }
 0x187   : > { %v2691_v27 = vsel %vm2689_vm10, %v2674_v10, %v2489_v24  ;;  %v1900_v49 = vsel %vm1871_vm0, %v1898_v41, %v1899_v42  ;;  %v1972_v50 = vsel %vm1871_vm0, 0.0, %v1898_v41  ;;  %v2366_v37 = vrot.slane %v1989_v31, 2 }
 0x188   : > { %v2542_v29 = vpop.permute.xlu1 %2541  ;;  %v2150_v19 = vpop.permute.xlu2 %2149  ;;  %v2275_v52 = vrot.slane %v1972_v50, 1  ;;  %v2276_v56 = vrot.slane %v1900_v49, 1  ;;  %v2364_v63 = vrot.slane %v1900_v49, 2  ;;  %v10841_v14 = vsel %vm1871_vm0, %v1901_v59, %v1902_v60 }
 0x189   : > { %v2708_v12 = vsel %vm2706_vm11, %v2691_v27, %v2542_v29  ;;  %v10844_v15 = vsel %vm1871_vm0, 0.0, %v1901_v59  ;;  %v2129_v25 = vrot.slane %v10841_v14, 2 }
 0x18a   : > { %8634 = vmatmul.msk.f32.gmra.mxu0 %vm2728_vm12, %v2708_v12  ;;  %v2277_v53 = vsel %vm2013_vm1, %v2275_v52, %v2276_v56  ;;  %v2039_v1 = vrot.slane %v10844_v15, 1  ;;  %v2128_v24 = vrot.slane %v10844_v15, 2  ;;  %v2367_v42 = vsel %vm2102_vm2, %v2364_v63, %v2366_v37  ;;  %v1826_v52 = vld [vmem:[%s10563_s28 + $0xa0] sm:$0xff] }
 0x18c   : > { %2309 = vrot.lane.b32.xlu0 %v2274_v13, %s14213_s7 }
 0x18e   : > { %2397 = vrot.lane.b32.xlu1 %v2362_v20, %s10096_s22  ;;  %v2148_v33 = vpop.permute.xlu0 %2147  ;;  %2446 = vrot.lane.b32.xlu2 %v10759_v44, %s10093_s1 }
 0x18f   : > { %v2607_v26 = vsel %vm2604_vm5, %v2590_v22, %v2148_v33 }
 0x190   : > { %v2204_v36 = vpop.permute.xlu1 %2203  ;;  %v2390_v38 = vpop.permute.xlu2 %2389 }
 0x191   : > { %v2624_v43 = vsel %vm2621_vm6, %v2607_v26, %v2204_v36 }
 0x192   : > { %v2641_v40 = vsel %vm2638_vm7, %v2624_v43, %v2300_v61  ;;  %v2363_v61 = vrot.slane %v1972_v50, 2 }
 0x194   : > { %2500 = vrot.lane.b32.xlu0 %v2038_v35, %s10097_s2 }
 0x196   : > { %2553 = vrot.lane.b32.xlu1 %v2127_v39, %s14215_s23  ;;  %v2388_v28 = vpop.permute.xlu0 %2387  ;;  %2070 = vrot.lane.b32.xlu2 %v2036_v62, %s14212_s10 }
 0x197   : > { %v2658_v51 = vsel %vm2655_vm8, %v2641_v40, %v2388_v28 }
 0x198   : > { %v2437_v48 = vpop.permute.xlu1 %2436  ;;  %v2546_v57 = vpop.permute.xlu2 %2545 }
 0x199   : > { %v2675_v58 = vsel %vm2672_vm9, %v2658_v51, %v2437_v48 }
 0x19a   : > { %v2692_v62 = vsel %vm2689_vm10, %v2675_v58, %v2491_v16  ;;  %v2365_v16 = vsel %vm2102_vm2, %v2363_v61, %v2364_v63  ;;  %v1905_v58 = vrot.slane %v1827_v54, 7 }
 0x19c   : > { %2159 = vrot.lane.b32.xlu0 %v2125_v4, %s10094_s20  ;;  %v2040_v4 = vrot.slane %v10841_v14, 1 }
 0x19e   : > { %2215 = vrot.lane.b32.xlu1 %v1972_v50, %s10092_s26  ;;  %v2544_v0 = vpop.permute.xlu0 %2543  ;;  %2311 = vrot.lane.b32.xlu2 %v2277_v53, %s14213_s7  ;;  %v2041_v10 = vsel %vm2013_vm1, %v2039_v1, %v2040_v4 }
 0x19f   : > { %v2709_v11 = vsel %vm2706_vm11, %v2692_v62, %v2544_v0  ;;  %v1828_v0 = vld [vmem:[%s10563_s28 + $0xb0] sm:$0xff] }
 0x1a0   : > { %v2061_v9 = vpop.permute.xlu1 %2060  ;;  %8635 = vmatmul.msk.f32.gmra.mxu0 %vm2728_vm12, %v2709_v11  ;;  %v2208_v17 = vpop.permute.xlu2 %2207 }
 0x1a1   : > { %v2591_v23 = vsel %vm2587_vm4, %v10593_v32, %v2061_v9  ;;  %v2130_v32 = vsel %vm2102_vm2, %v2128_v24, %v2129_v25  ;;  %v1829_v9 = vld [vmem:[%s10563_s28 + $0xb8] sm:$0xff]  ;;  %v1907_v24 = vrot.slane %v1828_v0, 7 }
 0x1a2   : > { %v2608_v29 = vsel %vm2604_vm5, %v2591_v23, %v2150_v19  ;;  %v2278_v19 = vrot.slane %v1989_v31, 1 }
 0x1a4   : > { %2399 = vrot.lane.b32.xlu0 %v2365_v16, %s10096_s22 }
 0x1a6   : > { %2448 = vrot.lane.b32.xlu1 %v10844_v15, %s10093_s1  ;;  %v2206_v27 = vpop.permute.xlu0 %2205  ;;  %2502 = vrot.lane.b32.xlu2 %v2041_v10, %s10097_s2 }
 0x1a7   : > { %v2625_v13 = vsel %vm2621_vm6, %v2608_v29, %v2206_v27 }
 0x1a8   : > { %v2302_v12 = vpop.permute.xlu1 %2301  ;;  %v2441_v20 = vpop.permute.xlu2 %2440 }
 0x1a9   : > { %v2642_v21 = vsel %vm2638_vm7, %v2625_v13, %v2302_v12 }
 0x1aa   : > { %v2659_v33 = vsel %vm2655_vm8, %v2642_v21, %v2390_v38  ;;  %v1990_v38 = vsel %vm1871_vm0, %v1902_v60, 0.0  ;;  %v10916_v21 = vsel %vm1871_vm0, 0.0, %v1907_v24 }
 0x1ab   : > { %v2042_v43 = vrot.slane %v1990_v38, 1  ;;  %v2131_v40 = vrot.slane %v1990_v38, 2  ;;  %v2044_v31 = vrot.slane %v10916_v21, 1 }
 0x1ac   : > { %2555 = vrot.lane.b32.xlu0 %v2130_v32, %s14215_s23 }
 0x1ad   : > { %v2043_v51 = vsel %vm2013_vm1, %v2040_v4, %v2042_v43  ;;  %v2132_v55 = vsel %vm2102_vm2, %v2129_v25, %v2131_v40  ;;  %v1908_v25 = vrot.slane %v1829_v9, 7  ;;  %v1991_v40 = vsel %vm1871_vm0, %v1905_v58, 0.0 }
 0x1ae   : > { %2072 = vrot.lane.b32.xlu1 %v2038_v35, %s14212_s10  ;;  %v2439_v34 = vpop.permute.xlu0 %2438  ;;  %2161 = vrot.lane.b32.xlu2 %v2127_v39, %s10094_s20  ;;  %v2279_v35 = vsel %vm2013_vm1, %v2276_v56, %v2278_v19  ;;  %v2133_v19 = vrot.slane %v10916_v21, 2 }
 0x1af   : > { %v2676_v36 = vsel %vm2672_vm9, %v2659_v33, %v2439_v34 }
 0x1b0   : > { %v2493_v22 = vpop.permute.xlu1 %2492  ;;  %v10872_v41 = vpop.permute.xlu2 %2064 }
 0x1b1   : > { %v2693_v30 = vsel %vm2689_vm10, %v2676_v36, %v2493_v22 }
 0x1b2   : > { %v2710_v26 = vsel %vm2706_vm11, %v2693_v30, %v2546_v57  ;;  %v1904_v57 = vrot.slane %v1826_v52, 7  ;;  %v2593_v30 = vsel %vm2587_vm4, %v10631_v7, %v10872_v41  ;;  %v2283_v41 = vrot.slane %v1991_v40, 1 }
 0x1b3   : > { %8636 = vmatmul.msk.f32.gmra.mxu0 %vm2728_vm12, %v2710_v26 }
 0x1b4   : > { %2217 = vrot.lane.b32.xlu0 %v1900_v49, %s10092_s26  ;;  %v10895_v61 = vsel %vm1871_vm0, %v1904_v57, %v1905_v58  ;;  %v1974_v63 = vsel %vm1871_vm0, 0.0, %v1904_v57  ;;  %v1992_v58 = vsel %vm1871_vm0, %v1908_v25, 0.0 }
 0x1b5   : > { %v2280_v11 = vrot.slane %v1974_v63, 1  ;;  %v2281_v4 = vrot.slane %v10895_v61, 1  ;;  %v2368_v1 = vrot.slane %v1974_v63, 2  ;;  %v2369_v23 = vrot.slane %v10895_v61, 2 }
 0x1b6   : > { %2313 = vrot.lane.b32.xlu1 %v2279_v35, %s14213_s7  ;;  %v2063_v39 = vpop.permute.xlu0 %2062  ;;  %2401 = vrot.lane.b32.xlu2 %v2367_v42, %s10096_s22 }
 0x1b7   : > { %v2592_v48 = vsel %vm2587_vm4, %v10634_v8, %v2063_v39  ;;  %v2282_v12 = vsel %vm2013_vm1, %v2280_v11, %v2281_v4  ;;  %v2284_v54 = vsel %vm2013_vm1, %v2281_v4, %v2283_v41 }
 0x1b8   : > { %v2152_v28 = vpop.permute.xlu1 %2151  ;;  %v2306_v50 = vpop.permute.xlu2 %2305 }
 0x1b9   : > { %v2609_v49 = vsel %vm2604_vm5, %v2592_v48, %v2152_v28 }
 0x1ba   : > { %v2626_v8 = vsel %vm2621_vm6, %v2609_v49, %v2208_v17 }
 0x1bc   : > { %2450 = vrot.lane.b32.xlu0 %v10841_v14, %s10093_s1 }
 0x1be   : > { %2504 = vrot.lane.b32.xlu1 %v2043_v51, %s10097_s2  ;;  %v2304_v56 = vpop.permute.xlu0 %2303  ;;  %2557 = vrot.lane.b32.xlu2 %v2132_v55, %s14215_s23 }
 0x1bf   : > { %v2643_v60 = vsel %vm2638_vm7, %v2626_v8, %v2304_v56 }
 0x1c0   : > { %v2392_v59 = vpop.permute.xlu1 %2391  ;;  %v2497_v53 = vpop.permute.xlu2 %2496 }
 0x1c1   : > { %v2660_v62 = vsel %vm2655_vm8, %v2643_v60, %v2392_v59 }
 0x1c2   : > { %v2677_v16 = vsel %vm2672_vm9, %v2660_v62, %v2441_v20  ;;  %v10913_v20 = vsel %vm1871_vm0, %v1907_v24, %v1908_v25  ;;  %v2136_v62 = vrot.slane %v1992_v58, 2 }
 0x1c3   : > { %v2045_v33 = vrot.slane %v10913_v20, 1  ;;  %v2134_v36 = vrot.slane %v10913_v20, 2 }
 0x1c4   : > { %2074 = vrot.lane.b32.xlu0 %v2041_v10, %s14212_s10 }
 0x1c5   : > { %v2046_v26 = vsel %vm2013_vm1, %v2044_v31, %v2045_v33  ;;  %v2135_v38 = vsel %vm2102_vm2, %v2133_v19, %v2134_v36 }
 0x1c6   : > { %2163 = vrot.lane.b32.xlu1 %v2130_v32, %s10094_s20  ;;  %v2495_v17 = vpop.permute.xlu0 %2494  ;;  %2219 = vrot.lane.b32.xlu2 %v1974_v63, %s10092_s26  ;;  %v2370_v32 = vsel %vm2102_vm2, %v2368_v1, %v2369_v23 }
 0x1c7   : > { %v2694_v27 = vsel %vm2689_vm10, %v2677_v16, %v2495_v17  ;;  %v2137_v16 = vsel %vm2102_vm2, %v2134_v36, %v2136_v62 }
 0x1c8   : > { %v2548_v29 = vpop.permute.xlu1 %2547  ;;  %v2156_v13 = vpop.permute.xlu2 %2155 }
 0x1c9   : > { %v2711_v10 = vsel %vm2706_vm11, %v2694_v27, %v2548_v29  ;;  %v1832_v27 = vld [vmem:[%s10563_s28 + $0xd0] sm:$0xff]  ;;  %v1833_v29 = vld [vmem:[%s10563_s28 + $0xd8] sm:$0xff] }
 0x1ca   : > { %8637 = vmatmul.msk.f32.gmra.mxu0 %vm2728_vm12, %v2711_v10  ;;  %v1914_v19 = vrot.slane %v1833_v29, 7  ;;  %v11032_v29 = vld [vmem:[%s10563_s28 + $0xe8] sm:$0xff] }
 0x1cc   : > { %2315 = vrot.lane.b32.xlu0 %v2282_v12, %s14213_s7 }
 0x1ce   : > { %2403 = vrot.lane.b32.xlu1 %v2370_v32, %s10096_s22  ;;  %v2154_v34 = vpop.permute.xlu0 %2153  ;;  %2452 = vrot.lane.b32.xlu2 %v10916_v21, %s10093_s1 }
 0x1cf   : > { %v2610_v37 = vsel %vm2604_vm5, %v2593_v30, %v2154_v34  ;;  %v1913_v34 = vrot.slane %v1832_v27, 7  ;;  %v11029_v27 = vld [vmem:[%s10563_s28 + $0xe0] sm:$0xff] }
 0x1d0   : > { %v2210_v22 = vpop.permute.xlu1 %2209  ;;  %v2396_v35 = vpop.permute.xlu2 %2395 }
 0x1d1   : > { %v2627_v42 = vsel %vm2621_vm6, %v2610_v37, %v2210_v22 }
 0x1d2   : > { %v2644_v43 = vsel %vm2638_vm7, %v2627_v42, %v2306_v50  ;;  %v2371_v50 = vrot.slane %v1991_v40, 2  ;;  %v10984_v42 = vsel %vm1871_vm0, %v1913_v34, %v1914_v19 }
 0x1d3   : > { %v2050_v40 = vrot.slane %v10984_v42, 1  ;;  %v2139_v41 = vrot.slane %v10984_v42, 2 }
 0x1d4   : > { %2506 = vrot.lane.b32.xlu0 %v2046_v26, %s10097_s2  ;;  %v2372_v8 = vsel %vm2102_vm2, %v2369_v23, %v2371_v50 }
 0x1d6   : > { %2559 = vrot.lane.b32.xlu1 %v2135_v38, %s14215_s23  ;;  %v2394_v39 = vpop.permute.xlu0 %2393  ;;  %2076 = vrot.lane.b32.xlu2 %v2043_v51, %s14212_s10 }
 0x1d7   : > { %v2661_v7 = vsel %vm2655_vm8, %v2644_v43, %v2394_v39  ;;  %v10987_v39 = vsel %vm1871_vm0, 0.0, %v1913_v34 }
 0x1d8   : > { %v2443_v28 = vpop.permute.xlu1 %2442  ;;  %v2552_v48 = vpop.permute.xlu2 %2551 }
 0x1d9   : > { %v2678_v52 = vsel %vm2672_vm9, %v2661_v7, %v2443_v28  ;;  %v2049_v28 = vrot.slane %v10987_v39, 1 }
 0x1da   : > { %v2695_v49 = vsel %vm2689_vm10, %v2678_v52, %v2497_v53  ;;  %v1830_v53 = vld [vmem:[%s10563_s28 + $0xc0] sm:$0xff] }
 0x1db   : > { %v1910_v4 = vrot.slane %v1830_v53, 7  ;;  %v2051_v50 = vsel %vm2013_vm1, %v2049_v28, %v2050_v40 }
 0x1dc   : > { %2165 = vrot.lane.b32.xlu0 %v2132_v55, %s10094_s20  ;;  %v2047_v55 = vrot.slane %v1992_v58, 1 }
 0x1dd   : > { %v1976_v25 = vsel %vm1871_vm0, 0.0, %v1910_v4 }
 0x1de   : > { %2221 = vrot.lane.b32.xlu1 %v10895_v61, %s10092_s26  ;;  %v2550_v56 = vpop.permute.xlu0 %2549  ;;  %2317 = vrot.lane.b32.xlu2 %v2284_v54, %s14213_s7  ;;  %v1831_v61 = vld [vmem:[%s10563_s28 + $0xc8] sm:$0xff]  ;;  %v10956_v63 = vsel %vm2013_vm1, %v2045_v33, %v2047_v55  ;;  %v2373_v22 = vrot.slane %v1976_v25, 2 }
 0x1df   : > { %v2712_v57 = vsel %vm2706_vm11, %v2695_v49, %v2550_v56  ;;  %v1911_v1 = vrot.slane %v1831_v61, 7 }
 0x1e0   : > { %v2067_v51 = vpop.permute.xlu1 %2066  ;;  %8638 = vmatmul.msk.f32.gmra.mxu0 %vm2728_vm12, %v2712_v57  ;;  %v2214_v59 = vpop.permute.xlu2 %2213 }
 0x1e1   : > { %v2594_v60 = vsel %vm2587_vm4, %v10679_v46, %v2067_v51  ;;  %v10967_v24 = vsel %vm1871_vm0, %v1910_v4, %v1911_v1 }
 0x1e2   : > { %v2611_v9 = vsel %vm2604_vm5, %v2594_v60, %v2156_v13  ;;  %v2285_v13 = vrot.slane %v1976_v25, 1  ;;  %v2286_v32 = vrot.slane %v10967_v24, 1  ;;  %v2374_v30 = vrot.slane %v10967_v24, 2 }
 0x1e4   : > { %2405 = vrot.lane.b32.xlu0 %v2372_v8, %s10096_s22  ;;  %v1993_v8 = vsel %vm1871_vm0, %v1911_v1, 0.0 }
 0x1e5   : > { %v2288_v53 = vrot.slane %v1993_v8, 1 }
 0x1e6   : > { %2454 = vrot.lane.b32.xlu1 %v10913_v20, %s10093_s1  ;;  %v2212_v0 = vpop.permute.xlu0 %2211  ;;  %2508 = vrot.lane.b32.xlu2 %v10956_v63, %s10097_s2 }
 0x1e7   : > { %v2628_v46 = vsel %vm2621_vm6, %v2611_v9, %v2212_v0 }
 0x1e8   : > { %v2308_v11 = vpop.permute.xlu1 %2307  ;;  %v2447_v17 = vpop.permute.xlu2 %2446 }
 0x1e9   : > { %v2645_v23 = vsel %vm2638_vm7, %v2628_v46, %v2308_v11  ;;  %v1994_v46 = vsel %vm1871_vm0, %v1914_v19, 0.0 }
 0x1ea   : > { %v2662_v10 = vsel %vm2655_vm8, %v2645_v23, %v2396_v35  ;;  %v2287_v35 = vsel %vm2013_vm1, %v2285_v13, %v2286_v32  ;;  %v2141_v23 = vrot.slane %v1994_v46, 2 }
 0x1ec   : > { %2561 = vrot.lane.b32.xlu0 %v2137_v16, %s14215_s23 }
 0x1ee   : > { %2078 = vrot.lane.b32.xlu1 %v2046_v26, %s14212_s10  ;;  %v2445_v12 = vpop.permute.xlu0 %2444  ;;  %2167 = vrot.lane.b32.xlu2 %v2135_v38, %s10094_s20  ;;  %v2375_v38 = vsel %vm2102_vm2, %v2373_v22, %v2374_v30 }
 0x1ef   : > { %v2679_v31 = vsel %vm2672_vm9, %v2662_v10, %v2445_v12 }
 0x1f0   : > { %v2499_v33 = vpop.permute.xlu1 %2498  ;;  %v2071_v26 = vpop.permute.xlu2 %2070 }
 0x1f1   : > { %v2696_v36 = vsel %vm2689_vm10, %v2679_v31, %v2499_v33  ;;  %v1916_v31 = vrot.slane %v11029_v27, 7  ;;  %v1917_v33 = vrot.slane %v11032_v29, 7 }
 0x1f2   : > { %v2713_v37 = vsel %vm2706_vm11, %v2696_v36, %v2552_v48  ;;  %v2138_v48 = vrot.slane %v10987_v39, 2 }
 0x1f3   : > { %8639 = vmatmul.msk.f32.gmra.mxu0 %vm2728_vm12, %v2713_v37  ;;  %v1918_v22 = vsel %vm1871_vm0, %v1916_v31, %v1917_v33 }
 0x1f4   : > { %2223 = vrot.lane.b32.xlu0 %v1976_v25, %s10092_s26  ;;  %v2140_v56 = vsel %vm2102_vm2, %v2138_v48, %v2139_v41  ;;  %v2596_v25 = vsel %vm2587_vm4, %v10762_v47, %v2071_v26 }
 0x1f6   : > { %2319 = vrot.lane.b32.xlu1 %v2287_v35, %s14213_s7  ;;  %v2069_v43 = vpop.permute.xlu0 %2068  ;;  %2407 = vrot.lane.b32.xlu2 %v2375_v38, %s10096_s22  ;;  %v1836_v35 = vld [vmem:[%s10563_s28 + $0xf0] sm:$0xff]  ;;  %v1837_v38 = vld [vmem:[%s10563_s28 + $0xf8] sm:$0xff] }
 0x1f7   : > { %v2595_v52 = vsel %vm2587_vm4, %v10676_v45, %v2069_v43  ;;  %v2291_v43 = vrot.slane %v1918_v22, 1 }
 0x1f8   : > { %v2158_v7 = vpop.permute.xlu1 %2157  ;;  %v2312_v54 = vpop.permute.xlu2 %2311 }
 0x1f9   : > { %v2612_v49 = vsel %vm2604_vm5, %v2595_v52, %v2158_v7  ;;  %v1919_v7 = vrot.slane %v1836_v35, 7 }
 0x1fa   : > { %v2629_v57 = vsel %vm2621_vm6, %v2612_v49, %v2214_v59  ;;  %v2376_v59 = vrot.slane %v1993_v8, 2 }
 0x1fc   : > { %2456 = vrot.lane.b32.xlu0 %v10987_v39, %s10093_s1  ;;  %v2377_v1 = vsel %vm2102_vm2, %v2374_v30, %v2376_v59  ;;  %v1978_v30 = vsel %vm1871_vm0, 0.0, %v1916_v31 }
 0x1fd   : > { %v2290_v26 = vrot.slane %v1978_v30, 1  ;;  %v2378_v52 = vrot.slane %v1978_v30, 2 }
 0x1fe   : > { %2510 = vrot.lane.b32.xlu1 %v2051_v50, %s10097_s2  ;;  %v2310_v51 = vpop.permute.xlu0 %2309  ;;  %2563 = vrot.lane.b32.xlu2 %v2140_v56, %s14215_s23 }
 0x1ff   : > { %v2646_v45 = vsel %vm2638_vm7, %v2629_v57, %v2310_v51  ;;  %v2292_v48 = vsel %vm2013_vm1, %v2290_v26, %v2291_v43 }
 0x200   : > { %v2398_v58 = vpop.permute.xlu1 %2397  ;;  %v2503_v55 = vpop.permute.xlu2 %2502 }
 0x201   : > { %v2663_v60 = vsel %vm2655_vm8, %v2646_v45, %v2398_v58  ;;  %v1979_v45 = vsel %vm1871_vm0, 0.0, %v1919_v7 }
 0x202   : > { %v2680_v61 = vsel %vm2672_vm9, %v2663_v60, %v2447_v17 }
 0x204   : > { %2080 = vrot.lane.b32.xlu0 %v10956_v63, %s14212_s10  ;;  %v2289_v63 = vsel %vm2013_vm1, %v2286_v32, %v2288_v53  ;;  %v2142_v32 = vsel %vm2102_vm2, %v2139_v41, %v2141_v23  ;;  %v1920_v41 = vrot.slane %v1837_v38, 7 }
 0x206   : > { %2169 = vrot.lane.b32.xlu1 %v2137_v16, %s10094_s20  ;;  %v2501_v62 = vpop.permute.xlu0 %2500  ;;  %2225 = vrot.lane.b32.xlu2 %v10967_v24, %s10092_s26  ;;  %v2052_v16 = vrot.slane %v1994_v46, 1  ;;  %v1921_v58 = vsel %vm1871_vm0, %v1919_v7, %v1920_v41 }
 0x207   : > { %v2697_v0 = vsel %vm2689_vm10, %v2680_v61, %v2501_v62  ;;  %v2482_v8 = vrot.slane %v1921_v58, 1  ;;  %v2534_v62 = vrot.slane %v1979_v45, 2  ;;  %v2535_v59 = vrot.slane %v1921_v58, 2 }
 0x208   : > { %v2554_v9 = vpop.permute.xlu1 %2553  ;;  %v2162_v4 = vpop.permute.xlu2 %2161  ;;  %v2053_v12 = vsel %vm2013_vm1, %v2050_v40, %v2052_v16  ;;  %v1995_v16 = vsel %vm1871_vm0, %v1917_v33, 0.0 }
 0x209   : > { %v2714_v11 = vsel %vm2706_vm11, %v2697_v0, %v2554_v9  ;;  %v2381_v31 = vrot.slane %v1995_v16, 2 }
 0x20a   : > { %8640 = vmatmul.msk.f32.gmra.mxu0 %vm2728_vm12, %v2714_v11 }
 0x20c   : > { %2321 = vrot.lane.b32.xlu0 %v2289_v63, %s14213_s7 }
 0x20e   : > { %2409 = vrot.lane.b32.xlu1 %v2377_v1, %s10096_s22  ;;  %v2160_v17 = vpop.permute.xlu0 %2159  ;;  %2458 = vrot.lane.b32.xlu2 %v10984_v42, %s10093_s1  ;;  %v2536_v1 = vsel %vm2102_vm2, %v2534_v62, %v2535_v59 }
 0x20f   : > { %v2613_v10 = vsel %vm2604_vm5, %v2596_v25, %v2160_v17 }
 0x210   : > { %v2216_v24 = vpop.permute.xlu1 %2215  ;;  %v2402_v13 = vpop.permute.xlu2 %2401 }
 0x211   : > { %v2630_v34 = vsel %vm2621_vm6, %v2613_v10, %v2216_v24 }
 0x212   : > { %v2647_v19 = vsel %vm2638_vm7, %v2630_v34, %v2312_v54  ;;  %v2379_v54 = vrot.slane %v1918_v22, 2 }
 0x214   : > { %2512 = vrot.lane.b32.xlu0 %v2053_v12, %s10097_s2  ;;  %v2380_v60 = vsel %vm2102_vm2, %v2378_v52, %v2379_v54 }
 0x216   : > { %2565 = vrot.lane.b32.xlu1 %v2142_v32, %s14215_s23  ;;  %v2400_v47 = vpop.permute.xlu0 %2399  ;;  %2082 = vrot.lane.b32.xlu2 %v2051_v50, %s14212_s10 }
 0x217   : > { %v2664_v37 = vsel %vm2655_vm8, %v2647_v19, %v2400_v47 }
 0x218   : > { %v2449_v36 = vpop.permute.xlu1 %2448  ;;  %v2558_v28 = vpop.permute.xlu2 %2557 }
 0x219   : > { %v2681_v40 = vsel %vm2672_vm9, %v2664_v37, %v2449_v36 }
 0x21a   : > { %v2698_v50 = vsel %vm2689_vm10, %v2681_v40, %v2503_v55 }
 0x21c   : > { %2171 = vrot.lane.b32.xlu0 %v2140_v56, %s10094_s20  ;;  %v2481_v56 = vrot.slane %v1979_v45, 1 }
 0x21e   : > { %2227 = vrot.lane.b32.xlu1 %v1978_v30, %s10092_s26  ;;  %v2556_v49 = vpop.permute.xlu0 %2555  ;;  %2323 = vrot.lane.b32.xlu2 %v2292_v48, %s14213_s7  ;;  %v2483_v61 = vsel %vm2013_vm1, %v2481_v56, %v2482_v8 }
 0x21f   : > { %v2715_v57 = vsel %vm2706_vm11, %v2698_v50, %v2556_v49 }
 0x220   : > { %v2073_v51 = vpop.permute.xlu1 %2072  ;;  %8641 = vmatmul.msk.f32.gmra.mxu0 %vm2728_vm12, %v2715_v57  ;;  %v2220_v53 = vpop.permute.xlu2 %2219 }
 0x221   : > { %v2597_v55 = vsel %vm2587_vm4, %v10759_v44, %v2073_v51 }
 0x222   : > { %v2614_v9 = vsel %vm2604_vm5, %v2597_v55, %v2162_v4  ;;  %v2293_v4 = vrot.slane %v1995_v16, 1 }
 0x224   : > { %2411 = vrot.lane.b32.xlu0 %v2380_v60, %s10096_s22  ;;  %v2294_v33 = vsel %vm2013_vm1, %v2291_v43, %v2293_v4 }
 0x226   : > { %2460 = vrot.lane.b32.xlu1 %v1979_v45, %s10093_s1  ;;  %v2218_v0 = vpop.permute.xlu0 %2217  ;;  %2514 = vrot.lane.b32.xlu2 %v2483_v61, %s10097_s2 }
 0x227   : > { %v2631_v63 = vsel %vm2621_vm6, %v2614_v9, %v2218_v0 }
 0x228   : > { %v2314_v11 = vpop.permute.xlu1 %2313  ;;  %v2453_v46 = vpop.permute.xlu2 %2452 }
 0x229   : > { %v2648_v44 = vsel %vm2638_vm7, %v2631_v63, %v2314_v11 }
 0x22a   : > { %v2665_v17 = vsel %vm2655_vm8, %v2648_v44, %v2402_v13  ;;  %v2382_v13 = vsel %vm2102_vm2, %v2379_v54, %v2381_v31 }
 0x22c   : > { %2567 = vrot.lane.b32.xlu0 %v2536_v1, %s14215_s23 }
 0x22e   : > { %2084 = vrot.lane.b32.xlu1 %v2053_v12, %s14212_s10  ;;  %v2451_v23 = vpop.permute.xlu0 %2450  ;;  %2173 = vrot.lane.b32.xlu2 %v2142_v32, %s10094_s20  ;;  %v1996_v12 = vsel %vm1871_vm0, %v1920_v41, 0.0  ;;  %s14321_s20 = sld [smem:[#allocation24_spill]] }
 0x22f   : > { %v2682_v24 = vsel %vm2672_vm9, %v2665_v17, %v2451_v23  ;;  %v2484_v32 = vrot.slane %v1996_v12, 1  ;;  %v2537_v30 = vrot.slane %v1996_v12, 2  ;;  %s14325_s10 = sld [smem:[#allocation21_spill]] }
 0x230   : > { %v2505_v25 = vpop.permute.xlu1 %2504  ;;  %v2077_v47 = vpop.permute.xlu2 %2076 }
 0x231   : > { %v2699_v10 = vsel %vm2689_vm10, %v2682_v24, %v2505_v25  ;;  %v2485_v35 = vsel %vm2013_vm1, %v2482_v8, %v2484_v32  ;;  %v2599_v45 = vsel %vm2587_vm4, %v10841_v14, %v2077_v47 }
 0x232   : > { %v2716_v34 = vsel %vm2706_vm11, %v2699_v10, %v2558_v28 }
 0x233   : > { %8642 = vmatmul.msk.f32.gmra.mxu0 %vm2728_vm12, %v2716_v34 }
 0x234   : > { %2229 = vrot.lane.b32.xlu0 %v1918_v22, %s10092_s26  ;;  %v2538_v22 = vsel %vm2102_vm2, %v2535_v59, %v2537_v30  ;;  %s14319_s26 = sld [smem:[#allocation44_spill]] }
 0x236   : > { %2325 = vrot.lane.b32.xlu1 %v2294_v33, %s14213_s7  ;;  %v2075_v19 = vpop.permute.xlu0 %2074  ;;  %2413 = vrot.lane.b32.xlu2 %v2382_v13, %s10096_s22  ;;  %s14322_s22 = sld [smem:[#allocation42_spill]] }
 0x237   : > { %v2598_v37 = vsel %vm2587_vm4, %v10844_v15, %v2075_v19 }
 0x238   : > { %v2164_v36 = vpop.permute.xlu1 %2163  ;;  %v2318_v26 = vpop.permute.xlu2 %2317 }
 0x239   : > { %v2615_v38 = vsel %vm2604_vm5, %v2598_v37, %v2164_v36 }
 0x23a   : > { %v2632_v28 = vsel %vm2621_vm6, %v2615_v38, %v2220_v53 }
 0x23c   : > { %2462 = vrot.lane.b32.xlu0 %v1921_v58, %s10093_s1  ;;  %s14320_s1 = sld [smem:[#allocation41_spill]] }
 0x23e   : > { %2516 = vrot.lane.b32.xlu1 %v2485_v35, %s10097_s2  ;;  %v2316_v43 = vpop.permute.xlu0 %2315  ;;  %2569 = vrot.lane.b32.xlu2 %v2538_v22, %s14215_s23  ;;  %s14323_s2 = sld [smem:[#allocation25_spill]] }
 0x23f   : > { %v2649_v7 = vsel %vm2638_vm7, %v2632_v28, %v2316_v43 }
 0x240   : > { %v2404_v40 = vpop.permute.xlu1 %2403  ;;  %v2509_v15 = vpop.permute.xlu2 %2508 }
 0x241   : > { %v2666_v41 = vsel %vm2655_vm8, %v2649_v7, %v2404_v40 }
 0x242   : > { %v2683_v48 = vsel %vm2672_vm9, %v2666_v41, %v2453_v46 }
 0x246   : > { %v2507_v52 = vpop.permute.xlu0 %2506 }
 0x247   : > { %v2700_v54 = vsel %vm2689_vm10, %v2683_v48, %v2507_v52 }
 0x248   : > { %v2560_v50 = vpop.permute.xlu1 %2559  ;;  %v2168_v51 = vpop.permute.xlu2 %2167 }
 0x249   : > { %v2717_v49 = vsel %vm2706_vm11, %v2700_v54, %v2560_v50 }
 0x24a   : > { %8643 = vmatmul.msk.f32.gmra.mxu0 %vm2728_vm12, %v2717_v49 }
 0x24e   : > { %v2166_v57 = vpop.permute.xlu0 %2165 }
 0x24f   : > { %v2616_v56 = vsel %vm2604_vm5, %v2599_v45, %v2166_v57 }
 0x250   : > { %v2222_v58 = vpop.permute.xlu1 %2221  ;;  %v2408_v60 = vpop.permute.xlu2 %2407 }
 0x251   : > { %v2633_v8 = vsel %vm2621_vm6, %v2616_v56, %v2222_v58 }
 0x252   : > { %v2650_v55 = vsel %vm2638_vm7, %v2633_v8, %v2318_v26 }
 0x256   : > { %v2406_v53 = vpop.permute.xlu0 %2405 }
 0x257   : > { %v2667_v62 = vsel %vm2655_vm8, %v2650_v55, %v2406_v53 }
 0x258   : > { %v2455_v61 = vpop.permute.xlu1 %2454  ;;  %v2564_v11 = vpop.permute.xlu2 %2563 }
 0x259   : > { %v2684_v59 = vsel %vm2672_vm9, %v2667_v62, %v2455_v61 }
 0x25a   : > { %v2701_v0 = vsel %vm2689_vm10, %v2684_v59, %v2509_v15 }
 0x25e   : > { %v2562_v9 = vpop.permute.xlu0 %2561 }
 0x25f   : > { %v2718_v14 = vsel %vm2706_vm11, %v2701_v0, %v2562_v9 }
 0x260   : > { %v2079_v63 = vpop.permute.xlu1 %2078  ;;  %8644 = vmatmul.msk.f32.gmra.mxu0 %vm2728_vm12, %v2718_v14  ;;  %v2226_v23 = vpop.permute.xlu2 %2225 }
 0x261   : > { %v2600_v1 = vsel %vm2587_vm4, %v10916_v21, %v2079_v63 }
 0x262   : > { %v2617_v44 = vsel %vm2604_vm5, %v2600_v1, %v2168_v51 }
 0x266   : > { %v2224_v46 = vpop.permute.xlu0 %2223 }
 0x267   : > { %v2634_v17 = vsel %vm2621_vm6, %v2617_v44, %v2224_v46 }
 0x268   : > { %v2320_v16 = vpop.permute.xlu1 %2319  ;;  %v2459_v21 = vpop.permute.xlu2 %2458 }
 0x269   : > { %v2651_v4 = vsel %vm2638_vm7, %v2634_v17, %v2320_v16  ;;  %v2798_v16 = vpop.f32.mrf.mxu0 }
 0x26a   : > { %v2668_v24 = vsel %vm2655_vm8, %v2651_v4, %v2408_v60 }
 0x26e   : > { %v2457_v25 = vpop.permute.xlu0 %2456 }
 0x26f   : > { %v2685_v10 = vsel %vm2672_vm9, %v2668_v24, %v2457_v25 }
 0x270   : > { %v2511_v31 = vpop.permute.xlu1 %2510  ;;  %v2083_v32 = vpop.permute.xlu2 %2082 }
 0x271   : > { %v2702_v34 = vsel %vm2689_vm10, %v2685_v10, %v2511_v31  ;;  %v2602_v41 = vsel %vm2587_vm4, %v10987_v39, %v2083_v32  ;;  %v2801_v17 = vpop.f32.mrf.mxu0 }
 0x272   : > { %v2719_v47 = vsel %vm2706_vm11, %v2702_v34, %v2564_v11 }
 0x273   : > { %8645 = vmatmul.msk.f32.gmra.mxu0 %vm2728_vm12, %v2719_v47 }
 0x276   : > { %v2081_v33 = vpop.permute.xlu0 %2080 }
 0x277   : > { %v2601_v13 = vsel %vm2587_vm4, %v10913_v20, %v2081_v33 }
 0x278   : > { %v2170_v12 = vpop.permute.xlu1 %2169  ;;  %v2324_v43 = vpop.permute.xlu2 %2323 }
 0x279   : > { %v2618_v19 = vsel %vm2604_vm5, %v2601_v13, %v2170_v12 }
 0x27a   : > { %v2635_v30 = vsel %vm2621_vm6, %v2618_v19, %v2226_v23  ;;  %v2804_v23 = vpop.f32.mrf.mxu0 }
 0x27e   : > { %v2322_v36 = vpop.permute.xlu0 %2321 }
 0x27f   : > { %v2652_v26 = vsel %vm2638_vm7, %v2635_v30, %v2322_v36  ;;  %v11151_v36 = vld [vmem:[%s10287_s27] sm:$0xff]  ;;  %v11155_v30 = vld [vmem:[%s10287_s27 + $0x8] sm:$0xff] }
 0x280   : > { %v2410_v37 = vpop.permute.xlu1 %2409  ;;  %v2515_v48 = vpop.permute.xlu2 %2514 }
 0x281   : > { %v2669_v35 = vsel %vm2655_vm8, %v2652_v26, %v2410_v37  ;;  %v11159_v37 = vld [vmem:[%s10287_s27 + $0x10] sm:$0xff]  ;;  %v11163_v26 = vld [vmem:[%s10287_s27 + $0x18] sm:$0xff] }
 0x282   : > { %v2686_v38 = vsel %vm2672_vm9, %v2669_v35, %v2459_v21  ;;  %v2807_v4 = vpop.f32.mrf.mxu0  ;;  %v11167_v35 = vld [vmem:[%s10287_s27 + $0x20] sm:$0xff] }
 0x286   : > { %v2513_v22 = vpop.permute.xlu0 %2512 }
 0x287   : > { %v2703_v28 = vsel %vm2689_vm10, %v2686_v38, %v2513_v22  ;;  %v11171_v38 = vld [vmem:[%s10287_s27 + $0x28] sm:$0xff]  ;;  %v11175_v22 = vld [vmem:[%s10287_s27 + $0x30] sm:$0xff] }
 0x288   : > { %v2566_v40 = vpop.permute.xlu1 %2565  ;;  %v2174_v58 = vpop.permute.xlu2 %2173 }
 0x289   : > { %v2720_v20 = vsel %vm2706_vm11, %v2703_v28, %v2566_v40  ;;  %v3258_v28 = vld [vmem:[%s10297_s17 + $0x118] sm:$0xff]  ;;  %v3257_v40 = vld [vmem:[%s10297_s17 + $0x110] sm:$0xff] }
 0x28a   : > { %8646 = vmatmul.msk.f32.gmra.mxu0 %vm2728_vm12, %v2720_v20  ;;  %v2810_v24 = vpop.f32.mrf.mxu0  ;;  %v3256_v20 = vld [vmem:[%s10297_s17 + $0x108] sm:$0xff] }
 0x28e   : > { %v2172_v7 = vpop.permute.xlu0 %2171 }
 0x28f   : > { %v2619_v52 = vsel %vm2604_vm5, %v2602_v41, %v2172_v7  ;;  %v3255_v7 = vld [vmem:[%s10297_s17 + $0x100] sm:$0xff] }
 0x290   : > { %v2228_v15 = vpop.permute.xlu1 %2227  ;;  %v2414_v55 = vpop.permute.xlu2 %2413 }
 0x291   : > { %v2636_v54 = vsel %vm2621_vm6, %v2619_v52, %v2228_v15  ;;  %v11187_v15 = vld [vmem:[%s10262_s14] ss:$0 sm:$0xff] }
 0x292   : > { %v2653_v49 = vsel %vm2638_vm7, %v2636_v54, %v2324_v43  ;;  %v2813_v25 = vpop.f32.mrf.mxu0  ;;  %v11179_v43 = vld [vmem:[%s10287_s27 + $0x38] sm:$0xff] }
 0x296   : > { %v2412_v50 = vpop.permute.xlu0 %2411 }
 0x297   : > { %v2670_v57 = vsel %vm2655_vm8, %v2653_v49, %v2412_v50 }
 0x298   : > { %v2461_v51 = vpop.permute.xlu1 %2460  ;;  %v2570_v14 = vpop.permute.xlu2 %2569 }
 0x299   : > { %v2687_v45 = vsel %vm2672_vm9, %v2670_v57, %v2461_v51 }
 0x29a   : > { %v2704_v56 = vsel %vm2689_vm10, %v2687_v45, %v2515_v48  ;;  %v2816_v10 = vpop.f32.mrf.mxu0 }
 0x29e   : > { %v2568_v8 = vpop.permute.xlu0 %2567 }
 0x29f   : > { %v2721_v39 = vsel %vm2706_vm11, %v2704_v56, %v2568_v8 }
 0x2a0   : > { %v2085_v60 = vpop.permute.xlu1 %2084  ;;  %8647 = vmatmul.msk.f32.gmra.mxu0 %vm2728_vm12, %v2721_v39 }
 0x2a1   : > { %v2603_v53 = vsel %vm2587_vm4, %v10984_v42, %v2085_v60 }
 0x2a2   : > { %v2620_v62 = vsel %vm2604_vm5, %v2603_v53, %v2174_v58  ;;  %v2819_v31 = vpop.f32.mrf.mxu0 }
 0x2a6   : > { %v2230_v61 = vpop.permute.xlu0 %2229 }
 0x2a7   : > { %v2637_v0 = vsel %vm2621_vm6, %v2620_v62, %v2230_v61 }
 0x2a8   : > { %v2326_v59 = vpop.permute.xlu1 %2325 }
 0x2a9   : > { %v2654_v9 = vsel %vm2638_vm7, %v2637_v0, %v2326_v59 }
 0x2aa   : > { %v2671_v11 = vsel %vm2655_vm8, %v2654_v9, %v2414_v55  ;;  %v2822_v34 = vpop.f32.mrf.mxu0 }
 0x2ae   : > { %v2463_v63 = vpop.permute.xlu0 %2462 }
 0x2af   : > { %v2688_v1 = vsel %vm2672_vm9, %v2671_v11, %v2463_v63 }
 0x2b0   : > { %v2517_v46 = vpop.permute.xlu1 %2516 }
 0x2b1   : > { %v2705_v44 = vsel %vm2689_vm10, %v2688_v1, %v2517_v46 }
 0x2b2   : > { %v2722_v42 = vsel %vm2706_vm11, %v2705_v44, %v2570_v14  ;;  %v2825_v47 = vpop.f32.mrf.mxu0 }
 0x2b3   : > { %8648 = vmatmul.msk.f32.gmra.mxu0 %vm2728_vm12, %v2722_v42 }
 0x2c7   : > { %v2828_v21 = vpop.f32.mrf.mxu0 }
 0x2dd   : > { %v2831_v33 = vpop.f32.mrf.mxu0 }
 0x2f0   : > { %v2834_v12 = vpop.f32.mrf.mxu0 }
 0x307   : > { %v2837_v13 = vpop.f32.mrf.mxu0 }
 0x31d   : > { %v2840_v19 = vpop.f32.mrf.mxu0 }
 0x330   : > { %v2843_v32 = vpop.f32.mrf.mxu0 }
 0x331   : > { %2858 = vmatpush.msra.mxu1 %v2843_v32 }
 0x333   : > { %2859 = vmatpush.msra.mxu1 %v2840_v19 }
 0x335   : > { %2860 = vmatpush.msra.mxu1 %v2837_v13 }
 0x337   : > { %2861 = vmatpush.msra.mxu1 %v2834_v12 }
 0x339   : > { %2862 = vmatpush.msra.mxu1 %v2831_v33 }
 0x33b   : > { %2863 = vmatpush.msra.mxu1 %v2828_v21 }
 0x33d   : > { %2864 = vmatpush.msra.mxu1 %v2825_v47 }
 0x33f   : > { %2865 = vmatpush.msra.mxu1 %v2822_v34 }
 0x341   : > { %2866 = vmatpush.msra.mxu1 %v2819_v31 }
 0x343   : > { %2867 = vmatpush.msra.mxu1 %v2816_v10 }
 0x345   : > { %2868 = vmatpush.msra.mxu1 %v2813_v25 }
 0x347   : > { %2869 = vmatpush.msra.mxu1 %v2810_v24 }
 0x349   : > { %2870 = vmatpush.msra.mxu1 %v2807_v4 }
 0x34b   : > { %2871 = vmatpush.msra.mxu1 %v2804_v23 }
 0x34d   : > { %2872 = vmatpush.msra.mxu1 %v2801_v17 }
 0x34f   : > { %2873 = vmatpush.msra.mxu1 %v2798_v16 }
 0x350   : > { %2874 = vmatmul.f32.vlgmr.msra.gmra.mxu1 %v11151_v36 }
 0x351   : > { %3373 = vmatpush.msrb.mxu1 %v3258_v28 }
 0x353   : > { %3374 = vmatpush.msrb.mxu1 %v3257_v40 }
 0x355   : > { %3375 = vmatpush.msrb.mxu1 %v3256_v20 }
 0x357   : > { %3376 = vmatpush.msrb.mxu1 %v3255_v7 }
 0x358   : > { %2877 = vmatmul.f32.gmra.mxu1 %v11155_v30 }
 0x360   : > { %2880 = vmatmul.f32.gmra.mxu1 %v11159_v37 }
 0x368   : > { %2883 = vmatmul.f32.gmra.mxu1 %v11163_v26 }
 0x370   : > { %2886 = vmatmul.f32.gmra.mxu1 %v11167_v35 }
 0x378   : > { %2889 = vmatmul.f32.gmra.mxu1 %v11171_v38 }
 0x380   : > { %2892 = vmatmul.f32.gmra.mxu1 %v11175_v22 }
 0x388   : > { %2895 = vmatmul.f32.gmra.mxu1 %v11179_v43 }
 0x3cd   : > { %v2875_v41 = vpop.f32.mrf.mxu1 }
 0x3ce   : > { %v2876_v48 = vadd.f32 %v11187_v15, %v2875_v41 }
 0x3d0   : > { %v2899_v52 = vmul.f32 0.01, %v2876_v48 }
 0x3d2   : > { %v2907_v54 = vmax.f32 %v2876_v48, %v2899_v52 }
 0x3d4   : > { %v2923_v49 = vrot.slane %v2907_v54, 7 }
 0x3d5   : > { %v2878_v50 = vpop.f32.mrf.mxu1 }
 0x3d6   : > { %v2879_v51 = vadd.f32 %v11187_v15, %v2878_v50  ;;  %v11192_v58 = vsel %vm1871_vm0, 0.0, %v2923_v49  ;;  %v11195_v45 = vsel %vm1871_vm0, %v2923_v49, 0.0 }
 0x3d7   : > { %v3017_v60 = vrot.slane %v11195_v45, 2  ;;  %v3016_v53 = vrot.slane %v11192_v58, 2 }
 0x3d8   : > { %v2900_v57 = vmul.f32 0.01, %v2879_v51 }
 0x3d9   : > { %v11209_v63 = vsel %vm2102_vm2, %v3016_v53, %v3017_v60 }
 0x3da   : > { %v2908_v56 = vmax.f32 %v2879_v51, %v2900_v57 }
 0x3dc   : > { %v2924_v8 = vrot.slane %v2908_v56, 7 }
 0x3dd   : > { %v2881_v39 = vpop.f32.mrf.mxu1 }
 0x3de   : > { %v11200_v55 = vsel %vm1871_vm0, 0.0, %v2924_v8  ;;  %v2948_v61 = vsel %vm1871_vm0, %v2924_v8, 0.0  ;;  %v2882_v62 = vadd.f32 %v11187_v15, %v2881_v39 }
 0x3df   : > { %v3020_v59 = vrot.slane %v2948_v61, 2  ;;  %v3019_v0 = vrot.slane %v11200_v55, 2  ;;  %v2974_v44 = vrot.slane %v2948_v61, 1  ;;  %v2973_v4 = vrot.slane %v11200_v55, 1 }
 0x3e0   : > { %v2901_v9 = vmul.f32 0.01, %v2882_v62 }
 0x3e1   : > { %v11206_v11 = vsel %vm2102_vm2, %v3019_v0, %v3020_v59  ;;  %v11233_v12 = vsel %vm2013_vm1, %v2973_v4, %v2974_v44 }
 0x3e2   : > { %v2909_v14 = vmax.f32 %v2882_v62, %v2901_v9  ;;  %8649 = vmatmul.msk.f32.vlgmr.msrb.gmra.mxu1 %vm2706_vm11, %v11206_v11  ;;  %v8949_v1 = vpack.i.bf16 %v11206_v11, %v11209_v63 }
 0x3e4   : > { %v2925_v46 = vrot.slane %v2909_v14, 7  ;;  %8950 = vrot.lane.b32.xlu0 %v8949_v1, %s14215_s23 }
 0x3e5   : > { %v2884_v42 = vpop.f32.mrf.mxu1 }
 0x3e6   : > { %v11217_v16 = vsel %vm1871_vm0, 0.0, %v2925_v46  ;;  %v2949_v17 = vsel %vm1871_vm0, %v2925_v46, 0.0  ;;  %v2885_v23 = vadd.f32 %v11187_v15, %v2884_v42  ;;  %v11274_v46 = vsel %vm2013_vm1, %v2014_v5, %v2017_v6 }
 0x3e7   : > { %v2977_v24 = vrot.slane %v2949_v17, 1  ;;  %v8954_v25 = vpack.i.bf16 %v11217_v16, %v11200_v55  ;;  %v3022_v10 = vrot.slane %v11217_v16, 2  ;;  %v3023_v31 = vrot.slane %v2949_v17, 2 }
 0x3e8   : > { %v2902_v34 = vmul.f32 0.01, %v2885_v23  ;;  %v2976_v47 = vrot.slane %v11217_v16, 1  ;;  %v2971_v5 = vrot.slane %v11195_v45, 1 }
 0x3e9   : > { %8955 = vrot.lane.b32.xlu1 %v8954_v25, %s14217_s16  ;;  %v11228_v21 = vsel %vm2102_vm2, %v3022_v10, %v3023_v31  ;;  %v2970_v31 = vrot.slane %v11192_v58, 1 }
 0x3ea   : > { %v2910_v33 = vmax.f32 %v2885_v23, %v2902_v34  ;;  %8650 = vmatmul.msk.f32.gmra.mxu1 %vm2706_vm11, %v11228_v21  ;;  %v11236_v13 = vsel %vm2013_vm1, %v2976_v47, %v2977_v24 }
 0x3eb   : > { %v8959_v19 = vpack.i.bf16 %v11236_v13, %v11233_v12 }
 0x3ec   : > { %v2926_v32 = vrot.slane %v2910_v33, 7 }
 0x3ed   : > { %8960 = vrot.lane.b32.xlu2 %v8959_v19, %s14219_s15  ;;  %v2887_v28 = vpop.f32.mrf.mxu1 }
 0x3ee   : > { %v11242_v40 = vsel %vm1871_vm0, 0.0, %v2926_v32  ;;  %v2950_v20 = vsel %vm1871_vm0, %v2926_v32, 0.0  ;;  %v2888_v7 = vadd.f32 %v11187_v15, %v2887_v28 }
 0x3ef   : > { %v3025_v41 = vrot.slane %v11242_v40, 2  ;;  %v3026_v48 = vrot.slane %v2950_v20, 2  ;;  %v2980_v57 = vrot.slane %v2950_v20, 1  ;;  %v2979_v53 = vrot.slane %v11242_v40, 1 }
 0x3f0   : > { %v2903_v52 = vmul.f32 0.01, %v2888_v7 }
 0x3f1   : > { %v11248_v54 = vsel %vm2102_vm2, %v3025_v41, %v3026_v48  ;;  %v11279_v42 = vsel %vm2013_vm1, %v2979_v53, %v2980_v57  ;;  %v11311_v41 = vsel %vm2013_vm1, %v2970_v31, %v2971_v5 }
 0x3f2   : > { %v2911_v50 = vmax.f32 %v2888_v7, %v2903_v52  ;;  %8651 = vmatmul.msk.f32.gmra.mxu1 %vm2706_vm11, %v11248_v54  ;;  %v8964_v49 = vpack.i.bf16 %v11248_v54, %v11228_v21 }
 0x3f4   : > { %v2927_v51 = vrot.slane %v2911_v50, 7  ;;  %8965 = vrot.lane.b32.xlu0 %v8964_v49, %s14215_s23 }
 0x3f5   : > { %v2890_v56 = vpop.f32.mrf.mxu1 }
 0x3f6   : > { %v11256_v8 = vsel %vm1871_vm0, 0.0, %v2927_v51  ;;  %v2951_v60 = vsel %vm1871_vm0, %v2927_v51, 0.0  ;;  %v2891_v39 = vadd.f32 %v11187_v15, %v2890_v56 }
 0x3f7   : > { %v2983_v61 = vrot.slane %v2951_v60, 1  ;;  %v8969_v62 = vpack.i.bf16 %v11256_v8, %v11242_v40  ;;  %v3028_v59 = vrot.slane %v11256_v8, 2  ;;  %v3029_v0 = vrot.slane %v2951_v60, 2 }
 0x3f8   : > { %v2904_v9 = vmul.f32 0.01, %v2891_v39  ;;  %v2982_v14 = vrot.slane %v11256_v8, 1 }
 0x3f9   : > { %8970 = vrot.lane.b32.xlu1 %v8969_v62, %s14217_s16  ;;  %v11267_v1 = vsel %vm2102_vm2, %v3028_v59, %v3029_v0 }
 0x3fa   : > { %v2912_v44 = vmax.f32 %v2891_v39, %v2904_v9  ;;  %8652 = vmatmul.msk.f32.gmra.mxu1 %vm2706_vm11, %v11267_v1  ;;  %v11282_v17 = vsel %vm2013_vm1, %v2982_v14, %v2983_v61  ;;  %v8979_v23 = vpack.i.bf16 %v11267_v1, %v11274_v46 }
 0x3fb   : > { %v11288_v3 = vpack.i.bf16 %v11282_v17, %v11279_v42 }
 0x3fc   : > { %v2928_v4 = vrot.slane %v2912_v44, 7  ;;  %8980 = vrot.lane.b32.xlu0 %v8979_v23, %s14215_s23 }
 0x3fd   : > { %8975 = vrot.lane.b32.xlu2 %v11288_v3, %s14219_s15  ;;  %v2893_v6 = vpop.f32.mrf.mxu1 }
 0x3fe   : > { %v11295_v24 = vsel %vm1871_vm0, 0.0, %v2928_v4  ;;  %v2952_v25 = vsel %vm1871_vm0, %v2928_v4, 0.0  ;;  %v2894_v10 = vadd.f32 %v11187_v15, %v2893_v6 }
 0x3ff   : > { %v2986_v34 = vrot.slane %v2952_v25, 1  ;;  %v3032_v47 = vrot.slane %v2952_v25, 2  ;;  %v8984_v33 = vpack.i.bf16 %v11295_v24, %v10577_v18  ;;  %v2985_v45 = vrot.slane %v11295_v24, 1 }
 0x400   : > { %v2905_v19 = vmul.f32 0.01, %v2894_v10  ;;  %v3031_v32 = vrot.slane %v11295_v24, 2 }
 0x401   : > { %8985 = vrot.lane.b32.xlu1 %v8984_v33, %s14217_s16  ;;  %v11306_v28 = vsel %vm2013_vm1, %v2985_v45, %v2986_v34 }
 0x402   : > { %v2913_v20 = vmax.f32 %v2894_v10, %v2905_v19  ;;  %v8989_v7 = vpack.i.bf16 %v11306_v28, %v11192_v58  ;;  %v11314_v48 = vsel %vm2102_vm2, %v3031_v32, %v3032_v47  ;;  %v3254_v19 = vld [vmem:[%s10297_s17 + $0xf8] sm:$0xff]  ;;  %v3253_v32 = vld [vmem:[%s10297_s17 + $0xf0] sm:$0xff] }
 0x403   : > { %v8994_v52 = vpack.i.bf16 %v11314_v48, %v11311_v41  ;;  %8653 = vmatmul.msk.f32.gmra.mxu1 %vm2706_vm11, %v11314_v48  ;;  %3320 = vmatpush.msra.mxu3 %v3254_v19  ;;  %v3224_v19 = vld [vmem:[%s10297_s17 + $0x8] sm:$0xff] }
 0x404   : > { %v2929_v50 = vrot.slane %v2913_v20, 7  ;;  %v9029_v20 = vpack.i.bf16 %v11274_v46, %v11242_v40  ;;  %v3250_v46 = vld [vmem:[%s10297_s17 + $0xd8] sm:$0xff] }
 0x405   : > { %8990 = vrot.lane.b32.xlu2 %v8989_v7, %s14219_s15  ;;  %8995 = vrot.lane.b32.xlu0 %v8994_v52, %s14215_s23  ;;  %v2896_v49 = vpop.f32.mrf.mxu1  ;;  %v3252_v7 = vld [vmem:[%s10297_s17 + $0xe8] sm:$0xff] }
 0x406   : > { %v11323_v51 = vsel %vm1871_vm0, 0.0, %v2929_v50  ;;  %v2953_v57 = vsel %vm1871_vm0, %v2929_v50, 0.0  ;;  %v2897_v56 = vadd.f32 %v11187_v15, %v2896_v49  ;;  %3321 = vmatpush.msra.mxu3 %v3253_v32  ;;  %v3248_v52 = vld [vmem:[%s10297_s17 + $0xc8] sm:$0xff]  ;;  %v3245_v50 = vld [vmem:[%s10297_s17 + $0xb0] sm:$0xff] }
 0x407   : > { %v2989_v60 = vrot.slane %v2953_v57, 1  ;;  %v3035_v39 = vrot.slane %v2953_v57, 2  ;;  %v8999_v53 = vpack.i.bf16 %v11323_v51, %v11209_v63  ;;  %v2988_v61 = vrot.slane %v11323_v51, 1  ;;  %v3244_v49 = vld [vmem:[%s10297_s17 + $0xa8] sm:$0xff]  ;;  %v3238_v57 = vld [vmem:[%s10297_s17 + $0x78] sm:$0xff] }
 0x408   : > { %v2906_v62 = vmul.f32 0.01, %v2897_v56  ;;  %v3034_v59 = vrot.slane %v11323_v51, 2  ;;  %3322 = vmatpush.msra.mxu3 %v3252_v7  ;;  %3279 = vmatpush.msra.mxu2 %v3238_v57  ;;  %v9775_v32 = vld [vmem:[%s10563_s28 + $0x48] sm:$0xff]  ;;  %v3223_v7 = vld [vmem:[%s10297_s17] sm:$0xff] }
 0x409   : > { %9000 = vrot.lane.b32.xlu1 %v8999_v53, %s14217_s16  ;;  %v11333_v0 = vsel %vm2013_vm1, %v2988_v61, %v2989_v60  ;;  %v3237_v60 = vld [vmem:[%s10297_s17 + $0x70] sm:$0xff]  ;;  %v3236_v53 = vld [vmem:[%s10297_s17 + $0x68] sm:$0xff] }
 0x40a   : > { %v2914_v9 = vmax.f32 %v2897_v56, %v2906_v62  ;;  %v9004_v14 = vpack.i.bf16 %v11333_v0, %v11200_v55  ;;  %v3036_v15 = vsel %vm2102_vm2, %v3034_v59, %v3035_v39  ;;  %v3242_v56 = vld [vmem:[%s10297_s17 + $0x98] sm:$0xff]  ;;  %v3241_v39 = vld [vmem:[%s10297_s17 + $0x90] sm:$0xff]  ;;  %3280 = vmatpush.msra.mxu2 %v3237_v60  ;;  %v3240_v61 = vld [vmem:[%s10297_s17 + $0x88] sm:$0xff] }
 0x40b   : > { %v9009_v44 = vpack.i.bf16 %v3036_v15, %v11233_v12  ;;  %8654 = vmatmul.msk.f32.gmra.mxu1 %vm2706_vm11, %v3036_v15  ;;  %v3235_v62 = vld [vmem:[%s10297_s17 + $0x60] sm:$0xff]  ;;  %v9779_v57 = vld [vmem:[%s10563_s28 + $0x8] sm:$0xff] }
 0x40c   : > { %v2930_v63 = vrot.slane %v2914_v9, 7  ;;  %3281 = vmatpush.msra.mxu2 %v3236_v53  ;;  %v3239_v59 = vld [vmem:[%s10297_s17 + $0x80] sm:$0xff]  ;;  %v3234_v9 = vld [vmem:[%s10297_s17 + $0x58] sm:$0xff] }
 0x40d   : > { %9005 = vrot.lane.b32.xlu2 %v9004_v14, %s14219_s15  ;;  %9010 = vrot.lane.b32.xlu0 %v9009_v44, %s14215_s23  ;;  %v3233_v14 = vld [vmem:[%s10297_s17 + $0x50] sm:$0xff]  ;;  %v9767_v44 = vld [vmem:[%s10563_s28 + $0xc8] sm:$0xff] }
 0x40e   : > { %v2946_v23 = vsel %vm1871_vm0, 0.0, %v2930_v63  ;;  %v2954_v4 = vsel %vm1871_vm0, %v2930_v63, 0.0  ;;  %3282 = vmatpush.msra.mxu2 %v3235_v62  ;;  %v3231_v63 = vld [vmem:[%s10297_s17 + $0x40] sm:$0xff] }
 0x40f   : > { %v3088_v5 = vrot.slane %v2954_v4, 1  ;;  %v3099_v6 = vrot.slane %v2954_v4, 2  ;;  %v9014_v25 = vpack.i.bf16 %v2946_v23, %v11206_v11  ;;  %v3087_v10 = vrot.slane %v2946_v23, 1  ;;  %v3230_v4 = vld [vmem:[%s10297_s17 + $0x38] sm:$0xff]  ;;  %v9780_v53 = vld [vmem:[%s10563_s28] sm:$0xff] }
 0x410   : > { %v3098_v31 = vrot.slane %v2946_v23, 2  ;;  %v9019_v11 = vpack.i.bf16 %v10552_v2, %v11228_v21  ;;  %v3251_v21 = vld [vmem:[%s10297_s17 + $0xe0] sm:$0xff]  ;;  %3283 = vmatpush.msra.mxu2 %v3234_v9 }
 0x411   : > { %9015 = vrot.lane.b32.xlu1 %v9014_v25, %s14217_s16  ;;  %v11347_v34 = vsel %vm2013_vm1, %v3087_v10, %v3088_v5  ;;  %3323 = vmatpush.msra.mxu3 %v3251_v21  ;;  %v9769_v5 = vld [vmem:[%s10563_s28 + $0xa8] sm:$0xff]  ;;  %v3227_v10 = vld [vmem:[%s10297_s17 + $0x20] sm:$0xff] }
 0x412   : > { %v9024_v47 = vpack.i.bf16 %v11347_v34, %v11217_v16  ;;  %v3100_v33 = vsel %vm2102_vm2, %v3098_v31, %v3099_v6  ;;  %3284 = vmatpush.msra.mxu2 %v3233_v14  ;;  %v3228_v6 = vld [vmem:[%s10297_s17 + $0x28] sm:$0xff]  ;;  %v9772_v31 = vld [vmem:[%s10563_s28 + $0x80] sm:$0xff] }
 0x413   : > { %v9034_v45 = vpack.i.bf16 %v3100_v33, %v11236_v13  ;;  %8655 = vmatmul.msk.f32.gmra.mxu1 %vm2706_vm11, %v3100_v33  ;;  %3324 = vmatpush.msra.mxu3 %v3250_v46  ;;  %v9771_v25 = vld [vmem:[%s10563_s28 + $0x88] sm:$0xff]  ;;  %v3225_v33 = vld [vmem:[%s10297_s17 + $0x10] sm:$0xff]  ;;  %v9776_v21 = vld [vmem:[%s10563_s28 + $0x40] sm:$0xff] }
 0x415   : > { %9025 = vrot.lane.b32.xlu2 %v9024_v47, %s14219_s15  ;;  %9035 = vrot.lane.b32.xlu0 %v9034_v45, %s14215_s23  ;;  %v3226_v47 = vld [vmem:[%s10297_s17 + $0x18] sm:$0xff]  ;;  %v9773_v45 = vld [vmem:[%s10563_s28 + $0x68] sm:$0xff] }
 0x419   : > { %9020 = vrot.lane.b32.xlu1 %v9019_v11, %s14217_s16  ;;  %v9774_v11 = vld [vmem:[%s10563_s28 + $0x60] sm:$0xff] }
 0x41b   : > { %8656 = vmatmul.msk.f32.gmra.mxu1 %vm2706_vm11, %v10577_v18 }
 0x41d   : > { %9030 = vrot.lane.b32.xlu2 %v9029_v20, %s14219_s15  ;;  %9040 = vrot.lane.b32.xlu0 %v11288_v3, %s14215_s23  ;;  %v3249_v3 = vld [vmem:[%s10297_s17 + $0xd0] sm:$0xff] }
 0x41e   : > { %3325 = vmatpush.msra.mxu3 %v3249_v3  ;;  %v9777_v3 = vld [vmem:[%s10563_s28 + $0x28] sm:$0xff] }
 0x420   : > { %3326 = vmatpush.msra.mxu3 %v3248_v52 }
 0x421   : > { %3045 = vrot.lane.b32.xlu1 %v11248_v54, %s14217_s16  ;;  %v3247_v54 = vld [vmem:[%s10297_s17 + $0xc0] sm:$0xff] }
 0x422   : > { %3327 = vmatpush.msra.mxu3 %v3247_v54 }
 0x425   : > { %3070 = vrot.lane.b32.xlu2 %v11256_v8, %s14219_s15  ;;  %3047 = vrot.lane.b32.xlu0 %v11267_v1, %s14217_s16  ;;  %v3246_v1 = vld [vmem:[%s10297_s17 + $0xb8] sm:$0xff] }
 0x426   : > { %3328 = vmatpush.msra.mxu3 %v3246_v1  ;;  %v9778_v1 = vld [vmem:[%s10563_s28 + $0x20] sm:$0xff] }
 0x428   : > { %3329 = vmatpush.msra.mxu3 %v3245_v50 }
 0x429   : > { %3072 = vrot.lane.b32.xlu1 %v11295_v24, %s14219_s15 }
 0x42a   : > { %3330 = vmatpush.msra.mxu3 %v3244_v49 }
 0x42d   : > { %3003 = vrot.lane.b32.xlu2 %v11306_v28, %s14215_s23  ;;  %3049 = vrot.lane.b32.xlu0 %v11314_v48, %s14217_s16  ;;  %v3243_v48 = vld [vmem:[%s10297_s17 + $0xa0] sm:$0xff] }
 0x42e   : > { %3331 = vmatpush.msra.mxu3 %v3243_v48 }
 0x430   : > { %3332 = vmatpush.msra.mxu3 %v3242_v56 }
 0x431   : > { %3074 = vrot.lane.b32.xlu1 %v11323_v51, %s14219_s15 }
 0x432   : > { %3333 = vmatpush.msra.mxu3 %v3241_v39 }
 0x434   : > { %3334 = vmatpush.msra.mxu3 %v3240_v61 }
 0x435   : > { %3005 = vrot.lane.b32.xlu2 %v11333_v0, %s14215_s23  ;;  %3051 = vrot.lane.b32.xlu0 %v3036_v15, %s14217_s16  ;;  %v3232_v15 = vld [vmem:[%s10297_s17 + $0x48] sm:$0xff] }
 0x436   : > { %3335 = vmatpush.msra.mxu3 %v3239_v59  ;;  %3285 = vmatpush.msra.mxu2 %v3232_v15 }
 0x438   : > { %3571 = vmatpush.msrb.mxu3 %v11032_v29  ;;  %3286 = vmatpush.msra.mxu2 %v3231_v63  ;;  %v3229_v29 = vld [vmem:[%s10297_s17 + $0x30] sm:$0xff] }
 0x439   : > { %3076 = vrot.lane.b32.xlu1 %v2946_v23, %s14219_s15  ;;  %v9768_v23 = vld [vmem:[%s10563_s28 + $0xc0] sm:$0xff] }
 0x43a   : > { %3572 = vmatpush.msrb.mxu3 %v11029_v27  ;;  %3287 = vmatpush.msra.mxu2 %v3230_v4  ;;  %v9770_v27 = vld [vmem:[%s10563_s28 + $0xa0] sm:$0xff]  ;;  %s14308_s28 = sld [smem:[#allocation50_spill]] }
 0x43c   : > { %3573 = vmatpush.msrb.mxu3 %v9767_v44  ;;  %3288 = vmatpush.msra.mxu2 %v3229_v29 }
 0x43e   : > { %3574 = vmatpush.msrb.mxu3 %v9768_v23  ;;  %3289 = vmatpush.msra.mxu2 %v3228_v6 }
 0x440   : > { %3575 = vmatpush.msrb.mxu3 %v9769_v5  ;;  %3290 = vmatpush.msra.mxu2 %v3227_v10 }
 0x442   : > { %3576 = vmatpush.msrb.mxu3 %v9770_v27  ;;  %3291 = vmatpush.msra.mxu2 %v3226_v47 }
 0x444   : > { %3577 = vmatpush.msrb.mxu3 %v9771_v25  ;;  %3292 = vmatpush.msra.mxu2 %v3225_v33 }
 0x446   : > { %3578 = vmatpush.msrb.mxu3 %v9772_v31  ;;  %3293 = vmatpush.msra.mxu2 %v3224_v19 }
 0x447   : > { %v8961_v52 = vpop.permute.xlu2 %8960 }
 0x448   : > { %3579 = vmatpush.msrb.mxu3 %v9773_v45  ;;  %3294 = vmatpush.msra.mxu2 %v3223_v7  ;;  %v8962_v49 = vunpack.i.l.bf16 %v8961_v52  ;;  %v8963_v14 = vunpack.i.h.bf16 %v8961_v52 }
 0x44a   : > { %3580 = vmatpush.msrb.mxu3 %v9774_v11 }
 0x44c   : > { %3581 = vmatpush.msrb.mxu3 %v9775_v32 }
 0x44e   : > { %3582 = vmatpush.msrb.mxu3 %v9776_v21 }
 0x450   : > { %3583 = vmatpush.msrb.mxu3 %v9777_v3 }
 0x452   : > { %3584 = vmatpush.msrb.mxu3 %v9778_v1 }
 0x454   : > { %3585 = vmatpush.msrb.mxu3 %v9779_v57 }
 0x456   : > { %v8951_v20 = vpop.permute.xlu0 %8950  ;;  %3586 = vmatpush.msrb.mxu3 %v9780_v53 }
 0x457   : > { %v8952_v46 = vunpack.i.l.bf16 %v8951_v20  ;;  %v8953_v60 = vunpack.i.h.bf16 %v8951_v20  ;;  %v8976_v62 = vpop.permute.xlu2 %8975 }
 0x458   : > { %v8977_v29 = vunpack.i.l.bf16 %v8976_v62  ;;  %v8978_v19 = vunpack.i.h.bf16 %v8976_v62 }
 0x459   : > { %v3199_v48 = vsel %vm2706_vm11, %v11311_v41, %v8952_v46  ;;  %v3200_v59 = vsel %vm2706_vm11, %v11233_v12, %v8953_v60 }
 0x45b   : > { %v8956_v54 = vpop.permute.xlu1 %8955 }
 0x45c   : > { %v8957_v50 = vunpack.i.l.bf16 %v8956_v54  ;;  %v8958_v61 = vunpack.i.h.bf16 %v8956_v54 }
 0x45e   : > { %v3207_v56 = vsel %vm3181_vm13, %v3199_v48, %v8957_v50  ;;  %v3208_v9 = vsel %vm3181_vm13, %v3200_v59, %v8958_v61 }
 0x45f   : > { %v3215_v39 = vsel %vm3190_vm14, %v3207_v56, %v8962_v49  ;;  %v3216_v41 = vsel %vm3190_vm14, %v3208_v9, %v8963_v14  ;;  %v8991_v23 = vpop.permute.xlu2 %8990 }
 0x460   : > { %3336 = vmatmul.f32.vlgmr.msra.gmra.mxu3 %v3215_v39  ;;  %v8992_v32 = vunpack.i.l.bf16 %v8991_v23  ;;  %v8993_v57 = vunpack.i.h.bf16 %v8991_v23 }
 0x466   : > { %v8966_v15 = vpop.permute.xlu0 %8965 }
 0x467   : > { %v8967_v44 = vunpack.i.l.bf16 %v8966_v15  ;;  %v8968_v25 = vunpack.i.h.bf16 %v8966_v15  ;;  %v9006_v20 = vpop.permute.xlu2 %9005 }
 0x468   : > { %3339 = vmatmul.f32.gmra.mxu3 %v3216_v41  ;;  %v9007_v56 = vunpack.i.l.bf16 %v9006_v20  ;;  %v9008_v23 = vunpack.i.h.bf16 %v9006_v20 }
 0x469   : > { %v3201_v5 = vsel %vm2706_vm11, %v11236_v13, %v8967_v44  ;;  %v3202_v33 = vsel %vm2706_vm11, %v11279_v42, %v8968_v25  ;;  %v3612_v44 = vld [vmem:[%s10302_s13] sm:$0xf] }
 0x46a   : > { %8665 = vmatpush.msk.msrb.mxu0 %vm2777_vm3, %v3612_v44 }
 0x46b   : > { %v8971_v63 = vpop.permute.xlu1 %8970 }
 0x46c   : > { %v8972_v4 = vunpack.i.l.bf16 %v8971_v63  ;;  %v8973_v10 = vunpack.i.h.bf16 %v8971_v63 }
 0x46e   : > { %v8981_v27 = vpop.permute.xlu0 %8980  ;;  %v3209_v6 = vsel %vm3181_vm13, %v3201_v5, %v8972_v4  ;;  %v3210_v11 = vsel %vm3181_vm13, %v3202_v33, %v8973_v10 }
 0x46f   : > { %v3217_v12 = vsel %vm3190_vm14, %v3209_v6, %v8977_v29  ;;  %v8982_v31 = vunpack.i.l.bf16 %v8981_v27  ;;  %v8983_v21 = vunpack.i.h.bf16 %v8981_v27  ;;  %v3218_v52 = vsel %vm3190_vm14, %v3210_v11, %v8978_v19  ;;  %v9026_v9 = vpop.permute.xlu2 %9025 }
 0x470   : > { %3342 = vmatmul.f32.gmra.mxu3 %v3217_v12  ;;  %v9027_v4 = vunpack.i.l.bf16 %v9026_v9  ;;  %v9028_v11 = vunpack.i.h.bf16 %v9026_v9 }
 0x471   : > { %v3173_v13 = vsel %vm2706_vm11, %v10552_v2, %v8982_v31  ;;  %v3203_v50 = vsel %vm2706_vm11, %v11282_v17, %v8983_v21 }
 0x473   : > { %v8986_v47 = vpop.permute.xlu1 %8985 }
 0x474   : > { %v8987_v45 = vunpack.i.l.bf16 %v8986_v47  ;;  %v8988_v42 = vunpack.i.h.bf16 %v8986_v47 }
 0x476   : > { %v11450_v7 = vsel %vm3181_vm13, %v3173_v13, %v8987_v45  ;;  %v3211_v48 = vsel %vm3181_vm13, %v3203_v50, %v8988_v42 }
 0x477   : > { %v8996_v46 = vpop.permute.xlu0 %8995  ;;  %v3191_v3 = vsel %vm3190_vm14, %v11450_v7, %v8992_v32  ;;  %v3219_v59 = vsel %vm3190_vm14, %v3211_v48, %v8993_v57  ;;  %v9031_v31 = vpop.permute.xlu2 %9030 }
 0x478   : > { %3295 = vmatmul.f32.vlgmr.msra.gmra.mxu2 %v3191_v3  ;;  %3345 = vmatmul.f32.gmra.mxu3 %v3218_v52  ;;  %v8997_v54 = vunpack.i.l.bf16 %v8996_v46  ;;  %v8998_v53 = vunpack.i.h.bf16 %v8996_v46  ;;  %v9032_v19 = vunpack.i.l.bf16 %v9031_v31 }
 0x47a   : > { %v3174_v60 = vsel %vm2706_vm11, %v11192_v58, %v8997_v54  ;;  %v3204_v41 = vsel %vm2706_vm11, %v11306_v28, %v8998_v53 }
 0x47b   : > { %v9001_v1 = vpop.permute.xlu1 %9000 }
 0x47c   : > { %v9002_v49 = vunpack.i.l.bf16 %v9001_v1  ;;  %v9003_v14 = vunpack.i.h.bf16 %v9001_v1 }
 0x47e   : > { %v3183_v39 = vsel %vm3181_vm13, %v3174_v60, %v9002_v49  ;;  %v3212_v58 = vsel %vm3181_vm13, %v3204_v41, %v9003_v14  ;;  %v11490_v49 = vunpack.i.h.bf16 %v9031_v31 }
 0x47f   : > { %v9011_v61 = vpop.permute.xlu0 %9010  ;;  %v3192_v62 = vsel %vm3190_vm14, %v3183_v39, %v9007_v56  ;;  %v3220_v12 = vsel %vm3190_vm14, %v3212_v58, %v9008_v23  ;;  %v3071_v48 = vpop.permute.xlu2 %3070  ;;  %v3411_v23 = vld [vmem:[%s14291_s3 + $0x8] sm:$0xff] }
 0x480   : > { %3298 = vmatmul.f32.gmra.mxu2 %v3192_v62  ;;  %3348 = vmatmul.f32.gmra.mxu3 %v3219_v59  ;;  %v9012_v17 = vunpack.i.l.bf16 %v9011_v61  ;;  %v9013_v27 = vunpack.i.h.bf16 %v9011_v61 }
 0x482   : > { %v3175_v29 = vsel %vm2706_vm11, %v11200_v55, %v9012_v17  ;;  %v3205_v33 = vsel %vm2706_vm11, %v11333_v0, %v9013_v27  ;;  %v9715_v27 = vld [vmem:[%s10267_s24] ss:$0 sm:$0xff] }
 0x483   : > { %v9016_v15 = vpop.permute.xlu1 %9015 }
 0x484   : > { %v9017_v63 = vunpack.i.l.bf16 %v9016_v15  ;;  %v9018_v28 = vunpack.i.h.bf16 %v9016_v15 }
 0x486   : > { %v3184_v5 = vsel %vm3181_vm13, %v3175_v29, %v9017_v63  ;;  %v3213_v55 = vsel %vm3181_vm13, %v3205_v33, %v9018_v28 }
 0x487   : > { %v9036_v6 = vpop.permute.xlu0 %9035  ;;  %v3193_v25 = vsel %vm3190_vm14, %v3184_v5, %v9027_v4  ;;  %v3221_v3 = vsel %vm3190_vm14, %v3213_v55, %v9028_v11  ;;  %v3004_v62 = vpop.permute.xlu2 %3003 }
 0x488   : > { %3301 = vmatmul.f32.gmra.mxu2 %v3193_v25  ;;  %3351 = vmatmul.f32.gmra.mxu3 %v3220_v12  ;;  %v9037_v10 = vunpack.i.l.bf16 %v9036_v6  ;;  %v9038_v20 = vunpack.i.h.bf16 %v9036_v6  ;;  %v3179_v14 = vsel %vm2706_vm11, %v11295_v24, %v3004_v62 }
 0x48a   : > { %v3176_v32 = vsel %vm2706_vm11, %v11217_v16, %v9037_v10  ;;  %v3206_v16 = vsel %vm2706_vm11, %v11347_v34, %v9038_v20 }
 0x48b   : > { %v9021_v47 = vpop.permute.xlu1 %9020 }
 0x48c   : > { %v9022_v45 = vunpack.i.l.bf16 %v9021_v47  ;;  %v11481_v52 = vunpack.i.h.bf16 %v9021_v47 }
 0x48e   : > { %v3185_v13 = vsel %vm3181_vm13, %v3176_v32, %v9022_v45  ;;  %v3214_v50 = vsel %vm3181_vm13, %v3206_v16, %v11481_v52 }
 0x48f   : > { %v9041_v21 = vpop.permute.xlu0 %9040  ;;  %v3194_v46 = vsel %vm3190_vm14, %v3185_v13, %v9032_v19  ;;  %v3222_v60 = vsel %vm3190_vm14, %v3214_v50, %v11490_v49  ;;  %v3006_v41 = vpop.permute.xlu2 %3005 }
 0x490   : > { %v9042_v42 = vunpack.i.l.bf16 %v9041_v21  ;;  %3304 = vmatmul.f32.gmra.mxu2 %v3194_v46  ;;  %3354 = vmatmul.f32.gmra.mxu3 %v3221_v3  ;;  %v3180_v63 = vsel %vm2706_vm11, %v11323_v51, %v3006_v41  ;;  %v3410_v51 = vld [vmem:[%s14291_s3] sm:$0xff] }
 0x492   : > { %v3177_v54 = vsel %vm2706_vm11, %v11242_v40, %v9042_v42  ;;  %v9043_v40 = vunpack.i.h.bf16 %v9041_v21 }
 0x493   : > { %v3046_v0 = vpop.permute.xlu1 %3045 }
 0x494   : > { %v3186_v1 = vsel %vm3181_vm13, %v3177_v54, %v3046_v0  ;;  %v3178_v34 = vsel %vm2706_vm11, %v11256_v8, %v9043_v40  ;;  %v3413_v8 = vld [vmem:[%s14291_s3 + $0x18] sm:$0xff] }
 0x495   : > { %v3195_v56 = vsel %vm3190_vm14, %v3186_v1, %v3071_v48  ;;  %3454 = vmatpush.msrb.mxu2 %v3413_v8 }
 0x497   : > { %v3048_v57 = vpop.permute.xlu0 %3047 }
 0x498   : > { %3307 = vmatmul.f32.gmra.mxu2 %v3195_v56  ;;  %3357 = vmatmul.f32.gmra.mxu3 %v3222_v60  ;;  %v3187_v53 = vsel %vm3181_vm13, %v3178_v34, %v3048_v57 }
 0x49b   : > { %v3073_v39 = vpop.permute.xlu1 %3072 }
 0x49c   : > { %v3196_v61 = vsel %vm3190_vm14, %v3187_v53, %v3073_v39 }
 0x49f   : > { %v3050_v59 = vpop.permute.xlu0 %3049 }
 0x4a0   : > { %3310 = vmatmul.f32.gmra.mxu2 %v3196_v61  ;;  %3587 = vmatmul.f32.vlgmr.msrb.gmra.mxu3 %v11151_v36  ;;  %v3188_v17 = vsel %vm3181_vm13, %v3179_v14, %v3050_v59 }
 0x4a3   : > { %v3075_v9 = vpop.permute.xlu1 %3074 }
 0x4a4   : > { %v3197_v15 = vsel %vm3190_vm14, %v3188_v17, %v3075_v9 }
 0x4a7   : > { %v3052_v44 = vpop.permute.xlu0 %3051 }
 0x4a8   : > { %3313 = vmatmul.f32.gmra.mxu2 %v3197_v15  ;;  %3590 = vmatmul.f32.gmra.mxu3 %v11155_v30  ;;  %v3189_v24 = vsel %vm3181_vm13, %v3180_v63, %v3052_v44  ;;  %v3412_v30 = vld [vmem:[%s14291_s3 + $0x10] sm:$0xff]  ;;  %s14327_s3 = sld [smem:[#allocation55_spill]] }
 0x4a9   : > { %3455 = vmatpush.msrb.mxu2 %v3412_v30 }
 0x4ab   : > { %v3077_v36 = vpop.permute.xlu1 %3076  ;;  %3456 = vmatpush.msrb.mxu2 %v3411_v23 }
 0x4ac   : > { %v3198_v58 = vsel %vm3190_vm14, %v3189_v24, %v3077_v36 }
 0x4ad   : > { %3457 = vmatpush.msrb.mxu2 %v3410_v51 }
 0x4b0   : > { %3316 = vmatmul.f32.gmra.mxu2 %v3198_v58  ;;  %3593 = vmatmul.f32.gmra.mxu3 %v11159_v37  ;;  %v3378_v37 = vpop.f32.mrf.mxu1 }
 0x4b8   : > { %3596 = vmatmul.f32.gmra.mxu3 %v11163_v26  ;;  %v3381_v25 = vpop.f32.mrf.mxu1 }
 0x4c0   : > { %3599 = vmatmul.f32.gmra.mxu3 %v11167_v35  ;;  %v3384_v31 = vpop.f32.mrf.mxu1 }
 0x4c8   : > { %3602 = vmatmul.f32.gmra.mxu3 %v11171_v38  ;;  %v3387_v13 = vpop.f32.mrf.mxu1 }
 0x4d0   : > { %3605 = vmatmul.f32.gmra.mxu3 %v11175_v22  ;;  %v3390_v54 = vpop.f32.mrf.mxu1 }
 0x4d8   : > { %3608 = vmatmul.f32.gmra.mxu3 %v11179_v43  ;;  %v3393_v40 = vpop.f32.mrf.mxu1 }
 0x4e0   : > { %v3396_v8 = vpop.f32.mrf.mxu1 }
 0x4e3   : > { %v3337_v4 = vpop.f32.mrf.mxu3 }
 0x4e8   : > { %v3399_v30 = vpop.f32.mrf.mxu1 }
 0x4eb   : > { %v3340_v29 = vpop.f32.mrf.mxu3 }
 0x4f3   : > { %v3343_v5 = vpop.f32.mrf.mxu3 }
 0x4fb   : > { %v3296_v26 = vpop.f32.mrf.mxu2  ;;  %v3346_v6 = vpop.f32.mrf.mxu3 }
 0x4fc   : > { %v3297_v12 = vadd.f32 %v9715_v27, %v3296_v26 }
 0x4fe   : > { %v3338_v35 = vadd.f32 %v3337_v4, %v3297_v12 }
 0x500   : > { %v11520_v28 = vadd.f32 %v3378_v37, %v3338_v35  ;;  %v4018_v35 = vld [vmem:[%s14307_s11 + $0x118] sm:$0xff] }
 0x501   : > { %4131 = vmatpush.msra.mxu3 %v4018_v35 }
 0x502   : > { %v3402_v38 = vmul.f32 %v11520_v28, %v11520_v28 }
 0x503   : > { %v3299_v22 = vpop.f32.mrf.mxu2  ;;  %v3349_v10 = vpop.f32.mrf.mxu3 }
 0x504   : > { %v3300_v43 = vadd.f32 %v9715_v27, %v3299_v22  ;;  %8657 = vmatmul.msk.f32.vlgmr.msrb.gmra.mxu2 %vm2706_vm11, %v3402_v38  ;;  %v4017_v22 = vld [vmem:[%s14307_s11 + $0x110] sm:$0xff] }
 0x505   : > { %4132 = vmatpush.msra.mxu3 %v4017_v22 }
 0x506   : > { %v3341_v47 = vadd.f32 %v3340_v29, %v3300_v43 }
 0x508   : > { %v11525_v33 = vadd.f32 %v3381_v25, %v3341_v47  ;;  %v4016_v47 = vld [vmem:[%s14307_s11 + $0x108] sm:$0xff] }
 0x509   : > { %4133 = vmatpush.msra.mxu3 %v4016_v47 }
 0x50a   : > { %v3403_v45 = vmul.f32 %v11525_v33, %v11525_v33 }
 0x50b   : > { %v3302_v55 = vpop.f32.mrf.mxu2  ;;  %v3352_v11 = vpop.f32.mrf.mxu3 }
 0x50c   : > { %v3303_v19 = vadd.f32 %v9715_v27, %v3302_v55  ;;  %8658 = vmatmul.msk.f32.gmra.mxu2 %vm2706_vm11, %v3403_v45  ;;  %v4015_v55 = vld [vmem:[%s14307_s11 + $0x100] sm:$0xff] }
 0x50d   : > { %4134 = vmatpush.msra.mxu3 %v4015_v55 }
 0x50e   : > { %v3344_v32 = vadd.f32 %v3343_v5, %v3303_v19 }
 0x510   : > { %v11530_v20 = vadd.f32 %v3384_v31, %v3344_v32 }
 0x512   : > { %v3404_v21 = vmul.f32 %v11530_v20, %v11530_v20 }
 0x513   : > { %v3305_v46 = vpop.f32.mrf.mxu2  ;;  %v3355_v3 = vpop.f32.mrf.mxu3 }
 0x514   : > { %v3306_v42 = vadd.f32 %v9715_v27, %v3305_v46  ;;  %8659 = vmatmul.msk.f32.gmra.mxu2 %vm2706_vm11, %v3404_v21 }
 0x516   : > { %v3347_v0 = vadd.f32 %v3346_v6, %v3306_v42  ;;  %v11569_v6 = vld [vmem:[%s14306_s18] ss:$0 sm:$0xff]  ;;  %s14324_s18 = sld [smem:[#allocation23_spill]] }
 0x518   : > { %v11535_v16 = vadd.f32 %v3387_v13, %v3347_v0 }
 0x51a   : > { %v3405_v1 = vmul.f32 %v11535_v16, %v11535_v16 }
 0x51b   : > { %v3308_v50 = vpop.f32.mrf.mxu2  ;;  %v3358_v48 = vpop.f32.mrf.mxu3 }
 0x51c   : > { %v3309_v57 = vadd.f32 %v9715_v27, %v3308_v50  ;;  %8660 = vmatmul.msk.f32.gmra.mxu2 %vm2706_vm11, %v3405_v1 }
 0x51e   : > { %v3350_v56 = vadd.f32 %v3349_v10, %v3309_v57 }
 0x520   : > { %v11540_v60 = vadd.f32 %v3390_v54, %v3350_v56  ;;  %v11579_v54 = vld [vmem:[%s14308_s28] ss:$0 sm:$0xff]  ;;  %s8631_s28 = sshll.u32 %s10425_s0, 7 }
 0x522   : > { %v3406_v39 = vmul.f32 %v11540_v60, %v11540_v60 }
 0x523   : > { %v3311_v34 = vpop.f32.mrf.mxu2  ;;  %v3588_v53 = vpop.f32.mrf.mxu3 }
 0x524   : > { %v3312_v61 = vadd.f32 %v9715_v27, %v3311_v34  ;;  %8661 = vmatmul.msk.f32.gmra.mxu2 %vm2706_vm11, %v3406_v39  ;;  %8666 = vmatmul.msk.f32.vlgmr.msrb.gmra.mxu0 %vm2587_vm4, %v3588_v53 }
 0x526   : > { %v3353_v62 = vadd.f32 %v3352_v11, %v3312_v61 }
 0x528   : > { %v11546_v59 = vadd.f32 %v3393_v40, %v3353_v62 }
 0x52a   : > { %v3407_v9 = vmul.f32 %v11546_v59, %v11546_v59 }
 0x52b   : > { %v3314_v14 = vpop.f32.mrf.mxu2  ;;  %v3591_v17 = vpop.f32.mrf.mxu3 }
 0x52c   : > { %v3315_v15 = vadd.f32 %v9715_v27, %v3314_v14  ;;  %8662 = vmatmul.msk.f32.gmra.mxu2 %vm2706_vm11, %v3407_v9  ;;  %8667 = vmatmul.msk.f32.gmra.mxu0 %vm2587_vm4, %v3591_v17 }
 0x52e   : > { %v3356_v41 = vadd.f32 %v3355_v3, %v3315_v15 }
 0x530   : > { %v11552_v44 = vadd.f32 %v3396_v8, %v3356_v41 }
 0x532   : > { %v3408_v36 = vmul.f32 %v11552_v44, %v11552_v44 }
 0x533   : > { %v3317_v63 = vpop.f32.mrf.mxu2  ;;  %v3594_v24 = vpop.f32.mrf.mxu3 }
 0x534   : > { %v3318_v58 = vadd.f32 %v9715_v27, %v3317_v63  ;;  %8663 = vmatmul.msk.f32.gmra.mxu2 %vm2706_vm11, %v3408_v36  ;;  %8668 = vmatmul.msk.f32.gmra.mxu0 %vm2587_vm4, %v3594_v24 }
 0x536   : > { %v3359_v23 = vadd.f32 %v3358_v48, %v3318_v58 }
 0x538   : > { %v11558_v51 = vadd.f32 %v3399_v30, %v3359_v23 }
 0x53a   : > { %v3409_v4 = vmul.f32 %v11558_v51, %v11558_v51 }
 0x53b   : > { %v3597_v29 = vpop.f32.mrf.mxu3 }
 0x53c   : > { %8664 = vmatmul.msk.f32.gmra.mxu2 %vm2706_vm11, %v3409_v4  ;;  %8669 = vmatmul.msk.f32.gmra.mxu0 %vm2587_vm4, %v3597_v29 }
 0x543   : > { %v3600_v37 = vpop.f32.mrf.mxu3 }
 0x544   : > { %8670 = vmatmul.msk.f32.gmra.mxu0 %vm2587_vm4, %v3600_v37 }
 0x54b   : > { %v3603_v5 = vpop.f32.mrf.mxu3 }
 0x54c   : > { %8671 = vmatmul.msk.f32.gmra.mxu0 %vm2587_vm4, %v3603_v5 }
 0x553   : > { %v3606_v27 = vpop.f32.mrf.mxu3 }
 0x554   : > { %8672 = vmatmul.msk.f32.gmra.mxu0 %vm2587_vm4, %v3606_v27 }
 0x55b   : > { %v3609_v26 = vpop.f32.mrf.mxu3 }
 0x55c   : > { %8673 = vmatmul.msk.f32.gmra.mxu0 %vm2587_vm4, %v3609_v26 }
 0x587   : > { %v3459_v25 = vpop.f32.mrf.mxu2 }
 0x588   : > { %v3460_v12 = vadd.f32 %v11569_v6, %v3459_v25 }
 0x58a   : > { %9731 = vrsqrt.f32 %v3460_v12  ;;  %vm3489_vm4 = vweird.f32 %v3460_v12 }
 0x58f   : > { %v3462_v38 = vpop.f32.mrf.mxu2 }
 0x590   : > { %v9732_v10 = vpop.eup %9731  ;;  %v3463_v43 = vadd.f32 %v11569_v6, %v3462_v38 }
 0x591   : > { %v3484_v31 = vmul.f32 %v9732_v10, %v3460_v12  ;;  %vm3490_vm15 = vweird.f32 %v9732_v10 }
 0x592   : > { %9733 = vrsqrt.f32 %v3463_v43  ;;  %vm3491_vm5 = vmor %vm3489_vm4, %vm3490_vm15  ;;  %vm3499_vm8 = vweird.f32 %v3463_v43 }
 0x593   : > { %v3485_v45 = vmul.f32 %v9732_v10, %v3484_v31 }
 0x595   : > { %v3486_v11 = vmul.f32 0.5, %v3485_v45 }
 0x597   : > { %v3465_v19 = vpop.f32.mrf.mxu2  ;;  %v3487_v13 = vsub.f32 1.5, %v3486_v11 }
 0x598   : > { %v9734_v32 = vpop.eup %9733  ;;  %v3466_v21 = vadd.f32 %v11569_v6, %v3465_v19 }
 0x599   : > { %v3494_v46 = vmul.f32 %v9734_v32, %v3463_v43  ;;  %v3488_v42 = vmul.f32 %v9732_v10, %v3487_v13  ;;  %vm3500_vm6 = vweird.f32 %v9734_v32 }
 0x59a   : > { %9735 = vrsqrt.f32 %v3466_v21  ;;  %vm3501_vm9 = vmor %vm3499_vm8, %vm3500_vm6  ;;  %vm3509_vm12 = vweird.f32 %v3466_v21 }
 0x59b   : > { %v3495_v3 = vmul.f32 %v9734_v32, %v3494_v46  ;;  %v3492_v56 = vsel %vm3491_vm5, %v9732_v10, %v3488_v42 }
 0x59c   : > { %v3563_v61 = vmul.f32 %v3492_v56, %v11520_v28 }
 0x59d   : > { %v3496_v0 = vmul.f32 0.5, %v3495_v3 }
 0x59f   : > { %v3497_v1 = vsub.f32 1.5, %v3496_v0  ;;  %v3468_v50 = vpop.f32.mrf.mxu2 }
 0x5a0   : > { %v9736_v48 = vpop.eup %9735  ;;  %v11582_v57 = vadd.f32 %v11569_v6, %v3468_v50 }
 0x5a1   : > { %v3504_v40 = vmul.f32 %v9736_v48, %v3466_v21  ;;  %v3661_v39 = vpop.f32.mrf.mxu0  ;;  %v3498_v62 = vmul.f32 %v9734_v32, %v3497_v1  ;;  %vm3510_vm10 = vweird.f32 %v9736_v48 }
 0x5a2   : > { %9737 = vrsqrt.f32 %v11582_v57  ;;  %v3662_v34 = vadd.f32 %v11579_v54, %v3661_v39  ;;  %vm11606_vm15 = vmor %vm3509_vm12, %vm3510_vm10  ;;  %vm3519_vm5 = vweird.f32 %v11582_v57 }
 0x5a3   : > { %v3505_v53 = vmul.f32 %v9736_v48, %v3504_v40  ;;  %v3502_v8 = vsel %vm3501_vm9, %v9734_v32, %v3498_v62 }
 0x5a4   : > { %v11587_v14 = vadd.f32 %v3662_v34, %v3563_v61  ;;  %v3564_v58 = vmul.f32 %v3502_v8, %v11525_v33 }
 0x5a5   : > { %v3506_v9 = vmul.f32 0.5, %v3505_v53 }
 0x5a6   : > { %v3701_v24 = vrot.slane %v11587_v14, 7 }
 0x5a7   : > { %v3507_v17 = vsub.f32 1.5, %v3506_v9  ;;  %v3471_v15 = vpop.f32.mrf.mxu2 }
 0x5a8   : > { %v11589_v41 = vpop.eup %9737  ;;  %v11592_v36 = vadd.f32 %v11569_v6, %v3471_v15  ;;  %v11604_v5 = vsel %vm1871_vm0, 0.0, %v3701_v24  ;;  %v11611_v26 = vsel %vm1871_vm0, %v3701_v24, 0.0 }
 0x5a9   : > { %v3514_v63 = vmul.f32 %v11589_v41, %v11582_v57  ;;  %v3664_v28 = vpop.f32.mrf.mxu0  ;;  %v3508_v4 = vmul.f32 %v9736_v48, %v3507_v17  ;;  %vm3520_vm4 = vweird.f32 %v11589_v41  ;;  %v3789_v22 = vrot.slane %v11604_v5, 2 }
 0x5aa   : > { %9739 = vrsqrt.f32 %v11592_v36  ;;  %v3665_v30 = vadd.f32 %v11579_v54, %v3664_v28  ;;  %v3790_v47 = vrot.slane %v11611_v26, 2  ;;  %vm11651_vm6 = vmor %vm3519_vm5, %vm3520_vm4  ;;  %v3748_v34 = vrot.slane %v11611_v26, 1 }
 0x5ab   : > { %v3515_v23 = vmul.f32 %v11589_v41, %v3514_v63  ;;  %v3512_v35 = vsel %vm11606_vm15, %v9736_v48, %v3508_v4  ;;  %v3747_v63 = vrot.slane %v11604_v5, 1  ;;  %vm3529_vm9 = vweird.f32 %v11592_v36 }
 0x5ac   : > { %v11601_v29 = vadd.f32 %v3665_v30, %v3564_v58  ;;  %v3565_v13 = vmul.f32 %v3512_v35, %v11530_v20  ;;  %v3791_v56 = vsel %vm2102_vm2, %v3789_v22, %v3790_v47 }
 0x5ad   : > { %v3516_v37 = vmul.f32 0.5, %v3515_v23 }
 0x5ae   : > { %v3702_v33 = vrot.slane %v11601_v29, 7 }
 0x5af   : > { %v3517_v25 = vsub.f32 1.5, %v3516_v37  ;;  %v3474_v12 = vpop.f32.mrf.mxu2 }
 0x5b0   : > { %v11617_v38 = vpop.eup %9739  ;;  %v11621_v10 = vsel %vm1871_vm0, 0.0, %v3702_v33  ;;  %v3726_v43 = vsel %vm1871_vm0, %v3702_v33, 0.0  ;;  %v11625_v31 = vadd.f32 %v11569_v6, %v3474_v12 }
 0x5b1   : > { %v3524_v45 = vmul.f32 %v11617_v38, %v11592_v36  ;;  %v3750_v55 = vrot.slane %v11621_v10, 1  ;;  %v3751_v11 = vrot.slane %v3726_v43, 1  ;;  %v3667_v19 = vpop.f32.mrf.mxu0  ;;  %v3793_v32 = vrot.slane %v3726_v43, 2 }
 0x5b2   : > { %9741 = vrsqrt.f32 %v11625_v31  ;;  %v3668_v21 = vadd.f32 %v11579_v54, %v3667_v19  ;;  %v3792_v3 = vrot.slane %v11621_v10, 2  ;;  %v3518_v0 = vmul.f32 %v11589_v41, %v3517_v25 }
 0x5b3   : > { %v3525_v46 = vmul.f32 %v11617_v38, %v3524_v45  ;;  %v11637_v42 = vsel %vm2013_vm1, %v3750_v55, %v3751_v11  ;;  %vm3530_vm8 = vweird.f32 %v11617_v38  ;;  %v11709_v36 = vsel %vm2013_vm1, %v3747_v63, %v3748_v34 }
 0x5b4   : > { %v11640_v1 = vadd.f32 %v3668_v21, %v3565_v13  ;;  %v9054_v50 = vpack.i.bf16 %v11604_v5, %v11637_v42  ;;  %v11646_v20 = vsel %vm2102_vm2, %v3792_v3, %v3793_v32  ;;  %v3522_v62 = vsel %vm11651_vm6, %v11589_v41, %v3518_v0  ;;  %vm11701_vm10 = vmor %vm3529_vm9, %vm3530_vm8 }
 0x5b5   : > { %v3526_v48 = vmul.f32 0.5, %v3525_v46  ;;  %8674 = vmatmul.msk.f32.vlgmr.msra.gmra.mxu3 %vm2706_vm11, %v11646_v20  ;;  %v9044_v57 = vpack.i.bf16 %v11646_v20, %v3791_v56  ;;  %v3566_v30 = vmul.f32 %v3522_v62, %v11535_v16  ;;  %vm3539_vm15 = vweird.f32 %v11625_v31 }
 0x5b6   : > { %v3703_v39 = vrot.slane %v11640_v1, 7  ;;  %9055 = vrot.lane.b32.xlu1 %v9054_v50, %s14219_s15 }
 0x5b7   : > { %v3527_v53 = vsub.f32 1.5, %v3526_v48  ;;  %v3477_v61 = vpop.f32.mrf.mxu2  ;;  %9045 = vrot.lane.b32.xlu2 %v9044_v57, %s14215_s23 }
 0x5b8   : > { %v11664_v9 = vpop.eup %9741  ;;  %v11667_v17 = vsel %vm1871_vm0, 0.0, %v3703_v39  ;;  %v11671_v15 = vadd.f32 %v11569_v6, %v3477_v61  ;;  %v3727_v8 = vsel %vm1871_vm0, %v3703_v39, 0.0 }
 0x5b9   : > { %v3534_v24 = vmul.f32 %v11664_v9, %v11625_v31  ;;  %v3753_v41 = vrot.slane %v11667_v17, 1  ;;  %v3670_v28 = vpop.f32.mrf.mxu0  ;;  %v9049_v58 = vpack.i.bf16 %v11667_v17, %v11621_v10  ;;  %v3754_v4 = vrot.slane %v3727_v8, 1 }
 0x5ba   : > { %9743 = vrsqrt.f32 %v11671_v15  ;;  %v3671_v23 = vadd.f32 %v11579_v54, %v3670_v28  ;;  %v3795_v27 = vrot.slane %v11667_v17, 2  ;;  %v3796_v26 = vrot.slane %v3727_v8, 2 }
 0x5bb   : > { %v3535_v37 = vmul.f32 %v11664_v9, %v3534_v24  ;;  %9050 = vrot.lane.b32.xlu0 %v9049_v58, %s14217_s16  ;;  %v3528_v33 = vmul.f32 %v11617_v38, %v3527_v53  ;;  %v11691_v12 = vsel %vm2013_vm1, %v3753_v41, %v3754_v4  ;;  %vm3540_vm12 = vweird.f32 %v11664_v9 }
 0x5bc   : > { %v11688_v25 = vadd.f32 %v3671_v23, %v3566_v30  ;;  %v11695_v35 = vsel %vm2102_vm2, %v3795_v27, %v3796_v26  ;;  %v9059_v22 = vpack.i.bf16 %v11621_v10, %v11691_v12  ;;  %vm3541_vm4 = vmor %vm3539_vm15, %vm3540_vm12  ;;  %vm3549_vm6 = vweird.f32 %v11671_v15 }
 0x5bd   : > { %v3536_v16 = vmul.f32 0.5, %v3535_v37  ;;  %8675 = vmatmul.msk.f32.gmra.mxu3 %vm2706_vm11, %v11695_v35  ;;  %v3532_v11 = vsel %vm11701_vm10, %v11617_v38, %v3528_v33  ;;  %v9064_v38 = vpack.i.bf16 %v11695_v35, %v11709_v36 }
 0x5be   : > { %v3704_v47 = vrot.slane %v11688_v25, 7  ;;  %v3567_v48 = vmul.f32 %v3532_v11, %v11540_v60 }
 0x5bf   : > { %v3537_v45 = vsub.f32 1.5, %v3536_v16  ;;  %v3480_v55 = vpop.f32.mrf.mxu2  ;;  %9060 = vrot.lane.b32.xlu2 %v9059_v22, %s14219_s15 }
 0x5c0   : > { %v11714_v19 = vpop.eup %9743  ;;  %v11718_v32 = vsel %vm1871_vm0, 0.0, %v3704_v47  ;;  %v11722_v13 = vadd.f32 %v11569_v6, %v3480_v55  ;;  %v3728_v21 = vsel %vm1871_vm0, %v3704_v47, 0.0 }
 0x5c1   : > { %v3544_v46 = vmul.f32 %v11714_v19, %v11671_v15  ;;  %v3756_v3 = vrot.slane %v11718_v32, 1  ;;  %v3673_v0 = vpop.f32.mrf.mxu0  ;;  %v9069_v50 = vpack.i.bf16 %v11718_v32, %v3791_v56  ;;  %v3757_v40 = vrot.slane %v3728_v21, 1 }
 0x5c2   : > { %9745 = vrsqrt.f32 %v11722_v13  ;;  %v3674_v6 = vadd.f32 %v11579_v54, %v3673_v0  ;;  %v3798_v57 = vrot.slane %v11718_v32, 2  ;;  %v3799_v34 = vrot.slane %v3728_v21, 2  ;;  %v4010_v21 = vld [vmem:[%s14307_s11 + $0xd8] sm:$0xff] }
 0x5c3   : > { %v3545_v39 = vmul.f32 %v11714_v19, %v3544_v46  ;;  %9070 = vrot.lane.b32.xlu1 %v9069_v50, %s14217_s16  ;;  %9065 = vrot.lane.b32.xlu0 %v9064_v38, %s14215_s23  ;;  %v3538_v53 = vmul.f32 %v11664_v9, %v3537_v45  ;;  %v11743_v60 = vsel %vm2013_vm1, %v3756_v3, %v3757_v40  ;;  %vm3550_vm5 = vweird.f32 %v11714_v19 }
 0x5c4   : > { %v11740_v56 = vadd.f32 %v3674_v6, %v3567_v48  ;;  %v11748_v62 = vsel %vm2102_vm2, %v3798_v57, %v3799_v34  ;;  %v9074_v8 = vpack.i.bf16 %v11667_v17, %v11743_v60  ;;  %vm11789_vm8 = vmor %vm3549_vm6, %vm3550_vm5  ;;  %v4014_v48 = vld [vmem:[%s14307_s11 + $0xf8] sm:$0xff]  ;;  %vm3559_vm10 = vweird.f32 %v11722_v13 }
 0x5c5   : > { %v3546_v61 = vmul.f32 0.5, %v3545_v39  ;;  %8676 = vmatmul.msk.f32.gmra.mxu3 %vm2706_vm11, %v11748_v62  ;;  %v3542_v31 = vsel %vm3541_vm4, %v11664_v9, %v3538_v53  ;;  %v9079_v58 = vpack.i.bf16 %v11748_v62, %v11637_v42  ;;  %4078 = vmatpush.msra.mxu2 %v4014_v48 }
 0x5c6   : > { %v3705_v63 = vrot.slane %v11740_v56, 7  ;;  %v3568_v9 = vmul.f32 %v3542_v31, %v11546_v59  ;;  %v4013_v31 = vld [vmem:[%s14307_s11 + $0xf0] sm:$0xff] }
 0x5c7   : > { %v3547_v24 = vsub.f32 1.5, %v3546_v61  ;;  %9075 = vrot.lane.b32.xlu2 %v9074_v8, %s14219_s15  ;;  %4079 = vmatpush.msra.mxu2 %v4013_v31 }
 0x5c8   : > { %v11756_v41 = vpop.eup %9745  ;;  %v11759_v28 = vsel %vm1871_vm0, 0.0, %v3705_v63  ;;  %v3729_v30 = vsel %vm1871_vm0, %v3705_v63, 0.0  ;;  %v3998_v63 = vld [vmem:[%s14307_s11 + $0x78] sm:$0xff] }
 0x5c9   : > { %v3554_v23 = vmul.f32 %v11756_v41, %v11722_v13  ;;  %v3759_v4 = vrot.slane %v11759_v28, 1  ;;  %v3676_v37 = vpop.f32.mrf.mxu0  ;;  %v9084_v27 = vpack.i.bf16 %v11759_v28, %v11646_v20  ;;  %v3760_v33 = vrot.slane %v3729_v30, 1  ;;  %4037 = vmatpush.msra.mxu1 %v3998_v63 }
 0x5ca   : > { %v3677_v26 = vadd.f32 %v11579_v54, %v3676_v37  ;;  %v3801_v16 = vrot.slane %v11759_v28, 2  ;;  %v3802_v22 = vrot.slane %v3729_v30, 2  ;;  %v3548_v59 = vmul.f32 %v11714_v19, %v3547_v24  ;;  %v3997_v30 = vld [vmem:[%s14307_s11 + $0x70] sm:$0xff] }
 0x5cb   : > { %v3555_v43 = vmul.f32 %v11756_v41, %v3554_v23  ;;  %9085 = vrot.lane.b32.xlu1 %v9084_v27, %s14217_s16  ;;  %9080 = vrot.lane.b32.xlu0 %v9079_v58, %s14215_s23  ;;  %v11784_v45 = vsel %vm2013_vm1, %v3759_v4, %v3760_v33  ;;  %vm3560_vm9 = vweird.f32 %v11756_v41  ;;  %v4012_v23 = vld [vmem:[%s14307_s11 + $0xe8] sm:$0xff]  ;;  %v4011_v27 = vld [vmem:[%s14307_s11 + $0xe0] sm:$0xff] }
 0x5cc   : > { %v11778_v47 = vadd.f32 %v3677_v26, %v3568_v9  ;;  %v11781_v20 = vsel %vm2102_vm2, %v3801_v16, %v3802_v22  ;;  %v9089_v11 = vpack.i.bf16 %v11718_v32, %v11784_v45  ;;  %v3552_v38 = vsel %vm11789_vm8, %v11714_v19, %v3548_v59  ;;  %v3996_v4 = vld [vmem:[%s14307_s11 + $0x68] sm:$0xff]  ;;  %vm11835_vm12 = vmor %vm3559_vm10, %vm3560_vm9  ;;  %4038 = vmatpush.msra.mxu1 %v3997_v30  ;;  %v3995_v26 = vld [vmem:[%s14307_s11 + $0x60] sm:$0xff] }
 0x5cd   : > { %v3556_v55 = vmul.f32 0.5, %v3555_v43  ;;  %8677 = vmatmul.msk.f32.gmra.mxu3 %vm2706_vm11, %v11781_v20  ;;  %v9094_v0 = vpack.i.bf16 %v11781_v20, %v11691_v12  ;;  %v3569_v34 = vmul.f32 %v3552_v38, %v11552_v44  ;;  %4080 = vmatpush.msra.mxu2 %v4012_v23 }
 0x5ce   : > { %v3706_v46 = vrot.slane %v11778_v47, 7  ;;  %4039 = vmatpush.msra.mxu1 %v3996_v4 }
 0x5cf   : > { %v3557_v3 = vsub.f32 1.5, %v3556_v55  ;;  %9090 = vrot.lane.b32.xlu2 %v9089_v11, %s14219_s15  ;;  %4081 = vmatpush.msra.mxu2 %v4011_v27  ;;  %v4006_v27 = vld [vmem:[%s14307_s11 + $0xb8] sm:$0xff] }
 0x5d0   : > { %v11800_v15 = vsel %vm1871_vm0, 0.0, %v3706_v46  ;;  %v3730_v50 = vsel %vm1871_vm0, %v3706_v46, 0.0  ;;  %v3994_v46 = vld [vmem:[%s14307_s11 + $0x58] sm:$0xff]  ;;  %4040 = vmatpush.msra.mxu1 %v3995_v26  ;;  %v3989_v26 = vld [vmem:[%s14307_s11 + $0x30] sm:$0xff] }
 0x5d1   : > { %v3762_v6 = vrot.slane %v11800_v15, 1  ;;  %v3679_v40 = vpop.f32.mrf.mxu0  ;;  %v9099_v39 = vpack.i.bf16 %v11800_v15, %v11695_v35  ;;  %v3763_v19 = vrot.slane %v3730_v50, 1  ;;  %v3804_v57 = vrot.slane %v11800_v15, 2  ;;  %4082 = vmatpush.msra.mxu2 %v4010_v21  ;;  %v3985_v21 = vld [vmem:[%s14307_s11 + $0x10] sm:$0xff] }
 0x5d2   : > { %v3680_v53 = vadd.f32 %v11579_v54, %v3679_v40  ;;  %v3805_v61 = vrot.slane %v3730_v50, 2  ;;  %v3558_v8 = vmul.f32 %v11756_v41, %v3557_v3  ;;  %v4009_v50 = vld [vmem:[%s14307_s11 + $0xd0] sm:$0xff]  ;;  %4041 = vmatpush.msra.mxu1 %v3994_v46  ;;  %v4008_v40 = vld [vmem:[%s14307_s11 + $0xc8] sm:$0xff] }
 0x5d3   : > { %9100 = vrot.lane.b32.xlu1 %v9099_v39, %s14217_s16  ;;  %9095 = vrot.lane.b32.xlu0 %v9094_v0, %s14215_s23  ;;  %v11817_v35 = vsel %vm2013_vm1, %v3762_v6, %v3763_v19  ;;  %v3992_v19 = vld [vmem:[%s14307_s11 + $0x48] sm:$0xff] }
 0x5d4   : > { %v11822_v24 = vadd.f32 %v3680_v53, %v3569_v34  ;;  %v11825_v44 = vsel %vm2102_vm2, %v3804_v57, %v3805_v61  ;;  %v9104_v58 = vpack.i.bf16 %v11759_v28, %v11817_v35  ;;  %v3562_v13 = vsel %vm11835_vm12, %v11756_v41, %v3558_v8  ;;  %4083 = vmatpush.msra.mxu2 %v4009_v50  ;;  %v4007_v57 = vld [vmem:[%s14307_s11 + $0xc0] sm:$0xff]  ;;  %v3984_v46 = vld [vmem:[%s14307_s11 + $0x8] sm:$0xff] }
 0x5d5   : > { %8678 = vmatmul.msk.f32.gmra.mxu3 %vm2706_vm11, %v11825_v44  ;;  %v9109_v16 = vpack.i.bf16 %v11825_v44, %v11743_v60  ;;  %v3570_v3 = vmul.f32 %v3562_v13, %v11558_v51  ;;  %v4005_v13 = vld [vmem:[%s14307_s11 + $0xb0] sm:$0xff] }
 0x5d6   : > { %v3707_v37 = vrot.slane %v11822_v24, 7  ;;  %4084 = vmatpush.msra.mxu2 %v4008_v40 }
 0x5d7   : > { %9105 = vrot.lane.b32.xlu2 %v9104_v58, %s14219_s15 }
 0x5d8   : > { %v11848_v33 = vsel %vm1871_vm0, 0.0, %v3707_v37  ;;  %v3731_v22 = vsel %vm1871_vm0, %v3707_v37, 0.0  ;;  %4085 = vmatpush.msra.mxu2 %v4007_v57  ;;  %v3991_v37 = vld [vmem:[%s14307_s11 + $0x40] sm:$0xff] }
 0x5d9   : > { %v3765_v43 = vrot.slane %v11848_v33, 1  ;;  %v3682_v59 = vpop.f32.mrf.mxu0  ;;  %v9114_v41 = vpack.i.bf16 %v11848_v33, %v11748_v62  ;;  %v3766_v55 = vrot.slane %v3731_v22, 1  ;;  %v3807_v11 = vrot.slane %v11848_v33, 2 }
 0x5da   : > { %v3683_v38 = vadd.f32 %v11579_v54, %v3682_v59  ;;  %v3808_v0 = vrot.slane %v3731_v22, 2  ;;  %v3993_v54 = vld [vmem:[%s14307_s11 + $0x50] sm:$0xff]  ;;  %4086 = vmatpush.msra.mxu2 %v4006_v27  ;;  %v3988_v22 = vld [vmem:[%s14307_s11 + $0x28] sm:$0xff]  ;;  %v3987_v59 = vld [vmem:[%s14307_s11 + $0x20] sm:$0xff] }
 0x5db   : > { %9115 = vrot.lane.b32.xlu1 %v9114_v41, %s14217_s16  ;;  %9110 = vrot.lane.b32.xlu0 %v9109_v16, %s14215_s23  ;;  %v11865_v62 = vsel %vm2013_vm1, %v3765_v43, %v3766_v55  ;;  %v4004_v16 = vld [vmem:[%s14307_s11 + $0xa8] sm:$0xff]  ;;  %v4003_v43 = vld [vmem:[%s14307_s11 + $0xa0] sm:$0xff] }
 0x5dc   : > { %v11868_v48 = vadd.f32 %v3683_v38, %v3570_v3  ;;  %v3809_v6 = vsel %vm2102_vm2, %v3807_v11, %v3808_v0  ;;  %v9119_v51 = vpack.i.bf16 %v11800_v15, %v11865_v62  ;;  %4042 = vmatpush.msra.mxu1 %v3993_v54  ;;  %4087 = vmatpush.msra.mxu2 %v4005_v13  ;;  %v4002_v41 = vld [vmem:[%s14307_s11 + $0x98] sm:$0xff]  ;;  %v4001_v11 = vld [vmem:[%s14307_s11 + $0x90] sm:$0xff]  ;;  %v3983_v3 = vld [vmem:[%s14307_s11] sm:$0xff] }
 0x5dd   : > { %8679 = vmatmul.msk.f32.gmra.mxu3 %vm2706_vm11, %v3809_v6  ;;  %v9124_v53 = vpack.i.bf16 %v3809_v6, %v11784_v45  ;;  %v3986_v55 = vld [vmem:[%s14307_s11 + $0x18] sm:$0xff]  ;;  %v4000_v38 = vld [vmem:[%s14307_s11 + $0x88] sm:$0xff]  ;;  %v3999_v0 = vld [vmem:[%s14307_s11 + $0x80] sm:$0xff] }
 0x5de   : > { %v3708_v39 = vrot.slane %v11868_v48, 7  ;;  %4043 = vmatpush.msra.mxu1 %v3992_v19  ;;  %4088 = vmatpush.msra.mxu2 %v4004_v16 }
 0x5df   : > { %9120 = vrot.lane.b32.xlu2 %v9119_v51, %s14219_s15 }
 0x5e0   : > { %v3724_v34 = vsel %vm1871_vm0, 0.0, %v3708_v39  ;;  %v3732_v61 = vsel %vm1871_vm0, %v3708_v39, 0.0  ;;  %4044 = vmatpush.msra.mxu1 %v3991_v37  ;;  %4089 = vmatpush.msra.mxu2 %v4003_v43 }
 0x5e1   : > { %v3857_v8 = vrot.slane %v3724_v34, 1  ;;  %v9129_v63 = vpack.i.bf16 %v3724_v34, %v11781_v20  ;;  %v3858_v31 = vrot.slane %v3732_v61, 1  ;;  %v3868_v58 = vrot.slane %v3724_v34, 2 }
 0x5e2   : > { %v3869_v30 = vrot.slane %v3732_v61, 2  ;;  %4090 = vmatpush.msra.mxu2 %v4002_v41 }
 0x5e3   : > { %9130 = vrot.lane.b32.xlu1 %v9129_v63, %s14217_s16  ;;  %9125 = vrot.lane.b32.xlu0 %v9124_v53, %s14215_s23  ;;  %v11887_v23 = vsel %vm2013_vm1, %v3857_v8, %v3858_v31 }
 0x5e4   : > { %v3870_v4 = vsel %vm2102_vm2, %v3868_v58, %v3869_v30  ;;  %v9134_v20 = vpack.i.bf16 %v11848_v33, %v11887_v23  ;;  %4091 = vmatpush.msra.mxu2 %v4001_v11 }
 0x5e5   : > { %8680 = vmatmul.msk.f32.gmra.mxu3 %vm2706_vm11, %v3870_v4  ;;  %v9139_v9 = vpack.i.bf16 %v3870_v4, %v11817_v35 }
 0x5e6   : > { %4092 = vmatpush.msra.mxu2 %v4000_v38 }
 0x5e7   : > { %9135 = vrot.lane.b32.xlu2 %v9134_v20, %s14219_s15 }
 0x5e8   : > { %4093 = vmatpush.msra.mxu2 %v3999_v0 }
 0x5eb   : > { %3820 = vrot.lane.b32.xlu1 %v11825_v44, %s14217_s16  ;;  %9140 = vrot.lane.b32.xlu0 %v9139_v9, %s14215_s23  ;;  %v3990_v44 = vld [vmem:[%s14307_s11 + $0x38] sm:$0xff] }
 0x5ec   : > { %4045 = vmatpush.msra.mxu1 %v3990_v44 }
 0x5ed   : > { %8681 = vmatmul.msk.f32.gmra.mxu3 %vm2706_vm11, %v10577_v18 }
 0x5ee   : > { %4046 = vmatpush.msra.mxu1 %v3989_v26 }
 0x5ef   : > { %3780 = vrot.lane.b32.xlu2 %v11865_v62, %s14215_s23 }
 0x5f0   : > { %4047 = vmatpush.msra.mxu1 %v3988_v22 }
 0x5f2   : > { %4048 = vmatpush.msra.mxu1 %v3987_v59 }
 0x5f3   : > { %3846 = vrot.lane.b32.xlu1 %v3724_v34, %s14219_s15  ;;  %3822 = vrot.lane.b32.xlu0 %v3809_v6, %s14217_s16 }
 0x5f4   : > { %4049 = vmatpush.msra.mxu1 %v3986_v55 }
 0x5f6   : > { %4050 = vmatpush.msra.mxu1 %v3985_v21 }
 0x5f8   : > { %4051 = vmatpush.msra.mxu1 %v3984_v46 }
 0x5fa   : > { %4052 = vmatpush.msra.mxu1 %v3983_v3 }
 0x611   : > { %v9046_v50 = vpop.permute.xlu2 %9045 }
 0x612   : > { %v9047_v40 = vunpack.i.l.bf16 %v9046_v50  ;;  %v9048_v63 = vunpack.i.h.bf16 %v9046_v50 }
 0x614   : > { %v3959_v53 = vsel %vm2706_vm11, %v11709_v36, %v9047_v40  ;;  %v3960_v20 = vsel %vm2706_vm11, %v11637_v42, %v9048_v63 }
 0x619   : > { %v9061_v6 = vpop.permute.xlu2 %9060 }
 0x61a   : > { %v9062_v44 = vunpack.i.l.bf16 %v9061_v6  ;;  %v9063_v36 = vunpack.i.h.bf16 %v9061_v6 }
 0x621   : > { %v9076_v61 = vpop.permute.xlu2 %9075 }
 0x622   : > { %v9078_v0 = vunpack.i.h.bf16 %v9076_v61 }
 0x628   : > { %v9056_v51 = vpop.permute.xlu1 %9055 }
 0x629   : > { %v9058_v54 = vunpack.i.h.bf16 %v9056_v51  ;;  %v9057_v34 = vunpack.i.l.bf16 %v9056_v51  ;;  %v9091_v43 = vpop.permute.xlu2 %9090 }
 0x62a   : > { %v9093_v63 = vunpack.i.h.bf16 %v9091_v43 }
 0x62b   : > { %v3951_v39 = vsel %vm3190_vm14, %v11450_v7, %v9058_v54 }
 0x62c   : > { %4053 = vmatmul.f32.vlgmr.msra.gmra.mxu1 %v3951_v39 }
 0x62d   : > { %v9051_v19 = vpop.permute.xlu0 %9050 }
 0x62e   : > { %v9052_v57 = vunpack.i.l.bf16 %v9051_v19  ;;  %v9053_v58 = vunpack.i.h.bf16 %v9051_v19 }
 0x630   : > { %v3967_v8 = vsel %vm3181_vm13, %v3959_v53, %v9052_v57  ;;  %v3968_v27 = vsel %vm3181_vm13, %v3960_v20, %v9053_v58 }
 0x631   : > { %v3975_v31 = vsel %vm3190_vm14, %v3967_v8, %v9057_v34  ;;  %v3976_v16 = vsel %vm3190_vm14, %v3968_v27, %v9062_v44  ;;  %v9106_v39 = vpop.permute.xlu2 %9105 }
 0x632   : > { %4094 = vmatmul.f32.vlgmr.msra.gmra.mxu2 %v3975_v31 }
 0x635   : > { %v9071_v30 = vpop.permute.xlu1 %9070  ;;  %v9066_v4 = vpop.permute.xlu0 %9065 }
 0x636   : > { %v9072_v9 = vunpack.i.l.bf16 %v9071_v30  ;;  %v9067_v37 = vunpack.i.l.bf16 %v9066_v4  ;;  %v9068_v13 = vunpack.i.h.bf16 %v9066_v4  ;;  %v9073_v59 = vunpack.i.h.bf16 %v9071_v30 }
 0x638   : > { %v3937_v26 = vsel %vm2706_vm11, %v11604_v5, %v9067_v37  ;;  %v3961_v42 = vsel %vm2706_vm11, %v11691_v12, %v9068_v13  ;;  %v9077_v5 = vunpack.i.l.bf16 %v9076_v61 }
 0x639   : > { %v3944_v22 = vsel %vm3181_vm13, %v3937_v26, %v9072_v9  ;;  %v3969_v3 = vsel %vm3181_vm13, %v3961_v42, %v9073_v59 }
 0x63a   : > { %4097 = vmatmul.f32.gmra.mxu2 %v3976_v16  ;;  %v3952_v41 = vsel %vm3190_vm14, %v3944_v22, %v9063_v36  ;;  %v3977_v6 = vsel %vm3190_vm14, %v3969_v3, %v9077_v5  ;;  %v9107_v36 = vunpack.i.l.bf16 %v9106_v39  ;;  %v9108_v16 = vunpack.i.h.bf16 %v9106_v39 }
 0x63b   : > { %4056 = vmatmul.f32.gmra.mxu1 %v3952_v41 }
 0x63d   : > { %v9086_v55 = vpop.permute.xlu1 %9085  ;;  %v9081_v11 = vpop.permute.xlu0 %9080 }
 0x63e   : > { %v9087_v21 = vunpack.i.l.bf16 %v9086_v55  ;;  %v9082_v46 = vunpack.i.l.bf16 %v9081_v11  ;;  %v9083_v38 = vunpack.i.h.bf16 %v9081_v11  ;;  %v9088_v54 = vunpack.i.h.bf16 %v9086_v55 }
 0x640   : > { %v3938_v50 = vsel %vm2706_vm11, %v11621_v10, %v9082_v46  ;;  %v3962_v40 = vsel %vm2706_vm11, %v11743_v60, %v9083_v38  ;;  %v9092_v10 = vunpack.i.l.bf16 %v9091_v43 }
 0x641   : > { %v3945_v51 = vsel %vm3181_vm13, %v3938_v50, %v9087_v21  ;;  %v3970_v61 = vsel %vm3181_vm13, %v3962_v40, %v9088_v54 }
 0x642   : > { %4100 = vmatmul.f32.gmra.mxu2 %v3977_v6  ;;  %v3953_v12 = vsel %vm3190_vm14, %v3945_v51, %v9078_v0  ;;  %v3978_v58 = vsel %vm3190_vm14, %v3970_v61, %v9092_v10 }
 0x643   : > { %4059 = vmatmul.f32.gmra.mxu1 %v3953_v12 }
 0x645   : > { %v9101_v19 = vpop.permute.xlu1 %9100  ;;  %v9096_v57 = vpop.permute.xlu0 %9095 }
 0x646   : > { %v9102_v34 = vunpack.i.l.bf16 %v9101_v19  ;;  %v9097_v53 = vunpack.i.l.bf16 %v9096_v57  ;;  %v9098_v8 = vunpack.i.h.bf16 %v9096_v57  ;;  %v9103_v4 = vunpack.i.h.bf16 %v9101_v19 }
 0x648   : > { %v3939_v31 = vsel %vm2706_vm11, %v11667_v17, %v9097_v53  ;;  %v3963_v20 = vsel %vm2706_vm11, %v11784_v45, %v9098_v8  ;;  %v9121_v17 = vpop.permute.xlu2 %9120 }
 0x649   : > { %v3946_v30 = vsel %vm3181_vm13, %v3939_v31, %v9102_v34  ;;  %v3971_v13 = vsel %vm3181_vm13, %v3963_v20, %v9103_v4  ;;  %v9122_v5 = vunpack.i.l.bf16 %v9121_v17  ;;  %v9123_v38 = vunpack.i.h.bf16 %v9121_v17 }
 0x64a   : > { %4103 = vmatmul.f32.gmra.mxu2 %v3978_v58  ;;  %v3954_v60 = vsel %vm3190_vm14, %v3946_v30, %v9093_v63  ;;  %v3979_v43 = vsel %vm3190_vm14, %v3971_v13, %v9107_v36  ;;  %v11990_v13 = vld [vmem:[%s14320_s1] ss:$0 sm:$0xff]  ;;  %s1802_s1 = sadd.s32 1, %s8631_s28 }
 0x64b   : > { %4062 = vmatmul.f32.gmra.mxu1 %v3954_v60  ;;  %s1803_s7 = sld [smem:[#allocation2 + %s1802_s1]] }
 0x64c   : > { %s14335_s1 = sld [smem:[#allocation47_spill]] }
 0x64d   : > { %v9116_v9 = vpop.permute.xlu1 %9115  ;;  %v9111_v37 = vpop.permute.xlu0 %9110 }
 0x64e   : > { %v9117_v27 = vunpack.i.l.bf16 %v9116_v9  ;;  %v9112_v44 = vunpack.i.l.bf16 %v9111_v37  ;;  %v9113_v26 = vunpack.i.h.bf16 %v9111_v37  ;;  %v9118_v41 = vunpack.i.h.bf16 %v9116_v9  ;;  %v4500_v37 = vld [vmem:[%s14319_s26 + $0x110] sm:$0xff] }
 0x650   : > { %v3940_v22 = vsel %vm2706_vm11, %v11718_v32, %v9112_v44  ;;  %v3964_v42 = vsel %vm2706_vm11, %v11817_v35, %v9113_v26  ;;  %v9136_v50 = vpop.permute.xlu2 %9135  ;;  %v4498_v44 = vld [vmem:[%s14319_s26 + $0x100] sm:$0xff] }
 0x651   : > { %v3947_v59 = vsel %vm3181_vm13, %v3940_v22, %v9117_v27  ;;  %v3972_v3 = vsel %vm3181_vm13, %v3964_v42, %v9118_v41  ;;  %v9137_v34 = vunpack.i.l.bf16 %v9136_v50  ;;  %v9138_v53 = vunpack.i.h.bf16 %v9136_v50  ;;  %v4136_v27 = vpop.f32.mrf.mxu3 }
 0x652   : > { %4106 = vmatmul.f32.gmra.mxu2 %v3979_v43  ;;  %v3955_v45 = vsel %vm3190_vm14, %v3947_v59, %v9108_v16  ;;  %v3980_v6 = vsel %vm3190_vm14, %v3972_v3, %v9122_v5 }
 0x653   : > { %4065 = vmatmul.f32.gmra.mxu1 %v3955_v45 }
 0x655   : > { %v9131_v55 = vpop.permute.xlu1 %9130  ;;  %v9126_v11 = vpop.permute.xlu0 %9125 }
 0x656   : > { %v9132_v21 = vunpack.i.l.bf16 %v9131_v55  ;;  %v9127_v46 = vunpack.i.l.bf16 %v9126_v11  ;;  %v9128_v32 = vunpack.i.h.bf16 %v9126_v11  ;;  %v9133_v54 = vunpack.i.h.bf16 %v9131_v55 }
 0x658   : > { %v3941_v0 = vsel %vm2706_vm11, %v11759_v28, %v9127_v46  ;;  %v3965_v12 = vsel %vm2706_vm11, %v11865_v62, %v9128_v32  ;;  %v3781_v63 = vpop.permute.xlu2 %3780 }
 0x659   : > { %v3948_v51 = vsel %vm3181_vm13, %v3941_v0, %v9132_v21  ;;  %v3973_v57 = vsel %vm3181_vm13, %v3965_v12, %v9133_v54  ;;  %v4139_v17 = vpop.f32.mrf.mxu3 }
 0x65a   : > { %4109 = vmatmul.f32.gmra.mxu2 %v3980_v6  ;;  %v3956_v35 = vsel %vm3190_vm14, %v3948_v51, %v9123_v38  ;;  %v3981_v10 = vsel %vm3190_vm14, %v3973_v57, %v9137_v34 }
 0x65b   : > { %4068 = vmatmul.f32.gmra.mxu1 %v3956_v35 }
 0x65d   : > { %v3821_v40 = vpop.permute.xlu1 %3820  ;;  %v9141_v39 = vpop.permute.xlu0 %9140 }
 0x65e   : > { %v9142_v19 = vunpack.i.l.bf16 %v9141_v39  ;;  %v9143_v28 = vunpack.i.h.bf16 %v9141_v39 }
 0x660   : > { %v3942_v61 = vsel %vm2706_vm11, %v11800_v15, %v9142_v19  ;;  %v3966_v31 = vsel %vm2706_vm11, %v11887_v23, %v9143_v28  ;;  %v3943_v15 = vsel %vm2706_vm11, %v11848_v33, %v3781_v63  ;;  %v4501_v23 = vld [vmem:[%s14319_s26 + $0x118] sm:$0xff]  ;;  %v4499_v33 = vld [vmem:[%s14319_s26 + $0x108] sm:$0xff] }
 0x661   : > { %v3949_v8 = vsel %vm3181_vm13, %v3942_v61, %v3821_v40  ;;  %v3974_v30 = vsel %vm3181_vm13, %v3966_v31, %v11481_v52  ;;  %4614 = vmatpush.msrb.mxu2 %v4501_v23  ;;  %v4142_v55 = vpop.f32.mrf.mxu3 }
 0x662   : > { %4112 = vmatmul.f32.gmra.mxu2 %v3981_v10  ;;  %v3957_v62 = vsel %vm3190_vm14, %v3949_v8, %v9138_v53  ;;  %v3982_v20 = vsel %vm3190_vm14, %v3974_v30, %v11490_v49 }
 0x663   : > { %4071 = vmatmul.f32.gmra.mxu1 %v3957_v62  ;;  %4615 = vmatpush.msrb.mxu2 %v4500_v37 }
 0x665   : > { %v3823_v58 = vpop.permute.xlu0 %3822  ;;  %v3847_v4 = vpop.permute.xlu1 %3846  ;;  %4616 = vmatpush.msrb.mxu2 %v4499_v33 }
 0x666   : > { %v3950_v60 = vsel %vm3181_vm13, %v3943_v15, %v3823_v58 }
 0x667   : > { %v3958_v9 = vsel %vm3190_vm14, %v3950_v60, %v3847_v4  ;;  %4617 = vmatpush.msrb.mxu2 %v4498_v44 }
 0x669   : > { %v4145_v53 = vpop.f32.mrf.mxu3 }
 0x66a   : > { %4115 = vmatmul.f32.gmra.mxu2 %v3982_v20 }
 0x66b   : > { %4074 = vmatmul.f32.gmra.mxu1 %v3958_v9 }
 0x6a9   : > { %v4054_v36 = vpop.f32.mrf.mxu1 }
 0x6aa   : > { %v4055_v26 = vadd.f32 %v11990_v13, %v4054_v36 }
 0x6b5   : > { %v4095_v16 = vpop.f32.mrf.mxu2 }
 0x6b6   : > { %v4096_v22 = vadd.f32 %v4095_v16, %v4055_v26 }
 0x6b8   : > { %v4137_v43 = vadd.f32 %v4136_v27, %v4096_v22  ;;  %v4057_v59 = vpop.f32.mrf.mxu1 }
 0x6b9   : > { %v4058_v42 = vadd.f32 %v11990_v13, %v4057_v59 }
 0x6ba   : > { %v4160_v41 = vmul.f32 0.01, %v4137_v43 }
 0x6bc   : > { %v4168_v45 = vmax.f32 %v4137_v43, %v4160_v41  ;;  %v4148_v43 = vpop.f32.mrf.mxu3 }
 0x6bd   : > { %v4098_v11 = vpop.f32.mrf.mxu2 }
 0x6be   : > { %v4184_v21 = vrot.slane %v4168_v45, 7  ;;  %v4099_v46 = vadd.f32 %v4098_v11, %v4058_v42 }
 0x6c0   : > { %v11995_v3 = vsel %vm1871_vm0, 0.0, %v4184_v21  ;;  %v4208_v5 = vsel %vm1871_vm0, %v4184_v21, 0.0  ;;  %v4140_v32 = vadd.f32 %v4139_v17, %v4099_v46  ;;  %v4060_v38 = vpop.f32.mrf.mxu1 }
 0x6c1   : > { %v4230_v0 = vrot.slane %v11995_v3, 1  ;;  %v4231_v50 = vrot.slane %v4208_v5, 1  ;;  %v4272_v6 = vrot.slane %v11995_v3, 2  ;;  %v4273_v51 = vrot.slane %v4208_v5, 2 }
 0x6c2   : > { %v4161_v54 = vmul.f32 0.01, %v4140_v32  ;;  %v4061_v39 = vadd.f32 %v11990_v13, %v4060_v38 }
 0x6c3   : > { %v12001_v35 = vsel %vm2013_vm1, %v4230_v0, %v4231_v50  ;;  %v4274_v12 = vsel %vm2102_vm2, %v4272_v6, %v4273_v51 }
 0x6c4   : > { %v4169_v40 = vmax.f32 %v4140_v32, %v4161_v54  ;;  %v9144_v19 = vpack.i.bf16 %v12001_v35, %v4274_v12 }
 0x6c5   : > { %v4101_v57 = vpop.f32.mrf.mxu2 }
 0x6c6   : > { %v4185_v34 = vrot.slane %v4169_v40, 7  ;;  %v4102_v28 = vadd.f32 %v4101_v57, %v4061_v39  ;;  %9145 = vrot.lane.b32.xlu0 %v9144_v19, %s14215_s23 }
 0x6c8   : > { %v12008_v61 = vsel %vm1871_vm0, 0.0, %v4185_v34  ;;  %v4209_v10 = vsel %vm1871_vm0, %v4185_v34, 0.0  ;;  %v4143_v8 = vadd.f32 %v4142_v55, %v4102_v28  ;;  %v4063_v62 = vpop.f32.mrf.mxu1 }
 0x6c9   : > { %v4234_v63 = vrot.slane %v4209_v10, 1  ;;  %v4276_v31 = vrot.slane %v4209_v10, 2  ;;  %v9149_v58 = vpack.i.bf16 %v4274_v12, %v12008_v61  ;;  %v4275_v30 = vrot.slane %v12008_v61, 2 }
 0x6ca   : > { %v4162_v15 = vmul.f32 0.01, %v4143_v8  ;;  %v4233_v4 = vrot.slane %v12008_v61, 1  ;;  %v4064_v20 = vadd.f32 %v11990_v13, %v4063_v62 }
 0x6cb   : > { %9150 = vrot.lane.b32.xlu1 %v9149_v58, %s14217_s16  ;;  %v4277_v9 = vsel %vm2102_vm2, %v4275_v30, %v4276_v31 }
 0x6cc   : > { %v4170_v60 = vmax.f32 %v4143_v8, %v4162_v15  ;;  %v12018_v23 = vsel %vm2013_vm1, %v4233_v4, %v4234_v63  ;;  %8682 = vmatmul.msk.f32.vlgmr.msrb.gmra.mxu2 %vm2706_vm11, %v4277_v9  ;;  %v4151_v8 = vpop.f32.mrf.mxu3 }
 0x6cd   : > { %v4104_v37 = vpop.f32.mrf.mxu2  ;;  %v9154_v27 = vpack.i.bf16 %v12018_v23, %v11995_v3  ;;  %v9159_v33 = vpack.i.bf16 %v12018_v23, %v4277_v9 }
 0x6ce   : > { %v4186_v44 = vrot.slane %v4170_v60, 7  ;;  %v4105_v36 = vadd.f32 %v4104_v37, %v4064_v20  ;;  %v4497_v37 = vld [vmem:[%s14319_s26 + $0xf8] sm:$0xff] }
 0x6cf   : > { %9155 = vrot.lane.b32.xlu2 %v9154_v27, %s14219_s15  ;;  %9160 = vrot.lane.b32.xlu0 %v9159_v33, %s14215_s23 }
 0x6d0   : > { %v12027_v17 = vsel %vm1871_vm0, 0.0, %v4186_v44  ;;  %v4210_v26 = vsel %vm1871_vm0, %v4186_v44, 0.0  ;;  %v4146_v16 = vadd.f32 %v4145_v53, %v4105_v36  ;;  %v4066_v22 = vpop.f32.mrf.mxu1  ;;  %4561 = vmatpush.msrb.mxu1 %v4497_v37 }
 0x6d1   : > { %v4237_v59 = vrot.slane %v4210_v26, 1  ;;  %v9164_v41 = vpack.i.bf16 %v4277_v9, %v12027_v17  ;;  %v4278_v45 = vrot.slane %v12027_v17, 2  ;;  %v4279_v55 = vrot.slane %v4210_v26, 2  ;;  %v4481_v9 = vld [vmem:[%s14319_s26 + $0x78] sm:$0xff]  ;;  %v4480_v26 = vld [vmem:[%s14319_s26 + $0x70] sm:$0xff] }
 0x6d2   : > { %v4163_v42 = vmul.f32 0.01, %v4146_v16  ;;  %v4236_v11 = vrot.slane %v12027_v17, 1  ;;  %v4067_v46 = vadd.f32 %v11990_v13, %v4066_v22  ;;  %4520 = vmatpush.msra.mxu0 %v4481_v9 }
 0x6d3   : > { %9165 = vrot.lane.b32.xlu1 %v9164_v41, %s14217_s16  ;;  %v4280_v5 = vsel %vm2102_vm2, %v4278_v45, %v4279_v55 }
 0x6d4   : > { %v4171_v21 = vmax.f32 %v4146_v16, %v4163_v42  ;;  %v12037_v32 = vsel %vm2013_vm1, %v4236_v11, %v4237_v59  ;;  %8683 = vmatmul.msk.f32.gmra.mxu2 %vm2706_vm11, %v4280_v5  ;;  %4521 = vmatpush.msra.mxu0 %v4480_v26 }
 0x6d5   : > { %v9174_v38 = vpack.i.bf16 %v12037_v32, %v4280_v5  ;;  %v4107_v0 = vpop.f32.mrf.mxu2  ;;  %v9169_v50 = vpack.i.bf16 %v12037_v32, %v12008_v61 }
 0x6d6   : > { %v4187_v6 = vrot.slane %v4171_v21, 7  ;;  %v4108_v51 = vadd.f32 %v4107_v0, %v4067_v46  ;;  %v4154_v46 = vpop.f32.mrf.mxu3 }
 0x6d7   : > { %9170 = vrot.lane.b32.xlu2 %v9169_v50, %s14219_s15  ;;  %9175 = vrot.lane.b32.xlu0 %v9174_v38, %s14215_s23 }
 0x6d8   : > { %v12046_v54 = vsel %vm1871_vm0, 0.0, %v4187_v6  ;;  %v4211_v12 = vsel %vm1871_vm0, %v4187_v6, 0.0  ;;  %v4149_v40 = vadd.f32 %v4148_v43, %v4108_v51  ;;  %v4069_v39 = vpop.f32.mrf.mxu1  ;;  %v4496_v51 = vld [vmem:[%s14319_s26 + $0xf0] sm:$0xff] }
 0x6d9   : > { %v4240_v19 = vrot.slane %v4211_v12, 1  ;;  %v9179_v57 = vpack.i.bf16 %v4280_v5, %v12046_v54  ;;  %v4281_v34 = vrot.slane %v12046_v54, 2  ;;  %v4282_v53 = vrot.slane %v4211_v12, 2  ;;  %v4479_v12 = vld [vmem:[%s14319_s26 + $0x68] sm:$0xff]  ;;  %4562 = vmatpush.msrb.mxu1 %v4496_v51 }
 0x6da   : > { %v4164_v28 = vmul.f32 0.01, %v4149_v40  ;;  %v4239_v10 = vrot.slane %v12046_v54, 1  ;;  %v4070_v63 = vadd.f32 %v11990_v13, %v4069_v39  ;;  %4522 = vmatpush.msra.mxu0 %v4479_v12 }
 0x6db   : > { %9180 = vrot.lane.b32.xlu1 %v9179_v57, %s14217_s16  ;;  %v4283_v31 = vsel %vm2102_vm2, %v4281_v34, %v4282_v53  ;;  %v4495_v34 = vld [vmem:[%s14319_s26 + $0xe8] sm:$0xff] }
 0x6dc   : > { %v4172_v62 = vmax.f32 %v4149_v40, %v4164_v28  ;;  %v12056_v58 = vsel %vm2013_vm1, %v4239_v10, %v4240_v19  ;;  %8684 = vmatmul.msk.f32.gmra.mxu2 %vm2706_vm11, %v4283_v31  ;;  %v4478_v28 = vld [vmem:[%s14319_s26 + $0x60] sm:$0xff]  ;;  %4563 = vmatpush.msrb.mxu1 %v4495_v34 }
 0x6dd   : > { %v9189_v15 = vpack.i.bf16 %v12056_v58, %v4283_v31  ;;  %v4110_v30 = vpop.f32.mrf.mxu2  ;;  %v9184_v4 = vpack.i.bf16 %v12056_v58, %v12027_v17  ;;  %4523 = vmatpush.msra.mxu0 %v4478_v28 }
 0x6de   : > { %v4188_v60 = vrot.slane %v4172_v62, 7  ;;  %v4111_v20 = vadd.f32 %v4110_v30, %v4070_v63  ;;  %v4494_v62 = vld [vmem:[%s14319_s26 + $0xe0] sm:$0xff]  ;;  %v4477_v63 = vld [vmem:[%s14319_s26 + $0x58] sm:$0xff]  ;;  %v4157_v26 = vpop.f32.mrf.mxu3 }
 0x6df   : > { %9185 = vrot.lane.b32.xlu2 %v9184_v4, %s14219_s15  ;;  %9190 = vrot.lane.b32.xlu0 %v9189_v15, %s14215_s23 }
 0x6e0   : > { %v12067_v27 = vsel %vm1871_vm0, 0.0, %v4188_v60  ;;  %v4212_v33 = vsel %vm1871_vm0, %v4188_v60, 0.0  ;;  %v4152_v44 = vadd.f32 %v4151_v8, %v4111_v20  ;;  %v4072_v36 = vpop.f32.mrf.mxu1  ;;  %v4493_v60 = vld [vmem:[%s14319_s26 + $0xd8] sm:$0xff]  ;;  %v4476_v20 = vld [vmem:[%s14319_s26 + $0x50] sm:$0xff]  ;;  %4564 = vmatpush.msrb.mxu1 %v4494_v62  ;;  %4524 = vmatpush.msra.mxu0 %v4477_v63 }
 0x6e1   : > { %v4243_v16 = vrot.slane %v4212_v33, 1  ;;  %v9194_v22 = vpack.i.bf16 %v4283_v31, %v12067_v27  ;;  %v4284_v43 = vrot.slane %v12067_v27, 2  ;;  %v4285_v41 = vrot.slane %v4212_v33, 2  ;;  %v4488_v62 = vld [vmem:[%s14319_s26 + $0xb0] sm:$0xff] }
 0x6e2   : > { %v4165_v59 = vmul.f32 0.01, %v4152_v44  ;;  %v4242_v45 = vrot.slane %v12067_v27, 1  ;;  %v4073_v55 = vadd.f32 %v11990_v13, %v4072_v36  ;;  %4565 = vmatpush.msrb.mxu1 %v4493_v60  ;;  %4525 = vmatpush.msra.mxu0 %v4476_v20 }
 0x6e3   : > { %9195 = vrot.lane.b32.xlu1 %v9194_v22, %s14217_s16  ;;  %v4286_v11 = vsel %vm2102_vm2, %v4284_v43, %v4285_v41  ;;  %v4475_v22 = vld [vmem:[%s14319_s26 + $0x48] sm:$0xff]  ;;  %v4474_v41 = vld [vmem:[%s14319_s26 + $0x40] sm:$0xff] }
 0x6e4   : > { %v4173_v42 = vmax.f32 %v4152_v44, %v4165_v59  ;;  %v12078_v21 = vsel %vm2013_vm1, %v4242_v45, %v4243_v16  ;;  %8685 = vmatmul.msk.f32.gmra.mxu2 %vm2706_vm11, %v4286_v11  ;;  %v4492_v16 = vld [vmem:[%s14319_s26 + $0xd0] sm:$0xff]  ;;  %v4491_v45 = vld [vmem:[%s14319_s26 + $0xc8] sm:$0xff]  ;;  %4526 = vmatpush.msra.mxu0 %v4475_v22 }
 0x6e5   : > { %v9204_v5 = vpack.i.bf16 %v12078_v21, %v4286_v11  ;;  %v4113_v38 = vpop.f32.mrf.mxu2  ;;  %v9199_v0 = vpack.i.bf16 %v12078_v21, %v12046_v54  ;;  %4566 = vmatpush.msrb.mxu1 %v4492_v16  ;;  %v4467_v22 = vld [vmem:[%s14319_s26 + $0x8] sm:$0xff] }
 0x6e6   : > { %v4189_v50 = vrot.slane %v4173_v42, 7  ;;  %v4114_v6 = vadd.f32 %v4113_v38, %v4073_v55  ;;  %4527 = vmatpush.msra.mxu0 %v4474_v41  ;;  %v4486_v41 = vld [vmem:[%s14319_s26 + $0xa0] sm:$0xff] }
 0x6e7   : > { %9200 = vrot.lane.b32.xlu2 %v9199_v0, %s14219_s15  ;;  %9205 = vrot.lane.b32.xlu0 %v9204_v5, %s14215_s23 }
 0x6e8   : > { %v12089_v40 = vsel %vm1871_vm0, 0.0, %v4189_v50  ;;  %v4213_v39 = vsel %vm1871_vm0, %v4189_v50, 0.0  ;;  %v4155_v19 = vadd.f32 %v4154_v46, %v4114_v6  ;;  %v4075_v57 = vpop.f32.mrf.mxu1  ;;  %v4473_v50 = vld [vmem:[%s14319_s26 + $0x38] sm:$0xff]  ;;  %v4490_v6 = vld [vmem:[%s14319_s26 + $0xc0] sm:$0xff]  ;;  %4567 = vmatpush.msrb.mxu1 %v4491_v45 }
 0x6e9   : > { %v4246_v53 = vrot.slane %v4213_v39, 1  ;;  %v9209_v10 = vpack.i.bf16 %v4286_v11, %v12089_v40  ;;  %v4287_v8 = vrot.slane %v12089_v40, 2  ;;  %v4288_v15 = vrot.slane %v4213_v39, 2  ;;  %4528 = vmatpush.msra.mxu0 %v4473_v50  ;;  %v4485_v45 = vld [vmem:[%s14319_s26 + $0x98] sm:$0xff] }
 0x6ea   : > { %v4166_v31 = vmul.f32 0.01, %v4155_v19  ;;  %v4245_v30 = vrot.slane %v12089_v40, 1  ;;  %v4076_v4 = vadd.f32 %v11990_v13, %v4075_v57  ;;  %v4489_v57 = vld [vmem:[%s14319_s26 + $0xb8] sm:$0xff]  ;;  %4568 = vmatpush.msrb.mxu1 %v4490_v6 }
 0x6eb   : > { %9210 = vrot.lane.b32.xlu1 %v9209_v10, %s14217_s16  ;;  %v4289_v37 = vsel %vm2102_vm2, %v4287_v8, %v4288_v15  ;;  %v4471_v8 = vld [vmem:[%s14319_s26 + $0x28] sm:$0xff] }
 0x6ec   : > { %v4174_v9 = vmax.f32 %v4155_v19, %v4166_v31  ;;  %v12105_v33 = vsel %vm2013_vm1, %v4245_v30, %v4246_v53  ;;  %8686 = vmatmul.msk.f32.gmra.mxu2 %vm2706_vm11, %v4289_v37  ;;  %v4472_v19 = vld [vmem:[%s14319_s26 + $0x30] sm:$0xff]  ;;  %4569 = vmatpush.msrb.mxu1 %v4489_v57  ;;  %v4470_v31 = vld [vmem:[%s14319_s26 + $0x20] sm:$0xff] }
 0x6ed   : > { %v9219_v44 = vpack.i.bf16 %v12105_v33, %v4289_v37  ;;  %v4116_v36 = vpop.f32.mrf.mxu2  ;;  %v9214_v13 = vpack.i.bf16 %v12105_v33, %v12067_v27  ;;  %4529 = vmatpush.msra.mxu0 %v4472_v19 }
 0x6ee   : > { %v4190_v43 = vrot.slane %v4174_v9, 7  ;;  %v4117_v59 = vadd.f32 %v4116_v36, %v4076_v4  ;;  %4570 = vmatpush.msrb.mxu1 %v4488_v62 }
 0x6ef   : > { %9215 = vrot.lane.b32.xlu2 %v9214_v13, %s14219_s15  ;;  %9220 = vrot.lane.b32.xlu0 %v9219_v44, %s14215_s23  ;;  %v4468_v13 = vld [vmem:[%s14319_s26 + $0x10] sm:$0xff] }
 0x6f0   : > { %v12118_v42 = vsel %vm1871_vm0, 0.0, %v4190_v43  ;;  %v4214_v55 = vsel %vm1871_vm0, %v4190_v43, 0.0  ;;  %v4158_v11 = vadd.f32 %v4157_v26, %v4117_v59  ;;  %4530 = vmatpush.msra.mxu0 %v4471_v8  ;;  %v4466_v43 = vld [vmem:[%s14319_s26] sm:$0xff]  ;;  %v4487_v59 = vld [vmem:[%s14319_s26 + $0xa8] sm:$0xff] }
 0x6f1   : > { %v4249_v46 = vrot.slane %v4214_v55, 1  ;;  %v9224_v5 = vpack.i.bf16 %v4289_v37, %v12118_v42  ;;  %v4290_v38 = vrot.slane %v12118_v42, 2  ;;  %v4291_v0 = vrot.slane %v4214_v55, 2  ;;  %v4469_v37 = vld [vmem:[%s14319_s26 + $0x18] sm:$0xff]  ;;  %4571 = vmatpush.msrb.mxu1 %v4487_v59  ;;  %v4484_v55 = vld [vmem:[%s14319_s26 + $0x90] sm:$0xff] }
 0x6f2   : > { %v4167_v51 = vmul.f32 0.01, %v4158_v11  ;;  %v4248_v12 = vrot.slane %v12118_v42, 1  ;;  %4531 = vmatpush.msra.mxu0 %v4470_v31 }
 0x6f3   : > { %9225 = vrot.lane.b32.xlu1 %v9224_v5, %s14217_s16  ;;  %v4292_v39 = vsel %vm2102_vm2, %v4290_v38, %v4291_v0  ;;  %4572 = vmatpush.msrb.mxu1 %v4486_v41 }
 0x6f4   : > { %v4175_v34 = vmax.f32 %v4158_v11, %v4167_v51  ;;  %v12131_v28 = vsel %vm2013_vm1, %v4248_v12, %v4249_v46  ;;  %8687 = vmatmul.msk.f32.gmra.mxu2 %vm2706_vm11, %v4292_v39  ;;  %4532 = vmatpush.msra.mxu0 %v4469_v37  ;;  %v4483_v11 = vld [vmem:[%s14319_s26 + $0x88] sm:$0xff]  ;;  %v4482_v46 = vld [vmem:[%s14319_s26 + $0x80] sm:$0xff] }
 0x6f5   : > { %v9234_v53 = vpack.i.bf16 %v12131_v28, %v4292_v39  ;;  %v9229_v10 = vpack.i.bf16 %v12131_v28, %v12089_v40  ;;  %4573 = vmatpush.msrb.mxu1 %v4485_v45 }
 0x6f6   : > { %v4191_v63 = vrot.slane %v4175_v34, 7  ;;  %4533 = vmatpush.msra.mxu0 %v4468_v13 }
 0x6f7   : > { %9230 = vrot.lane.b32.xlu2 %v9229_v10, %s14219_s15  ;;  %9235 = vrot.lane.b32.xlu0 %v9234_v53, %s14215_s23 }
 0x6f8   : > { %v4207_v15 = vsel %vm1871_vm0, 0.0, %v4191_v63  ;;  %v4215_v30 = vsel %vm1871_vm0, %v4191_v63, 0.0  ;;  %4534 = vmatpush.msra.mxu0 %v4467_v22  ;;  %4574 = vmatpush.msrb.mxu1 %v4484_v55 }
 0x6f9   : > { %v4340_v4 = vrot.slane %v4207_v15, 1  ;;  %v4341_v60 = vrot.slane %v4215_v30, 1  ;;  %v4352_v20 = vrot.slane %v4215_v30, 2  ;;  %v9239_v9 = vpack.i.bf16 %v4292_v39, %v4207_v15 }
 0x6fa   : > { %v4351_v44 = vrot.slane %v4207_v15, 2  ;;  %4535 = vmatpush.msra.mxu0 %v4466_v43  ;;  %4575 = vmatpush.msrb.mxu1 %v4483_v11 }
 0x6fb   : > { %9240 = vrot.lane.b32.xlu1 %v9239_v9, %s14217_s16  ;;  %v12147_v36 = vsel %vm2013_vm1, %v4340_v4, %v4341_v60 }
 0x6fc   : > { %v4353_v26 = vsel %vm2102_vm2, %v4351_v44, %v4352_v20  ;;  %v9244_v16 = vpack.i.bf16 %v12147_v36, %v12118_v42  ;;  %4576 = vmatpush.msrb.mxu1 %v4482_v46 }
 0x6fd   : > { %8688 = vmatmul.msk.f32.gmra.mxu2 %vm2706_vm11, %v4353_v26 }
 0x6ff   : > { %9245 = vrot.lane.b32.xlu2 %v9244_v16, %s14219_s15  ;;  %4368 = vrot.lane.b32.xlu0 %v4353_v26, %s14215_s23  ;;  %s1801_s23 = sld [smem:[#allocation2 + %s8631_s28]] }
 0x705   : > { %8689 = vmatmul.msk.f32.gmra.mxu2 %vm2706_vm11, %v10577_v18 }
 0x707   : > { %4329 = vrot.lane.b32.xlu2 %v4207_v15, %s14219_s15  ;;  %s14326_s15 = sld [smem:[#allocation22_spill]] }
 0x729   : > { %v9156_v5 = vpop.permute.xlu2 %9155 }
 0x72a   : > { %v9157_v38 = vunpack.i.l.bf16 %v9156_v5  ;;  %v9158_v53 = vunpack.i.h.bf16 %v9156_v5 }
 0x72c   : > { %v4434_v0 = vsel %vm3190_vm14, %v11450_v7, %v9157_v38 }
 0x72d   : > { %4536 = vmatmul.f32.vlgmr.msra.gmra.mxu0 %v4434_v0 }
 0x731   : > { %v9171_v50 = vpop.permute.xlu2 %9170 }
 0x732   : > { %v9172_v10 = vunpack.i.l.bf16 %v9171_v50  ;;  %v9173_v13 = vunpack.i.h.bf16 %v9171_v50 }
 0x738   : > { %v9146_v6 = vpop.permute.xlu0 %9145 }
 0x739   : > { %v9148_v51 = vunpack.i.h.bf16 %v9146_v6  ;;  %v9147_v12 = vunpack.i.l.bf16 %v9146_v6  ;;  %v9186_v39 = vpop.permute.xlu2 %9185 }
 0x73a   : > { %v9187_v26 = vunpack.i.l.bf16 %v9186_v39 }
 0x73b   : > { %v4442_v8 = vsel %vm2706_vm11, %v12001_v35, %v9147_v12  ;;  %v4420_v62 = vsel %vm2706_vm11, %v11995_v3, %v9148_v51 }
 0x73d   : > { %v9151_v19 = vpop.permute.xlu1 %9150 }
 0x73e   : > { %v9153_v57 = vunpack.i.h.bf16 %v9151_v19  ;;  %v9152_v34 = vunpack.i.l.bf16 %v9151_v19 }
 0x740   : > { %v4427_v63 = vsel %vm3181_vm13, %v4420_v62, %v9153_v57  ;;  %v4450_v31 = vsel %vm3181_vm13, %v4442_v8, %v9152_v34 }
 0x741   : > { %v9161_v15 = vpop.permute.xlu0 %9160  ;;  %v4435_v30 = vsel %vm3190_vm14, %v4427_v63, %v9172_v10  ;;  %v4458_v4 = vsel %vm3190_vm14, %v4450_v31, %v9158_v53  ;;  %v9201_v37 = vpop.permute.xlu2 %9200 }
 0x742   : > { %4539 = vmatmul.f32.gmra.mxu0 %v4435_v30  ;;  %4577 = vmatmul.f32.vlgmr.msrb.gmra.mxu1 %v4458_v4  ;;  %v9163_v60 = vunpack.i.h.bf16 %v9161_v15  ;;  %v9162_v20 = vunpack.i.l.bf16 %v9161_v15  ;;  %v9202_v0 = vunpack.i.l.bf16 %v9201_v37  ;;  %v9203_v62 = vunpack.i.h.bf16 %v9201_v37 }
 0x744   : > { %v4421_v3 = vsel %vm2706_vm11, %v12008_v61, %v9163_v60  ;;  %v4443_v16 = vsel %vm2706_vm11, %v12018_v23, %v9162_v20  ;;  %v9188_v61 = vunpack.i.h.bf16 %v9186_v39 }
 0x745   : > { %v9166_v9 = vpop.permute.xlu1 %9165 }
 0x746   : > { %v9168_v44 = vunpack.i.h.bf16 %v9166_v9  ;;  %v9167_v35 = vunpack.i.l.bf16 %v9166_v9 }
 0x748   : > { %v4428_v22 = vsel %vm3181_vm13, %v4421_v3, %v9168_v44  ;;  %v4451_v43 = vsel %vm3181_vm13, %v4443_v16, %v9167_v35 }
 0x749   : > { %v9176_v59 = vpop.permute.xlu0 %9175  ;;  %v4436_v41 = vsel %vm3190_vm14, %v4428_v22, %v9187_v26  ;;  %v4459_v45 = vsel %vm3190_vm14, %v4451_v43, %v9173_v13  ;;  %v9216_v6 = vpop.permute.xlu2 %9215 }
 0x74a   : > { %4542 = vmatmul.f32.gmra.mxu0 %v4436_v41  ;;  %4580 = vmatmul.f32.gmra.mxu1 %v4459_v45  ;;  %v9178_v55 = vunpack.i.h.bf16 %v9176_v59  ;;  %v9177_v11 = vunpack.i.l.bf16 %v9176_v59  ;;  %v9217_v63 = vunpack.i.l.bf16 %v9216_v6  ;;  %v9218_v26 = vunpack.i.h.bf16 %v9216_v6 }
 0x74c   : > { %v4422_v23 = vsel %vm2706_vm11, %v12027_v17, %v9178_v55  ;;  %v4444_v50 = vsel %vm2706_vm11, %v12037_v32, %v9177_v11 }
 0x74d   : > { %v9181_v46 = vpop.permute.xlu1 %9180 }
 0x74e   : > { %v9183_v5 = vunpack.i.h.bf16 %v9181_v46  ;;  %v9182_v38 = vunpack.i.l.bf16 %v9181_v46 }
 0x750   : > { %v4429_v51 = vsel %vm3181_vm13, %v4422_v23, %v9183_v5  ;;  %v4452_v12 = vsel %vm3181_vm13, %v4444_v50, %v9182_v38 }
 0x751   : > { %v9191_v19 = vpop.permute.xlu0 %9190  ;;  %v4437_v57 = vsel %vm3190_vm14, %v4429_v51, %v9202_v0  ;;  %v4460_v34 = vsel %vm3190_vm14, %v4452_v12, %v9188_v61  ;;  %v9231_v9 = vpop.permute.xlu2 %9230 }
 0x752   : > { %4545 = vmatmul.f32.gmra.mxu0 %v4437_v57  ;;  %4583 = vmatmul.f32.gmra.mxu1 %v4460_v34  ;;  %v9193_v39 = vunpack.i.h.bf16 %v9191_v19  ;;  %v9192_v53 = vunpack.i.l.bf16 %v9191_v19  ;;  %v9232_v3 = vunpack.i.l.bf16 %v9231_v9  ;;  %v9233_v61 = vunpack.i.h.bf16 %v9231_v9 }
 0x754   : > { %v4423_v32 = vsel %vm2706_vm11, %v12046_v54, %v9193_v39  ;;  %v4445_v31 = vsel %vm2706_vm11, %v12056_v58, %v9192_v53 }
 0x755   : > { %v9196_v10 = vpop.permute.xlu1 %9195 }
 0x756   : > { %v9198_v8 = vunpack.i.h.bf16 %v9196_v10  ;;  %v9197_v17 = vunpack.i.l.bf16 %v9196_v10 }
 0x758   : > { %v4430_v15 = vsel %vm3181_vm13, %v4423_v32, %v9198_v8  ;;  %v4453_v30 = vsel %vm3181_vm13, %v4445_v31, %v9197_v17 }
 0x759   : > { %v9206_v4 = vpop.permute.xlu0 %9205  ;;  %v4438_v60 = vsel %vm3190_vm14, %v4430_v15, %v9217_v63  ;;  %v4461_v20 = vsel %vm3190_vm14, %v4453_v30, %v9203_v62  ;;  %v9246_v46 = vpop.permute.xlu2 %9245 }
 0x75a   : > { %4548 = vmatmul.f32.gmra.mxu0 %v4438_v60  ;;  %4586 = vmatmul.f32.gmra.mxu1 %v4461_v20  ;;  %v9208_v37 = vunpack.i.h.bf16 %v9206_v4  ;;  %v9207_v44 = vunpack.i.l.bf16 %v9206_v4  ;;  %v9247_v0 = vunpack.i.l.bf16 %v9246_v46  ;;  %v4619_v4 = vpop.f32.mrf.mxu2  ;;  %v4693_v20 = vld [vmem:[%s14321_s20 + $0x18] sm:$0xff] }
 0x75b   : > { %4711 = vmatpush.msrb.mxu3 %v4693_v20 }
 0x75c   : > { %v4424_v58 = vsel %vm2706_vm11, %v12067_v27, %v9208_v37  ;;  %v4446_v16 = vsel %vm2706_vm11, %v12078_v21, %v9207_v44 }
 0x75d   : > { %v9211_v35 = vpop.permute.xlu1 %9210 }
 0x75e   : > { %v9213_v13 = vunpack.i.h.bf16 %v9211_v35  ;;  %v9212_v54 = vunpack.i.l.bf16 %v9211_v35 }
 0x760   : > { %v4431_v22 = vsel %vm3181_vm13, %v4424_v58, %v9213_v13  ;;  %v4454_v43 = vsel %vm3181_vm13, %v4446_v16, %v9212_v54 }
 0x761   : > { %v9221_v59 = vpop.permute.xlu0 %9220  ;;  %v4439_v41 = vsel %vm3190_vm14, %v4431_v22, %v9232_v3  ;;  %v4462_v45 = vsel %vm3190_vm14, %v4454_v43, %v9218_v26  ;;  %v4330_v17 = vpop.permute.xlu2 %4329  ;;  %v4691_v43 = vld [vmem:[%s14321_s20 + $0x8] sm:$0xff] }
 0x762   : > { %4551 = vmatmul.f32.gmra.mxu0 %v4439_v41  ;;  %4589 = vmatmul.f32.gmra.mxu1 %v4462_v45  ;;  %v9223_v55 = vunpack.i.h.bf16 %v9221_v59  ;;  %v9222_v11 = vunpack.i.l.bf16 %v9221_v59  ;;  %v4622_v9 = vpop.f32.mrf.mxu2  ;;  %v9719_v41 = vld [vmem:[%s14322_s22] ss:$0 sm:$0xff]  ;;  %s1804_s22 = sadd.s32 2, %s8631_s28 }
 0x763   : > { %s1805_s16 = sld [smem:[#allocation2 + %s1804_s22]] }
 0x764   : > { %v4425_v21 = vsel %vm2706_vm11, %v12089_v40, %v9223_v55  ;;  %v4447_v23 = vsel %vm2706_vm11, %v12105_v33, %v9222_v11  ;;  %v9248_v40 = vunpack.i.h.bf16 %v9246_v46  ;;  %s14336_s22 = sld [smem:[#allocation45_spill]] }
 0x765   : > { %v9226_v5 = vpop.permute.xlu1 %9225 }
 0x766   : > { %v9228_v38 = vunpack.i.h.bf16 %v9226_v5  ;;  %v9227_v27 = vunpack.i.l.bf16 %v9226_v5 }
 0x768   : > { %v4432_v50 = vsel %vm3181_vm13, %v4425_v21, %v9228_v38  ;;  %v4455_v6 = vsel %vm3181_vm13, %v4447_v23, %v9227_v27 }
 0x769   : > { %v9236_v51 = vpop.permute.xlu0 %9235  ;;  %v4440_v12 = vsel %vm3190_vm14, %v4432_v50, %v9247_v0  ;;  %v4463_v19 = vsel %vm3190_vm14, %v4455_v6, %v9233_v61 }
 0x76a   : > { %4554 = vmatmul.f32.gmra.mxu0 %v4440_v12  ;;  %4592 = vmatmul.f32.gmra.mxu1 %v4463_v19  ;;  %v9238_v57 = vunpack.i.h.bf16 %v9236_v51  ;;  %v9237_v34 = vunpack.i.l.bf16 %v9236_v51  ;;  %v4625_v35 = vpop.f32.mrf.mxu2 }
 0x76c   : > { %v4426_v33 = vsel %vm2706_vm11, %v12118_v42, %v9238_v57  ;;  %v4448_v8 = vsel %vm2706_vm11, %v12131_v28, %v9237_v34 }
 0x76d   : > { %v9241_v39 = vpop.permute.xlu1 %9240 }
 0x76e   : > { %v9243_v53 = vunpack.i.h.bf16 %v9241_v39  ;;  %v9242_v10 = vunpack.i.l.bf16 %v9241_v39 }
 0x770   : > { %v4433_v62 = vsel %vm3181_vm13, %v4426_v33, %v9243_v53  ;;  %v4456_v63 = vsel %vm3181_vm13, %v4448_v8, %v9242_v10 }
 0x771   : > { %v4369_v32 = vpop.permute.xlu0 %4368  ;;  %v4441_v31 = vsel %vm3190_vm14, %v4433_v62, %v4330_v17  ;;  %v4464_v15 = vsel %vm3190_vm14, %v4456_v63, %v9248_v40 }
 0x772   : > { %4557 = vmatmul.f32.gmra.mxu0 %v4441_v31  ;;  %4595 = vmatmul.f32.gmra.mxu1 %v4464_v15  ;;  %v4449_v42 = vsel %vm2706_vm11, %v12147_v36, %v4369_v32  ;;  %v4692_v36 = vld [vmem:[%s14321_s20 + $0x10] sm:$0xff]  ;;  %v4628_v58 = vpop.f32.mrf.mxu2 }
 0x773   : > { %v4457_v30 = vsel %vm3181_vm13, %v4449_v42, %v11481_v52  ;;  %4712 = vmatpush.msrb.mxu3 %v4692_v36 }
 0x774   : > { %v4465_v28 = vsel %vm3190_vm14, %v4457_v30, %v11490_v49 }
 0x775   : > { %4713 = vmatpush.msrb.mxu3 %v4691_v43 }
 0x77a   : > { %4598 = vmatmul.f32.gmra.mxu1 %v4465_v28  ;;  %v4631_v59 = vpop.f32.mrf.mxu2 }
 0x782   : > { %v4634_v6 = vpop.f32.mrf.mxu2 }
 0x78a   : > { %v4637_v28 = vpop.f32.mrf.mxu2 }
 0x7aa   : > { %v4537_v60 = vpop.f32.mrf.mxu0 }
 0x7ab   : > { %v4538_v55 = vadd.f32 %v9719_v41, %v4537_v60 }
 0x7bf   : > { %v4540_v37 = vpop.f32.mrf.mxu0  ;;  %v4578_v44 = vpop.f32.mrf.mxu1 }
 0x7c0   : > { %v4541_v45 = vadd.f32 %v9719_v41, %v4540_v37  ;;  %v4579_v27 = vadd.f32 %v4578_v44, %v4538_v55 }
 0x7c2   : > { %v4620_v51 = vadd.f32 %v4619_v4, %v4579_v27 }
 0x7c4   : > { %v4643_v40 = vmul.f32 0.01, %v4620_v51 }
 0x7c6   : > { %v4651_v31 = vmax.f32 %v4620_v51, %v4643_v40 }
 0x7c7   : > { %v4543_v13 = vpop.f32.mrf.mxu0  ;;  %v4581_v54 = vpop.f32.mrf.mxu1 }
 0x7c8   : > { %v4544_v5 = vadd.f32 %v9719_v41, %v4543_v13  ;;  %v4582_v38 = vadd.f32 %v4581_v54, %v4541_v45  ;;  %v12239_v44 = vadd.f32 %v4651_v31, %v11587_v14  ;;  %v12285_v31 = vstv %s1801_s23  ;;  %s14330_s23 = smov 32  }
 0x7ca   : > { %v4623_v21 = vadd.f32 %v4622_v9, %v4582_v38  ;;  %v4667_v14 = vsel %vm2706_vm11, %v12239_v44, 0.0 }
 0x7cc   : > { %v4644_v39 = vmul.f32 0.01, %v4623_v21 }
 0x7ce   : > { %v4652_v62 = vmax.f32 %v4623_v21, %v4644_v39 }
 0x7cf   : > { %v4546_v26 = vpop.f32.mrf.mxu0  ;;  %v4584_v3 = vpop.f32.mrf.mxu1 }
 0x7d0   : > { %v4547_v61 = vadd.f32 %v9719_v41, %v4546_v26  ;;  %v4585_v0 = vadd.f32 %v4584_v3, %v4544_v5  ;;  %v12236_v60 = vadd.f32 %v4652_v62, %v11601_v29  ;;  %v4735_v62 = vld [vmem:[%s14323_s2] sm:$0xff] }
 0x7d2   : > { %v4626_v12 = vadd.f32 %v4625_v35, %v4585_v0  ;;  %v4690_v35 = vld [vmem:[%s14321_s20] sm:$0xff]  ;;  %v4668_v3 = vsel %vm2706_vm11, %v12236_v60, 0.0 }
 0x7d3   : > { %4714 = vmatpush.msrb.mxu3 %v4690_v35  ;;  %v4669_v45 = vadd.f32 %v4668_v3, %v4667_v14  ;;  %v5116_v14 = vld [vmem:[%s14327_s3 + $0x118] sm:$0xff] }
 0x7d4   : > { %v4645_v8 = vmul.f32 0.01, %v4626_v12  ;;  %5229 = vmatpush.msra.mxu1 %v5116_v14 }
 0x7d6   : > { %v4653_v15 = vmax.f32 %v4626_v12, %v4645_v8  ;;  %v4738_v8 = vld [vmem:[%s14323_s2 + $0x18] sm:$0xff] }
 0x7d7   : > { %v4549_v16 = vpop.f32.mrf.mxu0  ;;  %v4587_v22 = vpop.f32.mrf.mxu1  ;;  %4755 = vmatpush.msra.mxu3 %v4738_v8 }
 0x7d8   : > { %v4550_v23 = vadd.f32 %v9719_v41, %v4549_v16  ;;  %v4588_v50 = vadd.f32 %v4587_v22, %v4547_v61  ;;  %v12243_v13 = vadd.f32 %v4653_v15, %v11640_v1  ;;  %v12287_v15 = vstv %s1805_s16  ;;  %s14331_s16 = sld [smem:[#allocation53_spill]] }
 0x7da   : > { %v4629_v53 = vadd.f32 %v4628_v58, %v4588_v50  ;;  %v4670_v22 = vsel %vm2706_vm11, %v12243_v13, 0.0 }
 0x7db   : > { %v4671_v38 = vadd.f32 %v4670_v22, %v4669_v45  ;;  %v5115_v22 = vld [vmem:[%s14327_s3 + $0x110] sm:$0xff]  ;;  %v5114_v45 = vld [vmem:[%s14327_s3 + $0x108] sm:$0xff] }
 0x7dc   : > { %v4646_v63 = vmul.f32 0.01, %v4629_v53  ;;  %5230 = vmatpush.msra.mxu1 %v5115_v22 }
 0x7de   : > { %v4654_v20 = vmax.f32 %v4629_v53, %v4646_v63  ;;  %v4689_v63 = vld [vmem:[%s14324_s18] sm:$0x7]  ;;  %5231 = vmatpush.msra.mxu1 %v5114_v45  ;;  %s14334_s18 = sld [smem:[#allocation54_spill]] }
 0x7df   : > { %v4552_v11 = vpop.f32.mrf.mxu0  ;;  %v4590_v46 = vpop.f32.mrf.mxu1 }
 0x7e0   : > { %v4553_v19 = vadd.f32 %v9719_v41, %v4552_v11  ;;  %v4591_v57 = vadd.f32 %v4590_v46, %v4550_v23  ;;  %v12248_v29 = vadd.f32 %v4654_v20, %v11688_v25  ;;  %v4640_v11 = vpop.f32.mrf.mxu2 }
 0x7e2   : > { %v4632_v17 = vadd.f32 %v4631_v59, %v4591_v57  ;;  %v4672_v25 = vsel %vm2706_vm11, %v12248_v29, 0.0 }
 0x7e4   : > { %v4647_v42 = vmul.f32 0.01, %v4632_v17 }
 0x7e6   : > { %v4655_v54 = vmax.f32 %v4632_v17, %v4647_v42  ;;  %v4736_v17 = vld [vmem:[%s14323_s2 + $0x8] sm:$0xff] }
 0x7e7   : > { %v4593_v34 = vpop.f32.mrf.mxu1  ;;  %v4555_v33 = vpop.f32.mrf.mxu0 }
 0x7e8   : > { %v4594_v10 = vadd.f32 %v4593_v34, %v4553_v19  ;;  %v4556_v30 = vadd.f32 %v9719_v41, %v4555_v33  ;;  %v12255_v1 = vadd.f32 %v4655_v54, %v11740_v56  ;;  %v4731_v54 = vld [vmem:[%s14325_s10] sm:$0x1]  ;;  %s14328_s10 = smov 96  }
 0x7ea   : > { %v4635_v32 = vadd.f32 %v4634_v6, %v4594_v10  ;;  %v4674_v27 = vsel %vm2706_vm11, %v12255_v1, 0.0 }
 0x7ec   : > { %v4648_v9 = vmul.f32 0.01, %v4635_v32 }
 0x7ee   : > { %v4656_v58 = vmax.f32 %v4635_v32, %v4648_v9  ;;  %v12283_v32 = vstv %s1803_s7  ;;  %s14329_s7 = smov 64  }
 0x7ef   : > { %v4596_v4 = vpop.f32.mrf.mxu1  ;;  %v4558_v26 = vpop.f32.mrf.mxu0  ;;  %v4720_v42 = vmul.f32 %v12283_v32, %v4689_v63 }
 0x7f0   : > { %v4597_v37 = vadd.f32 %v4596_v4, %v4556_v30  ;;  %v4559_v43 = vadd.f32 %v9719_v41, %v4558_v26  ;;  %v12260_v46 = vadd.f32 %v4656_v58, %v11778_v47  ;;  %v4673_v41 = vadd.f32 %v4672_v25, %v4671_v38 }
 0x7f1   : > { %v4695_v30 = vmul.f32 %v12285_v31, %v4689_v63  ;;  %v4722_v4 = vrot.slane %v4720_v42, 1 }
 0x7f2   : > { %v4638_v36 = vadd.f32 %v4637_v28, %v4597_v37  ;;  %v4676_v0 = vsel %vm2706_vm11, %v12260_v46, 0.0  ;;  %v4675_v23 = vadd.f32 %v4674_v27, %v4673_v41  ;;  %v4726_v28 = vmul.f32 %v12287_v15, %v4689_v63 }
 0x7f4   : > { %v4649_v16 = vmul.f32 0.01, %v4638_v36  ;;  %v4677_v6 = vadd.f32 %v4676_v0, %v4675_v23  ;;  %v4728_v37 = vrot.slane %v4726_v28, 2 }
 0x7f6   : > { %v4657_v59 = vmax.f32 %v4638_v36, %v4649_v16  ;;  %v4739_v16 = vld [vmem:[%s14326_s15] sm:$0x1]  ;;  %s14332_s15 = sld [smem:[#allocation56_spill]] }
 0x7f7   : > { %v4599_v55 = vpop.f32.mrf.mxu1 }
 0x7f8   : > { %v4600_v5 = vadd.f32 %v4599_v55, %v4559_v43  ;;  %v12265_v61 = vadd.f32 %v4657_v59, %v11822_v24 }
 0x7fa   : > { %v4641_v56 = vadd.f32 %v4640_v11, %v4600_v5  ;;  %v4678_v47 = vsel %vm2706_vm11, %v12265_v61, 0.0  ;;  %v5113_v11 = vld [vmem:[%s14327_s3 + $0x100] sm:$0xff] }
 0x7fb   : > { %v4679_v24 = vadd.f32 %v4678_v47, %v4677_v6  ;;  %5232 = vmatpush.msra.mxu1 %v5113_v11 }
 0x7fc   : > { %v4650_v21 = vmul.f32 0.01, %v4641_v56  ;;  %s14333_s28 = smov %s14332_s15 }
 0x7fe   : > { %v4658_v50 = vmax.f32 %v4641_v56, %v4650_v21 }
 0x800   : > { %v12272_v51 = vadd.f32 %v4658_v50, %v11868_v48  ;;  %v4737_v48 = vld [vmem:[%s14323_s2 + $0x10] sm:$0xff] }
 0x801   : > { %4756 = vmatpush.msra.mxu3 %v4737_v48 }
 0x802   : > { %v4680_v12 = vsel %vm2706_vm11, %v12272_v51, 0.0 }
 0x803   : > { %v4681_v19 = vadd.f32 %v4680_v12, %v4679_v24  ;;  %4757 = vmatpush.msra.mxu3 %v4736_v17 }
 0x805   : > { %v4682_v57 = vrot.slane %v4681_v19, 4  ;;  %4758 = vmatpush.msra.mxu3 %v4735_v62 }
 0x807   : > { %v4683_v34 = vadd.f32 %v4682_v57, %v4681_v19 }
 0x809   : > { %v4684_v39 = vrot.slane %v4683_v34, 2 }
 0x80b   : > { %v4685_v53 = vadd.f32 %v4684_v39, %v4683_v34 }
 0x80d   : > { %v4686_v10 = vrot.slane %v4685_v53, 1 }
 0x80f   : > { %v4687_v40 = vadd.f32 %v4686_v10, %v4685_v53 }
 0x811   : > { %v4688_v33 = vmul.f32 0.015625, %v4687_v40 }
 0x813   : > { %8690 = vmatmul.msk.f32.vlgmr.msrb.gmra.mxu3 %vm2706_vm11, %v4688_v33 }
 0x896   : > { %v4716_v20 = vpop.f32.mrf.mxu3 }
 0x897   : > { %v4717_v9 = vadd.f32 %v4716_v20, %v4695_v30 }
 0x899   : > { %v4724_v35 = vadd.f32 %v4722_v4, %v4717_v9 }
 0x89b   : > { %v4730_v36 = vadd.f32 %v4728_v37, %v4724_v35 }
 0x89d   : > { %v4732_v26 = vadd.f32 %v4731_v54, %v4730_v36 }
 0x89f   : > { %v4733_v3 = vmul.f32 0.01, %v4732_v26 }
 0x8a1   : > { %v4734_v58 = vmax.f32 %v4732_v26, %v4733_v3 }
 0x8a3   : > { %8691 = vmatmul.msk.f32.vlgmr.msra.gmra.mxu3 %vm2706_vm11, %v4734_v58 }
 0x926   : > { %v4760_v43 = vpop.f32.mrf.mxu3 }
 0x927   : > { %v4761_v59 = vadd.f32 %v4760_v43, %v4739_v16 }
 0x929   : > { %v8692_v55 = vmul.f32 -1.442695, %v4761_v59 }
 0x92b   : > { %9747 = vpow2.f32 %v8692_v55 }
 0x931   : > { %v9748_v25 = vpop.eup %9747 }
 0x932   : > { %v4766_v5 = vadd.f32 1.0, %v9748_v25 }
 0x934   : > { %9749 = vrcp.f32 %v4766_v5  ;;  %v4778_v41 = vand.u32 2147483648, %v4766_v5  ;;  %v4776_v21 = vand.u32 2147483647, %v4766_v5  ;;  %vm4772_vm4 = vweird.f32 %v4766_v5 }
 0x936   : > { %v4779_v47 = vor.u32 1.1754944e-38, %v4778_v41  ;;  %vm4777_vm6 = vcmp.eq.f32.partialorder %v4776_v21, 8.507059e+37 }
 0x93a   : > { %v9750_v38 = vpop.eup %9749 }
 0x93b   : > { %v4768_v27 = vmul.f32 %v9750_v38, %v4766_v5  ;;  %vm4773_vm15 = vweird.f32 %v9750_v38 }
 0x93c   : > { %vm4774_vm5 = vmor %vm4772_vm4, %vm4773_vm15 }
 0x93d   : > { %v4769_v56 = vsub.f32 1.0, %v4768_v27 }
 0x93f   : > { %v4770_v0 = vmul.f32 %v9750_v38, %v4769_v56 }
 0x941   : > { %v4771_v23 = vadd.f32 %v9750_v38, %v4770_v0 }
 0x943   : > { %v4775_v50 = vsel %vm4774_vm5, %v9750_v38, %v4771_v23 }
 0x944   : > { %v4780_v6 = vsel %vm4777_vm6, %v4779_v47, %v4775_v50 }
 0x945   : > { %v12299_v24 = vperm.slane %v4780_v6, 0 }
 0x947   : > { %v12303_v12 = vmul.f32 %v12299_v24, %v12239_v44  ;;  %v12307_v19 = vmul.f32 %v12299_v24, %v12236_v60  ;;  %v12311_v57 = vmul.f32 %v12299_v24, %v12243_v13  ;;  %v12334_v4 = vmul.f32 %v12299_v24, %v12248_v29 }
 0x948   : > { %v12365_v45 = vmul.f32 %v12299_v24, %v12255_v1  ;;  %v12388_v47 = vmul.f32 %v12299_v24, %v12260_v46 }
 0x949   : > { %v4799_v34 = vrot.slane %v12303_v12, 7  ;;  %v4800_v39 = vrot.slane %v12307_v19, 7  ;;  %v4801_v53 = vrot.slane %v12311_v57, 7  ;;  %v4802_v58 = vrot.slane %v12334_v4, 7 }
 0x94a   : > { %v4803_v56 = vrot.slane %v12365_v45, 7 }
 0x94b   : > { %v12317_v10 = vsel %vm1871_vm0, 0.0, %v4799_v34  ;;  %v12320_v44 = vsel %vm1871_vm0, 0.0, %v4800_v39  ;;  %v4824_v40 = vsel %vm1871_vm0, %v4800_v39, 0.0  ;;  %v4823_v60 = vsel %vm1871_vm0, %v4799_v34, 0.0 }
 0x94c   : > { %v9249_v13 = vpack.i.bf16 %v12320_v44, %v12317_v10  ;;  %v4890_v33 = vrot.slane %v12320_v44, 2  ;;  %v4891_v8 = vrot.slane %v4824_v40, 2  ;;  %v4887_v48 = vrot.slane %v12317_v10, 2 }
 0x94d   : > { %v4888_v17 = vrot.slane %v4823_v60, 2  ;;  %v4845_v62 = vrot.slane %v12317_v10, 1  ;;  %v4846_v63 = vrot.slane %v4823_v60, 1  ;;  %v4848_v30 = vrot.slane %v12320_v44, 1 }
 0x94e   : > { %9250 = vrot.lane.b32.xlu1 %v9249_v13, %s14328_s10  ;;  %v4892_v42 = vsel %vm2102_vm2, %v4890_v33, %v4891_v8  ;;  %v4849_v28 = vrot.slane %v4824_v40, 1  ;;  %v12342_v37 = vsel %vm1871_vm0, 0.0, %v4801_v53  ;;  %v4825_v35 = vsel %vm1871_vm0, %v4801_v53, 0.0 }
 0x94f   : > { %8693 = vmatmul.msk.f32.vlgmr.msra.gmra.mxu1 %vm2706_vm11, %v4892_v42  ;;  %v4889_v20 = vsel %vm2102_vm2, %v4887_v48, %v4888_v17  ;;  %v12339_v9 = vsel %vm2013_vm1, %v4845_v62, %v4846_v63  ;;  %v4893_v29 = vrot.slane %v12342_v37, 2  ;;  %v4894_v3 = vrot.slane %v4825_v35, 2 }
 0x950   : > { %v9259_v54 = vpack.i.bf16 %v12320_v44, %v4889_v20  ;;  %v9254_v36 = vpack.i.bf16 %v4889_v20, %v12339_v9  ;;  %v12348_v26 = vsel %vm2013_vm1, %v4848_v30, %v4849_v28  ;;  %v4852_v14 = vrot.slane %v4825_v35, 1  ;;  %v5111_v35 = vld [vmem:[%s14327_s3 + $0xf0] sm:$0xff] }
 0x951   : > { %v9264_v16 = vpack.i.bf16 %v12342_v37, %v12348_v26  ;;  %v4851_v22 = vrot.slane %v12342_v37, 1  ;;  %v4895_v43 = vsel %vm2102_vm2, %v4893_v29, %v4894_v3  ;;  %v12360_v59 = vsel %vm1871_vm0, 0.0, %v4802_v58  ;;  %v5110_v29 = vld [vmem:[%s14327_s3 + $0xe8] sm:$0xff]  ;;  %v5096_v3 = vld [vmem:[%s14327_s3 + $0x78] sm:$0xff] }
 0x952   : > { %9260 = vrot.lane.b32.xlu0 %v9259_v54, %s14329_s7  ;;  %9255 = vrot.lane.b32.xlu2 %v9254_v36, %s14330_s23  ;;  %v4826_v55 = vsel %vm1871_vm0, %v4802_v58, 0.0  ;;  %v9274_v11 = vpack.i.bf16 %v12342_v37, %v4892_v42  ;;  %v9269_v25 = vpack.i.bf16 %v4892_v42, %v12348_v26  ;;  %v4896_v38 = vrot.slane %v12360_v59, 2 }
 0x953   : > { %v12371_v5 = vsel %vm2013_vm1, %v4851_v22, %v4852_v14  ;;  %v4897_v27 = vrot.slane %v4826_v55, 2  ;;  %v4855_v41 = vrot.slane %v4826_v55, 1  ;;  %v4854_v0 = vrot.slane %v12360_v59, 1  ;;  %5135 = vmatpush.msrb.mxu3 %v5096_v3  ;;  %v5095_v14 = vld [vmem:[%s14327_s3 + $0x70] sm:$0xff] }
 0x954   : > { %v9279_v1 = vpack.i.bf16 %v12360_v59, %v12371_v5  ;;  %v12383_v23 = vsel %vm1871_vm0, 0.0, %v4803_v56  ;;  %v4827_v50 = vsel %vm1871_vm0, %v4803_v56, 0.0  ;;  %v9289_v6 = vpack.i.bf16 %v12360_v59, %v4895_v43  ;;  %v5108_v56 = vld [vmem:[%s14327_s3 + $0xd8] sm:$0xff] }
 0x955   : > { %v4898_v21 = vsel %vm2102_vm2, %v4896_v38, %v4897_v27  ;;  %v9284_v34 = vpack.i.bf16 %v4895_v43, %v12371_v5  ;;  %v12394_v39 = vsel %vm2013_vm1, %v4854_v0, %v4855_v41  ;;  %v4899_v53 = vrot.slane %v12383_v23, 2  ;;  %5136 = vmatpush.msrb.mxu3 %v5095_v14  ;;  %v5107_v0 = vld [vmem:[%s14327_s3 + $0xd0] sm:$0xff] }
 0x956   : > { %9265 = vrot.lane.b32.xlu1 %v9264_v16, %s14328_s10  ;;  %v4900_v40 = vrot.slane %v4827_v50, 2  ;;  %v4804_v60 = vrot.slane %v12388_v47, 7  ;;  %v9294_v46 = vpack.i.bf16 %v12383_v23, %v12394_v39  ;;  %v4858_v13 = vrot.slane %v4827_v50, 1  ;;  %v5091_v14 = vld [vmem:[%s14327_s3 + $0x50] sm:$0xff] }
 0x957   : > { %8694 = vmatmul.msk.f32.gmra.mxu1 %vm2706_vm11, %v4895_v43  ;;  %v4857_v33 = vrot.slane %v12383_v23, 1  ;;  %v12411_v17 = vmul.f32 %v12299_v24, %v12265_v61  ;;  %v9304_v63 = vpack.i.bf16 %v12383_v23, %v4898_v21  ;;  %v9299_v42 = vpack.i.bf16 %v4898_v21, %v12394_v39  ;;  %v5112_v61 = vld [vmem:[%s14327_s3 + $0xf8] sm:$0xff]  ;;  %v5109_v43 = vld [vmem:[%s14327_s3 + $0xe0] sm:$0xff] }
 0x958   : > { %v4901_v8 = vsel %vm2102_vm2, %v4899_v53, %v4900_v40  ;;  %v12406_v48 = vsel %vm1871_vm0, 0.0, %v4804_v60  ;;  %v4828_v62 = vsel %vm1871_vm0, %v4804_v60, 0.0  ;;  %5176 = vmatpush.msrb.mxu0 %v5112_v61  ;;  %v5105_v40 = vld [vmem:[%s14327_s3 + $0xc0] sm:$0xff] }
 0x959   : > { %v12417_v30 = vsel %vm2013_vm1, %v4857_v33, %v4858_v13  ;;  %v4902_v28 = vrot.slane %v12406_v48, 2  ;;  %v4903_v20 = vrot.slane %v4828_v62, 2  ;;  %v4805_v54 = vrot.slane %v12411_v17, 7 }
 0x95a   : > { %9275 = vrot.lane.b32.xlu0 %v9274_v11, %s14329_s7  ;;  %9270 = vrot.lane.b32.xlu2 %v9269_v25, %s14330_s23  ;;  %v9309_v36 = vpack.i.bf16 %v12406_v48, %v12417_v30  ;;  %v4861_v58 = vrot.slane %v4828_v62, 1  ;;  %v4860_v16 = vrot.slane %v12406_v48, 1  ;;  %v12440_v11 = vmul.f32 %v12299_v24, %v12272_v51 }
 0x95b   : > { %5177 = vmatpush.msrb.mxu0 %v5111_v35  ;;  %v4904_v22 = vsel %vm2102_vm2, %v4902_v28, %v4903_v20  ;;  %v12435_v55 = vsel %vm1871_vm0, 0.0, %v4805_v54  ;;  %v4829_v25 = vsel %vm1871_vm0, %v4805_v54, 0.0  ;;  %v9319_v38 = vpack.i.bf16 %v12406_v48, %v4901_v8 }
 0x95c   : > { %v9314_v27 = vpack.i.bf16 %v4901_v8, %v12417_v30  ;;  %v12448_v41 = vsel %vm2013_vm1, %v4860_v16, %v4861_v58  ;;  %v4905_v51 = vrot.slane %v12435_v55, 2  ;;  %v4906_v24 = vrot.slane %v4829_v25, 2  ;;  %v5092_v58 = vld [vmem:[%s14327_s3 + $0x58] sm:$0xff] }
 0x95d   : > { %5178 = vmatpush.msrb.mxu0 %v5110_v29  ;;  %v4806_v50 = vrot.slane %v12440_v11, 7  ;;  %v9334_v13 = vpack.i.bf16 %v12435_v55, %v4904_v22  ;;  %v9329_v33 = vpack.i.bf16 %v4904_v22, %v12448_v41  ;;  %v4864_v62 = vrot.slane %v4829_v25, 1  ;;  %v5104_v16 = vld [vmem:[%s14327_s3 + $0xb8] sm:$0xff]  ;;  %v5089_v25 = vld [vmem:[%s14327_s3 + $0x40] sm:$0xff] }
 0x95e   : > { %9280 = vrot.lane.b32.xlu1 %v9279_v1, %s14328_s10  ;;  %v5094_v1 = vld [vmem:[%s14327_s3 + $0x68] sm:$0xff]  ;;  %v4907_v53 = vsel %vm2102_vm2, %v4905_v51, %v4906_v24  ;;  %v5085_v24 = vld [vmem:[%s14327_s3 + $0x20] sm:$0xff] }
 0x95f   : > { %8695 = vmatmul.msk.f32.gmra.mxu1 %vm2706_vm11, %v4898_v21  ;;  %5179 = vmatpush.msrb.mxu0 %v5109_v43  ;;  %v5093_v21 = vld [vmem:[%s14327_s3 + $0x60] sm:$0xff]  ;;  %v4822_v60 = vsel %vm1871_vm0, 0.0, %v4806_v50  ;;  %v5090_v43 = vld [vmem:[%s14327_s3 + $0x48] sm:$0xff] }
 0x960   : > { %5137 = vmatpush.msrb.mxu3 %v5094_v1  ;;  %v4955_v61 = vrot.slane %v4822_v60, 1  ;;  %v9344_v54 = vpack.i.bf16 %v4822_v60, %v4907_v53  ;;  %v5087_v1 = vld [vmem:[%s14327_s3 + $0x30] sm:$0xff]  ;;  %v5086_v51 = vld [vmem:[%s14327_s3 + $0x28] sm:$0xff] }
 0x961   : > { %5180 = vmatpush.msrb.mxu0 %v5108_v56  ;;  %v5101_v56 = vld [vmem:[%s14327_s3 + $0xa0] sm:$0xff] }
 0x962   : > { %9290 = vrot.lane.b32.xlu0 %v9289_v6, %s14329_s7  ;;  %9285 = vrot.lane.b32.xlu2 %v9284_v34, %s14330_s23  ;;  %v9324_v6 = vpack.i.bf16 %v12435_v55, %v12448_v41  ;;  %v5106_v34 = vld [vmem:[%s14327_s3 + $0xc8] sm:$0xff] }
 0x963   : > { %5181 = vmatpush.msrb.mxu0 %v5107_v0  ;;  %5138 = vmatpush.msrb.mxu3 %v5093_v21  ;;  %v5084_v0 = vld [vmem:[%s14327_s3 + $0x18] sm:$0xff] }
 0x964   : > { %v5100_v21 = vld [vmem:[%s14327_s3 + $0x98] sm:$0xff] }
 0x965   : > { %5182 = vmatpush.msrb.mxu0 %v5106_v34  ;;  %5139 = vmatpush.msrb.mxu3 %v5092_v58  ;;  %v5099_v34 = vld [vmem:[%s14327_s3 + $0x90] sm:$0xff] }
 0x966   : > { %9295 = vrot.lane.b32.xlu1 %v9294_v46, %s14328_s10  ;;  %v4830_v46 = vsel %vm1871_vm0, %v4806_v50, 0.0  ;;  %v5083_v50 = vld [vmem:[%s14327_s3 + $0x10] sm:$0xff] }
 0x967   : > { %8696 = vmatmul.msk.f32.gmra.mxu1 %vm2706_vm11, %v4901_v8  ;;  %v4863_v8 = vrot.slane %v12435_v55, 1  ;;  %5183 = vmatpush.msrb.mxu0 %v5105_v40  ;;  %v4956_v20 = vrot.slane %v4830_v46, 1  ;;  %v5098_v40 = vld [vmem:[%s14327_s3 + $0x88] sm:$0xff] }
 0x968   : > { %5140 = vmatpush.msrb.mxu3 %v5091_v14 }
 0x969   : > { %v12471_v28 = vsel %vm2013_vm1, %v4863_v8, %v4864_v62  ;;  %v12479_v29 = vsel %vm2013_vm1, %v4955_v61, %v4956_v20  ;;  %5184 = vmatpush.msrb.mxu0 %v5104_v16 }
 0x96a   : > { %9305 = vrot.lane.b32.xlu0 %v9304_v63, %s14329_s7  ;;  %9300 = vrot.lane.b32.xlu2 %v9299_v42, %s14330_s23  ;;  %v4966_v63 = vrot.slane %v4822_v60, 2  ;;  %v4967_v42 = vrot.slane %v4830_v46, 2  ;;  %v9349_v3 = vpack.i.bf16 %v12479_v29, %v4822_v60  ;;  %v5097_v60 = vld [vmem:[%s14327_s3 + $0x80] sm:$0xff] }
 0x96b   : > { %5141 = vmatpush.msrb.mxu3 %v5090_v43 }
 0x96c   : > { %v4968_v35 = vsel %vm2102_vm2, %v4966_v63, %v4967_v42 }
 0x96d   : > { %5142 = vmatpush.msrb.mxu3 %v5089_v25 }
 0x96e   : > { %9310 = vrot.lane.b32.xlu1 %v9309_v36, %s14328_s10  ;;  %v9339_v36 = vpack.i.bf16 %v4907_v53, %v12471_v28 }
 0x96f   : > { %8697 = vmatmul.msk.f32.gmra.mxu1 %vm2706_vm11, %v4904_v22  ;;  %v5103_v22 = vld [vmem:[%s14327_s3 + $0xb0] sm:$0xff] }
 0x970   : > { %5185 = vmatpush.msrb.mxu0 %v5103_v22 }
 0x972   : > { %9320 = vrot.lane.b32.xlu0 %v9319_v38, %s14329_s7  ;;  %9315 = vrot.lane.b32.xlu2 %v9314_v27, %s14330_s23  ;;  %v5088_v38 = vld [vmem:[%s14327_s3 + $0x38] sm:$0xff]  ;;  %v5102_v27 = vld [vmem:[%s14327_s3 + $0xa8] sm:$0xff] }
 0x973   : > { %5186 = vmatpush.msrb.mxu0 %v5102_v27  ;;  %5143 = vmatpush.msrb.mxu3 %v5088_v38 }
 0x975   : > { %5187 = vmatpush.msrb.mxu0 %v5101_v56  ;;  %5144 = vmatpush.msrb.mxu3 %v5087_v1 }
 0x976   : > { %9325 = vrot.lane.b32.xlu1 %v9324_v6, %s14328_s10  ;;  %v5082_v6 = vld [vmem:[%s14327_s3 + $0x8] sm:$0xff] }
 0x977   : > { %8698 = vmatmul.msk.f32.gmra.mxu1 %vm2706_vm11, %v4907_v53  ;;  %5145 = vmatpush.msrb.mxu3 %v5086_v51  ;;  %v5081_v53 = vld [vmem:[%s14327_s3] sm:$0xff] }
 0x978   : > { %5188 = vmatpush.msrb.mxu0 %v5100_v21 }
 0x979   : > { %5146 = vmatpush.msrb.mxu3 %v5085_v24 }
 0x97a   : > { %9335 = vrot.lane.b32.xlu0 %v9334_v13, %s14329_s7  ;;  %9330 = vrot.lane.b32.xlu2 %v9329_v33, %s14330_s23 }
 0x97b   : > { %5147 = vmatpush.msrb.mxu3 %v5084_v0  ;;  %5189 = vmatpush.msrb.mxu0 %v5099_v34 }
 0x97d   : > { %5148 = vmatpush.msrb.mxu3 %v5083_v50  ;;  %5190 = vmatpush.msrb.mxu0 %v5098_v40 }
 0x97e   : > { %5024 = vrot.lane.b32.xlu1 %v12471_v28, %s14328_s10 }
 0x97f   : > { %8699 = vmatmul.msk.f32.gmra.mxu1 %vm2706_vm11, %v4968_v35  ;;  %5149 = vmatpush.msrb.mxu3 %v5082_v6 }
 0x980   : > { %5191 = vmatpush.msrb.mxu0 %v5097_v60 }
 0x981   : > { %5150 = vmatpush.msrb.mxu3 %v5081_v53 }
 0x982   : > { %9345 = vrot.lane.b32.xlu0 %v9344_v54, %s14329_s7  ;;  %9340 = vrot.lane.b32.xlu2 %v9339_v36, %s14330_s23 }
 0x986   : > { %9350 = vrot.lane.b32.xlu1 %v9349_v3, %s14328_s10 }
 0x987   : > { %8700 = vmatmul.msk.f32.gmra.mxu1 %vm2706_vm11, %v10577_v18 }
 0x98a   : > { %4983 = vrot.lane.b32.xlu2 %v4968_v35, %s14330_s23 }
 0x9ac   : > { %v9256_v46 = vpop.permute.xlu2 %9255 }
 0x9ad   : > { %v9257_v62 = vunpack.i.l.bf16 %v9256_v46  ;;  %v9258_v20 = vunpack.i.h.bf16 %v9256_v46 }
 0x9af   : > { %v5035_v54 = vsel %vm2706_vm11, %v12317_v10, %v9257_v62  ;;  %v5057_v16 = vsel %vm2706_vm11, %v12339_v9, %v9258_v20 }
 0x9b4   : > { %v9271_v13 = vpop.permute.xlu2 %9270 }
 0x9b5   : > { %v9272_v25 = vunpack.i.l.bf16 %v9271_v13  ;;  %v9273_v10 = vunpack.i.h.bf16 %v9271_v13 }
 0x9b7   : > { %v5036_v24 = vsel %vm2706_vm11, %v12320_v44, %v9272_v25  ;;  %v5058_v6 = vsel %vm2706_vm11, %v12348_v26, %v9273_v10 }
 0x9bc   : > { %v9286_v36 = vpop.permute.xlu2 %9285 }
 0x9bd   : > { %v9287_v40 = vunpack.i.l.bf16 %v9286_v36  ;;  %v9288_v44 = vunpack.i.h.bf16 %v9286_v36 }
 0x9bf   : > { %v5037_v62 = vsel %vm2706_vm11, %v12342_v37, %v9287_v40 }
 0x9c0   : > { %v9251_v33 = vpop.permute.xlu1 %9250 }
 0x9c1   : > { %v9252_v8 = vunpack.i.l.bf16 %v9251_v33  ;;  %v9253_v14 = vunpack.i.h.bf16 %v9251_v33 }
 0x9c3   : > { %v5049_v63 = vsel %vm3190_vm14, %v11450_v7, %v9252_v8 }
 0x9c4   : > { %v9261_v42 = vpop.permute.xlu0 %9260  ;;  %5151 = vmatmul.f32.vlgmr.msrb.gmra.mxu3 %v5049_v63  ;;  %v9301_v34 = vpop.permute.xlu2 %9300 }
 0x9c5   : > { %v9262_v61 = vunpack.i.l.bf16 %v9261_v42  ;;  %v9263_v35 = vunpack.i.h.bf16 %v9261_v42  ;;  %v9303_v37 = vunpack.i.h.bf16 %v9301_v34 }
 0x9c7   : > { %v5042_v58 = vsel %vm3181_vm13, %v5035_v54, %v9262_v61  ;;  %v5065_v43 = vsel %vm3181_vm13, %v5057_v16, %v9263_v35  ;;  %v5059_v61 = vsel %vm2706_vm11, %v12371_v5, %v9288_v44  ;;  %v9302_v54 = vunpack.i.l.bf16 %v9301_v34 }
 0x9c8   : > { %v9266_v3 = vpop.permute.xlu1 %9265  ;;  %v5050_v38 = vsel %vm3190_vm14, %v5042_v58, %v9253_v14 }
 0x9c9   : > { %v9267_v22 = vunpack.i.l.bf16 %v9266_v3  ;;  %v9268_v21 = vunpack.i.h.bf16 %v9266_v3 }
 0x9cb   : > { %v5073_v27 = vsel %vm3190_vm14, %v5065_v43, %v9267_v22  ;;  %v5038_v43 = vsel %vm2706_vm11, %v12360_v59, %v9302_v54 }
 0x9cc   : > { %v9276_v56 = vpop.permute.xlu0 %9275  ;;  %5154 = vmatmul.f32.gmra.mxu3 %v5050_v38  ;;  %5192 = vmatmul.f32.vlgmr.msrb.gmra.mxu0 %v5073_v27  ;;  %v9316_v58 = vpop.permute.xlu2 %9315 }
 0x9cd   : > { %v9277_v1 = vunpack.i.l.bf16 %v9276_v56  ;;  %v9278_v51 = vunpack.i.h.bf16 %v9276_v56  ;;  %v5060_v56 = vsel %vm2706_vm11, %v12394_v39, %v9303_v37 }
 0x9cf   : > { %v5043_v9 = vsel %vm3181_vm13, %v5036_v24, %v9277_v1  ;;  %v5066_v53 = vsel %vm3181_vm13, %v5058_v6, %v9278_v51  ;;  %v9317_v1 = vunpack.i.l.bf16 %v9316_v58 }
 0x9d0   : > { %v9281_v0 = vpop.permute.xlu1 %9280  ;;  %v5051_v60 = vsel %vm3190_vm14, %v5043_v9, %v9268_v21  ;;  %v9318_v9 = vunpack.i.h.bf16 %v9316_v58 }
 0x9d1   : > { %v9282_v50 = vunpack.i.l.bf16 %v9281_v0  ;;  %v9283_v42 = vunpack.i.h.bf16 %v9281_v0  ;;  %v5039_v6 = vsel %vm2706_vm11, %v12383_v23, %v9317_v1 }
 0x9d3   : > { %v5074_v46 = vsel %vm3190_vm14, %v5066_v53, %v9282_v50 }
 0x9d4   : > { %v9291_v13 = vpop.permute.xlu0 %9290  ;;  %5157 = vmatmul.f32.gmra.mxu3 %v5051_v60  ;;  %5195 = vmatmul.f32.gmra.mxu0 %v5074_v46  ;;  %v9331_v21 = vpop.permute.xlu2 %9330  ;;  %v5061_v60 = vsel %vm2706_vm11, %v12417_v30, %v9318_v9  ;;  %v5599_v9 = vld [vmem:[%s14332_s15 + $0x118] sm:$0xff]  ;;  %s14339_s15 = sld [smem:[#allocation29_spill]] }
 0x9d5   : > { %v9292_v33 = vunpack.i.l.bf16 %v9291_v13  ;;  %v9293_v8 = vunpack.i.h.bf16 %v9291_v13  ;;  %v9332_v13 = vunpack.i.l.bf16 %v9331_v21  ;;  %5712 = vmatpush.msra.mxu0 %v5599_v9 }
 0x9d7   : > { %v5044_v26 = vsel %vm3181_vm13, %v5037_v62, %v9292_v33  ;;  %v5067_v35 = vsel %vm3181_vm13, %v5059_v61, %v9293_v8  ;;  %v9333_v62 = vunpack.i.h.bf16 %v9331_v21 }
 0x9d8   : > { %v9296_v63 = vpop.permute.xlu1 %9295  ;;  %v5052_v3 = vsel %vm3190_vm14, %v5044_v26, %v9283_v42  ;;  %v5040_v26 = vsel %vm2706_vm11, %v12406_v48, %v9332_v13 }
 0x9d9   : > { %v9297_v20 = vunpack.i.l.bf16 %v9296_v63  ;;  %v9298_v38 = vunpack.i.h.bf16 %v9296_v63 }
 0x9db   : > { %v5075_v36 = vsel %vm3190_vm14, %v5067_v35, %v9297_v20  ;;  %v5062_v35 = vsel %vm2706_vm11, %v12448_v41, %v9333_v62 }
 0x9dc   : > { %v9306_v16 = vpop.permute.xlu0 %9305  ;;  %5160 = vmatmul.f32.gmra.mxu3 %v5052_v3  ;;  %5198 = vmatmul.f32.gmra.mxu0 %v5075_v36  ;;  %v9341_v42 = vpop.permute.xlu2 %9340 }
 0x9dd   : > { %v9307_v14 = vunpack.i.l.bf16 %v9306_v16  ;;  %v9308_v22 = vunpack.i.h.bf16 %v9306_v16  ;;  %v9343_v16 = vunpack.i.h.bf16 %v9341_v42  ;;  %v9342_v37 = vunpack.i.l.bf16 %v9341_v42 }
 0x9df   : > { %v5045_v5 = vsel %vm3181_vm13, %v5038_v43, %v9307_v14  ;;  %v5068_v10 = vsel %vm3181_vm13, %v5060_v56, %v9308_v22  ;;  %v5041_v41 = vsel %vm2706_vm11, %v12435_v55, %v9342_v37 }
 0x9e0   : > { %v9311_v25 = vpop.permute.xlu1 %9310  ;;  %v5053_v51 = vsel %vm3190_vm14, %v5045_v5, %v9298_v38  ;;  %v5063_v5 = vsel %vm2706_vm11, %v12471_v28, %v9343_v16 }
 0x9e1   : > { %v9312_v27 = vunpack.i.l.bf16 %v9311_v25  ;;  %v9313_v53 = vunpack.i.h.bf16 %v9311_v25 }
 0x9e3   : > { %v5076_v24 = vsel %vm3190_vm14, %v5068_v10, %v9312_v27 }
 0x9e4   : > { %v9321_v0 = vpop.permute.xlu0 %9320  ;;  %5163 = vmatmul.f32.gmra.mxu3 %v5053_v51  ;;  %5201 = vmatmul.f32.gmra.mxu0 %v5076_v24  ;;  %v4984_v38 = vpop.permute.xlu2 %4983 }
 0x9e5   : > { %v9322_v59 = vunpack.i.l.bf16 %v9321_v0  ;;  %v9323_v50 = vunpack.i.h.bf16 %v9321_v0  ;;  %v5064_v55 = vsel %vm2706_vm11, %v12479_v29, %v4984_v38  ;;  %v5234_v24 = vpop.f32.mrf.mxu1  ;;  %v12573_v0 = vld [vmem:[%s14331_s16] ss:$0 sm:$0xff]  ;;  %s14337_s16 = sld [smem:[#allocation48_spill]] }
 0x9e6   : > { %v5072_v51 = vsel %vm3181_vm13, %v5064_v55, %v11481_v52 }
 0x9e7   : > { %v5046_v39 = vsel %vm3181_vm13, %v5039_v6, %v9322_v59  ;;  %v5069_v46 = vsel %vm3181_vm13, %v5061_v60, %v9323_v50  ;;  %v5080_v28 = vsel %vm3190_vm14, %v5072_v51, %v11490_v49  ;;  %v5598_v59 = vld [vmem:[%s14333_s28 + $0x110] sm:$0xff]  ;;  %v5597_v6 = vld [vmem:[%s14333_s28 + $0x108] sm:$0xff] }
 0x9e8   : > { %v9326_v34 = vpop.permute.xlu1 %9325  ;;  %v5054_v44 = vsel %vm3190_vm14, %v5046_v39, %v9313_v53  ;;  %5713 = vmatpush.msra.mxu0 %v5598_v59  ;;  %v5596_v39 = vld [vmem:[%s14333_s28 + $0x100] sm:$0xff] }
 0x9e9   : > { %v9327_v40 = vunpack.i.l.bf16 %v9326_v34  ;;  %v9328_v61 = vunpack.i.h.bf16 %v9326_v34 }
 0x9ea   : > { %5714 = vmatpush.msra.mxu0 %v5597_v6 }
 0x9eb   : > { %v5077_v33 = vsel %vm3190_vm14, %v5069_v46, %v9327_v40 }
 0x9ec   : > { %v9336_v8 = vpop.permute.xlu0 %9335  ;;  %5166 = vmatmul.f32.gmra.mxu3 %v5054_v44  ;;  %5204 = vmatmul.f32.gmra.mxu0 %v5077_v33 }
 0x9ed   : > { %v9337_v23 = vunpack.i.l.bf16 %v9336_v8  ;;  %v9338_v63 = vunpack.i.h.bf16 %v9336_v8  ;;  %v5237_v21 = vpop.f32.mrf.mxu1  ;;  %5715 = vmatpush.msra.mxu0 %v5596_v39 }
 0x9ef   : > { %v5047_v30 = vsel %vm3181_vm13, %v5040_v26, %v9337_v23  ;;  %v5070_v54 = vsel %vm3181_vm13, %v5062_v35, %v9338_v63 }
 0x9f0   : > { %v5025_v20 = vpop.permute.xlu1 %5024  ;;  %v5055_v3 = vsel %vm3190_vm14, %v5047_v30, %v9328_v61 }
 0x9f1   : > { %v5078_v36 = vsel %vm3190_vm14, %v5070_v54, %v5025_v20 }
 0x9f4   : > { %v9346_v58 = vpop.permute.xlu0 %9345  ;;  %5169 = vmatmul.f32.gmra.mxu3 %v5055_v3  ;;  %5207 = vmatmul.f32.gmra.mxu0 %v5078_v36 }
 0x9f5   : > { %v9348_v48 = vunpack.i.h.bf16 %v9346_v58  ;;  %v9347_v14 = vunpack.i.l.bf16 %v9346_v58  ;;  %v5240_v33 = vpop.f32.mrf.mxu1 }
 0x9f7   : > { %v5048_v27 = vsel %vm3181_vm13, %v5041_v41, %v9347_v14  ;;  %v5071_v56 = vsel %vm3181_vm13, %v5063_v5, %v9348_v48 }
 0x9f8   : > { %v9351_v22 = vpop.permute.xlu1 %9350 }
 0x9f9   : > { %v9353_v43 = vunpack.i.h.bf16 %v9351_v22  ;;  %v9352_v25 = vunpack.i.l.bf16 %v9351_v22 }
 0x9fb   : > { %v5056_v10 = vsel %vm3190_vm14, %v5048_v27, %v9352_v25  ;;  %v5079_v1 = vsel %vm3190_vm14, %v5071_v56, %v9353_v43 }
 0x9fc   : > { %5172 = vmatmul.f32.gmra.mxu3 %v5056_v10  ;;  %5210 = vmatmul.f32.gmra.mxu0 %v5079_v1 }
 0x9fd   : > { %v5243_v25 = vpop.f32.mrf.mxu1 }
 0xa04   : > { %5213 = vmatmul.f32.gmra.mxu0 %v5080_v28 }
 0xa47   : > { %v5152_v50 = vpop.f32.mrf.mxu3 }
 0xa48   : > { %v5153_v34 = vadd.f32 %v12573_v0, %v5152_v50 }
 0xa49   : > { %v5193_v29 = vpop.f32.mrf.mxu0 }
 0xa4a   : > { %v5194_v53 = vadd.f32 %v5193_v29, %v5153_v34 }
 0xa4c   : > { %v5235_v40 = vadd.f32 %v5234_v24, %v5194_v53 }
 0xa4e   : > { %v5258_v60 = vmul.f32 0.01, %v5235_v40 }
 0xa4f   : > { %v5155_v46 = vpop.f32.mrf.mxu3 }
 0xa50   : > { %v5266_v13 = vmax.f32 %v5235_v40, %v5258_v60  ;;  %v5156_v44 = vadd.f32 %v12573_v0, %v5155_v46  ;;  %v5246_v46 = vpop.f32.mrf.mxu1 }
 0xa51   : > { %v5196_v8 = vpop.f32.mrf.mxu0 }
 0xa52   : > { %v5282_v62 = vrot.slane %v5266_v13, 7  ;;  %v5197_v23 = vadd.f32 %v5196_v8, %v5156_v44 }
 0xa54   : > { %v12582_v63 = vsel %vm1871_vm0, 0.0, %v5282_v62  ;;  %v5306_v26 = vsel %vm1871_vm0, %v5282_v62, 0.0  ;;  %v5238_v42 = vadd.f32 %v5237_v21, %v5197_v23 }
 0xa55   : > { %v5328_v20 = vrot.slane %v12582_v63, 1  ;;  %v5329_v30 = vrot.slane %v5306_v26, 1  ;;  %v5370_v61 = vrot.slane %v12582_v63, 2  ;;  %v5371_v35 = vrot.slane %v5306_v26, 2 }
 0xa56   : > { %v5259_v54 = vmul.f32 0.01, %v5238_v42 }
 0xa57   : > { %v5158_v3 = vpop.f32.mrf.mxu3  ;;  %v12588_v36 = vsel %vm2013_vm1, %v5328_v20, %v5329_v30  ;;  %v5372_v58 = vsel %vm2102_vm2, %v5370_v61, %v5371_v35 }
 0xa58   : > { %v5267_v16 = vmax.f32 %v5238_v42, %v5259_v54  ;;  %v5159_v37 = vadd.f32 %v12573_v0, %v5158_v3  ;;  %v9354_v48 = vpack.i.bf16 %v12588_v36, %v5372_v58 }
 0xa59   : > { %v5199_v14 = vpop.f32.mrf.mxu0 }
 0xa5a   : > { %v5283_v22 = vrot.slane %v5267_v16, 7  ;;  %v5200_v43 = vadd.f32 %v5199_v14, %v5159_v37  ;;  %9355 = vrot.lane.b32.xlu1 %v9354_v48, %s14330_s23 }
 0xa5c   : > { %v12595_v41 = vsel %vm1871_vm0, 0.0, %v5283_v22  ;;  %v5307_v5 = vsel %vm1871_vm0, %v5283_v22, 0.0  ;;  %v5241_v38 = vadd.f32 %v5240_v33, %v5200_v43 }
 0xa5d   : > { %v5332_v27 = vrot.slane %v5307_v5, 1  ;;  %v5374_v56 = vrot.slane %v5307_v5, 2  ;;  %v9359_v10 = vpack.i.bf16 %v5372_v58, %v12595_v41  ;;  %v5373_v1 = vrot.slane %v12595_v41, 2 }
 0xa5e   : > { %v5260_v55 = vmul.f32 0.01, %v5241_v38  ;;  %v5331_v51 = vrot.slane %v12595_v41, 1 }
 0xa5f   : > { %v5161_v28 = vpop.f32.mrf.mxu3  ;;  %9360 = vrot.lane.b32.xlu2 %v9359_v10, %s14329_s7  ;;  %v5375_v24 = vsel %vm2102_vm2, %v5373_v1, %v5374_v56  ;;  %v5249_v56 = vpop.f32.mrf.mxu1 }
 0xa60   : > { %v5268_v9 = vmax.f32 %v5241_v38, %v5260_v55  ;;  %v5162_v59 = vadd.f32 %v12573_v0, %v5161_v28  ;;  %8701 = vmatmul.msk.f32.vlgmr.msra.gmra.mxu0 %vm2706_vm11, %v5375_v24  ;;  %v12606_v21 = vsel %vm2013_vm1, %v5331_v51, %v5332_v27 }
 0xa61   : > { %v5202_v50 = vpop.f32.mrf.mxu0  ;;  %v9369_v6 = vpack.i.bf16 %v12606_v21, %v5375_v24  ;;  %v9364_v34 = vpack.i.bf16 %v12606_v21, %v12582_v63 }
 0xa62   : > { %v5284_v29 = vrot.slane %v5268_v9, 7  ;;  %v5203_v39 = vadd.f32 %v5202_v50, %v5162_v59 }
 0xa63   : > { %9370 = vrot.lane.b32.xlu1 %v9369_v6, %s14330_s23  ;;  %9365 = vrot.lane.b32.xlu0 %v9364_v34, %s14328_s10  ;;  %v5579_v34 = vld [vmem:[%s14333_s28 + $0x78] sm:$0xff] }
 0xa64   : > { %v12614_v53 = vsel %vm1871_vm0, 0.0, %v5284_v29  ;;  %v5308_v40 = vsel %vm1871_vm0, %v5284_v29, 0.0  ;;  %v5244_v60 = vadd.f32 %v5243_v25, %v5203_v39  ;;  %5618 = vmatpush.msra.mxu2 %v5579_v34 }
 0xa65   : > { %v5335_v13 = vrot.slane %v5308_v40, 1  ;;  %v9374_v44 = vpack.i.bf16 %v5375_v24, %v12614_v53  ;;  %v5376_v33 = vrot.slane %v12614_v53, 2  ;;  %v5377_v8 = vrot.slane %v5308_v40, 2 }
 0xa66   : > { %v5261_v62 = vmul.f32 0.01, %v5244_v60  ;;  %v5334_v23 = vrot.slane %v12614_v53, 1 }
 0xa67   : > { %v5164_v26 = vpop.f32.mrf.mxu3  ;;  %9375 = vrot.lane.b32.xlu2 %v9374_v44, %s14329_s7  ;;  %v5378_v42 = vsel %vm2102_vm2, %v5376_v33, %v5377_v8 }
 0xa68   : > { %v5269_v20 = vmax.f32 %v5244_v60, %v5261_v62  ;;  %v5165_v30 = vadd.f32 %v12573_v0, %v5164_v26  ;;  %v12624_v61 = vsel %vm2013_vm1, %v5334_v23, %v5335_v13  ;;  %8702 = vmatmul.msk.f32.gmra.mxu0 %vm2706_vm11, %v5378_v42 }
 0xa69   : > { %v9384_v35 = vpack.i.bf16 %v12624_v61, %v5378_v42  ;;  %v5205_v54 = vpop.f32.mrf.mxu0  ;;  %v9379_v3 = vpack.i.bf16 %v12624_v61, %v12595_v41 }
 0xa6a   : > { %v5285_v58 = vrot.slane %v5269_v20, 7  ;;  %v5206_v16 = vadd.f32 %v5205_v54, %v5165_v30  ;;  %v5252_v30 = vpop.f32.mrf.mxu1 }
 0xa6b   : > { %9385 = vrot.lane.b32.xlu1 %v9384_v35, %s14330_s23  ;;  %9380 = vrot.lane.b32.xlu0 %v9379_v3, %s14328_s10 }
 0xa6c   : > { %v12633_v37 = vsel %vm1871_vm0, 0.0, %v5285_v58  ;;  %v5309_v48 = vsel %vm1871_vm0, %v5285_v58, 0.0  ;;  %v5247_v14 = vadd.f32 %v5246_v46, %v5206_v16 }
 0xa6d   : > { %v5338_v22 = vrot.slane %v5309_v48, 1  ;;  %v9389_v43 = vpack.i.bf16 %v5378_v42, %v12633_v37  ;;  %v5379_v25 = vrot.slane %v12633_v37, 2  ;;  %v5380_v5 = vrot.slane %v5309_v48, 2  ;;  %v5595_v48 = vld [vmem:[%s14333_s28 + $0xf8] sm:$0xff] }
 0xa6e   : > { %v5262_v38 = vmul.f32 0.01, %v5247_v14  ;;  %v5337_v27 = vrot.slane %v12633_v37, 1  ;;  %5659 = vmatpush.msra.mxu3 %v5595_v48  ;;  %v5573_v48 = vld [vmem:[%s14333_s28 + $0x48] sm:$0xff] }
 0xa6f   : > { %v5167_v10 = vpop.f32.mrf.mxu3  ;;  %9390 = vrot.lane.b32.xlu2 %v9389_v43, %s14329_s7  ;;  %v5381_v1 = vsel %vm2102_vm2, %v5379_v25, %v5380_v5  ;;  %v5594_v5 = vld [vmem:[%s14333_s28 + $0xf0] sm:$0xff] }
 0xa70   : > { %v5270_v55 = vmax.f32 %v5247_v14, %v5262_v38  ;;  %v5168_v51 = vadd.f32 %v12573_v0, %v5167_v10  ;;  %v12643_v28 = vsel %vm2013_vm1, %v5337_v27, %v5338_v22  ;;  %8703 = vmatmul.msk.f32.gmra.mxu0 %vm2706_vm11, %v5381_v1  ;;  %v5578_v14 = vld [vmem:[%s14333_s28 + $0x70] sm:$0xff]  ;;  %v5577_v38 = vld [vmem:[%s14333_s28 + $0x68] sm:$0xff]  ;;  %5660 = vmatpush.msra.mxu3 %v5594_v5 }
 0xa71   : > { %v9399_v24 = vpack.i.bf16 %v12643_v28, %v5381_v1  ;;  %v5208_v9 = vpop.f32.mrf.mxu0  ;;  %v9394_v59 = vpack.i.bf16 %v12643_v28, %v12614_v53  ;;  %5619 = vmatpush.msra.mxu2 %v5578_v14 }
 0xa72   : > { %v5286_v50 = vrot.slane %v5270_v55, 7  ;;  %v5209_v6 = vadd.f32 %v5208_v9, %v5168_v51  ;;  %v5593_v55 = vld [vmem:[%s14333_s28 + $0xe8] sm:$0xff]  ;;  %v5576_v9 = vld [vmem:[%s14333_s28 + $0x60] sm:$0xff] }
 0xa73   : > { %9400 = vrot.lane.b32.xlu1 %v9399_v24, %s14330_s23  ;;  %9395 = vrot.lane.b32.xlu0 %v9394_v59, %s14328_s10 }
 0xa74   : > { %v12653_v29 = vsel %vm1871_vm0, 0.0, %v5286_v50  ;;  %v5310_v39 = vsel %vm1871_vm0, %v5286_v50, 0.0  ;;  %v5250_v40 = vadd.f32 %v5249_v56, %v5209_v6  ;;  %5620 = vmatpush.msra.mxu2 %v5577_v38  ;;  %v5592_v6 = vld [vmem:[%s14333_s28 + $0xe0] sm:$0xff]  ;;  %5661 = vmatpush.msra.mxu3 %v5593_v55 }
 0xa75   : > { %v5341_v60 = vrot.slane %v5310_v39, 1  ;;  %v9404_v46 = vpack.i.bf16 %v5381_v1, %v12653_v29  ;;  %v5382_v13 = vrot.slane %v12653_v29, 2  ;;  %v5383_v44 = vrot.slane %v5310_v39, 2  ;;  %v5572_v38 = vld [vmem:[%s14333_s28 + $0x40] sm:$0xff] }
 0xa76   : > { %v5263_v33 = vmul.f32 0.01, %v5250_v40  ;;  %v5340_v8 = vrot.slane %v12653_v29, 1  ;;  %5621 = vmatpush.msra.mxu2 %v5576_v9  ;;  %5662 = vmatpush.msra.mxu3 %v5592_v6  ;;  %v5588_v55 = vld [vmem:[%s14333_s28 + $0xc0] sm:$0xff] }
 0xa77   : > { %v5170_v62 = vpop.f32.mrf.mxu3  ;;  %9405 = vrot.lane.b32.xlu2 %v9404_v46, %s14329_s7  ;;  %v5384_v23 = vsel %vm2102_vm2, %v5382_v13, %v5383_v44  ;;  %v5255_v44 = vpop.f32.mrf.mxu1 }
 0xa78   : > { %v5271_v26 = vmax.f32 %v5250_v40, %v5263_v33  ;;  %v5171_v42 = vadd.f32 %v12573_v0, %v5170_v62  ;;  %v12663_v20 = vsel %vm2013_vm1, %v5340_v8, %v5341_v60  ;;  %8704 = vmatmul.msk.f32.gmra.mxu0 %vm2706_vm11, %v5384_v23  ;;  %v5575_v33 = vld [vmem:[%s14333_s28 + $0x58] sm:$0xff] }
 0xa79   : > { %v9414_v35 = vpack.i.bf16 %v12663_v20, %v5384_v23  ;;  %v5211_v54 = vpop.f32.mrf.mxu0  ;;  %v9409_v3 = vpack.i.bf16 %v12663_v20, %v12633_v37  ;;  %v5591_v8 = vld [vmem:[%s14333_s28 + $0xd8] sm:$0xff]  ;;  %5622 = vmatpush.msra.mxu2 %v5575_v33 }
 0xa7a   : > { %v5287_v58 = vrot.slane %v5271_v26, 7  ;;  %v5212_v16 = vadd.f32 %v5211_v54, %v5171_v42  ;;  %v5590_v26 = vld [vmem:[%s14333_s28 + $0xd0] sm:$0xff]  ;;  %5663 = vmatpush.msra.mxu3 %v5591_v8  ;;  %v5587_v33 = vld [vmem:[%s14333_s28 + $0xb8] sm:$0xff] }
 0xa7b   : > { %9415 = vrot.lane.b32.xlu1 %v9414_v35, %s14330_s23  ;;  %9410 = vrot.lane.b32.xlu0 %v9409_v3, %s14328_s10  ;;  %v5570_v8 = vld [vmem:[%s14333_s28 + $0x30] sm:$0xff] }
 0xa7c   : > { %v12674_v22 = vsel %vm1871_vm0, 0.0, %v5287_v58  ;;  %v5311_v43 = vsel %vm1871_vm0, %v5287_v58, 0.0  ;;  %v5253_v25 = vadd.f32 %v5252_v30, %v5212_v16  ;;  %5664 = vmatpush.msra.mxu3 %v5590_v26  ;;  %v5568_v26 = vld [vmem:[%s14333_s28 + $0x20] sm:$0xff] }
 0xa7d   : > { %v5344_v27 = vrot.slane %v5311_v43, 1  ;;  %v9419_v56 = vpack.i.bf16 %v5384_v23, %v12674_v22  ;;  %v5385_v10 = vrot.slane %v12674_v22, 2  ;;  %v5386_v1 = vrot.slane %v5311_v43, 2  ;;  %v5574_v23 = vld [vmem:[%s14333_s28 + $0x50] sm:$0xff] }
 0xa7e   : > { %v5264_v51 = vmul.f32 0.01, %v5253_v25  ;;  %v5343_v24 = vrot.slane %v12674_v22, 1  ;;  %5623 = vmatpush.msra.mxu2 %v5574_v23  ;;  %v5585_v23 = vld [vmem:[%s14333_s28 + $0xa8] sm:$0xff] }
 0xa7f   : > { %v5173_v59 = vpop.f32.mrf.mxu3  ;;  %9420 = vrot.lane.b32.xlu2 %v9419_v56, %s14329_s7  ;;  %v5387_v50 = vsel %vm2102_vm2, %v5385_v10, %v5386_v1 }
 0xa80   : > { %v5272_v34 = vmax.f32 %v5253_v25, %v5264_v51  ;;  %v5174_v39 = vadd.f32 %v12573_v0, %v5173_v59  ;;  %v12689_v40 = vsel %vm2013_vm1, %v5343_v24, %v5344_v27  ;;  %8705 = vmatmul.msk.f32.gmra.mxu0 %vm2706_vm11, %v5387_v50  ;;  %v5589_v25 = vld [vmem:[%s14333_s28 + $0xc8] sm:$0xff]  ;;  %5624 = vmatpush.msra.mxu2 %v5573_v48  ;;  %v5571_v51 = vld [vmem:[%s14333_s28 + $0x38] sm:$0xff] }
 0xa81   : > { %v9429_v60 = vpack.i.bf16 %v12689_v40, %v5387_v50  ;;  %v5214_v46 = vpop.f32.mrf.mxu0  ;;  %v9424_v13 = vpack.i.bf16 %v12689_v40, %v12653_v29  ;;  %5665 = vmatpush.msra.mxu3 %v5589_v25  ;;  %v5581_v48 = vld [vmem:[%s14333_s28 + $0x88] sm:$0xff] }
 0xa82   : > { %v5288_v62 = vrot.slane %v5272_v34, 7  ;;  %v5215_v0 = vadd.f32 %v5214_v46, %v5174_v39  ;;  %5625 = vmatpush.msra.mxu2 %v5572_v38 }
 0xa83   : > { %9430 = vrot.lane.b32.xlu1 %v9429_v60, %s14330_s23  ;;  %9425 = vrot.lane.b32.xlu0 %v9424_v13, %s14328_s10 }
 0xa84   : > { %v12702_v42 = vsel %vm1871_vm0, 0.0, %v5288_v62  ;;  %v5312_v30 = vsel %vm1871_vm0, %v5288_v62, 0.0  ;;  %v5256_v35 = vadd.f32 %v5255_v44, %v5215_v0  ;;  %5666 = vmatpush.msra.mxu3 %v5588_v55  ;;  %5626 = vmatpush.msra.mxu2 %v5571_v51  ;;  %v5586_v62 = vld [vmem:[%s14333_s28 + $0xb0] sm:$0xff]  ;;  %v5569_v0 = vld [vmem:[%s14333_s28 + $0x28] sm:$0xff] }
 0xa85   : > { %v5347_v54 = vrot.slane %v5312_v30, 1  ;;  %v9434_v3 = vpack.i.bf16 %v5387_v50, %v12702_v42  ;;  %v5388_v58 = vrot.slane %v12702_v42, 2  ;;  %v5389_v16 = vrot.slane %v5312_v30, 2  ;;  %v5584_v30 = vld [vmem:[%s14333_s28 + $0xa0] sm:$0xff] }
 0xa86   : > { %v5265_v14 = vmul.f32 0.01, %v5256_v35  ;;  %v5346_v43 = vrot.slane %v12702_v42, 1  ;;  %5667 = vmatpush.msra.mxu3 %v5587_v33  ;;  %5627 = vmatpush.msra.mxu2 %v5570_v8 }
 0xa87   : > { %9435 = vrot.lane.b32.xlu2 %v9434_v3, %s14329_s7  ;;  %v5390_v5 = vsel %vm2102_vm2, %v5388_v58, %v5389_v16  ;;  %v5566_v3 = vld [vmem:[%s14333_s28 + $0x10] sm:$0xff]  ;;  %v5565_v16 = vld [vmem:[%s14333_s28 + $0x8] sm:$0xff] }
 0xa88   : > { %v5273_v27 = vmax.f32 %v5256_v35, %v5265_v14  ;;  %v12714_v56 = vsel %vm2013_vm1, %v5346_v43, %v5347_v54  ;;  %8706 = vmatmul.msk.f32.gmra.mxu0 %vm2706_vm11, %v5390_v5  ;;  %5668 = vmatpush.msra.mxu3 %v5586_v62  ;;  %v5567_v35 = vld [vmem:[%s14333_s28 + $0x18] sm:$0xff]  ;;  %v5582_v58 = vld [vmem:[%s14333_s28 + $0x90] sm:$0xff]  ;;  %v5564_v14 = vld [vmem:[%s14333_s28] sm:$0xff] }
 0xa89   : > { %v9444_v10 = vpack.i.bf16 %v12714_v56, %v5390_v5  ;;  %v9439_v1 = vpack.i.bf16 %v12714_v56, %v12674_v22  ;;  %5628 = vmatpush.msra.mxu2 %v5569_v0  ;;  %v5583_v54 = vld [vmem:[%s14333_s28 + $0x98] sm:$0xff]  ;;  %v5580_v43 = vld [vmem:[%s14333_s28 + $0x80] sm:$0xff] }
 0xa8a   : > { %v5289_v24 = vrot.slane %v5273_v27, 7  ;;  %5669 = vmatpush.msra.mxu3 %v5585_v23 }
 0xa8b   : > { %9445 = vrot.lane.b32.xlu1 %v9444_v10, %s14330_s23  ;;  %9440 = vrot.lane.b32.xlu0 %v9439_v1, %s14328_s10 }
 0xa8c   : > { %v5305_v9 = vsel %vm1871_vm0, 0.0, %v5289_v24  ;;  %v5313_v59 = vsel %vm1871_vm0, %v5289_v24, 0.0  ;;  %5629 = vmatpush.msra.mxu2 %v5568_v26  ;;  %5670 = vmatpush.msra.mxu3 %v5584_v30 }
 0xa8d   : > { %v5438_v50 = vrot.slane %v5305_v9, 1  ;;  %v5439_v6 = vrot.slane %v5313_v59, 1  ;;  %v5450_v34 = vrot.slane %v5313_v59, 2  ;;  %v9449_v39 = vpack.i.bf16 %v5390_v5, %v5305_v9 }
 0xa8e   : > { %v5449_v60 = vrot.slane %v5305_v9, 2  ;;  %5630 = vmatpush.msra.mxu2 %v5567_v35  ;;  %5671 = vmatpush.msra.mxu3 %v5583_v54 }
 0xa8f   : > { %9450 = vrot.lane.b32.xlu2 %v9449_v39, %s14329_s7  ;;  %v12728_v46 = vsel %vm2013_vm1, %v5438_v50, %v5439_v6 }
 0xa90   : > { %v5451_v13 = vsel %vm2102_vm2, %v5449_v60, %v5450_v34  ;;  %v9454_v44 = vpack.i.bf16 %v12728_v46, %v12702_v42  ;;  %5631 = vmatpush.msra.mxu2 %v5566_v3  ;;  %5672 = vmatpush.msra.mxu3 %v5582_v58 }
 0xa91   : > { %8707 = vmatmul.msk.f32.gmra.mxu0 %vm2706_vm11, %v5451_v13 }
 0xa92   : > { %5632 = vmatpush.msra.mxu2 %v5565_v16  ;;  %5673 = vmatpush.msra.mxu3 %v5581_v48 }
 0xa93   : > { %5466 = vrot.lane.b32.xlu1 %v5451_v13, %s14330_s23  ;;  %9455 = vrot.lane.b32.xlu0 %v9454_v44, %s14328_s10 }
 0xa94   : > { %5633 = vmatpush.msra.mxu2 %v5564_v14  ;;  %5674 = vmatpush.msra.mxu3 %v5580_v43 }
 0xa99   : > { %8708 = vmatmul.msk.f32.gmra.mxu0 %vm2706_vm11, %v10577_v18 }
 0xa9b   : > { %5427 = vrot.lane.b32.xlu0 %v5305_v9, %s14328_s10 }
 0xab9   : > { %v9361_v25 = vpop.permute.xlu2 %9360 }
 0xaba   : > { %v9362_v1 = vunpack.i.l.bf16 %v9361_v25  ;;  %v9363_v44 = vunpack.i.h.bf16 %v9361_v25 }
 0xac1   : > { %v9376_v38 = vpop.permute.xlu2 %9375 }
 0xac2   : > { %v9377_v33 = vunpack.i.l.bf16 %v9376_v38  ;;  %v9378_v48 = vunpack.i.h.bf16 %v9376_v38 }
 0xac9   : > { %v9391_v60 = vpop.permute.xlu2 %9390 }
 0xaca   : > { %v9392_v14 = vunpack.i.l.bf16 %v9391_v60  ;;  %v9393_v38 = vunpack.i.h.bf16 %v9391_v60 }
 0xacc   : > { %v9356_v5 = vpop.permute.xlu1 %9355 }
 0xacd   : > { %v9357_v27 = vunpack.i.l.bf16 %v9356_v5  ;;  %v9358_v50 = vunpack.i.h.bf16 %v9356_v5 }
 0xacf   : > { %v5540_v10 = vsel %vm2706_vm11, %v12588_v36, %v9357_v27  ;;  %v5518_v36 = vsel %vm2706_vm11, %v12582_v63, %v9358_v50 }
 0xad0   : > { %v5548_v59 = vsel %vm3181_vm13, %v5540_v10, %v9362_v1  ;;  %v5525_v26 = vsel %vm3181_vm13, %v5518_v36, %v9363_v44 }
 0xad1   : > { %v9406_v63 = vpop.permute.xlu2 %9405 }
 0xad5   : > { %v9371_v55 = vpop.permute.xlu1 %9370  ;;  %v9366_v51 = vpop.permute.xlu0 %9365 }
 0xad6   : > { %v9368_v24 = vunpack.i.h.bf16 %v9366_v51  ;;  %v9367_v9 = vunpack.i.l.bf16 %v9366_v51  ;;  %v9372_v6 = vunpack.i.l.bf16 %v9371_v55  ;;  %v9373_v35 = vunpack.i.h.bf16 %v9371_v55 }
 0xad8   : > { %v5532_v34 = vsel %vm3190_vm14, %v11450_v7, %v9367_v9  ;;  %v5556_v39 = vsel %vm3190_vm14, %v5548_v59, %v9368_v24  ;;  %v5541_v13 = vsel %vm2706_vm11, %v12606_v21, %v9372_v6  ;;  %v5519_v21 = vsel %vm2706_vm11, %v12595_v41, %v9373_v35 }
 0xad9   : > { %5634 = vmatmul.f32.vlgmr.msra.gmra.mxu2 %v5532_v34  ;;  %5675 = vmatmul.f32.vlgmr.msra.gmra.mxu3 %v5556_v39  ;;  %v5549_v30 = vsel %vm3181_vm13, %v5541_v13, %v9377_v33  ;;  %v5526_v10 = vsel %vm3181_vm13, %v5519_v21, %v9378_v48  ;;  %v9407_v59 = vunpack.i.l.bf16 %v9406_v63  ;;  %v9421_v34 = vpop.permute.xlu2 %9420 }
 0xadd   : > { %v9386_v8 = vpop.permute.xlu1 %9385  ;;  %v9381_v62 = vpop.permute.xlu0 %9380 }
 0xade   : > { %v9383_v0 = vunpack.i.h.bf16 %v9381_v62  ;;  %v9382_v23 = vunpack.i.l.bf16 %v9381_v62  ;;  %v9387_v54 = vunpack.i.l.bf16 %v9386_v8  ;;  %v9388_v55 = vunpack.i.h.bf16 %v9386_v8 }
 0xae0   : > { %v5533_v3 = vsel %vm3190_vm14, %v5525_v26, %v9382_v23  ;;  %v5557_v58 = vsel %vm3190_vm14, %v5549_v30, %v9383_v0  ;;  %v5542_v16 = vsel %vm2706_vm11, %v12624_v61, %v9387_v54  ;;  %v5520_v41 = vsel %vm2706_vm11, %v12614_v53, %v9388_v55 }
 0xae1   : > { %5637 = vmatmul.f32.gmra.mxu2 %v5533_v3  ;;  %5678 = vmatmul.f32.gmra.mxu3 %v5557_v58  ;;  %v5550_v1 = vsel %vm3181_vm13, %v5542_v16, %v9392_v14  ;;  %v5527_v13 = vsel %vm3181_vm13, %v5520_v41, %v9393_v38  ;;  %v9408_v0 = vunpack.i.h.bf16 %v9406_v63  ;;  %v9422_v23 = vunpack.i.l.bf16 %v9421_v34  ;;  %v9436_v21 = vpop.permute.xlu2 %9435 }
 0xae5   : > { %v9401_v43 = vpop.permute.xlu1 %9400  ;;  %v9396_v25 = vpop.permute.xlu0 %9395 }
 0xae6   : > { %v9398_v5 = vunpack.i.h.bf16 %v9396_v25  ;;  %v9397_v27 = vunpack.i.l.bf16 %v9396_v25  ;;  %v9402_v51 = vunpack.i.l.bf16 %v9401_v43  ;;  %v9403_v33 = vunpack.i.h.bf16 %v9401_v43 }
 0xae7   : > { %v9423_v43 = vunpack.i.h.bf16 %v9421_v34  ;;  %v9437_v25 = vunpack.i.l.bf16 %v9436_v21 }
 0xae8   : > { %v5534_v24 = vsel %vm3190_vm14, %v5526_v10, %v9397_v27  ;;  %v5558_v9 = vsel %vm3190_vm14, %v5550_v1, %v9398_v5  ;;  %v5543_v61 = vsel %vm2706_vm11, %v12643_v28, %v9402_v51  ;;  %v5521_v28 = vsel %vm2706_vm11, %v12633_v37, %v9403_v33 }
 0xae9   : > { %5640 = vmatmul.f32.gmra.mxu2 %v5534_v24  ;;  %5681 = vmatmul.f32.gmra.mxu3 %v5558_v9  ;;  %v5551_v44 = vsel %vm3181_vm13, %v5543_v61, %v9407_v59  ;;  %v5528_v3 = vsel %vm3181_vm13, %v5521_v28, %v9408_v0  ;;  %v9438_v59 = vunpack.i.h.bf16 %v9436_v21 }
 0xaed   : > { %v9416_v50 = vpop.permute.xlu1 %9415  ;;  %v9411_v6 = vpop.permute.xlu0 %9410 }
 0xaee   : > { %v9413_v39 = vunpack.i.h.bf16 %v9411_v6  ;;  %v9412_v36 = vunpack.i.l.bf16 %v9411_v6  ;;  %v9417_v8 = vunpack.i.l.bf16 %v9416_v50  ;;  %v9418_v16 = vunpack.i.h.bf16 %v9416_v50 }
 0xaf0   : > { %v5535_v62 = vsel %vm3190_vm14, %v5527_v13, %v9412_v36  ;;  %v5559_v53 = vsel %vm3190_vm14, %v5551_v44, %v9413_v39  ;;  %v5544_v60 = vsel %vm2706_vm11, %v12663_v20, %v9417_v8  ;;  %v5522_v20 = vsel %vm2706_vm11, %v12653_v29, %v9418_v16  ;;  %v9451_v29 = vpop.permute.xlu2 %9450 }
 0xaf1   : > { %5643 = vmatmul.f32.gmra.mxu2 %v5535_v62  ;;  %5684 = vmatmul.f32.gmra.mxu3 %v5559_v53  ;;  %v5552_v58 = vsel %vm3181_vm13, %v5544_v60, %v9422_v23  ;;  %v5529_v55 = vsel %vm3181_vm13, %v5522_v20, %v9423_v43  ;;  %v9452_v50 = vunpack.i.l.bf16 %v9451_v29  ;;  %v9453_v53 = vunpack.i.h.bf16 %v9451_v29  ;;  %v6087_v20 = vld [vmem:[%s14335_s1 + $0x100] sm:$0xff] }
 0xaf5   : > { %v9431_v26 = vpop.permute.xlu1 %9430  ;;  %v9426_v30 = vpop.permute.xlu0 %9425 }
 0xaf6   : > { %v9428_v35 = vunpack.i.h.bf16 %v9426_v30  ;;  %v9427_v54 = vunpack.i.l.bf16 %v9426_v30  ;;  %v9432_v48 = vunpack.i.l.bf16 %v9431_v26  ;;  %v9433_v24 = vunpack.i.h.bf16 %v9431_v26  ;;  %v12819_v30 = vld [vmem:[%s14334_s18] ss:$0 sm:$0xff]  ;;  %s14341_s18 = sld [smem:[#allocation46_spill]] }
 0xaf8   : > { %v5536_v14 = vsel %vm3190_vm14, %v5528_v3, %v9427_v54  ;;  %v5560_v37 = vsel %vm3190_vm14, %v5552_v58, %v9428_v35  ;;  %v5545_v63 = vsel %vm2706_vm11, %v12689_v40, %v9432_v48  ;;  %v5523_v40 = vsel %vm2706_vm11, %v12674_v22, %v9433_v24  ;;  %v6090_v35 = vld [vmem:[%s14335_s1 + $0x118] sm:$0xff]  ;;  %v6089_v54 = vld [vmem:[%s14335_s1 + $0x110] sm:$0xff] }
 0xaf9   : > { %5646 = vmatmul.f32.gmra.mxu2 %v5536_v14  ;;  %5687 = vmatmul.f32.gmra.mxu3 %v5560_v37  ;;  %v5553_v51 = vsel %vm3181_vm13, %v5545_v63, %v9437_v25  ;;  %v5530_v13 = vsel %vm3181_vm13, %v5523_v40, %v9438_v59  ;;  %v6088_v37 = vld [vmem:[%s14335_s1 + $0x108] sm:$0xff] }
 0xafa   : > { %6203 = vmatpush.msrb.mxu3 %v6090_v35 }
 0xafc   : > { %6204 = vmatpush.msrb.mxu3 %v6089_v54 }
 0xafd   : > { %v9446_v5 = vpop.permute.xlu1 %9445  ;;  %v9441_v27 = vpop.permute.xlu0 %9440 }
 0xafe   : > { %v9443_v10 = vunpack.i.h.bf16 %v9441_v27  ;;  %v9442_v1 = vunpack.i.l.bf16 %v9441_v27  ;;  %v9447_v9 = vunpack.i.l.bf16 %v9446_v5  ;;  %v9448_v33 = vunpack.i.h.bf16 %v9446_v5  ;;  %6205 = vmatpush.msrb.mxu3 %v6088_v37 }
 0xb00   : > { %v5537_v41 = vsel %vm3190_vm14, %v5529_v55, %v9442_v1  ;;  %v5561_v61 = vsel %vm3190_vm14, %v5553_v51, %v9443_v10  ;;  %v5546_v38 = vsel %vm2706_vm11, %v12714_v56, %v9447_v9  ;;  %v5524_v56 = vsel %vm2706_vm11, %v12702_v42, %v9448_v33  ;;  %6206 = vmatpush.msrb.mxu3 %v6087_v20 }
 0xb01   : > { %5649 = vmatmul.f32.gmra.mxu2 %v5537_v41  ;;  %5690 = vmatmul.f32.gmra.mxu3 %v5561_v61  ;;  %v5554_v44 = vsel %vm3181_vm13, %v5546_v38, %v9452_v50  ;;  %v5531_v0 = vsel %vm3181_vm13, %v5524_v56, %v9453_v53 }
 0xb05   : > { %v9456_v6 = vpop.permute.xlu0 %9455  ;;  %v5467_v36 = vpop.permute.xlu1 %5466 }
 0xb06   : > { %v9458_v34 = vunpack.i.h.bf16 %v9456_v6  ;;  %v9457_v39 = vunpack.i.l.bf16 %v9456_v6  ;;  %v5547_v22 = vsel %vm2706_vm11, %v12728_v46, %v5467_v36  ;;  %v5717_v46 = vpop.f32.mrf.mxu0 }
 0xb07   : > { %v5555_v60 = vsel %vm3181_vm13, %v5547_v22, %v11481_v52 }
 0xb08   : > { %v5538_v8 = vsel %vm3190_vm14, %v5530_v13, %v9457_v39  ;;  %v5562_v62 = vsel %vm3190_vm14, %v5554_v44, %v9458_v34  ;;  %v5563_v26 = vsel %vm3190_vm14, %v5555_v60, %v11490_v49 }
 0xb09   : > { %5652 = vmatmul.f32.gmra.mxu2 %v5538_v8  ;;  %5693 = vmatmul.f32.gmra.mxu3 %v5562_v62 }
 0xb0d   : > { %v5428_v28 = vpop.permute.xlu0 %5427 }
 0xb0e   : > { %v5539_v23 = vsel %vm3190_vm14, %v5531_v0, %v5428_v28  ;;  %v5720_v42 = vpop.f32.mrf.mxu0 }
 0xb11   : > { %5655 = vmatmul.f32.gmra.mxu2 %v5539_v23  ;;  %5696 = vmatmul.f32.gmra.mxu3 %v5563_v26 }
 0xb16   : > { %v5723_v25 = vpop.f32.mrf.mxu0 }
 0xb1e   : > { %v5726_v40 = vpop.f32.mrf.mxu0 }
 0xb5c   : > { %v5635_v3 = vpop.f32.mrf.mxu2  ;;  %v5676_v58 = vpop.f32.mrf.mxu3 }
 0xb5d   : > { %v5636_v21 = vadd.f32 %v12819_v30, %v5635_v3  ;;  %v5729_v3 = vpop.f32.mrf.mxu0 }
 0xb5f   : > { %v5677_v16 = vadd.f32 %v5676_v58, %v5636_v21 }
 0xb61   : > { %v5718_v48 = vadd.f32 %v5717_v46, %v5677_v16 }
 0xb63   : > { %v5741_v14 = vmul.f32 0.01, %v5718_v48 }
 0xb64   : > { %v5638_v63 = vpop.f32.mrf.mxu2  ;;  %v5679_v43 = vpop.f32.mrf.mxu3 }
 0xb65   : > { %v5749_v5 = vmax.f32 %v5718_v48, %v5741_v14  ;;  %v5639_v27 = vadd.f32 %v12819_v30, %v5638_v63 }
 0xb67   : > { %v12828_v10 = vadd.f32 %v5749_v5, %v12303_v12  ;;  %v5680_v1 = vadd.f32 %v5679_v43, %v5639_v27 }
 0xb69   : > { %v5721_v55 = vadd.f32 %v5720_v42, %v5680_v1  ;;  %v5773_v51 = vrot.slane %v12828_v10, 7 }
 0xb6b   : > { %v5742_v24 = vmul.f32 0.01, %v5721_v55  ;;  %v5797_v38 = vsel %vm1871_vm0, %v5773_v51, 0.0  ;;  %v12837_v12 = vsel %vm1871_vm0, 0.0, %v5773_v51 }
 0xb6c   : > { %v5641_v9 = vpop.f32.mrf.mxu2  ;;  %v5682_v41 = vpop.f32.mrf.mxu3  ;;  %v5862_v39 = vrot.slane %v5797_v38, 2  ;;  %v5861_v36 = vrot.slane %v12837_v12, 2  ;;  %v5820_v51 = vrot.slane %v5797_v38, 1 }
 0xb6d   : > { %v5750_v61 = vmax.f32 %v5721_v55, %v5742_v24  ;;  %v5642_v29 = vadd.f32 %v12819_v30, %v5641_v9  ;;  %v5819_v55 = vrot.slane %v12837_v12, 1 }
 0xb6e   : > { %v5863_v26 = vsel %vm2102_vm2, %v5861_v36, %v5862_v39 }
 0xb6f   : > { %v12834_v59 = vadd.f32 %v5750_v61, %v12307_v19  ;;  %v5683_v50 = vadd.f32 %v5682_v41, %v5642_v29  ;;  %v12892_v38 = vsel %vm2013_vm1, %v5819_v55, %v5820_v51 }
 0xb71   : > { %v5774_v6 = vrot.slane %v12834_v59, 7  ;;  %v5724_v34 = vadd.f32 %v5723_v25, %v5683_v50 }
 0xb73   : > { %v12842_v13 = vsel %vm1871_vm0, 0.0, %v5774_v6  ;;  %v5798_v44 = vsel %vm1871_vm0, %v5774_v6, 0.0  ;;  %v5743_v33 = vmul.f32 0.01, %v5724_v34 }
 0xb74   : > { %v5823_v8 = vrot.slane %v5798_v44, 1  ;;  %v5865_v62 = vrot.slane %v5798_v44, 2  ;;  %v5644_v19 = vpop.f32.mrf.mxu2  ;;  %v5685_v22 = vpop.f32.mrf.mxu3  ;;  %v5864_v56 = vrot.slane %v12842_v13, 2  ;;  %v5822_v53 = vrot.slane %v12842_v13, 1 }
 0xb75   : > { %v5751_v28 = vmax.f32 %v5724_v34, %v5743_v33  ;;  %v5645_v60 = vadd.f32 %v12819_v30, %v5644_v19 }
 0xb76   : > { %v12849_v0 = vsel %vm2102_vm2, %v5864_v56, %v5865_v62  ;;  %v12852_v23 = vsel %vm2013_vm1, %v5822_v53, %v5823_v8 }
 0xb77   : > { %v12856_v46 = vadd.f32 %v5751_v28, %v12311_v57  ;;  %v5686_v42 = vadd.f32 %v5685_v22, %v5645_v60  ;;  %8709 = vmatmul.msk.f32.vlgmr.msrb.gmra.mxu3 %vm2706_vm11, %v12849_v0  ;;  %v9469_v35 = vpack.i.bf16 %v12837_v12, %v12852_v23  ;;  %v9459_v54 = vpack.i.bf16 %v12849_v0, %v5863_v26 }
 0xb79   : > { %v5775_v58 = vrot.slane %v12856_v46, 7  ;;  %v5727_v21 = vadd.f32 %v5726_v40, %v5686_v42  ;;  %9470 = vrot.lane.b32.xlu1 %v9469_v35, %s14328_s10  ;;  %9460 = vrot.lane.b32.xlu2 %v9459_v54, %s14330_s23 }
 0xb7b   : > { %v12867_v57 = vsel %vm1871_vm0, 0.0, %v5775_v58  ;;  %v5744_v16 = vmul.f32 0.01, %v5727_v21  ;;  %v5799_v48 = vsel %vm1871_vm0, %v5775_v58, 0.0 }
 0xb7c   : > { %v5647_v14 = vpop.f32.mrf.mxu2  ;;  %v5688_v37 = vpop.f32.mrf.mxu3  ;;  %v9464_v20 = vpack.i.bf16 %v12867_v57, %v12842_v13  ;;  %v5826_v63 = vrot.slane %v5799_v48, 1  ;;  %v5867_v43 = vrot.slane %v12867_v57, 2  ;;  %v5868_v25 = vrot.slane %v5799_v48, 2 }
 0xb7d   : > { %v5752_v5 = vmax.f32 %v5727_v21, %v5744_v16  ;;  %v5648_v27 = vadd.f32 %v12819_v30, %v5647_v14  ;;  %v5825_v1 = vrot.slane %v12867_v57, 1 }
 0xb7e   : > { %9465 = vrot.lane.b32.xlu0 %v9464_v20, %s14329_s7  ;;  %v12878_v24 = vsel %vm2102_vm2, %v5867_v43, %v5868_v25 }
 0xb7f   : > { %v12881_v9 = vadd.f32 %v5752_v5, %v12334_v4  ;;  %v5689_v41 = vadd.f32 %v5688_v37, %v5648_v27  ;;  %8710 = vmatmul.msk.f32.gmra.mxu3 %vm2706_vm11, %v12878_v24  ;;  %v12886_v61 = vsel %vm2013_vm1, %v5825_v1, %v5826_v63  ;;  %v5732_v4 = vpop.f32.mrf.mxu0  ;;  %v9479_v39 = vpack.i.bf16 %v12878_v24, %v12892_v38 }
 0xb80   : > { %v9474_v29 = vpack.i.bf16 %v12842_v13, %v12886_v61 }
 0xb81   : > { %v5776_v40 = vrot.slane %v12881_v9, 7  ;;  %v5730_v50 = vadd.f32 %v5729_v3, %v5689_v41 }
 0xb82   : > { %9475 = vrot.lane.b32.xlu2 %v9474_v29, %s14328_s10 }
 0xb83   : > { %v12896_v6 = vsel %vm1871_vm0, 0.0, %v5776_v40  ;;  %v5745_v34 = vmul.f32 0.01, %v5730_v50  ;;  %v5800_v36 = vsel %vm1871_vm0, %v5776_v40, 0.0 }
 0xb84   : > { %v5650_v44 = vpop.f32.mrf.mxu2  ;;  %v5691_v33 = vpop.f32.mrf.mxu3  ;;  %v9484_v8 = vpack.i.bf16 %v12896_v6, %v5863_v26  ;;  %v5829_v62 = vrot.slane %v5800_v36, 1  ;;  %v5870_v19 = vrot.slane %v12896_v6, 2  ;;  %v5871_v22 = vrot.slane %v5800_v36, 2 }
 0xb85   : > { %v5753_v56 = vmax.f32 %v5730_v50, %v5745_v34  ;;  %v5651_v53 = vadd.f32 %v12819_v30, %v5650_v44  ;;  %v5828_v28 = vrot.slane %v12896_v6, 1  ;;  %v6086_v34 = vld [vmem:[%s14335_s1 + $0xf8] sm:$0xff] }
 0xb86   : > { %9485 = vrot.lane.b32.xlu1 %v9484_v8, %s14329_s7  ;;  %9480 = vrot.lane.b32.xlu0 %v9479_v39, %s14330_s23  ;;  %v12908_v60 = vsel %vm2102_vm2, %v5870_v19, %v5871_v22 }
 0xb87   : > { %v12911_v42 = vadd.f32 %v5753_v56, %v12365_v45  ;;  %v5692_v26 = vadd.f32 %v5691_v33, %v5651_v53  ;;  %8711 = vmatmul.msk.f32.gmra.mxu3 %vm2706_vm11, %v12908_v60  ;;  %v12916_v35 = vsel %vm2013_vm1, %v5828_v28, %v5829_v62  ;;  %v9494_v16 = vpack.i.bf16 %v12908_v60, %v12852_v23  ;;  %v5735_v55 = vpop.f32.mrf.mxu0 }
 0xb88   : > { %v9489_v54 = vpack.i.bf16 %v12867_v57, %v12916_v35  ;;  %6150 = vmatpush.msrb.mxu2 %v6086_v34 }
 0xb89   : > { %v5777_v3 = vrot.slane %v12911_v42, 7  ;;  %v5733_v58 = vadd.f32 %v5732_v4, %v5692_v26 }
 0xb8a   : > { %9490 = vrot.lane.b32.xlu2 %v9489_v54, %s14328_s10 }
 0xb8b   : > { %v12923_v21 = vsel %vm1871_vm0, 0.0, %v5777_v3  ;;  %v5746_v45 = vmul.f32 0.01, %v5733_v58  ;;  %v5801_v48 = vsel %vm1871_vm0, %v5777_v3, 0.0  ;;  %v6070_v3 = vld [vmem:[%s14335_s1 + $0x78] sm:$0xff] }
 0xb8c   : > { %v5653_v14 = vpop.f32.mrf.mxu2  ;;  %v5694_v37 = vpop.f32.mrf.mxu3  ;;  %v9499_v20 = vpack.i.bf16 %v12923_v21, %v12849_v0  ;;  %v5832_v63 = vrot.slane %v5801_v48, 1  ;;  %v5873_v43 = vrot.slane %v12923_v21, 2  ;;  %v5874_v25 = vrot.slane %v5801_v48, 2  ;;  %v6069_v48 = vld [vmem:[%s14335_s1 + $0x70] sm:$0xff]  ;;  %6109 = vmatpush.msrb.mxu1 %v6070_v3 }
 0xb8d   : > { %v5754_v5 = vmax.f32 %v5733_v58, %v5746_v45  ;;  %v5654_v27 = vadd.f32 %v12819_v30, %v5653_v14  ;;  %v5831_v1 = vrot.slane %v12923_v21, 1  ;;  %v6085_v58 = vld [vmem:[%s14335_s1 + $0xf0] sm:$0xff] }
 0xb8e   : > { %9500 = vrot.lane.b32.xlu1 %v9499_v20, %s14329_s7  ;;  %9495 = vrot.lane.b32.xlu0 %v9494_v16, %s14330_s23  ;;  %v12936_v51 = vsel %vm2102_vm2, %v5873_v43, %v5874_v25  ;;  %v6083_v43 = vld [vmem:[%s14335_s1 + $0xe0] sm:$0xff] }
 0xb8f   : > { %v12939_v0 = vadd.f32 %v5754_v5, %v12388_v47  ;;  %v5695_v41 = vadd.f32 %v5694_v37, %v5654_v27  ;;  %8712 = vmatmul.msk.f32.gmra.mxu3 %vm2706_vm11, %v12936_v51  ;;  %v12944_v29 = vsel %vm2013_vm1, %v5831_v1, %v5832_v63  ;;  %v9509_v36 = vpack.i.bf16 %v12936_v51, %v12886_v61  ;;  %v6084_v37 = vld [vmem:[%s14335_s1 + $0xe8] sm:$0xff] }
 0xb90   : > { %v9504_v40 = vpack.i.bf16 %v12896_v6, %v12944_v29  ;;  %6151 = vmatpush.msrb.mxu2 %v6085_v58  ;;  %6110 = vmatpush.msrb.mxu1 %v6069_v48 }
 0xb91   : > { %v5778_v50 = vrot.slane %v12939_v0, 7  ;;  %v5736_v4 = vadd.f32 %v5735_v55, %v5695_v41 }
 0xb92   : > { %9505 = vrot.lane.b32.xlu2 %v9504_v40, %s14328_s10  ;;  %6152 = vmatpush.msrb.mxu2 %v6084_v37 }
 0xb93   : > { %v12952_v39 = vsel %vm1871_vm0, 0.0, %v5778_v50  ;;  %v5747_v47 = vmul.f32 0.01, %v5736_v4  ;;  %v5802_v44 = vsel %vm1871_vm0, %v5778_v50, 0.0 }
 0xb94   : > { %v5656_v33 = vpop.f32.mrf.mxu2  ;;  %v9514_v8 = vpack.i.bf16 %v12952_v39, %v12878_v24  ;;  %v5835_v62 = vrot.slane %v5802_v44, 1  ;;  %v5876_v19 = vrot.slane %v12952_v39, 2  ;;  %v5877_v22 = vrot.slane %v5802_v44, 2  ;;  %v5697_v26 = vpop.f32.mrf.mxu3  ;;  %6153 = vmatpush.msrb.mxu2 %v6083_v43  ;;  %v6066_v44 = vld [vmem:[%s14335_s1 + $0x58] sm:$0xff]  ;;  %v6063_v43 = vld [vmem:[%s14335_s1 + $0x40] sm:$0xff] }
 0xb95   : > { %v5755_v56 = vmax.f32 %v5736_v4, %v5747_v47  ;;  %v5657_v53 = vadd.f32 %v12819_v30, %v5656_v33  ;;  %v5834_v28 = vrot.slane %v12952_v39, 1  ;;  %v5738_v24 = vpop.f32.mrf.mxu0  ;;  %v6067_v4 = vld [vmem:[%s14335_s1 + $0x60] sm:$0xff] }
 0xb96   : > { %9515 = vrot.lane.b32.xlu1 %v9514_v8, %s14329_s7  ;;  %9510 = vrot.lane.b32.xlu0 %v9509_v36, %s14330_s23  ;;  %v12965_v54 = vsel %vm2102_vm2, %v5876_v19, %v5877_v22  ;;  %v6082_v36 = vld [vmem:[%s14335_s1 + $0xd8] sm:$0xff]  ;;  %v6065_v22 = vld [vmem:[%s14335_s1 + $0x50] sm:$0xff] }
 0xb97   : > { %v12970_v45 = vadd.f32 %v5755_v56, %v12411_v17  ;;  %v5698_v30 = vadd.f32 %v5697_v26, %v5657_v53  ;;  %8713 = vmatmul.msk.f32.gmra.mxu3 %vm2706_vm11, %v12965_v54  ;;  %v12975_v16 = vsel %vm2013_vm1, %v5834_v28, %v5835_v62  ;;  %v6068_v17 = vld [vmem:[%s14335_s1 + $0x68] sm:$0xff]  ;;  %v9524_v5 = vpack.i.bf16 %v12965_v54, %v12916_v35  ;;  %v6081_v62 = vld [vmem:[%s14335_s1 + $0xd0] sm:$0xff] }
 0xb98   : > { %v9519_v14 = vpack.i.bf16 %v12923_v21, %v12975_v16  ;;  %6111 = vmatpush.msrb.mxu1 %v6068_v17  ;;  %6154 = vmatpush.msrb.mxu2 %v6082_v36  ;;  %v6080_v53 = vld [vmem:[%s14335_s1 + $0xc8] sm:$0xff]  ;;  %v6057_v36 = vld [vmem:[%s14335_s1 + $0x10] sm:$0xff] }
 0xb99   : > { %v5779_v20 = vrot.slane %v12970_v45, 7  ;;  %v5739_v63 = vadd.f32 %v5738_v24, %v5698_v30 }
 0xb9a   : > { %9520 = vrot.lane.b32.xlu2 %v9519_v14, %s14328_s10  ;;  %6112 = vmatpush.msrb.mxu1 %v6067_v4  ;;  %v6079_v14 = vld [vmem:[%s14335_s1 + $0xc0] sm:$0xff]  ;;  %v6074_v4 = vld [vmem:[%s14335_s1 + $0x98] sm:$0xff] }
 0xb9b   : > { %v12986_v25 = vsel %vm1871_vm0, 0.0, %v5779_v20  ;;  %v5748_v27 = vmul.f32 0.01, %v5739_v63  ;;  %v5803_v1 = vsel %vm1871_vm0, %v5779_v20, 0.0  ;;  %6155 = vmatpush.msrb.mxu2 %v6081_v62  ;;  %v6072_v62 = vld [vmem:[%s14335_s1 + $0x88] sm:$0xff] }
 0xb9c   : > { %v9529_v55 = vpack.i.bf16 %v12986_v25, %v12908_v60  ;;  %v5838_v41 = vrot.slane %v5803_v1, 1  ;;  %v5879_v40 = vrot.slane %v12986_v25, 2  ;;  %v5880_v50 = vrot.slane %v5803_v1, 2  ;;  %6113 = vmatpush.msrb.mxu1 %v6066_v44  ;;  %v6061_v1 = vld [vmem:[%s14335_s1 + $0x30] sm:$0xff]  ;;  %v6055_v44 = vld [vmem:[%s14335_s1] sm:$0xff] }
 0xb9d   : > { %v5756_v34 = vmax.f32 %v5739_v63, %v5748_v27  ;;  %v5837_v47 = vrot.slane %v12986_v25, 1  ;;  %6156 = vmatpush.msrb.mxu2 %v6080_v53  ;;  %v6077_v27 = vld [vmem:[%s14335_s1 + $0xb0] sm:$0xff] }
 0xb9e   : > { %9530 = vrot.lane.b32.xlu1 %v9529_v55, %s14329_s7  ;;  %9525 = vrot.lane.b32.xlu0 %v9524_v5, %s14330_s23  ;;  %v5881_v60 = vsel %vm2102_vm2, %v5879_v40, %v5880_v50  ;;  %v6078_v5 = vld [vmem:[%s14335_s1 + $0xb8] sm:$0xff]  ;;  %v6076_v55 = vld [vmem:[%s14335_s1 + $0xa8] sm:$0xff] }
 0xb9f   : > { %v13002_v33 = vadd.f32 %v5756_v34, %v12440_v11  ;;  %8714 = vmatmul.msk.f32.gmra.mxu3 %vm2706_vm11, %v5881_v60  ;;  %v13006_v8 = vsel %vm2013_vm1, %v5837_v47, %v5838_v41  ;;  %v6064_v11 = vld [vmem:[%s14335_s1 + $0x48] sm:$0xff]  ;;  %v9539_v24 = vpack.i.bf16 %v5881_v60, %v12944_v29  ;;  %6114 = vmatpush.msrb.mxu1 %v6065_v22  ;;  %v6075_v40 = vld [vmem:[%s14335_s1 + $0xa0] sm:$0xff]  ;;  %v6058_v34 = vld [vmem:[%s14335_s1 + $0x18] sm:$0xff] }
 0xba0   : > { %v9534_v19 = vpack.i.bf16 %v12952_v39, %v13006_v8  ;;  %6157 = vmatpush.msrb.mxu2 %v6079_v14  ;;  %v6060_v41 = vld [vmem:[%s14335_s1 + $0x28] sm:$0xff]  ;;  %v6059_v50 = vld [vmem:[%s14335_s1 + $0x20] sm:$0xff]  ;;  %v6073_v47 = vld [vmem:[%s14335_s1 + $0x90] sm:$0xff] }
 0xba1   : > { %v5780_v56 = vrot.slane %v13002_v33, 7  ;;  %6115 = vmatpush.msrb.mxu1 %v6064_v11 }
 0xba2   : > { %9535 = vrot.lane.b32.xlu2 %v9534_v19, %s14328_s10  ;;  %6158 = vmatpush.msrb.mxu2 %v6078_v5  ;;  %v6071_v19 = vld [vmem:[%s14335_s1 + $0x80] sm:$0xff] }
 0xba3   : > { %v5796_v28 = vsel %vm1871_vm0, 0.0, %v5780_v56  ;;  %v5804_v26 = vsel %vm1871_vm0, %v5780_v56, 0.0  ;;  %6116 = vmatpush.msrb.mxu1 %v6063_v43 }
 0xba4   : > { %v5929_v3 = vrot.slane %v5796_v28, 1  ;;  %v5930_v58 = vrot.slane %v5804_v26, 1  ;;  %v9544_v30 = vpack.i.bf16 %v5796_v28, %v12936_v51  ;;  %v5940_v48 = vrot.slane %v5796_v28, 2  ;;  %6159 = vmatpush.msrb.mxu2 %v6077_v27 }
 0xba5   : > { %v5941_v37 = vrot.slane %v5804_v26, 2 }
 0xba6   : > { %9545 = vrot.lane.b32.xlu1 %v9544_v30, %s14329_s7  ;;  %9540 = vrot.lane.b32.xlu0 %v9539_v24, %s14330_s23  ;;  %v13024_v20 = vsel %vm2013_vm1, %v5929_v3, %v5930_v58 }
 0xba7   : > { %v5942_v63 = vsel %vm2102_vm2, %v5940_v48, %v5941_v37  ;;  %v9549_v51 = vpack.i.bf16 %v12986_v25, %v13024_v20  ;;  %6160 = vmatpush.msrb.mxu2 %v6076_v55 }
 0xba8   : > { %8715 = vmatmul.msk.f32.gmra.mxu3 %vm2706_vm11, %v5942_v63  ;;  %v9554_v17 = vpack.i.bf16 %v5942_v63, %v12975_v16 }
 0xba9   : > { %6161 = vmatpush.msrb.mxu2 %v6075_v40 }
 0xbaa   : > { %9550 = vrot.lane.b32.xlu2 %v9549_v51, %s14328_s10 }
 0xbab   : > { %6162 = vmatpush.msrb.mxu2 %v6074_v4 }
 0xbad   : > { %6163 = vmatpush.msrb.mxu2 %v6073_v47 }
 0xbae   : > { %5892 = vrot.lane.b32.xlu1 %v12965_v54, %s14329_s7  ;;  %9555 = vrot.lane.b32.xlu0 %v9554_v17, %s14330_s23  ;;  %v6062_v54 = vld [vmem:[%s14335_s1 + $0x38] sm:$0xff] }
 0xbaf   : > { %6117 = vmatpush.msrb.mxu1 %v6062_v54  ;;  %6164 = vmatpush.msrb.mxu2 %v6072_v62 }
 0xbb0   : > { %8716 = vmatmul.msk.f32.gmra.mxu3 %vm2706_vm11, %v10577_v18 }
 0xbb1   : > { %6118 = vmatpush.msrb.mxu1 %v6061_v1  ;;  %6165 = vmatpush.msrb.mxu2 %v6071_v19 }
 0xbb2   : > { %5852 = vrot.lane.b32.xlu2 %v13006_v8, %s14330_s23 }
 0xbb3   : > { %6119 = vmatpush.msrb.mxu1 %v6060_v41 }
 0xbb5   : > { %6120 = vmatpush.msrb.mxu1 %v6059_v50 }
 0xbb6   : > { %5918 = vrot.lane.b32.xlu1 %v5796_v28, %s14328_s10  ;;  %5894 = vrot.lane.b32.xlu0 %v5881_v60, %s14329_s7  ;;  %v6056_v60 = vld [vmem:[%s14335_s1 + $0x8] sm:$0xff]  ;;  %s14338_s1 = smov %s14337_s16 }
 0xbb7   : > { %6121 = vmatpush.msrb.mxu1 %v6058_v34 }
 0xbb9   : > { %6122 = vmatpush.msrb.mxu1 %v6057_v36 }
 0xbbb   : > { %6123 = vmatpush.msrb.mxu1 %v6056_v60 }
 0xbbd   : > { %6124 = vmatpush.msrb.mxu1 %v6055_v44 }
 0xbd3   : > { %v9461_v22 = vpop.permute.xlu2 %9460 }
 0xbd4   : > { %v9462_v28 = vunpack.i.l.bf16 %v9461_v22  ;;  %v9463_v37 = vunpack.i.h.bf16 %v9461_v22 }
 0xbd6   : > { %v6031_v58 = vsel %vm2706_vm11, %v12892_v38, %v9462_v28  ;;  %v6032_v5 = vsel %vm2706_vm11, %v12852_v23, %v9463_v37 }
 0xbdc   : > { %v9476_v56 = vpop.permute.xlu2 %9475 }
 0xbdd   : > { %v9477_v55 = vunpack.i.l.bf16 %v9476_v56  ;;  %v9478_v41 = vunpack.i.h.bf16 %v9476_v56 }
 0xbe4   : > { %v9491_v48 = vpop.permute.xlu2 %9490 }
 0xbeb   : > { %v9471_v53 = vpop.permute.xlu1 %9470 }
 0xbec   : > { %v9473_v11 = vunpack.i.h.bf16 %v9471_v53  ;;  %v9472_v30 = vunpack.i.l.bf16 %v9471_v53  ;;  %v9506_v34 = vpop.permute.xlu2 %9505  ;;  %v9493_v53 = vunpack.i.h.bf16 %v9491_v48 }
 0xbee   : > { %v6023_v26 = vsel %vm3190_vm14, %v11450_v7, %v9473_v11 }
 0xbef   : > { %6125 = vmatmul.f32.vlgmr.msrb.gmra.mxu1 %v6023_v26 }
 0xbf0   : > { %v9466_v24 = vpop.permute.xlu0 %9465 }
 0xbf1   : > { %v9467_v3 = vunpack.i.l.bf16 %v9466_v24  ;;  %v9468_v51 = vunpack.i.h.bf16 %v9466_v24 }
 0xbf3   : > { %v6039_v14 = vsel %vm3181_vm13, %v6031_v58, %v9467_v3  ;;  %v6040_v1 = vsel %vm3181_vm13, %v6032_v5, %v9468_v51 }
 0xbf4   : > { %v6047_v63 = vsel %vm3190_vm14, %v6039_v14, %v9472_v30  ;;  %v6048_v50 = vsel %vm3190_vm14, %v6040_v1, %v9477_v55  ;;  %v9521_v58 = vpop.permute.xlu2 %9520 }
 0xbf5   : > { %6166 = vmatmul.f32.vlgmr.msrb.gmra.mxu2 %v6047_v63 }
 0xbf8   : > { %v9486_v17 = vpop.permute.xlu1 %9485  ;;  %v9481_v43 = vpop.permute.xlu0 %9480 }
 0xbf9   : > { %v9487_v54 = vunpack.i.l.bf16 %v9486_v17  ;;  %v9482_v27 = vunpack.i.l.bf16 %v9481_v43  ;;  %v9483_v38 = vunpack.i.h.bf16 %v9481_v43  ;;  %v9488_v47 = vunpack.i.h.bf16 %v9486_v17 }
 0xbfa   : > { %v9508_v17 = vunpack.i.h.bf16 %v9506_v34 }
 0xbfb   : > { %v6009_v40 = vsel %vm2706_vm11, %v12837_v12, %v9482_v27  ;;  %v6033_v23 = vsel %vm2706_vm11, %v12886_v61, %v9483_v38  ;;  %v9492_v12 = vunpack.i.l.bf16 %v9491_v48 }
 0xbfc   : > { %v6016_v4 = vsel %vm3181_vm13, %v6009_v40, %v9487_v54  ;;  %v6041_v22 = vsel %vm3181_vm13, %v6033_v23, %v9488_v47  ;;  %v9523_v47 = vunpack.i.h.bf16 %v9521_v58 }
 0xbfd   : > { %6169 = vmatmul.f32.gmra.mxu2 %v6048_v50  ;;  %v6024_v36 = vsel %vm3190_vm14, %v6016_v4, %v9478_v41  ;;  %v6049_v28 = vsel %vm3190_vm14, %v6041_v22, %v9492_v12  ;;  %v9522_v4 = vunpack.i.l.bf16 %v9521_v58 }
 0xbfe   : > { %6128 = vmatmul.f32.gmra.mxu1 %v6024_v36 }
 0xc00   : > { %v9501_v60 = vpop.permute.xlu1 %9500  ;;  %v9496_v44 = vpop.permute.xlu0 %9495 }
 0xc01   : > { %v9502_v62 = vunpack.i.l.bf16 %v9501_v60  ;;  %v9497_v19 = vunpack.i.l.bf16 %v9496_v44  ;;  %v9498_v56 = vunpack.i.h.bf16 %v9496_v44  ;;  %v9503_v24 = vunpack.i.h.bf16 %v9501_v60 }
 0xc03   : > { %v6010_v11 = vsel %vm2706_vm11, %v12842_v13, %v9497_v19  ;;  %v6034_v3 = vsel %vm2706_vm11, %v12916_v35, %v9498_v56  ;;  %v9507_v13 = vunpack.i.l.bf16 %v9506_v34 }
 0xc04   : > { %v6017_v26 = vsel %vm3181_vm13, %v6010_v11, %v9502_v62  ;;  %v6042_v63 = vsel %vm3181_vm13, %v6034_v3, %v9503_v24 }
 0xc05   : > { %6172 = vmatmul.f32.gmra.mxu2 %v6049_v28  ;;  %v6025_v61 = vsel %vm3190_vm14, %v6017_v26, %v9493_v53  ;;  %v6050_v5 = vsel %vm3190_vm14, %v6042_v63, %v9507_v13 }
 0xc06   : > { %6131 = vmatmul.f32.gmra.mxu1 %v6025_v61 }
 0xc08   : > { %v9516_v30 = vpop.permute.xlu1 %9515  ;;  %v9511_v14 = vpop.permute.xlu0 %9510 }
 0xc09   : > { %v9517_v37 = vunpack.i.l.bf16 %v9516_v30  ;;  %v9512_v48 = vunpack.i.l.bf16 %v9511_v14  ;;  %v9513_v51 = vunpack.i.h.bf16 %v9511_v14  ;;  %v9518_v27 = vunpack.i.h.bf16 %v9516_v30 }
 0xc0b   : > { %v6011_v43 = vsel %vm2706_vm11, %v12867_v57, %v9512_v48  ;;  %v6035_v1 = vsel %vm2706_vm11, %v12944_v29, %v9513_v51  ;;  %v9536_v57 = vpop.permute.xlu2 %9535 }
 0xc0c   : > { %v6018_v54 = vsel %vm3181_vm13, %v6011_v43, %v9517_v37  ;;  %v6043_v50 = vsel %vm3181_vm13, %v6035_v1, %v9518_v27  ;;  %v9537_v11 = vunpack.i.l.bf16 %v9536_v57  ;;  %v9538_v28 = vunpack.i.h.bf16 %v9536_v57  ;;  %v6573_v57 = vld [vmem:[%s14337_s16 + $0x118] sm:$0xff]  ;;  %s14344_s16 = sld [smem:[#allocation28_spill]] }
 0xc0d   : > { %6175 = vmatmul.f32.gmra.mxu2 %v6050_v5  ;;  %v6026_v35 = vsel %vm3190_vm14, %v6018_v54, %v9508_v17  ;;  %v6051_v23 = vsel %vm3190_vm14, %v6043_v50, %v9522_v4  ;;  %v13123_v50 = vld [vmem:[%s14336_s22] ss:$0 sm:$0xff]  ;;  %s14342_s22 = sld [smem:[#allocation30_spill]] }
 0xc0e   : > { %6134 = vmatmul.f32.gmra.mxu1 %v6026_v35  ;;  %6686 = vmatpush.msra.mxu2 %v6573_v57 }
 0xc10   : > { %v9531_v55 = vpop.permute.xlu1 %9530  ;;  %v9526_v38 = vpop.permute.xlu0 %9525 }
 0xc11   : > { %v9532_v41 = vunpack.i.l.bf16 %v9531_v55  ;;  %v9527_v40 = vunpack.i.l.bf16 %v9526_v38  ;;  %v9528_v34 = vunpack.i.h.bf16 %v9526_v38  ;;  %v9533_v44 = vunpack.i.h.bf16 %v9531_v55 }
 0xc13   : > { %v6012_v36 = vsel %vm2706_vm11, %v12896_v6, %v9527_v40  ;;  %v6036_v62 = vsel %vm2706_vm11, %v12975_v16, %v9528_v34  ;;  %v9551_v24 = vpop.permute.xlu2 %9550  ;;  %s14343_s2 = smov %s14342_s22 }
 0xc14   : > { %v6019_v60 = vsel %vm3181_vm13, %v6012_v36, %v9532_v41  ;;  %v6044_v53 = vsel %vm3181_vm13, %v6036_v62, %v9533_v44  ;;  %v9552_v13 = vunpack.i.l.bf16 %v9551_v24  ;;  %v9553_v51 = vunpack.i.h.bf16 %v9551_v24 }
 0xc15   : > { %6178 = vmatmul.f32.gmra.mxu2 %v6051_v23  ;;  %v6027_v29 = vsel %vm3190_vm14, %v6019_v60, %v9523_v47  ;;  %v6052_v61 = vsel %vm3190_vm14, %v6044_v53, %v9537_v11  ;;  %v6571_v47 = vld [vmem:[%s14338_s1 + $0x108] sm:$0xff]  ;;  %v6570_v60 = vld [vmem:[%s14338_s1 + $0x100] sm:$0xff] }
 0xc16   : > { %6137 = vmatmul.f32.gmra.mxu1 %v6027_v29 }
 0xc18   : > { %v9546_v19 = vpop.permute.xlu1 %9545  ;;  %v9541_v22 = vpop.permute.xlu0 %9540 }
 0xc19   : > { %v9547_v12 = vunpack.i.l.bf16 %v9546_v19  ;;  %v9542_v56 = vunpack.i.l.bf16 %v9541_v22  ;;  %v9543_v6 = vunpack.i.h.bf16 %v9541_v22  ;;  %v9548_v58 = vunpack.i.h.bf16 %v9546_v19 }
 0xc1b   : > { %v6013_v26 = vsel %vm2706_vm11, %v12923_v21, %v9542_v56  ;;  %v6037_v30 = vsel %vm2706_vm11, %v13006_v8, %v9543_v6  ;;  %v5853_v8 = vpop.permute.xlu2 %5852 }
 0xc1c   : > { %v6020_v3 = vsel %vm3181_vm13, %v6013_v26, %v9547_v12  ;;  %v6045_v63 = vsel %vm3181_vm13, %v6037_v30, %v9548_v58 }
 0xc1d   : > { %6181 = vmatmul.f32.gmra.mxu2 %v6052_v61  ;;  %v6028_v16 = vsel %vm3190_vm14, %v6020_v3, %v9538_v28  ;;  %v6053_v43 = vsel %vm3190_vm14, %v6045_v63, %v9552_v13 }
 0xc1e   : > { %6140 = vmatmul.f32.gmra.mxu1 %v6028_v16 }
 0xc20   : > { %v5893_v14 = vpop.permute.xlu1 %5892  ;;  %v9556_v37 = vpop.permute.xlu0 %9555 }
 0xc21   : > { %v9557_v48 = vunpack.i.l.bf16 %v9556_v37  ;;  %v9558_v21 = vunpack.i.h.bf16 %v9556_v37 }
 0xc23   : > { %v6014_v17 = vsel %vm2706_vm11, %v12952_v39, %v9557_v48  ;;  %v6038_v27 = vsel %vm2706_vm11, %v13024_v20, %v9558_v21  ;;  %v6015_v39 = vsel %vm2706_vm11, %v12986_v25, %v5853_v8  ;;  %v6208_v20 = vpop.f32.mrf.mxu3  ;;  %v6572_v25 = vld [vmem:[%s14338_s1 + $0x110] sm:$0xff] }
 0xc24   : > { %v6021_v5 = vsel %vm3181_vm13, %v6014_v17, %v5893_v14  ;;  %v6046_v1 = vsel %vm3181_vm13, %v6038_v27, %v11481_v52  ;;  %6687 = vmatpush.msra.mxu2 %v6572_v25 }
 0xc25   : > { %6184 = vmatmul.f32.gmra.mxu2 %v6053_v43  ;;  %v6029_v54 = vsel %vm3190_vm14, %v6021_v5, %v9553_v51  ;;  %v6054_v41 = vsel %vm3190_vm14, %v6046_v1, %v11490_v49 }
 0xc26   : > { %6143 = vmatmul.f32.gmra.mxu1 %v6029_v54  ;;  %6688 = vmatpush.msra.mxu2 %v6571_v47 }
 0xc28   : > { %v5895_v35 = vpop.permute.xlu0 %5894  ;;  %v5919_v55 = vpop.permute.xlu1 %5918  ;;  %6689 = vmatpush.msra.mxu2 %v6570_v60 }
 0xc29   : > { %v6022_v38 = vsel %vm3181_vm13, %v6015_v39, %v5895_v35 }
 0xc2a   : > { %v6030_v40 = vsel %vm3190_vm14, %v6022_v38, %v5919_v55 }
 0xc2b   : > { %v6211_v34 = vpop.f32.mrf.mxu3 }
 0xc2d   : > { %6187 = vmatmul.f32.gmra.mxu2 %v6054_v41 }
 0xc2e   : > { %6146 = vmatmul.f32.gmra.mxu1 %v6030_v40 }
 0xc33   : > { %v6214_v56 = vpop.f32.mrf.mxu3 }
 0xc3b   : > { %v6217_v5 = vpop.f32.mrf.mxu3 }
 0xc6c   : > { %v6126_v4 = vpop.f32.mrf.mxu1 }
 0xc6d   : > { %v6127_v36 = vadd.f32 %v13123_v50, %v6126_v4 }
 0xc78   : > { %v6167_v23 = vpop.f32.mrf.mxu2 }
 0xc79   : > { %v6168_v44 = vadd.f32 %v6167_v23, %v6127_v36 }
 0xc7b   : > { %v6209_v29 = vadd.f32 %v6208_v20, %v6168_v44  ;;  %v6129_v62 = vpop.f32.mrf.mxu1 }
 0xc7c   : > { %v6130_v12 = vadd.f32 %v13123_v50, %v6129_v62 }
 0xc7d   : > { %v6232_v19 = vmul.f32 0.01, %v6209_v29 }
 0xc7f   : > { %v6240_v22 = vmax.f32 %v6209_v29, %v6232_v19 }
 0xc80   : > { %v6170_v53 = vpop.f32.mrf.mxu2 }
 0xc81   : > { %v6256_v11 = vrot.slane %v6240_v22, 7  ;;  %v6171_v6 = vadd.f32 %v6170_v53, %v6130_v12  ;;  %v6220_v22 = vpop.f32.mrf.mxu3 }
 0xc83   : > { %v13132_v28 = vsel %vm1871_vm0, 0.0, %v6256_v11  ;;  %v6280_v26 = vsel %vm1871_vm0, %v6256_v11, 0.0  ;;  %v6212_v24 = vadd.f32 %v6211_v34, %v6171_v6  ;;  %v6132_v61 = vpop.f32.mrf.mxu1 }
 0xc84   : > { %v6302_v3 = vrot.slane %v13132_v28, 1  ;;  %v6303_v58 = vrot.slane %v6280_v26, 1  ;;  %v6344_v16 = vrot.slane %v13132_v28, 2  ;;  %v6345_v30 = vrot.slane %v6280_v26, 2 }
 0xc85   : > { %v6233_v14 = vmul.f32 0.01, %v6212_v24  ;;  %v6133_v13 = vadd.f32 %v13123_v50, %v6132_v61 }
 0xc86   : > { %v13138_v37 = vsel %vm2013_vm1, %v6302_v3, %v6303_v58  ;;  %v6346_v48 = vsel %vm2102_vm2, %v6344_v16, %v6345_v30 }
 0xc87   : > { %v6241_v63 = vmax.f32 %v6212_v24, %v6233_v14  ;;  %v9559_v21 = vpack.i.bf16 %v13138_v37, %v6346_v48 }
 0xc88   : > { %v6173_v51 = vpop.f32.mrf.mxu2 }
 0xc89   : > { %v6257_v17 = vrot.slane %v6241_v63, 7  ;;  %v6174_v43 = vadd.f32 %v6173_v51, %v6133_v13  ;;  %9560 = vrot.lane.b32.xlu0 %v9559_v21, %s14330_s23 }
 0xc8b   : > { %v13145_v54 = vsel %vm1871_vm0, 0.0, %v6257_v17  ;;  %v6281_v8 = vsel %vm1871_vm0, %v6257_v17, 0.0  ;;  %v6215_v27 = vadd.f32 %v6214_v56, %v6174_v43  ;;  %v6135_v35 = vpop.f32.mrf.mxu1 }
 0xc8c   : > { %v6305_v39 = vrot.slane %v13145_v54, 1  ;;  %v6306_v1 = vrot.slane %v6281_v8, 1  ;;  %v6348_v55 = vrot.slane %v6281_v8, 2  ;;  %v9564_v41 = vpack.i.bf16 %v6346_v48, %v13145_v54 }
 0xc8d   : > { %v6234_v38 = vmul.f32 0.01, %v6215_v27  ;;  %v6347_v40 = vrot.slane %v13145_v54, 2  ;;  %v6136_v57 = vadd.f32 %v13123_v50, %v6135_v35 }
 0xc8e   : > { %v13152_v20 = vsel %vm2013_vm1, %v6305_v39, %v6306_v1  ;;  %9565 = vrot.lane.b32.xlu1 %v9564_v41, %s14329_s7  ;;  %v6223_v1 = vpop.f32.mrf.mxu3 }
 0xc8f   : > { %v6242_v4 = vmax.f32 %v6215_v27, %v6234_v38  ;;  %v6349_v25 = vsel %vm2102_vm2, %v6347_v40, %v6348_v55  ;;  %v9569_v34 = vpack.i.bf16 %v13152_v20, %v13132_v28 }
 0xc90   : > { %8717 = vmatmul.msk.f32.vlgmr.msra.gmra.mxu2 %vm2706_vm11, %v6349_v25  ;;  %v6176_v47 = vpop.f32.mrf.mxu2  ;;  %v9574_v36 = vpack.i.bf16 %v13152_v20, %v6349_v25 }
 0xc91   : > { %v6258_v23 = vrot.slane %v6242_v4, 7  ;;  %v6177_v60 = vadd.f32 %v6176_v47, %v6136_v57  ;;  %9570 = vrot.lane.b32.xlu2 %v9569_v34, %s14328_s10 }
 0xc92   : > { %9575 = vrot.lane.b32.xlu0 %v9574_v36, %s14330_s23  ;;  %v6553_v36 = vld [vmem:[%s14338_s1 + $0x78] sm:$0xff] }
 0xc93   : > { %v13164_v44 = vsel %vm1871_vm0, 0.0, %v6258_v23  ;;  %v6282_v29 = vsel %vm1871_vm0, %v6258_v23, 0.0  ;;  %v6218_v62 = vadd.f32 %v6217_v5, %v6177_v60  ;;  %v6138_v19 = vpop.f32.mrf.mxu1  ;;  %v6569_v23 = vld [vmem:[%s14338_s1 + $0xf8] sm:$0xff]  ;;  %6592 = vmatpush.msrb.mxu0 %v6553_v36 }
 0xc94   : > { %v6309_v12 = vrot.slane %v6282_v29, 1  ;;  %v9579_v56 = vpack.i.bf16 %v6349_v25, %v13164_v44  ;;  %v6350_v53 = vrot.slane %v13164_v44, 2  ;;  %v6351_v6 = vrot.slane %v6282_v29, 2  ;;  %6633 = vmatpush.msra.mxu1 %v6569_v23  ;;  %v6565_v23 = vld [vmem:[%s14338_s1 + $0xd8] sm:$0xff] }
 0xc95   : > { %v6235_v11 = vmul.f32 0.01, %v6218_v62  ;;  %v6308_v26 = vrot.slane %v13164_v44, 1  ;;  %v6139_v61 = vadd.f32 %v13123_v50, %v6138_v19 }
 0xc96   : > { %9580 = vrot.lane.b32.xlu1 %v9579_v56, %s14329_s7  ;;  %v6352_v3 = vsel %vm2102_vm2, %v6350_v53, %v6351_v6 }
 0xc97   : > { %v6243_v24 = vmax.f32 %v6218_v62, %v6235_v11  ;;  %v13174_v58 = vsel %vm2013_vm1, %v6308_v26, %v6309_v12 }
 0xc98   : > { %v9589_v16 = vpack.i.bf16 %v13174_v58, %v6352_v3  ;;  %8718 = vmatmul.msk.f32.gmra.mxu2 %vm2706_vm11, %v6352_v3  ;;  %v6179_v30 = vpop.f32.mrf.mxu2  ;;  %v9584_v14 = vpack.i.bf16 %v13174_v58, %v13145_v54 }
 0xc99   : > { %v6259_v48 = vrot.slane %v6243_v24, 7  ;;  %v6180_v63 = vadd.f32 %v6179_v30, %v6139_v61  ;;  %v6226_v30 = vpop.f32.mrf.mxu3 }
 0xc9a   : > { %9585 = vrot.lane.b32.xlu2 %v9584_v14, %s14328_s10  ;;  %9590 = vrot.lane.b32.xlu0 %v9589_v16, %s14330_s23 }
 0xc9b   : > { %v13183_v13 = vsel %vm1871_vm0, 0.0, %v6259_v48  ;;  %v6283_v21 = vsel %vm1871_vm0, %v6259_v48, 0.0  ;;  %v6221_v51 = vadd.f32 %v6220_v22, %v6180_v63  ;;  %v6141_v17 = vpop.f32.mrf.mxu1  ;;  %v6552_v22 = vld [vmem:[%s14338_s1 + $0x70] sm:$0xff] }
 0xc9c   : > { %v6312_v43 = vrot.slane %v6283_v21, 1  ;;  %v9594_v5 = vpack.i.bf16 %v6352_v3, %v13183_v13  ;;  %v6353_v8 = vrot.slane %v13183_v13, 2  ;;  %v6354_v35 = vrot.slane %v6283_v21, 2  ;;  %6593 = vmatpush.msrb.mxu0 %v6552_v22 }
 0xc9d   : > { %v6236_v27 = vmul.f32 0.01, %v6221_v51  ;;  %v6311_v39 = vrot.slane %v13183_v13, 1  ;;  %v6142_v38 = vadd.f32 %v13123_v50, %v6141_v17  ;;  %v6568_v17 = vld [vmem:[%s14338_s1 + $0xf0] sm:$0xff] }
 0xc9e   : > { %9595 = vrot.lane.b32.xlu1 %v9594_v5, %s14329_s7  ;;  %v6355_v41 = vsel %vm2102_vm2, %v6353_v8, %v6354_v35  ;;  %6634 = vmatpush.msra.mxu1 %v6568_v17  ;;  %v6546_v17 = vld [vmem:[%s14338_s1 + $0x40] sm:$0xff] }
 0xc9f   : > { %v6244_v55 = vmax.f32 %v6221_v51, %v6236_v27  ;;  %v13193_v40 = vsel %vm2013_vm1, %v6311_v39, %v6312_v43  ;;  %v6551_v43 = vld [vmem:[%s14338_s1 + $0x68] sm:$0xff] }
 0xca0   : > { %v9604_v4 = vpack.i.bf16 %v13193_v40, %v6355_v41  ;;  %8719 = vmatmul.msk.f32.gmra.mxu2 %vm2706_vm11, %v6355_v41  ;;  %v6182_v57 = vpop.f32.mrf.mxu2  ;;  %v9599_v25 = vpack.i.bf16 %v13193_v40, %v13164_v44  ;;  %6594 = vmatpush.msrb.mxu0 %v6551_v43  ;;  %v6567_v39 = vld [vmem:[%s14338_s1 + $0xe8] sm:$0xff] }
 0xca1   : > { %v6260_v34 = vrot.slane %v6244_v55, 7  ;;  %v6183_v47 = vadd.f32 %v6182_v57, %v6142_v38  ;;  %6635 = vmatpush.msra.mxu1 %v6567_v39  ;;  %v6545_v39 = vld [vmem:[%s14338_s1 + $0x38] sm:$0xff] }
 0xca2   : > { %9600 = vrot.lane.b32.xlu2 %v9599_v25, %s14328_s10  ;;  %9605 = vrot.lane.b32.xlu0 %v9604_v4, %s14330_s23  ;;  %v6566_v4 = vld [vmem:[%s14338_s1 + $0xe0] sm:$0xff] }
 0xca3   : > { %v13204_v60 = vsel %vm1871_vm0, 0.0, %v6260_v34  ;;  %v6284_v29 = vsel %vm1871_vm0, %v6260_v34, 0.0  ;;  %v6224_v62 = vadd.f32 %v6223_v1, %v6183_v47  ;;  %v6144_v19 = vpop.f32.mrf.mxu1  ;;  %v6550_v1 = vld [vmem:[%s14338_s1 + $0x60] sm:$0xff]  ;;  %v6549_v47 = vld [vmem:[%s14338_s1 + $0x58] sm:$0xff]  ;;  %6636 = vmatpush.msra.mxu1 %v6566_v4  ;;  %v6544_v4 = vld [vmem:[%s14338_s1 + $0x30] sm:$0xff] }
 0xca4   : > { %v6315_v12 = vrot.slane %v6284_v29, 1  ;;  %v9609_v56 = vpack.i.bf16 %v6355_v41, %v13204_v60  ;;  %v6356_v53 = vrot.slane %v13204_v60, 2  ;;  %v6357_v6 = vrot.slane %v6284_v29, 2  ;;  %6595 = vmatpush.msrb.mxu0 %v6550_v1 }
 0xca5   : > { %v6237_v11 = vmul.f32 0.01, %v6224_v62  ;;  %v6314_v26 = vrot.slane %v13204_v60, 1  ;;  %v6145_v61 = vadd.f32 %v13123_v50, %v6144_v19  ;;  %6637 = vmatpush.msra.mxu1 %v6565_v23 }
 0xca6   : > { %9610 = vrot.lane.b32.xlu1 %v9609_v56, %s14329_s7  ;;  %v6358_v3 = vsel %vm2102_vm2, %v6356_v53, %v6357_v6  ;;  %v6229_v56 = vpop.f32.mrf.mxu3  ;;  %6596 = vmatpush.msrb.mxu0 %v6549_v47  ;;  %v6548_v53 = vld [vmem:[%s14338_s1 + $0x50] sm:$0xff] }
 0xca7   : > { %v6245_v24 = vmax.f32 %v6224_v62, %v6237_v11  ;;  %v13215_v16 = vsel %vm2013_vm1, %v6314_v26, %v6315_v12  ;;  %v6564_v11 = vld [vmem:[%s14338_s1 + $0xd0] sm:$0xff] }
 0xca8   : > { %v9619_v14 = vpack.i.bf16 %v13215_v16, %v6358_v3  ;;  %8720 = vmatmul.msk.f32.gmra.mxu2 %vm2706_vm11, %v6358_v3  ;;  %v6185_v48 = vpop.f32.mrf.mxu2  ;;  %v9614_v63 = vpack.i.bf16 %v13215_v16, %v13183_v13  ;;  %6597 = vmatpush.msrb.mxu0 %v6548_v53  ;;  %v6560_v47 = vld [vmem:[%s14338_s1 + $0xb0] sm:$0xff] }
 0xca9   : > { %v6261_v21 = vrot.slane %v6245_v24, 7  ;;  %v6186_v51 = vadd.f32 %v6185_v48, %v6145_v61  ;;  %v6547_v24 = vld [vmem:[%s14338_s1 + $0x48] sm:$0xff]  ;;  %6638 = vmatpush.msra.mxu1 %v6564_v11  ;;  %v6541_v11 = vld [vmem:[%s14338_s1 + $0x18] sm:$0xff] }
 0xcaa   : > { %9615 = vrot.lane.b32.xlu2 %v9614_v63, %s14328_s10  ;;  %9620 = vrot.lane.b32.xlu0 %v9619_v14, %s14330_s23  ;;  %v6563_v61 = vld [vmem:[%s14338_s1 + $0xc8] sm:$0xff] }
 0xcab   : > { %v13226_v5 = vsel %vm1871_vm0, 0.0, %v6261_v21  ;;  %v6285_v8 = vsel %vm1871_vm0, %v6261_v21, 0.0  ;;  %v6227_v27 = vadd.f32 %v6226_v30, %v6186_v51  ;;  %v6147_v35 = vpop.f32.mrf.mxu1  ;;  %6598 = vmatpush.msrb.mxu0 %v6547_v24  ;;  %6639 = vmatpush.msra.mxu1 %v6563_v61  ;;  %v6540_v24 = vld [vmem:[%s14338_s1 + $0x10] sm:$0xff]  ;;  %v6539_v61 = vld [vmem:[%s14338_s1 + $0x8] sm:$0xff] }
 0xcac   : > { %v6318_v55 = vrot.slane %v6285_v8, 1  ;;  %v9624_v38 = vpack.i.bf16 %v6358_v3, %v13226_v5  ;;  %v6359_v41 = vrot.slane %v13226_v5, 2  ;;  %v6360_v25 = vrot.slane %v6285_v8, 2 }
 0xcad   : > { %v6238_v57 = vmul.f32 0.01, %v6227_v27  ;;  %v6317_v34 = vrot.slane %v13226_v5, 1  ;;  %v6148_v36 = vadd.f32 %v13123_v50, %v6147_v35  ;;  %6599 = vmatpush.msrb.mxu0 %v6546_v17  ;;  %v6554_v17 = vld [vmem:[%s14338_s1 + $0x80] sm:$0xff] }
 0xcae   : > { %9625 = vrot.lane.b32.xlu1 %v9624_v38, %s14329_s7  ;;  %v6361_v62 = vsel %vm2102_vm2, %v6359_v41, %v6360_v25 }
 0xcaf   : > { %v6246_v29 = vmax.f32 %v6227_v27, %v6238_v57  ;;  %v13241_v19 = vsel %vm2013_vm1, %v6317_v34, %v6318_v55  ;;  %v6562_v27 = vld [vmem:[%s14338_s1 + $0xc0] sm:$0xff]  ;;  %v6561_v57 = vld [vmem:[%s14338_s1 + $0xb8] sm:$0xff]  ;;  %6600 = vmatpush.msrb.mxu0 %v6545_v39  ;;  %v6543_v34 = vld [vmem:[%s14338_s1 + $0x28] sm:$0xff] }
 0xcb0   : > { %v9634_v22 = vpack.i.bf16 %v13241_v19, %v6361_v62  ;;  %8721 = vmatmul.msk.f32.gmra.mxu2 %vm2706_vm11, %v6361_v62  ;;  %v6188_v12 = vpop.f32.mrf.mxu2  ;;  %v9629_v50 = vpack.i.bf16 %v13241_v19, %v13204_v60  ;;  %6640 = vmatpush.msra.mxu1 %v6562_v27 }
 0xcb1   : > { %v6262_v6 = vrot.slane %v6246_v29, 7  ;;  %v6189_v26 = vadd.f32 %v6188_v12, %v6148_v36  ;;  %6601 = vmatpush.msrb.mxu0 %v6544_v4 }
 0xcb2   : > { %9630 = vrot.lane.b32.xlu2 %v9629_v50, %s14328_s10  ;;  %9635 = vrot.lane.b32.xlu0 %v9634_v22, %s14330_s23  ;;  %v6542_v50 = vld [vmem:[%s14338_s1 + $0x20] sm:$0xff] }
 0xcb3   : > { %v13254_v3 = vsel %vm1871_vm0, 0.0, %v6262_v6  ;;  %v6286_v30 = vsel %vm1871_vm0, %v6262_v6, 0.0  ;;  %v6230_v14 = vadd.f32 %v6229_v56, %v6189_v26  ;;  %6641 = vmatpush.msra.mxu1 %v6561_v57  ;;  %6602 = vmatpush.msrb.mxu0 %v6543_v34 }
 0xcb4   : > { %v6321_v48 = vrot.slane %v6286_v30, 1  ;;  %v9639_v63 = vpack.i.bf16 %v6361_v62, %v13254_v3  ;;  %v6362_v21 = vrot.slane %v13254_v3, 2  ;;  %v6363_v51 = vrot.slane %v6286_v30, 2  ;;  %v6538_v30 = vld [vmem:[%s14338_s1] sm:$0xff] }
 0xcb5   : > { %v6239_v43 = vmul.f32 0.01, %v6230_v14  ;;  %v6320_v8 = vrot.slane %v13254_v3, 1  ;;  %6642 = vmatpush.msra.mxu1 %v6560_v47  ;;  %6603 = vmatpush.msrb.mxu0 %v6542_v50 }
 0xcb6   : > { %v6364_v35 = vsel %vm2102_vm2, %v6362_v21, %v6363_v51  ;;  %9640 = vrot.lane.b32.xlu1 %v9639_v63, %s14329_s7  ;;  %v6557_v63 = vld [vmem:[%s14338_s1 + $0x98] sm:$0xff]  ;;  %v6556_v21 = vld [vmem:[%s14338_s1 + $0x90] sm:$0xff]  ;;  %v6555_v51 = vld [vmem:[%s14338_s1 + $0x88] sm:$0xff] }
 0xcb7   : > { %v6247_v1 = vmax.f32 %v6230_v14, %v6239_v43  ;;  %v13266_v55 = vsel %vm2013_vm1, %v6320_v8, %v6321_v48  ;;  %6604 = vmatpush.msrb.mxu0 %v6541_v11  ;;  %v6559_v14 = vld [vmem:[%s14338_s1 + $0xa8] sm:$0xff]  ;;  %v6558_v48 = vld [vmem:[%s14338_s1 + $0xa0] sm:$0xff]  ;;  %s14340_s1 = smov %s14339_s15 }
 0xcb8   : > { %v9649_v38 = vpack.i.bf16 %v13266_v55, %v6364_v35  ;;  %8722 = vmatmul.msk.f32.gmra.mxu2 %vm2706_vm11, %v6364_v35  ;;  %v9644_v41 = vpack.i.bf16 %v13266_v55, %v13226_v5  ;;  %6643 = vmatpush.msra.mxu1 %v6559_v14 }
 0xcb9   : > { %v6263_v25 = vrot.slane %v6247_v1, 7  ;;  %6605 = vmatpush.msrb.mxu0 %v6540_v24 }
 0xcba   : > { %9645 = vrot.lane.b32.xlu2 %v9644_v41, %s14328_s10  ;;  %9650 = vrot.lane.b32.xlu0 %v9649_v38, %s14330_s23 }
 0xcbb   : > { %v6279_v36 = vsel %vm1871_vm0, 0.0, %v6263_v25  ;;  %v6287_v23 = vsel %vm1871_vm0, %v6263_v25, 0.0  ;;  %6606 = vmatpush.msrb.mxu0 %v6539_v61  ;;  %6644 = vmatpush.msra.mxu1 %v6558_v48 }
 0xcbc   : > { %v6412_v29 = vrot.slane %v6279_v36, 1  ;;  %v6413_v62 = vrot.slane %v6287_v23, 1  ;;  %v6424_v22 = vrot.slane %v6287_v23, 2  ;;  %v9654_v12 = vpack.i.bf16 %v6364_v35, %v6279_v36 }
 0xcbd   : > { %v6423_v56 = vrot.slane %v6279_v36, 2  ;;  %6607 = vmatpush.msrb.mxu0 %v6538_v30  ;;  %6645 = vmatpush.msra.mxu1 %v6557_v63 }
 0xcbe   : > { %v13282_v53 = vsel %vm2013_vm1, %v6412_v29, %v6413_v62  ;;  %9655 = vrot.lane.b32.xlu1 %v9654_v12, %s14329_s7 }
 0xcbf   : > { %v6425_v6 = vsel %vm2102_vm2, %v6423_v56, %v6424_v22  ;;  %v9659_v26 = vpack.i.bf16 %v13282_v53, %v13254_v3  ;;  %6646 = vmatpush.msra.mxu1 %v6556_v21 }
 0xcc0   : > { %8723 = vmatmul.msk.f32.gmra.mxu2 %vm2706_vm11, %v6425_v6 }
 0xcc1   : > { %6647 = vmatpush.msra.mxu1 %v6555_v51 }
 0xcc2   : > { %9660 = vrot.lane.b32.xlu2 %v9659_v26, %s14328_s10  ;;  %6440 = vrot.lane.b32.xlu0 %v6425_v6, %s14330_s23 }
 0xcc3   : > { %6648 = vmatpush.msra.mxu1 %v6554_v17 }
 0xcc8   : > { %8724 = vmatmul.msk.f32.gmra.mxu2 %vm2706_vm11, %v10577_v18 }
 0xcca   : > { %6401 = vrot.lane.b32.xlu2 %v6279_v36, %s14328_s10 }
 0xceb   : > { %v9571_v18 = vpop.permute.xlu2 %9570 }
 0xcec   : > { %v9572_v43 = vunpack.i.l.bf16 %v9571_v18  ;;  %v9573_v47 = vunpack.i.h.bf16 %v9571_v18 }
 0xcee   : > { %v6506_v8 = vsel %vm3190_vm14, %v11450_v7, %v9572_v43 }
 0xcef   : > { %6608 = vmatmul.f32.vlgmr.msrb.gmra.mxu0 %v6506_v8 }
 0xcf4   : > { %v9586_v27 = vpop.permute.xlu2 %9585 }
 0xcf5   : > { %v9587_v36 = vunpack.i.l.bf16 %v9586_v27  ;;  %v9588_v61 = vunpack.i.h.bf16 %v9586_v27 }
 0xcfb   : > { %v9561_v35 = vpop.permute.xlu0 %9560 }
 0xcfc   : > { %v9563_v39 = vunpack.i.h.bf16 %v9561_v35  ;;  %v9562_v1 = vunpack.i.l.bf16 %v9561_v35  ;;  %v9601_v38 = vpop.permute.xlu2 %9600 }
 0xcfd   : > { %v9602_v30 = vunpack.i.l.bf16 %v9601_v38  ;;  %v9603_v35 = vunpack.i.h.bf16 %v9601_v38 }
 0xcfe   : > { %v6514_v25 = vsel %vm2706_vm11, %v13138_v37, %v9562_v1  ;;  %v6492_v34 = vsel %vm2706_vm11, %v13132_v28, %v9563_v39 }
 0xd00   : > { %v9566_v41 = vpop.permute.xlu1 %9565 }
 0xd01   : > { %v9568_v4 = vunpack.i.h.bf16 %v9566_v41  ;;  %v9567_v57 = vunpack.i.l.bf16 %v9566_v41 }
 0xd03   : > { %v6522_v23 = vsel %vm3181_vm13, %v6514_v25, %v9567_v57  ;;  %v6499_v62 = vsel %vm3181_vm13, %v6492_v34, %v9568_v4 }
 0xd04   : > { %v9576_v29 = vpop.permute.xlu0 %9575  ;;  %v6507_v22 = vsel %vm3190_vm14, %v6499_v62, %v9587_v36  ;;  %v6530_v12 = vsel %vm3190_vm14, %v6522_v23, %v9573_v47  ;;  %v9616_v37 = vpop.permute.xlu2 %9615 }
 0xd05   : > { %v9578_v50 = vunpack.i.h.bf16 %v9576_v29  ;;  %v9577_v56 = vunpack.i.l.bf16 %v9576_v29  ;;  %6611 = vmatmul.f32.gmra.mxu0 %v6507_v22  ;;  %6649 = vmatmul.f32.vlgmr.msra.gmra.mxu1 %v6530_v12  ;;  %v9617_v39 = vunpack.i.l.bf16 %v9616_v37  ;;  %v9618_v62 = vunpack.i.h.bf16 %v9616_v37 }
 0xd07   : > { %v6493_v28 = vsel %vm2706_vm11, %v13145_v54, %v9578_v50  ;;  %v6515_v24 = vsel %vm2706_vm11, %v13152_v20, %v9577_v56 }
 0xd08   : > { %v9581_v11 = vpop.permute.xlu1 %9580 }
 0xd09   : > { %v9583_v6 = vunpack.i.h.bf16 %v9581_v11  ;;  %v9582_v26 = vunpack.i.l.bf16 %v9581_v11 }
 0xd0b   : > { %v6500_v48 = vsel %vm3181_vm13, %v6493_v28, %v9583_v6  ;;  %v6523_v63 = vsel %vm3181_vm13, %v6515_v24, %v9582_v26 }
 0xd0c   : > { %v9591_v14 = vpop.permute.xlu0 %9590  ;;  %v6508_v21 = vsel %vm3190_vm14, %v6500_v48, %v9602_v30  ;;  %v6531_v51 = vsel %vm3190_vm14, %v6523_v63, %v9588_v61  ;;  %v9631_v1 = vpop.permute.xlu2 %9630 }
 0xd0d   : > { %v9593_v17 = vunpack.i.h.bf16 %v9591_v14  ;;  %v9592_v18 = vunpack.i.l.bf16 %v9591_v14  ;;  %6614 = vmatmul.f32.gmra.mxu0 %v6508_v21  ;;  %6652 = vmatmul.f32.gmra.mxu1 %v6531_v51  ;;  %v9632_v22 = vunpack.i.l.bf16 %v9631_v1 }
 0xd0f   : > { %v6494_v20 = vsel %vm2706_vm11, %v13164_v44, %v9593_v17  ;;  %v6516_v27 = vsel %vm2706_vm11, %v13174_v58, %v9592_v18 }
 0xd10   : > { %v9596_v43 = vpop.permute.xlu1 %9595 }
 0xd11   : > { %v9598_v54 = vunpack.i.h.bf16 %v9596_v43  ;;  %v9597_v8 = vunpack.i.l.bf16 %v9596_v43 }
 0xd13   : > { %v6501_v4 = vsel %vm3181_vm13, %v6494_v20, %v9598_v54  ;;  %v6524_v57 = vsel %vm3181_vm13, %v6516_v27, %v9597_v8 }
 0xd14   : > { %v9606_v41 = vpop.permute.xlu0 %9605  ;;  %v6509_v25 = vsel %vm3190_vm14, %v6501_v4, %v9617_v39  ;;  %v6532_v34 = vsel %vm3190_vm14, %v6524_v57, %v9603_v35  ;;  %v9646_v11 = vpop.permute.xlu2 %9645 }
 0xd15   : > { %v9608_v47 = vunpack.i.h.bf16 %v9606_v41  ;;  %v9607_v36 = vunpack.i.l.bf16 %v9606_v41  ;;  %6617 = vmatmul.f32.gmra.mxu0 %v6509_v25  ;;  %6655 = vmatmul.f32.gmra.mxu1 %v6532_v34  ;;  %v9647_v37 = vunpack.i.l.bf16 %v9646_v11  ;;  %v9648_v35 = vunpack.i.h.bf16 %v9646_v11 }
 0xd17   : > { %v6495_v58 = vsel %vm2706_vm11, %v13183_v13, %v9608_v47  ;;  %v6517_v38 = vsel %vm2706_vm11, %v13193_v40, %v9607_v36  ;;  %v9633_v40 = vunpack.i.h.bf16 %v9631_v1 }
 0xd18   : > { %v9611_v44 = vpop.permute.xlu1 %9610 }
 0xd19   : > { %v9613_v23 = vunpack.i.h.bf16 %v9611_v44  ;;  %v9612_v29 = vunpack.i.l.bf16 %v9611_v44 }
 0xd1b   : > { %v6502_v50 = vsel %vm3181_vm13, %v6495_v58, %v9613_v23  ;;  %v6525_v56 = vsel %vm3181_vm13, %v6517_v38, %v9612_v29 }
 0xd1c   : > { %v9621_v12 = vpop.permute.xlu0 %9620  ;;  %v6510_v6 = vsel %vm3190_vm14, %v6502_v50, %v9632_v22  ;;  %v6533_v26 = vsel %vm3190_vm14, %v6525_v56, %v9618_v62  ;;  %v9661_v8 = vpop.permute.xlu2 %9660 }
 0xd1d   : > { %v9623_v28 = vunpack.i.h.bf16 %v9621_v12  ;;  %v9622_v24 = vunpack.i.l.bf16 %v9621_v12  ;;  %6620 = vmatmul.f32.gmra.mxu0 %v6510_v6  ;;  %6658 = vmatmul.f32.gmra.mxu1 %v6533_v26  ;;  %v9662_v39 = vunpack.i.l.bf16 %v9661_v8  ;;  %v6691_v6 = vpop.f32.mrf.mxu2 }
 0xd1f   : > { %v6496_v14 = vsel %vm2706_vm11, %v13204_v60, %v9623_v28  ;;  %v6518_v48 = vsel %vm2706_vm11, %v13215_v16, %v9622_v24  ;;  %v6765_v28 = vld [vmem:[%s14339_s15 + $0x18] sm:$0xff]  ;;  %s14345_s15 = sld [smem:[#allocation26_spill]] }
 0xd20   : > { %v9626_v13 = vpop.permute.xlu1 %9625  ;;  %6782 = vmatpush.msra.mxu3 %v6765_v28 }
 0xd21   : > { %v9628_v61 = vunpack.i.h.bf16 %v9626_v13  ;;  %v9627_v30 = vunpack.i.l.bf16 %v9626_v13 }
 0xd23   : > { %v6503_v21 = vsel %vm3181_vm13, %v6496_v14, %v9628_v61  ;;  %v6526_v51 = vsel %vm3181_vm13, %v6518_v48, %v9627_v30 }
 0xd24   : > { %v9636_v63 = vpop.permute.xlu0 %9635  ;;  %v6511_v17 = vsel %vm3190_vm14, %v6503_v21, %v9647_v37  ;;  %v6534_v18 = vsel %vm3190_vm14, %v6526_v51, %v9633_v40  ;;  %v6402_v38 = vpop.permute.xlu2 %6401  ;;  %v6763_v21 = vld [vmem:[%s14340_s1 + $0x8] sm:$0xff] }
 0xd25   : > { %v9638_v43 = vunpack.i.h.bf16 %v9636_v63  ;;  %v9637_v54 = vunpack.i.l.bf16 %v9636_v63  ;;  %6623 = vmatmul.f32.gmra.mxu0 %v6511_v17  ;;  %6661 = vmatmul.f32.gmra.mxu1 %v6534_v18  ;;  %v6694_v24 = vpop.f32.mrf.mxu2  ;;  %v9723_v17 = vld [vmem:[%s14341_s18] ss:$0 sm:$0xff]  ;;  %s14346_s18 = sld [smem:[#allocation61_spill]] }
 0xd27   : > { %v6497_v16 = vsel %vm2706_vm11, %v13226_v5, %v9638_v43  ;;  %v6519_v1 = vsel %vm2706_vm11, %v13241_v19, %v9637_v54  ;;  %v9663_v5 = vunpack.i.h.bf16 %v9661_v8 }
 0xd28   : > { %v9641_v20 = vpop.permute.xlu1 %9640 }
 0xd29   : > { %v9643_v27 = vunpack.i.h.bf16 %v9641_v20  ;;  %v9642_v60 = vunpack.i.l.bf16 %v9641_v20 }
 0xd2b   : > { %v6504_v4 = vsel %vm3181_vm13, %v6497_v16, %v9643_v27  ;;  %v6527_v57 = vsel %vm3181_vm13, %v6519_v1, %v9642_v60 }
 0xd2c   : > { %v9651_v41 = vpop.permute.xlu0 %9650  ;;  %v6512_v25 = vsel %vm3190_vm14, %v6504_v4, %v9662_v39  ;;  %v6535_v34 = vsel %vm3190_vm14, %v6527_v57, %v9648_v35 }
 0xd2d   : > { %v9653_v47 = vunpack.i.h.bf16 %v9651_v41  ;;  %v9652_v36 = vunpack.i.l.bf16 %v9651_v41  ;;  %6626 = vmatmul.f32.gmra.mxu0 %v6512_v25  ;;  %6664 = vmatmul.f32.gmra.mxu1 %v6535_v34  ;;  %v6697_v30 = vpop.f32.mrf.mxu2 }
 0xd2f   : > { %v6498_v19 = vsel %vm2706_vm11, %v13254_v3, %v9653_v47  ;;  %v6520_v58 = vsel %vm2706_vm11, %v13266_v55, %v9652_v36 }
 0xd30   : > { %v9656_v44 = vpop.permute.xlu1 %9655 }
 0xd31   : > { %v9658_v23 = vunpack.i.h.bf16 %v9656_v44  ;;  %v9657_v29 = vunpack.i.l.bf16 %v9656_v44 }
 0xd33   : > { %v6505_v62 = vsel %vm3181_vm13, %v6498_v19, %v9658_v23  ;;  %v6528_v22 = vsel %vm3181_vm13, %v6520_v58, %v9657_v29 }
 0xd34   : > { %v6441_v12 = vpop.permute.xlu0 %6440  ;;  %v6513_v50 = vsel %vm3190_vm14, %v6505_v62, %v6402_v38  ;;  %v6536_v56 = vsel %vm3190_vm14, %v6528_v22, %v9663_v5 }
 0xd35   : > { %6629 = vmatmul.f32.gmra.mxu0 %v6513_v50  ;;  %6667 = vmatmul.f32.gmra.mxu1 %v6536_v56  ;;  %v6521_v3 = vsel %vm2706_vm11, %v13282_v53, %v6441_v12  ;;  %v6764_v53 = vld [vmem:[%s14340_s1 + $0x10] sm:$0xff]  ;;  %v6700_v48 = vpop.f32.mrf.mxu2 }
 0xd36   : > { %v6529_v11 = vsel %vm3181_vm13, %v6521_v3, %v11481_v52  ;;  %6783 = vmatpush.msra.mxu3 %v6764_v53 }
 0xd37   : > { %v6537_v55 = vsel %vm3190_vm14, %v6529_v11, %v11490_v49 }
 0xd38   : > { %6784 = vmatpush.msra.mxu3 %v6763_v21  ;;  %v6805_v21 = vld [vmem:[%s14343_s2 + $0x8] sm:$0xff] }
 0xd3d   : > { %6670 = vmatmul.f32.gmra.mxu1 %v6537_v55  ;;  %v6703_v51 = vpop.f32.mrf.mxu2 }
 0xd45   : > { %v6706_v4 = vpop.f32.mrf.mxu2 }
 0xd4d   : > { %v6709_v55 = vpop.f32.mrf.mxu2 }
 0xd6c   : > { %v6609_v26 = vpop.f32.mrf.mxu0 }
 0xd6d   : > { %v6610_v43 = vadd.f32 %v9723_v17, %v6609_v26 }
 0xd82   : > { %v6612_v13 = vpop.f32.mrf.mxu0  ;;  %v6650_v61 = vpop.f32.mrf.mxu1 }
 0xd83   : > { %v6613_v18 = vadd.f32 %v9723_v17, %v6612_v13  ;;  %v6651_v60 = vadd.f32 %v6650_v61, %v6610_v43 }
 0xd85   : > { %v6692_v57 = vadd.f32 %v6691_v6, %v6651_v60 }
 0xd87   : > { %v6715_v5 = vmul.f32 0.01, %v6692_v57 }
 0xd89   : > { %v6723_v50 = vmax.f32 %v6692_v57, %v6715_v5 }
 0xd8a   : > { %v6615_v40 = vpop.f32.mrf.mxu0  ;;  %v6653_v37 = vpop.f32.mrf.mxu1 }
 0xd8b   : > { %v6616_v20 = vadd.f32 %v9723_v17, %v6615_v40  ;;  %v6654_v27 = vadd.f32 %v6653_v37, %v6613_v18  ;;  %v13376_v61 = vadd.f32 %v6723_v50, %v12828_v10 }
 0xd8d   : > { %v6695_v16 = vadd.f32 %v6694_v24, %v6654_v27  ;;  %v6804_v27 = vld [vmem:[%s14343_s2] sm:$0xff] }
 0xd8f   : > { %v6716_v44 = vmul.f32 0.01, %v6695_v16 }
 0xd91   : > { %v6724_v62 = vmax.f32 %v6695_v16, %v6716_v44 }
 0xd92   : > { %v6618_v14 = vpop.f32.mrf.mxu0  ;;  %v6656_v52 = vpop.f32.mrf.mxu1 }
 0xd93   : > { %v6619_v35 = vadd.f32 %v9723_v17, %v6618_v14  ;;  %v6657_v39 = vadd.f32 %v6656_v52, %v6616_v20  ;;  %v13373_v26 = vadd.f32 %v6724_v62, %v12834_v59  ;;  %v6807_v52 = vld [vmem:[%s14342_s22 + $0x18] sm:$0xff]  ;;  %s14348_s22 = sld [smem:[#allocation62_spill]] }
 0xd94   : > { %6824 = vmatpush.msra.mxu0 %v6807_v52 }
 0xd95   : > { %v6698_v25 = vadd.f32 %v6697_v30, %v6657_v39  ;;  %v6762_v30 = vld [vmem:[%s14340_s1] sm:$0xff]  ;;  %v6740_v59 = vsel %vm2706_vm11, %v13373_v26, 0.0  ;;  %s14347_s1 = smov %s14346_s18 }
 0xd96   : > { %6785 = vmatpush.msra.mxu3 %v6762_v30  ;;  %v7090_v52 = vld [vmem:[%s14347_s1 + $0x110] sm:$0xff] }
 0xd97   : > { %v6717_v58 = vmul.f32 0.01, %v6698_v25 }
 0xd99   : > { %v6725_v56 = vmax.f32 %v6698_v25, %v6717_v58 }
 0xd9a   : > { %v6621_v63 = vpop.f32.mrf.mxu0  ;;  %v6659_v49 = vpop.f32.mrf.mxu1 }
 0xd9b   : > { %v6622_v1 = vadd.f32 %v9723_v17, %v6621_v63  ;;  %v6660_v41 = vadd.f32 %v6659_v49, %v6619_v35  ;;  %v13380_v40 = vadd.f32 %v6725_v56, %v12856_v46  ;;  %v6739_v46 = vsel %vm2706_vm11, %v13376_v61, 0.0 }
 0xd9d   : > { %v6701_v23 = vadd.f32 %v6700_v48, %v6660_v41  ;;  %v6806_v48 = vld [vmem:[%s14343_s2 + $0x10] sm:$0xff]  ;;  %s14349_s2 = smov %s14348_s22 }
 0xd9e   : > { %6825 = vmatpush.msra.mxu0 %v6806_v48  ;;  %v7089_v48 = vld [vmem:[%s14347_s1 + $0x108] sm:$0xff] }
 0xd9f   : > { %v6718_v22 = vmul.f32 0.01, %v6701_v23 }
 0xda0   : > { %6826 = vmatpush.msra.mxu0 %v6805_v21 }
 0xda1   : > { %v6726_v28 = vmax.f32 %v6701_v23, %v6718_v22 }
 0xda2   : > { %v6624_v54 = vpop.f32.mrf.mxu0  ;;  %v6662_v8 = vpop.f32.mrf.mxu1  ;;  %6827 = vmatpush.msra.mxu0 %v6804_v27 }
 0xda3   : > { %v6625_v34 = vadd.f32 %v9723_v17, %v6624_v54  ;;  %v6663_v47 = vadd.f32 %v6662_v8, %v6622_v1  ;;  %v13387_v63 = vadd.f32 %v6726_v28, %v12881_v9  ;;  %v6741_v8 = vadd.f32 %v6740_v59, %v6739_v46  ;;  %v6712_v9 = vpop.f32.mrf.mxu2  ;;  %v7088_v59 = vld [vmem:[%s14347_s1 + $0x100] sm:$0xff]  ;;  %v7392_v46 = vld [vmem:[%s14349_s2 + $0x68] sm:$0xff] }
 0xda5   : > { %v6704_v38 = vadd.f32 %v6703_v51, %v6663_v47  ;;  %v6742_v51 = vsel %vm2706_vm11, %v13380_v40, 0.0  ;;  %v6744_v60 = vsel %vm2706_vm11, %v13387_v63, 0.0 }
 0xda6   : > { %v6743_v16 = vadd.f32 %v6742_v51, %v6741_v8  ;;  %v7391_v51 = vld [vmem:[%s14349_s2 + $0x60] sm:$0xff]  ;;  %v7389_v8 = vld [vmem:[%s14349_s2 + $0x50] sm:$0xff] }
 0xda7   : > { %v6719_v3 = vmul.f32 0.01, %v6704_v38 }
 0xda8   : > { %v6745_v41 = vadd.f32 %v6744_v60, %v6743_v16  ;;  %v7387_v60 = vld [vmem:[%s14349_s2 + $0x40] sm:$0xff]  ;;  %v7385_v16 = vld [vmem:[%s14349_s2 + $0x30] sm:$0xff] }
 0xda9   : > { %v6727_v37 = vmax.f32 %v6704_v38, %v6719_v3 }
 0xdaa   : > { %v6665_v36 = vpop.f32.mrf.mxu1  ;;  %v6627_v19 = vpop.f32.mrf.mxu0 }
 0xdab   : > { %v6666_v29 = vadd.f32 %v6665_v36, %v6625_v34  ;;  %v6628_v11 = vadd.f32 %v9723_v17, %v6627_v19  ;;  %v13395_v18 = vadd.f32 %v6727_v37, %v12911_v42 }
 0xdad   : > { %v6707_v12 = vadd.f32 %v6706_v4, %v6666_v29  ;;  %v6746_v42 = vsel %vm2706_vm11, %v13395_v18, 0.0 }
 0xdae   : > { %v6747_v25 = vadd.f32 %v6746_v42, %v6745_v41  ;;  %v7384_v42 = vld [vmem:[%s14349_s2 + $0x28] sm:$0xff] }
 0xdaf   : > { %v6720_v24 = vmul.f32 0.01, %v6707_v12 }
 0xdb1   : > { %v6728_v49 = vmax.f32 %v6707_v12, %v6720_v24  ;;  %v6761_v12 = vld [vmem:[%s14344_s16] sm:$0x7]  ;;  %s14350_s16 = sld [smem:[#allocation27_spill]] }
 0xdb2   : > { %v6668_v6 = vpop.f32.mrf.mxu1  ;;  %v6630_v14 = vpop.f32.mrf.mxu0  ;;  %v6766_v50 = vmul.f32 %v6761_v12, %v12285_v31  ;;  %v6795_v56 = vmul.f32 %v6761_v12, %v12287_v15  ;;  %v6800_v24 = vld [vmem:[%s14345_s15] sm:$0x1]  ;;  %s14351_s15 = sld [smem:[#allocation60_spill]] }
 0xdb3   : > { %v6669_v13 = vadd.f32 %v6668_v6, %v6628_v11  ;;  %v6631_v43 = vadd.f32 %v9723_v17, %v6630_v14  ;;  %v13401_v35 = vadd.f32 %v6728_v49, %v12939_v0  ;;  %v7091_v14 = vld [vmem:[%s14346_s18 + $0x118] sm:$0xff]  ;;  %s14353_s18 = sld [smem:[#allocation57_spill]] }
 0xdb4   : > { %v6797_v6 = vrot.slane %v6795_v56, 2  ;;  %7170 = vmatpush.msrb.mxu3 %v7091_v14  ;;  %v7394_v49 = vld [vmem:[%s14348_s22 + $0x78] sm:$0xff]  ;;  %s14354_s22 = sld [smem:[#allocation59_spill]] }
 0xdb5   : > { %v6710_v53 = vadd.f32 %v6709_v55, %v6669_v13  ;;  %v6748_v4 = vsel %vm2706_vm11, %v13401_v35, 0.0 }
 0xdb6   : > { %v6749_v47 = vadd.f32 %v6748_v4, %v6747_v25  ;;  %7171 = vmatpush.msrb.mxu3 %v7090_v52  ;;  %v7383_v4 = vld [vmem:[%s14349_s2 + $0x20] sm:$0xff]  ;;  %v7381_v25 = vld [vmem:[%s14349_s2 + $0x10] sm:$0xff] }
 0xdb7   : > { %v6721_v10 = vmul.f32 0.01, %v6710_v53  ;;  %v6808_v21 = vld [vmem:[%s14350_s16] sm:$0x1]  ;;  %s14356_s16 = sld [smem:[#allocation58_spill]] }
 0xdb8   : > { %7172 = vmatpush.msrb.mxu3 %v7089_v48 }
 0xdb9   : > { %v6729_v54 = vmax.f32 %v6710_v53, %v6721_v10  ;;  %v7393_v10 = vld [vmem:[%s14349_s2 + $0x70] sm:$0xff] }
 0xdba   : > { %v6671_v20 = vpop.f32.mrf.mxu1  ;;  %7173 = vmatpush.msrb.mxu3 %v7088_v59 }
 0xdbb   : > { %v6672_v39 = vadd.f32 %v6671_v20, %v6631_v43  ;;  %v13406_v17 = vadd.f32 %v6729_v54, %v12970_v45  ;;  %v7390_v43 = vld [vmem:[%s14349_s2 + $0x58] sm:$0xff] }
 0xdbd   : > { %v6713_v1 = vadd.f32 %v6712_v9, %v6672_v39  ;;  %v6750_v0 = vsel %vm2706_vm11, %v13406_v17, 0.0  ;;  %v7388_v9 = vld [vmem:[%s14349_s2 + $0x48] sm:$0xff]  ;;  %v7386_v39 = vld [vmem:[%s14349_s2 + $0x38] sm:$0xff] }
 0xdbe   : > { %v6751_v44 = vadd.f32 %v6750_v0, %v6749_v47  ;;  %v7380_v0 = vld [vmem:[%s14349_s2 + $0x8] sm:$0xff]  ;;  %v7379_v47 = vld [vmem:[%s14349_s2] sm:$0xff] }
 0xdbf   : > { %v6722_v57 = vmul.f32 0.01, %v6713_v1 }
 0xdc1   : > { %v6730_v34 = vmax.f32 %v6713_v1, %v6722_v57  ;;  %v7382_v57 = vld [vmem:[%s14349_s2 + $0x18] sm:$0xff] }
 0xdc3   : > { %v13413_v36 = vadd.f32 %v6730_v34, %v13002_v33  ;;  %v6790_v33 = vmul.f32 %v6761_v12, %v12283_v32 }
 0xdc5   : > { %v6752_v45 = vsel %vm2706_vm11, %v13413_v36, 0.0  ;;  %v6792_v3 = vrot.slane %v6790_v33, 1 }
 0xdc6   : > { %v6753_v23 = vadd.f32 %v6752_v45, %v6751_v44 }
 0xdc8   : > { %v6754_v29 = vrot.slane %v6753_v23, 4 }
 0xdca   : > { %v6755_v5 = vadd.f32 %v6754_v29, %v6753_v23 }
 0xdcc   : > { %v6756_v19 = vrot.slane %v6755_v5, 2 }
 0xdce   : > { %v6757_v58 = vadd.f32 %v6756_v19, %v6755_v5 }
 0xdd0   : > { %v6758_v38 = vrot.slane %v6757_v58, 1 }
 0xdd2   : > { %v6759_v62 = vadd.f32 %v6758_v38, %v6757_v58 }
 0xdd4   : > { %v6760_v22 = vmul.f32 0.015625, %v6759_v62 }
 0xdd6   : > { %8725 = vmatmul.msk.f32.vlgmr.msra.gmra.mxu3 %vm2706_vm11, %v6760_v22 }
 0xdd7   : > { %7448 = vmatpush.msra.mxu3 %v7394_v49 }
 0xdd9   : > { %7449 = vmatpush.msra.mxu3 %v7393_v10 }
 0xddb   : > { %7450 = vmatpush.msra.mxu3 %v7392_v46 }
 0xddd   : > { %7451 = vmatpush.msra.mxu3 %v7391_v51 }
 0xddf   : > { %7452 = vmatpush.msra.mxu3 %v7390_v43 }
 0xde1   : > { %7453 = vmatpush.msra.mxu3 %v7389_v8 }
 0xde3   : > { %7454 = vmatpush.msra.mxu3 %v7388_v9 }
 0xde5   : > { %7455 = vmatpush.msra.mxu3 %v7387_v60 }
 0xde7   : > { %7456 = vmatpush.msra.mxu3 %v7386_v39 }
 0xde9   : > { %7457 = vmatpush.msra.mxu3 %v7385_v16 }
 0xdeb   : > { %7458 = vmatpush.msra.mxu3 %v7384_v42 }
 0xded   : > { %7459 = vmatpush.msra.mxu3 %v7383_v4 }
 0xdef   : > { %7460 = vmatpush.msra.mxu3 %v7382_v57 }
 0xdf1   : > { %7461 = vmatpush.msra.mxu3 %v7381_v25 }
 0xdf3   : > { %7462 = vmatpush.msra.mxu3 %v7380_v0 }
 0xdf5   : > { %7463 = vmatpush.msra.mxu3 %v7379_v47 }
 0xe59   : > { %v6787_v11 = vpop.f32.mrf.mxu3 }
 0xe5a   : > { %v6788_v55 = vadd.f32 %v6787_v11, %v6766_v50 }
 0xe5c   : > { %v6794_v28 = vadd.f32 %v6792_v3, %v6788_v55 }
 0xe5e   : > { %v6799_v13 = vadd.f32 %v6797_v6, %v6794_v28 }
 0xe60   : > { %v6801_v30 = vadd.f32 %v6800_v24, %v6799_v13 }
 0xe62   : > { %v6802_v37 = vmul.f32 0.01, %v6801_v30 }
 0xe64   : > { %v6803_v53 = vmax.f32 %v6801_v30, %v6802_v37 }
 0xe66   : > { %8726 = vmatmul.msk.f32.vlgmr.msra.gmra.mxu0 %vm2706_vm11, %v6803_v53 }
 0xee3   : > { %v6829_v54 = vpop.f32.mrf.mxu0 }
 0xee4   : > { %v6830_v20 = vadd.f32 %v6829_v54, %v6808_v21 }
 0xee6   : > { %v8727_v27 = vmul.f32 -1.442695, %v6830_v20 }
 0xee8   : > { %9751 = vpow2.f32 %v8727_v27 }
 0xeee   : > { %v9752_v1 = vpop.eup %9751 }
 0xeef   : > { %v6835_v41 = vadd.f32 1.0, %v9752_v1 }
 0xef1   : > { %9753 = vrcp.f32 %v6835_v41  ;;  %v6847_v23 = vand.u32 2147483648, %v6835_v41  ;;  %v6845_v5 = vand.u32 2147483647, %v6835_v41  ;;  %vm6841_vm9 = vweird.f32 %v6835_v41 }
 0xef3   : > { %v6848_v58 = vor.u32 1.1754944e-38, %v6847_v23  ;;  %vm6846_vm12 = vcmp.eq.f32.partialorder %v6845_v5, 8.507059e+37 }
 0xef7   : > { %v9754_v34 = vpop.eup %9753 }
 0xef8   : > { %v6837_v44 = vmul.f32 %v9754_v34, %v6835_v41  ;;  %vm6842_vm8 = vweird.f32 %v9754_v34 }
 0xef9   : > { %vm6843_vm10 = vmor %vm6841_vm9, %vm6842_vm8 }
 0xefa   : > { %v6838_v45 = vsub.f32 1.0, %v6837_v44 }
 0xefc   : > { %v6839_v29 = vmul.f32 %v9754_v34, %v6838_v45 }
 0xefe   : > { %v6840_v19 = vadd.f32 %v9754_v34, %v6839_v29 }
 0xf00   : > { %v6844_v38 = vsel %vm6843_vm10, %v9754_v34, %v6840_v19 }
 0xf01   : > { %v6849_v62 = vsel %vm6846_vm12, %v6848_v58, %v6844_v38 }
 0xf02   : > { %v6851_v22 = vperm.slane %v6849_v62, 0  ;;  %v7087_v62 = vld [vmem:[%s14347_s1 + $0xf8] sm:$0xff] }
 0xf03   : > { %7129 = vmatpush.msrb.mxu2 %v7087_v62  ;;  %v7060_v62 = vld [vmem:[%s14347_s1 + $0x20] sm:$0xff] }
 0xf04   : > { %v6853_v12 = vmul.f32 %v6851_v22, %v13373_v26  ;;  %v6855_v33 = vmul.f32 %v6851_v22, %v13387_v63  ;;  %v6858_v50 = vmul.f32 %v6851_v22, %v13406_v17  ;;  %v6856_v56 = vmul.f32 %v6851_v22, %v13395_v18 }
 0xf05   : > { %v6852_v3 = vmul.f32 %v6851_v22, %v13376_v61  ;;  %v6854_v11 = vmul.f32 %v6851_v22, %v13380_v40  ;;  %v13473_v48 = vmul.f32 %v6851_v22, %v13413_v36  ;;  %v6857_v59 = vmul.f32 %v6851_v22, %v13401_v35  ;;  %v7086_v22 = vld [vmem:[%s14347_s1 + $0xf0] sm:$0xff] }
 0xf06   : > { %v6869_v55 = vrot.slane %v6853_v12, 7  ;;  %v6871_v6 = vrot.slane %v6855_v33, 7  ;;  %v6872_v28 = vrot.slane %v6856_v56, 7  ;;  %v6874_v24 = vrot.slane %v6858_v50, 7  ;;  %v7071_v12 = vld [vmem:[%s14347_s1 + $0x78] sm:$0xff]  ;;  %7130 = vmatpush.msrb.mxu2 %v7086_v22  ;;  %v7074_v22 = vld [vmem:[%s14347_s1 + $0x90] sm:$0xff] }
 0xf07   : > { %v6868_v63 = vrot.slane %v6852_v3, 7  ;;  %v6870_v40 = vrot.slane %v6854_v11, 7  ;;  %v6873_v4 = vrot.slane %v6857_v59, 7  ;;  %7100 = vmatpush.msrb.mxu1 %v7071_v12  ;;  %v7059_v12 = vld [vmem:[%s14347_s1 + $0x18] sm:$0xff] }
 0xf08   : > { %v13452_v13 = vsel %vm1871_vm0, 0.0, %v6869_v55  ;;  %v13455_v30 = vsel %vm1871_vm0, 0.0, %v6871_v6  ;;  %v6893_v26 = vsel %vm1871_vm0, %v6869_v55, 0.0  ;;  %v13462_v37 = vsel %vm1871_vm0, 0.0, %v6872_v28  ;;  %v7085_v55 = vld [vmem:[%s14347_s1 + $0xe8] sm:$0xff] }
 0xf09   : > { %v9664_v18 = vpack.i.bf16 %v13455_v30, %v13452_v13  ;;  %v6924_v61 = vrot.slane %v13452_v13, 2  ;;  %v6925_v17 = vrot.slane %v6893_v26, 2  ;;  %v13465_v53 = vsel %vm1871_vm0, %v6872_v28, 0.0  ;;  %7131 = vmatpush.msrb.mxu2 %v7085_v55 }
 0xf0a   : > { %v6984_v52 = vrot.slane %v13462_v37, 2  ;;  %v6985_v49 = vrot.slane %v13465_v53, 2  ;;  %v13480_v10 = vsel %vm1871_vm0, 0.0, %v6868_v63  ;;  %v13483_v46 = vsel %vm1871_vm0, %v6868_v63, 0.0 }
 0xf0b   : > { %9665 = vrot.lane.b32.xlu2 %v9664_v18, %s14329_s7  ;;  %v13469_v14 = vsel %vm2102_vm2, %v6924_v61, %v6925_v17  ;;  %v6906_v21 = vrot.slane %v13452_v13, 1  ;;  %v13487_v51 = vsel %vm1871_vm0, %v6874_v24, 0.0  ;;  %v6907_v36 = vrot.slane %v6893_v26, 1  ;;  %v7084_v61 = vld [vmem:[%s14347_s1 + $0xe0] sm:$0xff] }
 0xf0c   : > { %8728 = vmatmul.msk.f32.vlgmr.msrb.gmra.mxu3 %vm2706_vm11, %v13469_v14  ;;  %v6978_v35 = vrot.slane %v13480_v10, 2  ;;  %v13491_v43 = vsel %vm1871_vm0, 0.0, %v6870_v40  ;;  %v13494_v54 = vsel %vm1871_vm0, %v6870_v40, 0.0  ;;  %v6979_v8 = vrot.slane %v13483_v46, 2  ;;  %7132 = vmatpush.msrb.mxu2 %v7084_v61 }
 0xf0d   : > { %7590 = vmatpush.msrb.mxu3 %v6858_v50  ;;  %v6981_v20 = vrot.slane %v13491_v43, 2  ;;  %v6986_v9 = vsel %vm2102_vm2, %v6984_v52, %v6985_v49  ;;  %v13500_v27 = vsel %vm1871_vm0, 0.0, %v6874_v24  ;;  %v6908_v60 = vsel %vm2013_vm1, %v6906_v21, %v6907_v36  ;;  %v7070_v50 = vld [vmem:[%s14347_s1 + $0x70] sm:$0xff]  ;;  %v7083_v49 = vld [vmem:[%s14347_s1 + $0xd8] sm:$0xff] }
 0xf0e   : > { %v6982_v39 = vrot.slane %v13494_v54, 2  ;;  %v6895_v16 = vsel %vm1871_vm0, %v6871_v6, 0.0  ;;  %v6988_v42 = vrot.slane %v13487_v51, 2  ;;  %v9674_v1 = vpack.i.bf16 %v13480_v10, %v6908_v60  ;;  %v7069_v6 = vld [vmem:[%s14347_s1 + $0x68] sm:$0xff]  ;;  %7101 = vmatpush.msrb.mxu1 %v7070_v50  ;;  %7133 = vmatpush.msrb.mxu2 %v7083_v49 }
 0xf0f   : > { %7591 = vmatpush.msrb.mxu3 %v6856_v56  ;;  %v6980_v41 = vsel %vm2102_vm2, %v6978_v35, %v6979_v8  ;;  %v9684_v25 = vpack.i.bf16 %v6986_v9, %v6908_v60  ;;  %v6927_v0 = vrot.slane %v13455_v30, 2  ;;  %v6928_v34 = vrot.slane %v6895_v16, 2  ;;  %v7082_v8 = vld [vmem:[%s14347_s1 + $0xd0] sm:$0xff]  ;;  %v7081_v9 = vld [vmem:[%s14347_s1 + $0xc8] sm:$0xff] }
 0xf10   : > { %v6983_v57 = vsel %vm2102_vm2, %v6981_v20, %v6982_v39  ;;  %9675 = vrot.lane.b32.xlu0 %v9674_v1, %s14328_s10  ;;  %v6910_v44 = vrot.slane %v6895_v16, 1  ;;  %v6909_v45 = vrot.slane %v13455_v30, 1  ;;  %v6987_v23 = vrot.slane %v13500_v27, 2  ;;  %7102 = vmatpush.msrb.mxu1 %v7069_v6  ;;  %v7067_v20 = vld [vmem:[%s14347_s1 + $0x58] sm:$0xff]  ;;  %v7066_v60 = vld [vmem:[%s14347_s1 + $0x50] sm:$0xff]  ;;  %v7073_v50 = vld [vmem:[%s14347_s1 + $0x88] sm:$0xff] }
 0xf11   : > { %7592 = vmatpush.msrb.mxu3 %v6854_v11  ;;  %v9669_v47 = vpack.i.bf16 %v6983_v57, %v6980_v41  ;;  %v6968_v29 = vrot.slane %v13462_v37, 1  ;;  %v13516_v5 = vsel %vm2102_vm2, %v6927_v0, %v6928_v34  ;;  %v6969_v19 = vrot.slane %v13465_v53, 1  ;;  %7134 = vmatpush.msrb.mxu2 %v7082_v8  ;;  %v7080_v41 = vld [vmem:[%s14347_s1 + $0xc0] sm:$0xff]  ;;  %v7065_v57 = vld [vmem:[%s14347_s1 + $0x48] sm:$0xff] }
 0xf12   : > { %v13523_v58 = vsel %vm1871_vm0, 0.0, %v6873_v4  ;;  %v6897_v38 = vsel %vm1871_vm0, %v6873_v4, 0.0  ;;  %v6962_v33 = vrot.slane %v13480_v10, 1  ;;  %v6875_v56 = vrot.slane %v13473_v48, 7  ;;  %v7068_v10 = vld [vmem:[%s14347_s1 + $0x60] sm:$0xff] }
 0xf13   : > { %7593 = vmatpush.msrb.mxu3 %v6852_v3  ;;  %9685 = vrot.lane.b32.xlu2 %v9684_v25, %s14330_s23  ;;  %v6911_v3 = vsel %vm2013_vm1, %v6909_v45, %v6910_v44  ;;  %v6989_v11 = vsel %vm2102_vm2, %v6987_v23, %v6988_v42  ;;  %v6972_v28 = vrot.slane %v13487_v51, 1  ;;  %v6930_v24 = vrot.slane %v13523_v58, 2  ;;  %v7064_v44 = vld [vmem:[%s14347_s1 + $0x40] sm:$0xff]  ;;  %v7078_v45 = vld [vmem:[%s14347_s1 + $0xb0] sm:$0xff]  ;;  %v7063_v23 = vld [vmem:[%s14347_s1 + $0x38] sm:$0xff] }
 0xf14   : > { %9670 = vrot.lane.b32.xlu1 %v9669_v47, %s14330_s23  ;;  %8729 = vmatmul.msk.f32.gmra.mxu3 %vm2706_vm11, %v13516_v5  ;;  %v6931_v26 = vrot.slane %v6897_v38, 2  ;;  %v6963_v63 = vrot.slane %v13483_v46, 1  ;;  %v9689_v18 = vpack.i.bf16 %v13523_v58, %v13469_v14  ;;  %v6965_v17 = vrot.slane %v13491_v43, 1  ;;  %v7079_v47 = vld [vmem:[%s14347_s1 + $0xb8] sm:$0xff] }
 0xf15   : > { %v6966_v40 = vrot.slane %v13494_v54, 1  ;;  %v13545_v53 = vsel %vm2013_vm1, %v6968_v29, %v6969_v19  ;;  %v9699_v52 = vpack.i.bf16 %v6989_v11, %v6911_v3  ;;  %v6971_v59 = vrot.slane %v13500_v27, 1  ;;  %7103 = vmatpush.msrb.mxu1 %v7068_v10  ;;  %7135 = vmatpush.msrb.mxu2 %v7081_v9  ;;  %v7077_v29 = vld [vmem:[%s14347_s1 + $0xa8] sm:$0xff]  ;;  %v7076_v19 = vld [vmem:[%s14347_s1 + $0xa0] sm:$0xff] }
 0xf16   : > { %v13548_v48 = vsel %vm2013_vm1, %v6962_v33, %v6963_v63  ;;  %v9679_v14 = vpack.i.bf16 %v13491_v43, %v6911_v3  ;;  %v6913_v21 = vrot.slane %v6897_v38, 1  ;;  %v6932_v51 = vsel %vm2102_vm2, %v6930_v24, %v6931_v26  ;;  %v7075_v38 = vld [vmem:[%s14347_s1 + $0x98] sm:$0xff]  ;;  %v7058_v33 = vld [vmem:[%s14347_s1 + $0x10] sm:$0xff]  ;;  %v7056_v3 = vld [vmem:[%s14347_s1] sm:$0xff] }
 0xf17   : > { %v13556_v46 = vsel %vm2013_vm1, %v6965_v17, %v6966_v40  ;;  %v6912_v36 = vrot.slane %v13523_v58, 1  ;;  %v13562_v35 = vsel %vm2013_vm1, %v6971_v59, %v6972_v28  ;;  %v6891_v43 = vsel %vm1871_vm0, 0.0, %v6875_v56  ;;  %7104 = vmatpush.msrb.mxu1 %v7067_v20  ;;  %7136 = vmatpush.msrb.mxu2 %v7080_v41  ;;  %v7072_v11 = vld [vmem:[%s14347_s1 + $0x80] sm:$0xff] }
 0xf18   : > { %9690 = vrot.lane.b32.xlu0 %v9689_v18, %s14329_s7  ;;  %v6899_v54 = vsel %vm1871_vm0, %v6875_v56, 0.0  ;;  %v7031_v16 = vrot.slane %v6891_v43, 2  ;;  %v9704_v1 = vpack.i.bf16 %v6891_v43, %v13516_v5  ;;  %v7016_v0 = vrot.slane %v6891_v43, 1  ;;  %v7062_v5 = vld [vmem:[%s14347_s1 + $0x30] sm:$0xff]  ;;  %v7057_v56 = vld [vmem:[%s14347_s1 + $0x8] sm:$0xff] }
 0xf19   : > { %v6914_v39 = vsel %vm2013_vm1, %v6912_v36, %v6913_v21  ;;  %v7032_v42 = vrot.slane %v6899_v54, 2  ;;  %7105 = vmatpush.msrb.mxu1 %v7066_v60  ;;  %v7017_v34 = vrot.slane %v6899_v54, 1  ;;  %7137 = vmatpush.msrb.mxu2 %v7079_v47 }
 0xf1a   : > { %v9694_v4 = vpack.i.bf16 %v13462_v37, %v6914_v39 }
 0xf1b   : > { %9700 = vrot.lane.b32.xlu2 %v9699_v52, %s14330_s23  ;;  %v7033_v25 = vsel %vm2102_vm2, %v7031_v16, %v7032_v42  ;;  %7106 = vmatpush.msrb.mxu1 %v7065_v57  ;;  %v7018_v37 = vsel %vm2013_vm1, %v7016_v0, %v7017_v34  ;;  %vm7242_vm1 = vcmask 1044480  }
 0xf1c   : > { %9680 = vrot.lane.b32.xlu1 %v9679_v14, %s14328_s10  ;;  %8730 = vmatmul.msk.f32.gmra.mxu3 %vm2706_vm11, %v6932_v51 }
 0xf1d   : > { %7107 = vmatpush.msrb.mxu1 %v7064_v44  ;;  %7138 = vmatpush.msrb.mxu2 %v7078_v45 }
 0xf1f   : > { %7108 = vmatpush.msrb.mxu1 %v7063_v23  ;;  %7139 = vmatpush.msrb.mxu2 %v7077_v29 }
 0xf20   : > { %9705 = vrot.lane.b32.xlu0 %v9704_v1, %s14329_s7 }
 0xf21   : > { %7109 = vmatpush.msrb.mxu1 %v7062_v5  ;;  %7140 = vmatpush.msrb.mxu2 %v7076_v19 }
 0xf23   : > { %6919 = vrot.lane.b32.xlu2 %v6914_v39, %s14330_s23  ;;  %7141 = vmatpush.msrb.mxu2 %v7075_v38 }
 0xf24   : > { %9695 = vrot.lane.b32.xlu1 %v9694_v4, %s14328_s10  ;;  %8731 = vmatmul.msk.f32.gmra.mxu3 %vm2706_vm11, %v7033_v25 }
 0xf25   : > { %7142 = vmatpush.msrb.mxu2 %v7074_v22 }
 0xf27   : > { %7143 = vmatpush.msrb.mxu2 %v7073_v50 }
 0xf28   : > { %6937 = vrot.lane.b32.xlu0 %v6932_v51, %s14329_s7 }
 0xf29   : > { %7144 = vmatpush.msrb.mxu2 %v7072_v11 }
 0xf2c   : > { %7025 = vrot.lane.b32.xlu1 %v7018_v37, %s14328_s10 }
 0xf34   : > { %6952 = vrot.lane.b32.xlu1 %v13500_v27, %s14328_s10  ;;  %v7061_v27 = vld [vmem:[%s14347_s1 + $0x28] sm:$0xff]  ;;  %s14352_s1 = smov %s14351_s15 }
 0xf35   : > { %7110 = vmatpush.msrb.mxu1 %v7061_v27 }
 0xf37   : > { %7111 = vmatpush.msrb.mxu1 %v7060_v62 }
 0xf39   : > { %7112 = vmatpush.msrb.mxu1 %v7059_v12 }
 0xf3b   : > { %7113 = vmatpush.msrb.mxu1 %v7058_v33 }
 0xf3d   : > { %7114 = vmatpush.msrb.mxu1 %v7057_v56 }
 0xf3f   : > { %7115 = vmatpush.msrb.mxu1 %v7056_v3 }
 0xf65   : > { %v9666_v55 = vpop.permute.xlu2 %9665 }
 0xf66   : > { %v9667_v61 = vunpack.i.l.bf16 %v9666_v55  ;;  %v9668_v20 = vunpack.i.h.bf16 %v9666_v55 }
 0xf6d   : > { %v9686_v28 = vpop.permute.xlu2 %9685 }
 0xf6e   : > { %v9687_v52 = vunpack.i.l.bf16 %v9686_v28 }
 0xf70   : > { %v7034_v36 = vsel %vm2706_vm11, %v13452_v13, %v9687_v52  ;;  %v9688_v13 = vunpack.i.h.bf16 %v9686_v28 }
 0xf72   : > { %v7046_v37 = vsel %vm2706_vm11, %v13545_v53, %v9688_v13 }
 0xf82   : > { %v9676_v6 = vpop.permute.xlu0 %9675 }
 0xf83   : > { %v9678_v24 = vunpack.i.h.bf16 %v9676_v6  ;;  %v9677_v17 = vunpack.i.l.bf16 %v9676_v6 }
 0xf85   : > { %v7040_v18 = vsel %vm3190_vm14, %v11450_v7, %v9678_v24  ;;  %v9701_v7 = vpop.permute.xlu2 %9700 }
 0xf86   : > { %v9671_v26 = vpop.permute.xlu1 %9670  ;;  %7116 = vmatmul.f32.vlgmr.msrb.gmra.mxu1 %v7040_v18  ;;  %v9702_v60 = vunpack.i.l.bf16 %v9701_v7  ;;  %v9703_v45 = vunpack.i.h.bf16 %v9701_v7 }
 0xf87   : > { %v9672_v63 = vunpack.i.l.bf16 %v9671_v26  ;;  %v9673_v14 = vunpack.i.h.bf16 %v9671_v26 }
 0xf88   : > { %v7035_v57 = vsel %vm2706_vm11, %v13455_v30, %v9702_v60  ;;  %v7047_v30 = vsel %vm2706_vm11, %v13562_v35, %v9703_v45 }
 0xf89   : > { %v7044_v40 = vsel %vm2706_vm11, %v13548_v48, %v9672_v63  ;;  %v7045_v48 = vsel %vm2706_vm11, %v13556_v46, %v9673_v14 }
 0xf8a   : > { %v7048_v59 = vsel %vm3181_vm13, %v7044_v40, %v9667_v61  ;;  %v9691_v10 = vpop.permute.xlu0 %9690  ;;  %v7049_v39 = vsel %vm3181_vm13, %v7045_v48, %v9668_v20  ;;  %v9724_v48 = vld [vmem:[%s14353_s18] ss:$0 sm:$0xff]  ;;  %s14359_s18 = sld [smem:[#allocation34_spill]] }
 0xf8b   : > { %v7052_v49 = vsel %vm3190_vm14, %v7048_v59, %v9677_v17  ;;  %v9692_v21 = vunpack.i.l.bf16 %v9691_v10  ;;  %v9693_v41 = vunpack.i.h.bf16 %v9691_v10  ;;  %v13640_v10 = vld [vmem:[%s14352_s1 + $0x8] sm:$0xff]  ;;  %s14355_s1 = smov %s14354_s22 }
 0xf8c   : > { %7145 = vmatmul.f32.vlgmr.msrb.gmra.mxu2 %v7052_v49  ;;  %v13635_v49 = vld [vmem:[%s14351_s15] sm:$0xff]  ;;  %s14357_s15 = sld [smem:[#allocation63_spill]] }
 0xf8d   : > { %v7037_v8 = vsel %vm3181_vm13, %v7034_v36, %v9692_v21  ;;  %v7050_v47 = vsel %vm3181_vm13, %v7046_v37, %v9693_v41  ;;  %v6920_v5 = vpop.permute.xlu2 %6919  ;;  %v13646_v21 = vsel %vm7242_vm1, %v10552_v2, 0.0  ;;  %v7414_v2 = vld [vmem:[%s14349_s2 + $0x118] sm:$0xff] }
 0xf8e   : > { %v9681_v51 = vpop.permute.xlu1 %9680  ;;  %v7036_v53 = vsel %vm2706_vm11, %v13523_v58, %v6920_v5  ;;  %v13652_v36 = vrot.slane %v13646_v21, 1  ;;  %7506 = vmatpush.msra.mxu1 %v7414_v2 }
 0xf8f   : > { %v9683_v43 = vunpack.i.h.bf16 %v9681_v51  ;;  %v9682_v54 = vunpack.i.l.bf16 %v9681_v51  ;;  %v7175_v33 = vpop.f32.mrf.mxu3  ;;  %v13649_v51 = vrot.slane %v13646_v21, 2 }
 0xf90   : > { %7256 = vrot.lane.b32.xlu0 %v13652_v36, %s14330_s23  ;;  %7333 = vrot.lane.b32.xlu2 %v13652_v36, %s14328_s10 }
 0xf91   : > { %v7041_v9 = vsel %vm3190_vm14, %v7037_v8, %v9683_v43  ;;  %v7053_v16 = vsel %vm3190_vm14, %v7049_v39, %v9682_v54  ;;  %v9709_v7 = vpack.i.bf16 %v13646_v21, %v13649_v51  ;;  %7433 = vst [vmem:[#allocation1 + $0x31] ss:$2 sm:$0xff] %v13649_v51  ;;  %v7413_v43 = vld [vmem:[%s14349_s2 + $0x110] sm:$0xff]  ;;  %v7412_v54 = vld [vmem:[%s14349_s2 + $0x108] sm:$0xff]  ;;  %v7411_v8 = vld [vmem:[%s14349_s2 + $0x100] sm:$0xff] }
 0xf92   : > { %7119 = vmatmul.f32.gmra.mxu1 %v7041_v9  ;;  %v9706_v42 = vpop.permute.xlu0 %9705 }
 0xf93   : > { %v9707_v1 = vunpack.i.l.bf16 %v9706_v42  ;;  %v9708_v23 = vunpack.i.h.bf16 %v9706_v42  ;;  %9710 = vrot.lane.b32.xlu1 %v9709_v7, %s14329_s7  ;;  %7507 = vmatpush.msra.mxu1 %v7413_v43 }
 0xf94   : > { %7148 = vmatmul.f32.gmra.mxu2 %v7053_v16 }
 0xf95   : > { %v7038_v0 = vsel %vm3181_vm13, %v7035_v57, %v9707_v1  ;;  %v7051_v19 = vsel %vm3181_vm13, %v7047_v30, %v9708_v23  ;;  %7508 = vmatpush.msra.mxu1 %v7412_v54 }
 0xf96   : > { %v9696_v4 = vpop.permute.xlu1 %9695 }
 0xf97   : > { %v9698_v25 = vunpack.i.h.bf16 %v9696_v4  ;;  %v9697_v46 = vunpack.i.l.bf16 %v9696_v4  ;;  %v7178_v35 = vpop.f32.mrf.mxu3  ;;  %7509 = vmatpush.msra.mxu1 %v7411_v8 }
 0xf99   : > { %v7042_v34 = vsel %vm3190_vm14, %v7038_v0, %v9698_v25  ;;  %v7054_v44 = vsel %vm3190_vm14, %v7050_v47, %v9697_v46 }
 0xf9a   : > { %7122 = vmatmul.f32.gmra.mxu1 %v7042_v34  ;;  %v6938_v27 = vpop.permute.xlu0 %6937 }
 0xf9b   : > { %v7039_v62 = vsel %vm3181_vm13, %v7036_v53, %v6938_v27 }
 0xf9c   : > { %7151 = vmatmul.f32.gmra.mxu2 %v7054_v44 }
 0xf9e   : > { %v7026_v29 = vpop.permute.xlu1 %7025 }
 0xf9f   : > { %v7055_v38 = vsel %vm3190_vm14, %v7051_v19, %v7026_v29  ;;  %v7181_v55 = vpop.f32.mrf.mxu3 }
 0xfa4   : > { %7154 = vmatmul.f32.gmra.mxu2 %v7055_v38 }
 0xfa6   : > { %v6953_v22 = vpop.permute.xlu1 %6952 }
 0xfa7   : > { %v7043_v12 = vsel %vm3190_vm14, %v7039_v62, %v6953_v22  ;;  %v7184_v18 = vpop.f32.mrf.mxu3 }
 0xfa8   : > { %7125 = vmatmul.f32.gmra.mxu1 %v7043_v12 }
0x1003   : > { %v7117_v50 = vpop.f32.mrf.mxu1 }
0x100f   : > { %v7146_v56 = vpop.f32.mrf.mxu2  ;;  %v7120_v3 = vpop.f32.mrf.mxu1 }
0x1010   : > { %v7147_v40 = vadd.f32 %v7146_v56, %v7117_v50  ;;  %v7410_v50 = vld [vmem:[%s14349_s2 + $0xf8] sm:$0xff]  ;;  %v7409_v56 = vld [vmem:[%s14349_s2 + $0xf0] sm:$0xff] }
0x1012   : > { %v7176_v14 = vadd.f32 %v7175_v33, %v7147_v40  ;;  %v13731_v33 = vpop.permute.xlu2 %7333  ;;  %v7400_v40 = vld [vmem:[%s14349_s2 + $0xa8] sm:$0xff] }
0x1017   : > { %v7149_v11 = vpop.f32.mrf.mxu2  ;;  %v7123_v6 = vpop.f32.mrf.mxu1 }
0x1018   : > { %v7150_v61 = vadd.f32 %v7149_v11, %v7120_v3  ;;  %v7407_v11 = vld [vmem:[%s14349_s2 + $0xe0] sm:$0xff] }
0x101a   : > { %v7179_v59 = vadd.f32 %v7178_v35, %v7150_v61  ;;  %v7408_v35 = vld [vmem:[%s14349_s2 + $0xe8] sm:$0xff]  ;;  %v7401_v61 = vld [vmem:[%s14349_s2 + $0xb0] sm:$0xff] }
0x101f   : > { %v7152_v28 = vpop.f32.mrf.mxu2 }
0x1020   : > { %v7153_v58 = vadd.f32 %v7152_v28, %v7123_v6  ;;  %v7405_v6 = vld [vmem:[%s14349_s2 + $0xd0] sm:$0xff] }
0x1022   : > { %v7182_v52 = vadd.f32 %v7181_v55, %v7153_v58  ;;  %v7406_v55 = vld [vmem:[%s14349_s2 + $0xd8] sm:$0xff] }
0x1023   : > { %v7402_v58 = vld [vmem:[%s14349_s2 + $0xb8] sm:$0xff] }
0x1025   : > { %v7126_v24 = vpop.f32.mrf.mxu1 }
0x1027   : > { %v7155_v26 = vpop.f32.mrf.mxu2 }
0x1028   : > { %v7156_v63 = vadd.f32 %v7155_v26, %v7126_v24  ;;  %v7404_v24 = vld [vmem:[%s14349_s2 + $0xc8] sm:$0xff]  ;;  %v7403_v26 = vld [vmem:[%s14349_s2 + $0xc0] sm:$0xff] }
0x102a   : > { %v7185_v17 = vadd.f32 %v7184_v18, %v7156_v63  ;;  %v7257_v63 = vpop.permute.xlu0 %7256  ;;  %v13742_v18 = vpop.permute.xlu1 %9710 }
0x102b   : > { %v7339_v2 = vsel %vm2706_vm11, %v13646_v21, %v7257_v63 }
0x102c   : > { %7211 = vmatpush.msrb.mxu0 %v7185_v17 }
0x102e   : > { %7212 = vmatpush.msrb.mxu0 %v7182_v52  ;;  %v7399_v52 = vld [vmem:[%s14349_s2 + $0xa0] sm:$0xff] }
0x1030   : > { %7213 = vmatpush.msrb.mxu0 %v7179_v59  ;;  %v9712_v59 = vunpack.i.l.bf16 %v13742_v18 }
0x1032   : > { %7214 = vmatpush.msrb.mxu0 %v7176_v14  ;;  %v7398_v14 = vld [vmem:[%s14349_s2 + $0x98] sm:$0xff] }
0x1033   : > { %8732 = vmatmul.msk.f32.vlgmr.msrb.gmra.mxu0 %vm2706_vm11, %v13635_v49 }
0x1034   : > { %7471 = vmatpush.msra.mxu0 %v7410_v50 }
0x1036   : > { %7472 = vmatpush.msra.mxu0 %v7409_v56 }
0x1038   : > { %7473 = vmatpush.msra.mxu0 %v7408_v35 }
0x103a   : > { %7474 = vmatpush.msra.mxu0 %v7407_v11 }
0x103b   : > { %8733 = vmatmul.msk.f32.gmra.mxu0 %vm2706_vm11, %v13640_v10 }
0x103c   : > { %7475 = vmatpush.msra.mxu0 %v7406_v55 }
0x103e   : > { %7476 = vmatpush.msra.mxu0 %v7405_v6 }
0x1040   : > { %7477 = vmatpush.msra.mxu0 %v7404_v24 }
0x1042   : > { %7478 = vmatpush.msra.mxu0 %v7403_v26 }
0x1044   : > { %7479 = vmatpush.msra.mxu0 %v7402_v58 }
0x1046   : > { %7480 = vmatpush.msra.mxu0 %v7401_v61 }
0x1048   : > { %7481 = vmatpush.msra.mxu0 %v7400_v40  ;;  %v7522_v40 = vld [vmem:[%s14354_s22 + $0x18] sm:$0xff]  ;;  %s14361_s22 = sld [smem:[#allocation35_spill]] }
0x1049   : > { %7545 = vmatpush.msra.mxu2 %v7522_v40 }
0x104a   : > { %7482 = vmatpush.msra.mxu0 %v7399_v52 }
0x104c   : > { %7483 = vmatpush.msra.mxu0 %v7398_v14 }
0x10b0   : > { %v7216_v20 = vpop.f32.mrf.mxu0 }
0x10b1   : > { %v7217_v9 = vadd.f32 %v9724_v48, %v7216_v20 }
0x10b3   : > { %v7222_v60 = vmul.f32 0.01, %v7217_v9 }
0x10b5   : > { %v7224_v39 = vmax.f32 %v7217_v9, %v7222_v60 }
0x10b7   : > { %v7230_v16 = vrot.slane %v7224_v39, 7  ;;  %v8734_v42 = vrot.slane %v7224_v39, 11  ;;  %v13756_v39 = vsel %vm3181_vm13, %v7339_v2, %v9712_v59 }
0x10b8   : > { %v7219_v13 = vpop.f32.mrf.mxu0 }
0x10b9   : > { %v7239_v1 = vsel %vm1871_vm0, 0.0, %v8734_v42  ;;  %v7220_v41 = vadd.f32 %v9724_v48, %v7219_v13  ;;  %v7238_v4 = vsel %vm1871_vm0, 0.0, %v7230_v16  ;;  %v7397_v48 = vld [vmem:[%s14349_s2 + $0x90] sm:$0xff]  ;;  %v7396_v13 = vld [vmem:[%s14349_s2 + $0x88] sm:$0xff] }
0x10ba   : > { %v13670_v57 = vsel %vm7242_vm1, %v7239_v1, 0.0  ;;  %v13673_v25 = vsel %vm7242_vm1, %v7238_v4, 0.0  ;;  %7484 = vmatpush.msra.mxu0 %v7397_v48  ;;  %v7395_v1 = vld [vmem:[%s14349_s2 + $0x80] sm:$0xff]  ;;  %s14358_s2 = smov %s14357_s15  ;;  %v7520_v48 = vld [vmem:[%s14355_s1 + $0x8] sm:$0xff] }
0x10bb   : > { %v7223_v46 = vmul.f32 0.01, %v7220_v41  ;;  %7315 = vrot.lane.b32.xlu1 %v13670_v57, %s14329_s7  ;;  %7285 = vrot.lane.b32.xlu0 %v13673_v25, %s14328_s10  ;;  %v7269_v0 = vrot.slane %v13673_v25, 2  ;;  %v7270_v34 = vrot.slane %v13670_v57, 2  ;;  %v13695_v19 = vrot.slane %v13670_v57, 1 }
0x10bc   : > { %v7253_v38 = vrot.slane %v13673_v25, 1  ;;  %7485 = vmatpush.msra.mxu0 %v7396_v13 }
0x10bd   : > { %v7225_v37 = vmax.f32 %v7220_v41, %v7223_v46  ;;  %7303 = vrot.lane.b32.xlu2 %v7269_v0, %s14330_s23  ;;  %7423 = vst [vmem:[#allocation1 + $0x10] ss:$2 sm:$0xff] %v7270_v34 }
0x10be   : > { %7486 = vmatpush.msra.mxu0 %v7395_v1 }
0x10bf   : > { %v7232_v47 = vrot.slane %v7225_v37, 7  ;;  %v8735_v44 = vrot.slane %v7225_v37, 11 }
0x10c1   : > { %v7240_v45 = vsel %vm1871_vm0, 0.0, %v7232_v47  ;;  %v7241_v23 = vsel %vm1871_vm0, 0.0, %v8735_v44 }
0x10c2   : > { %v13685_v29 = vsel %vm7242_vm1, %v7240_v45, 0.0  ;;  %v13688_v30 = vsel %vm7242_vm1, %v7241_v23, 0.0 }
0x10c3   : > { %v7271_v5 = vrot.slane %v13685_v29, 2  ;;  %7287 = vrot.lane.b32.xlu1 %v13670_v57, %s14328_s10  ;;  %7305 = vrot.lane.b32.xlu0 %v7270_v34, %s14330_s23  ;;  %v7302_v27 = vrot.slane %v13688_v30, 2  ;;  %v13707_v22 = vrot.slane %v13685_v29, 1  ;;  %v7297_v12 = vrot.slane %v13688_v30, 1 }
0x10c5   : > { %7425 = vst [vmem:[#allocation1 + $0x11] ss:$2 sm:$0xff] %v7271_v5  ;;  %7327 = vrot.lane.b32.xlu2 %v13695_v19, %s14328_s10 }
0x10c6   : > { %7431 = vst [vmem:[#allocation1 + $0x30] ss:$2 sm:$0xff] %v7302_v27 }
0x10cb   : > { %7276 = vrot.lane.b32.xlu0 %v7270_v34, %s14329_s7  ;;  %7258 = vrot.lane.b32.xlu1 %v7253_v38, %s14330_s23 }
0x10cc   : > { %v7436_v53 = vld.sshfl [vmem:[#allocation1 + $0x10] sm:$0xff pattern:$0x75316420] }
0x10cd   : > { %8736 = vmatmul.msk.f32.vlgmr.msra.gmra.mxu1 %vm2706_vm11, %v7436_v53  ;;  %7274 = vrot.lane.b32.xlu2 %v7269_v0, %s14329_s7  ;;  %v7439_v62 = vld.sshfl [vmem:[#allocation1 + $0x30] sm:$0xff pattern:$0x75316420] }
0x10ce   : > { %7931 = vst [vmem:[#allocation1 + $0x31] ss:$2 sm:$0xff] %v13649_v51 }
0x10d3   : > { %7329 = vrot.lane.b32.xlu0 %v13707_v22, %s14328_s10  ;;  %7319 = vrot.lane.b32.xlu1 %v13688_v30, %s14329_s7 }
0x10d5   : > { %7260 = vrot.lane.b32.xlu2 %v13695_v19, %s14330_s23  ;;  %8737 = vmatmul.msk.f32.gmra.mxu1 %vm2706_vm11, %v7439_v62 }
0x10db   : > { %7309 = vrot.lane.b32.xlu0 %v7302_v27, %s14330_s23  ;;  %7331 = vrot.lane.b32.xlu1 %v7297_v12, %s14328_s10 }
0x10dd   : > { %7317 = vrot.lane.b32.xlu2 %v13685_v29, %s14329_s7 }
0x10e3   : > { %7262 = vrot.lane.b32.xlu0 %v13707_v22, %s14330_s23  ;;  %7278 = vrot.lane.b32.xlu1 %v7271_v5, %s14329_s7 }
0x10e5   : > { %7307 = vrot.lane.b32.xlu2 %v7271_v5, %s14330_s23 }
0x10eb   : > { %7291 = vrot.lane.b32.xlu0 %v13688_v30, %s14328_s10 }
0x10ed   : > { %7289 = vrot.lane.b32.xlu2 %v13685_v29, %s14328_s10 }
0x1117   : > { %v7304_v3 = vpop.permute.xlu2 %7303 }
0x1118   : > { %v7351_v7 = vsel %vm2706_vm11, %v7253_v38, %v7304_v3 }
0x111f   : > { %v7328_v28 = vpop.permute.xlu2 %7327 }
0x1127   : > { %v7275_v17 = vpop.permute.xlu2 %7274 }
0x112d   : > { %v7316_v43 = vpop.permute.xlu1 %7315  ;;  %v7286_v54 = vpop.permute.xlu0 %7285 }
0x112e   : > { %v7355_v8 = vsel %vm3181_vm13, %v7351_v7, %v7316_v43  ;;  %v7347_v16 = vsel %vm3190_vm14, %v13756_v39, %v7286_v54 }
0x112f   : > { %v7359_v20 = vsel %vm3190_vm14, %v7355_v8, %v7328_v28  ;;  %v7261_v9 = vpop.permute.xlu2 %7260 }
0x1130   : > { %v7371_v60 = vrot.slane %v7359_v20, 4  ;;  %v7341_v11 = vsel %vm2706_vm11, %v13670_v57, %v7261_v9  ;;  %v9713_v57 = vunpack.i.h.bf16 %v13742_v18  ;;  %v7519_v20 = vld [vmem:[%s14355_s1] sm:$0xff] }
0x1131   : > { %v9725_v9 = vld [vmem:[%s14356_s16] ss:$0 sm:$0xff]  ;;  %s14363_s16 = sld [smem:[#allocation33_spill]] }
0x1132   : > { %v7375_v42 = vsel %vm2777_vm3, %v7347_v16, %v7371_v60  ;;  %v7604_v60 = vld [vmem:[%s14357_s15 + $0x18] sm:$0xff]  ;;  %v7603_v16 = vld [vmem:[%s14358_s2 + $0x10] sm:$0xff]  ;;  %s14364_s15 = sld [smem:[#allocation31_spill]] }
0x1133   : > { %7419 = vst [vmem:[#allocation1] ss:$2 sm:$0xff] %v7375_v42  ;;  %7627 = vmatpush.msrb.mxu0 %v7604_v60  ;;  %v7602_v42 = vld [vmem:[%s14358_s2 + $0x8] sm:$0xff] }
0x1135   : > { %v7288_v41 = vpop.permute.xlu1 %7287  ;;  %v7306_v4 = vpop.permute.xlu0 %7305  ;;  %7628 = vmatpush.msrb.mxu0 %v7603_v16 }
0x1136   : > { %v7352_v37 = vsel %vm2706_vm11, %v13695_v19, %v7306_v4 }
0x1137   : > { %v7318_v46 = vpop.permute.xlu2 %7317  ;;  %7629 = vmatpush.msrb.mxu0 %v7602_v42 }
0x1138   : > { %v7356_v45 = vsel %vm3181_vm13, %v7352_v37, %v7318_v46 }
0x113d   : > { %v7277_v0 = vpop.permute.xlu0 %7276  ;;  %v7259_v34 = vpop.permute.xlu1 %7258 }
0x113e   : > { %v7340_v47 = vsel %vm2706_vm11, %v13673_v25, %v7259_v34  ;;  %v7345_v6 = vsel %vm3181_vm13, %v7341_v11, %v7277_v0 }
0x113f   : > { %v7308_v44 = vpop.permute.xlu2 %7307  ;;  %v7344_v23 = vsel %vm3181_vm13, %v7340_v47, %v7275_v17 }
0x1140   : > { %v7348_v62 = vsel %vm3190_vm14, %v7344_v23, %v7288_v41  ;;  %v7353_v19 = vsel %vm2706_vm11, %v13707_v22, %v7308_v44  ;;  %v7601_v41 = vld [vmem:[%s14358_s2] sm:$0xff]  ;;  %s14362_s2 = smov %s14361_s22 }
0x1141   : > { %7630 = vmatpush.msrb.mxu0 %v7601_v41 }
0x1145   : > { %v7330_v5 = vpop.permute.xlu0 %7329  ;;  %v7320_v27 = vpop.permute.xlu1 %7319 }
0x1146   : > { %v7360_v38 = vsel %vm3190_vm14, %v7356_v45, %v7330_v5  ;;  %v7357_v25 = vsel %vm3181_vm13, %v7353_v19, %v7320_v27 }
0x1147   : > { %v7372_v53 = vrot.slane %v7360_v38, 4  ;;  %v7290_v56 = vpop.permute.xlu2 %7289 }
0x1148   : > { %v7349_v24 = vsel %vm3190_vm14, %v7345_v6, %v7290_v56 }
0x1149   : > { %v7376_v50 = vsel %vm2777_vm3, %v7348_v62, %v7372_v53  ;;  %v9726_v53 = vld [vmem:[#allocation6] ss:$0 sm:$0xff] }
0x114a   : > { %7421 = vst [vmem:[#allocation1 + $0x1] ss:$2 sm:$0xff] %v7376_v50  ;;  %v7511_v46 = vpop.f32.mrf.mxu1 }
0x114d   : > { %v7310_v35 = vpop.permute.xlu0 %7309  ;;  %v7332_v3 = vpop.permute.xlu1 %7331 }
0x114e   : > { %v7361_v55 = vsel %vm3190_vm14, %v7357_v25, %v7332_v3  ;;  %v7354_v63 = vsel %vm2706_vm11, %v7297_v12, %v7310_v35 }
0x114f   : > { %v7373_v28 = vrot.slane %v7361_v55, 4  ;;  %v7358_v17 = vsel %vm3181_vm13, %v7354_v63, %v9713_v57 }
0x1150   : > { %v7362_v52 = vsel %vm3190_vm14, %v7358_v17, %v13731_v33 }
0x1151   : > { %v7377_v26 = vsel %vm2777_vm3, %v7349_v24, %v7373_v28  ;;  %v7434_v58 = vld.sshfl [vmem:[#allocation1] sm:$0xff pattern:$0x75316420]  ;;  %v7435_v22 = vld.sshfl [vmem:[#allocation1 + $0x8] sm:$0xff pattern:$0x75316420] }
0x1152   : > { %7427 = vst [vmem:[#allocation1 + $0x20] ss:$2 sm:$0xff] %v7377_v26  ;;  %7464 = vmatmul.f32.vlgmr.msra.gmra.mxu3 %v7434_v58  ;;  %7487 = vmatmul.f32.vlgmr.msra.gmra.mxu0 %v7435_v22  ;;  %v7374_v12 = vrot.slane %v7362_v52, 4  ;;  %v7514_v45 = vpop.f32.mrf.mxu1  ;;  %v7654_v28 = vld [vmem:[%s14359_s18 + $0x18] sm:$0xff]  ;;  %v9727_v52 = vld [vmem:[#allocation7] ss:$0 sm:$0xff] }
0x1153   : > { %7671 = vmatpush.msrb.mxu1 %v7654_v28  ;;  %v7911_v28 = vld [vmem:[%s10387_s21 + $0x110] sm:$0xff] }
0x1155   : > { %v7263_v61 = vpop.permute.xlu0 %7262  ;;  %v7279_v30 = vpop.permute.xlu1 %7278 }
0x1156   : > { %v7342_v59 = vsel %vm2706_vm11, %v13685_v29, %v7263_v61  ;;  %v7521_v29 = vld [vmem:[%s14355_s1 + $0x10] sm:$0xff]  ;;  %s14360_s1 = smov %s14359_s18  ;;  %v7696_v61 = vld [vmem:[%s14361_s22 + $0x18] sm:$0xff]  ;;  %s14365_s18 = sld [smem:[#allocation32_spill]] }
0x1157   : > { %v7346_v14 = vsel %vm3181_vm13, %v7342_v59, %v7279_v30  ;;  %7546 = vmatpush.msra.mxu2 %v7521_v29  ;;  %v7653_v24 = vld [vmem:[%s14360_s1 + $0x10] sm:$0xff]  ;;  %v7652_v63 = vld [vmem:[%s14360_s1 + $0x8] sm:$0xff]  ;;  %v7651_v40 = vld [vmem:[%s14360_s1] sm:$0xff]  ;;  %s14366_s22 = smov 16  }
0x1158   : > { %7672 = vmatpush.msrb.mxu1 %v7653_v24 }
0x1159   : > { %7547 = vmatpush.msra.mxu2 %v7520_v48 }
0x115a   : > { %7673 = vmatpush.msrb.mxu1 %v7652_v63 }
0x115b   : > { %7548 = vmatpush.msra.mxu2 %v7519_v20 }
0x115c   : > { %7674 = vmatpush.msrb.mxu1 %v7651_v40 }
0x115d   : > { %v7292_v7 = vpop.permute.xlu0 %7291  ;;  %7713 = vmatpush.msrb.mxu2 %v7696_v61 }
0x115e   : > { %v7350_v2 = vsel %vm3190_vm14, %v7346_v14, %v7292_v7 }
0x115f   : > { %v7378_v43 = vsel %vm2777_vm3, %v7350_v2, %v7374_v12 }
0x1160   : > { %7429 = vst [vmem:[#allocation1 + $0x21] ss:$2 sm:$0xff] %v7378_v43 }
0x1167   : > { %v7437_v54 = vld.sshfl [vmem:[#allocation1 + $0x20] sm:$0xff pattern:$0x75316420]  ;;  %v7438_v8 = vld.sshfl [vmem:[#allocation1 + $0x28] sm:$0xff pattern:$0x75316420] }
0x1168   : > { %7467 = vmatmul.f32.gmra.mxu3 %v7437_v54  ;;  %7490 = vmatmul.f32.gmra.mxu0 %v7438_v8 }
0x1170   : > { %8740 = vmatmul.msk.f32.vlgmr.msrb.gmra.mxu3 %vm2706_vm11, %v13635_v49 }
0x1178   : > { %8741 = vmatmul.msk.f32.gmra.mxu3 %vm2706_vm11, %v13640_v10 }
0x11cf   : > { %v7488_v49 = vpop.f32.mrf.mxu0 }
0x11d5   : > { %v7465_v13 = vpop.f32.mrf.mxu3 }
0x11d6   : > { %v7466_v1 = vadd.f32 %v9725_v9, %v7465_v13 }
0x11d8   : > { %v7489_v4 = vadd.f32 %v7488_v49, %v7466_v1 }
0x11da   : > { %v7512_v10 = vadd.f32 %v7511_v46, %v7489_v4 }
0x11dc   : > { %v7517_v0 = vmul.f32 %v7512_v10, %v7512_v10 }
0x11de   : > { %8738 = vmatmul.msk.f32.vlgmr.msra.gmra.mxu2 %vm2706_vm11, %v7517_v0  ;;  %v7694_v0 = vld [vmem:[%s14362_s2 + $0x8] sm:$0xff] }
0x11e5   : > { %v7491_v47 = vpop.f32.mrf.mxu0 }
0x11eb   : > { %v7468_v34 = vpop.f32.mrf.mxu3 }
0x11ec   : > { %v7469_v37 = vadd.f32 %v9725_v9, %v7468_v34  ;;  %v7693_v34 = vld [vmem:[%s14362_s2] sm:$0xff] }
0x11ee   : > { %v7492_v44 = vadd.f32 %v7491_v47, %v7469_v37  ;;  %v7650_v37 = vld [vmem:[%s14363_s16] sm:$0x7]  ;;  %s10101_s16 = smov 48  }
0x11ef   : > { %v7679_v47 = vmul.f32 %v7650_v37, %v12283_v32 }
0x11f0   : > { %v7515_v23 = vadd.f32 %v7514_v45, %v7492_v44  ;;  %v7655_v44 = vmul.f32 %v7650_v37, %v12285_v31  ;;  %v7684_v45 = vmul.f32 %v7650_v37, %v12287_v15 }
0x11f2   : > { %v7518_v5 = vmul.f32 %v7515_v23, %v7515_v23 }
0x11f3   : > { %v7595_v27 = vpop.f32.mrf.mxu3 }
0x11f4   : > { %8739 = vmatmul.msk.f32.gmra.mxu2 %vm2706_vm11, %v7518_v5  ;;  %8742 = vmatmul.msk.f32.vlgmr.msrb.gmra.mxu0 %vm2706_vm11, %v7595_v27 }
0x11fb   : > { %v7598_v38 = vpop.f32.mrf.mxu3 }
0x11fc   : > { %8743 = vmatmul.msk.f32.gmra.mxu0 %vm2706_vm11, %v7598_v38  ;;  %v7686_v38 = vrot.slane %v7684_v45, 2 }
0x1261   : > { %v7550_v62 = vpop.f32.mrf.mxu2 }
0x1262   : > { %v7551_v50 = vadd.f32 %v9726_v53, %v7550_v62  ;;  %v7689_v62 = vld [vmem:[%s14364_s15] sm:$0x1]  ;;  %s10102_s15 = smov 80  }
0x1264   : > { %9755 = vrsqrt.f32 %v7551_v50  ;;  %vm7562_vm15 = vweird.f32 %v7551_v50 }
0x126a   : > { %v9756_v19 = vpop.eup %9755 }
0x126b   : > { %v7557_v56 = vmul.f32 %v9756_v19, %v7551_v50  ;;  %vm7563_vm2 = vweird.f32 %v9756_v19 }
0x126c   : > { %vm7564_vm4 = vmor %vm7562_vm15, %vm7563_vm2  ;;  %vm8161_vm15 = vcmask 916480  }
0x126d   : > { %v7558_v25 = vmul.f32 %v9756_v19, %v7557_v56 }
0x126f   : > { %v7559_v11 = vmul.f32 0.5, %v7558_v25 }
0x1271   : > { %v7560_v55 = vsub.f32 1.5, %v7559_v11  ;;  %v7632_v6 = vpop.f32.mrf.mxu0 }
0x1272   : > { %v7633_v2 = vadd.f32 %v9727_v52, %v7632_v6  ;;  %v7912_v6 = vld [vmem:[%s10387_s21 + $0x118] sm:$0xff] }
0x1273   : > { %v7561_v58 = vmul.f32 %v9756_v19, %v7560_v55  ;;  %8004 = vmatpush.msra.mxu1 %v7912_v6  ;;  %v7903_v6 = vld [vmem:[%s10387_s21 + $0xd0] sm:$0xff] }
0x1275   : > { %v7565_v59 = vsel %vm7564_vm4, %v9756_v19, %v7561_v58  ;;  %v7910_v58 = vld [vmem:[%s10387_s21 + $0x108] sm:$0xff]  ;;  %8005 = vmatpush.msra.mxu1 %v7911_v28 }
0x1276   : > { %v7576_v7 = vmul.f32 %v7565_v59, %v7512_v10  ;;  %v7695_v10 = vld [vmem:[%s14362_s2 + $0x10] sm:$0xff]  ;;  %v7886_v28 = vld [vmem:[%s10387_s21 + $0x48] sm:$0xff]  ;;  %s8766_s2 = sshll.u32 %s10425_s0, 4 }
0x1277   : > { %v7553_v35 = vpop.f32.mrf.mxu2  ;;  %7714 = vmatpush.msrb.mxu2 %v7695_v10  ;;  %8006 = vmatpush.msra.mxu1 %v7910_v58 }
0x1278   : > { %v7554_v3 = vadd.f32 %v9726_v53, %v7553_v35  ;;  %v13817_v29 = vadd.f32 %v7633_v2, %v7576_v7  ;;  %v7697_v35 = vld [vmem:[%s14365_s18] sm:$0x1]  ;;  %s10103_s18 = smov 112  }
0x1279   : > { %v7635_v14 = vpop.f32.mrf.mxu0  ;;  %7715 = vmatpush.msrb.mxu2 %v7694_v0 }
0x127a   : > { %9757 = vrsqrt.f32 %v7554_v3  ;;  %vm7572_vm6 = vweird.f32 %v7554_v3  ;;  %v7636_v54 = vadd.f32 %v9727_v52, %v7635_v14  ;;  %v7640_v9 = vsel %vm2706_vm11, %v13817_v29, 0.0 }
0x127b   : > { %7716 = vmatpush.msrb.mxu2 %v7693_v34 }
0x1280   : > { %v9758_v26 = vpop.eup %9757 }
0x1281   : > { %v7567_v22 = vmul.f32 %v9758_v26, %v7554_v3  ;;  %vm7573_vm5 = vweird.f32 %v9758_v26 }
0x1282   : > { %vm7574_vm8 = vmor %vm7572_vm6, %vm7573_vm5 }
0x1283   : > { %v7568_v17 = vmul.f32 %v9758_v26, %v7567_v22  ;;  %v7909_v22 = vld [vmem:[%s10387_s21 + $0x100] sm:$0xff] }
0x1284   : > { %8007 = vmatpush.msra.mxu1 %v7909_v22 }
0x1285   : > { %v7569_v30 = vmul.f32 0.5, %v7568_v17 }
0x1287   : > { %v7570_v12 = vsub.f32 1.5, %v7569_v30 }
0x1289   : > { %v7571_v43 = vmul.f32 %v9758_v26, %v7570_v12 }
0x128b   : > { %v7575_v8 = vsel %vm7574_vm8, %v9758_v26, %v7571_v43 }
0x128c   : > { %v7577_v48 = vmul.f32 %v7575_v8, %v7515_v23  ;;  %v7681_v23 = vrot.slane %v7679_v47, 1 }
0x128e   : > { %v13819_v20 = vadd.f32 %v7636_v54, %v7577_v48 }
0x1290   : > { %v7641_v60 = vsel %vm2706_vm11, %v13819_v20, 0.0 }
0x1291   : > { %v7642_v16 = vadd.f32 %v7641_v60, %v7640_v9 }
0x1293   : > { %v7643_v42 = vrot.slane %v7642_v16, 4 }
0x1295   : > { %v7644_v13 = vadd.f32 %v7643_v42, %v7642_v16 }
0x1297   : > { %v7645_v1 = vrot.slane %v7644_v13, 2 }
0x1299   : > { %v7646_v41 = vadd.f32 %v7645_v1, %v7644_v13 }
0x129b   : > { %v7647_v49 = vrot.slane %v7646_v41, 1 }
0x129d   : > { %v7648_v4 = vadd.f32 %v7647_v49, %v7646_v41 }
0x129f   : > { %v7649_v46 = vmul.f32 0.0625, %v7648_v4 }
0x12a1   : > { %8744 = vmatmul.msk.f32.vlgmr.msrb.gmra.mxu1 %vm2706_vm11, %v7649_v46 }
0x131e   : > { %v7676_v5 = vpop.f32.mrf.mxu1 }
0x131f   : > { %v7677_v27 = vadd.f32 %v7676_v5, %v7655_v44  ;;  %v7892_v5 = vld [vmem:[%s10387_s21 + $0x78] sm:$0xff] }
0x1320   : > { %7946 = vmatpush.msra.mxu3 %v7892_v5 }
0x1321   : > { %v7683_v53 = vadd.f32 %v7681_v23, %v7677_v27  ;;  %v7908_v27 = vld [vmem:[%s10387_s21 + $0xf8] sm:$0xff] }
0x1322   : > { %7969 = vmatpush.msra.mxu0 %v7908_v27 }
0x1323   : > { %v7688_v50 = vadd.f32 %v7686_v38, %v7683_v53  ;;  %v7891_v38 = vld [vmem:[%s10387_s21 + $0x70] sm:$0xff] }
0x1324   : > { %v7907_v53 = vld [vmem:[%s10387_s21 + $0xf0] sm:$0xff]  ;;  %7947 = vmatpush.msra.mxu3 %v7891_v38 }
0x1325   : > { %v7690_v19 = vadd.f32 %v7689_v62, %v7688_v50  ;;  %7970 = vmatpush.msra.mxu0 %v7907_v53  ;;  %v7890_v50 = vld [vmem:[%s10387_s21 + $0x68] sm:$0xff] }
0x1326   : > { %7948 = vmatpush.msra.mxu3 %v7890_v50  ;;  %v8270_v50 = vld [vmem:[%s10397_s12 + $0x18] sm:$0xff] }
0x1327   : > { %v7691_v56 = vmul.f32 0.01, %v7690_v19 }
0x1329   : > { %v7692_v25 = vmax.f32 %v7690_v19, %v7691_v56  ;;  %v7906_v19 = vld [vmem:[%s10387_s21 + $0xe8] sm:$0xff]  ;;  %v7889_v56 = vld [vmem:[%s10387_s21 + $0x60] sm:$0xff] }
0x132a   : > { %7971 = vmatpush.msra.mxu0 %v7906_v19  ;;  %7949 = vmatpush.msra.mxu3 %v7889_v56  ;;  %v8269_v19 = vld [vmem:[%s10397_s12 + $0x10] sm:$0xff] }
0x132b   : > { %8745 = vmatmul.msk.f32.vlgmr.msrb.gmra.mxu2 %vm2706_vm11, %v7692_v25  ;;  %v7905_v25 = vld [vmem:[%s10387_s21 + $0xe0] sm:$0xff] }
0x132c   : > { %7972 = vmatpush.msra.mxu0 %v7905_v25 }
0x13ae   : > { %v7718_v3 = vpop.f32.mrf.mxu2 }
0x13af   : > { %v7719_v11 = vadd.f32 %v7718_v3, %v7697_v35  ;;  %v7888_v35 = vld [vmem:[%s10387_s21 + $0x58] sm:$0xff] }
0x13b0   : > { %v7904_v3 = vld [vmem:[%s10387_s21 + $0xd8] sm:$0xff]  ;;  %7950 = vmatpush.msra.mxu3 %v7888_v35  ;;  %v8268_v35 = vld [vmem:[%s10397_s12 + $0x8] sm:$0xff] }
0x13b1   : > { %v8746_v55 = vmul.f32 -1.442695, %v7719_v11  ;;  %v7887_v11 = vld [vmem:[%s10387_s21 + $0x50] sm:$0xff]  ;;  %7973 = vmatpush.msra.mxu0 %v7904_v3 }
0x13b2   : > { %7951 = vmatpush.msra.mxu3 %v7887_v11 }
0x13b3   : > { %9759 = vpow2.f32 %v8746_v55  ;;  %7974 = vmatpush.msra.mxu0 %v7903_v6  ;;  %v8267_v6 = vld [vmem:[%s10397_s12] sm:$0xff] }
0x13b4   : > { %7952 = vmatpush.msra.mxu3 %v7886_v28 }
0x13b9   : > { %v9760_v24 = vpop.eup %9759 }
0x13ba   : > { %v7724_v26 = vadd.f32 1.0, %v9760_v24  ;;  %v7902_v24 = vld [vmem:[%s10387_s21 + $0xc8] sm:$0xff] }
0x13bb   : > { %7975 = vmatpush.msra.mxu0 %v7902_v24 }
0x13bc   : > { %9761 = vrcp.f32 %v7724_v26  ;;  %v7736_v40 = vand.u32 2147483648, %v7724_v26  ;;  %v7734_v59 = vand.u32 2147483647, %v7724_v26  ;;  %vm7730_vm10 = vweird.f32 %v7724_v26 }
0x13be   : > { %v7737_v12 = vor.u32 1.1754944e-38, %v7736_v40  ;;  %vm7735_vm2 = vcmp.eq.f32.partialorder %v7734_v59, 8.507059e+37  ;;  %v7900_v40 = vld [vmem:[%s10387_s21 + $0xb8] sm:$0xff]  ;;  %v7899_v59 = vld [vmem:[%s10387_s21 + $0xb0] sm:$0xff] }
0x13c2   : > { %v9762_v63 = vpop.eup %9761 }
0x13c3   : > { %v7726_v61 = vmul.f32 %v9762_v63, %v7724_v26  ;;  %vm7731_vm9 = vweird.f32 %v9762_v63  ;;  %v7885_v26 = vld [vmem:[%s10387_s21 + $0x40] sm:$0xff] }
0x13c4   : > { %vm7732_vm12 = vmor %vm7730_vm10, %vm7731_vm9  ;;  %7953 = vmatpush.msra.mxu3 %v7885_v26 }
0x13c5   : > { %v7727_v17 = vsub.f32 1.0, %v7726_v61 }
0x13c7   : > { %v7728_v52 = vmul.f32 %v9762_v63, %v7727_v17  ;;  %v7884_v17 = vld [vmem:[%s10387_s21 + $0x38] sm:$0xff] }
0x13c8   : > { %7954 = vmatpush.msra.mxu3 %v7884_v17 }
0x13c9   : > { %v7729_v30 = vadd.f32 %v9762_v63, %v7728_v52  ;;  %v7883_v52 = vld [vmem:[%s10387_s21 + $0x30] sm:$0xff] }
0x13ca   : > { %7955 = vmatpush.msra.mxu3 %v7883_v52 }
0x13cb   : > { %v7733_v14 = vsel %vm7732_vm12, %v9762_v63, %v7729_v30  ;;  %v7901_v63 = vld [vmem:[%s10387_s21 + $0xc0] sm:$0xff]  ;;  %v7882_v30 = vld [vmem:[%s10387_s21 + $0x28] sm:$0xff] }
0x13cc   : > { %v7738_v7 = vsel %vm7735_vm2, %v7737_v12, %v7733_v14  ;;  %7976 = vmatpush.msra.mxu0 %v7901_v63  ;;  %v7898_v12 = vld [vmem:[%s10387_s21 + $0xa8] sm:$0xff]  ;;  %v7881_v14 = vld [vmem:[%s10387_s21 + $0x20] sm:$0xff]  ;;  %7956 = vmatpush.msra.mxu3 %v7882_v30 }
0x13cd   : > { %v7740_v2 = vperm.slane %v7738_v7, 0  ;;  %v7897_v7 = vld [vmem:[%s10387_s21 + $0xa0] sm:$0xff] }
0x13ce   : > { %7977 = vmatpush.msra.mxu0 %v7900_v40  ;;  %7957 = vmatpush.msra.mxu3 %v7881_v14 }
0x13cf   : > { %v13841_v43 = vmul.f32 %v7740_v2, %v13819_v20  ;;  %v13844_v54 = vmul.f32 %v7740_v2, %v13817_v29 }
0x13d0   : > { %7978 = vmatpush.msra.mxu0 %v7899_v59 }
0x13d1   : > { %v7749_v8 = vrot.slane %v13841_v43, 7  ;;  %v8747_v48 = vrot.slane %v13844_v54, 11  ;;  %v8748_v9 = vrot.slane %v13841_v43, 11  ;;  %v7747_v42 = vrot.slane %v13844_v54, 7 }
0x13d2   : > { %7979 = vmatpush.msra.mxu0 %v7898_v12 }
0x13d3   : > { %v7757_v60 = vsel %vm1871_vm0, 0.0, %v7749_v8  ;;  %v7756_v16 = vsel %vm1871_vm0, 0.0, %v8747_v48  ;;  %v7758_v13 = vsel %vm1871_vm0, 0.0, %v8748_v9  ;;  %v7755_v46 = vsel %vm1871_vm0, 0.0, %v7747_v42  ;;  %v7880_v48 = vld [vmem:[%s10387_s21 + $0x18] sm:$0xff]  ;;  %v7895_v42 = vld [vmem:[%s10387_s21 + $0x90] sm:$0xff] }
0x13d4   : > { %v13854_v20 = vsel %vm7242_vm1, %v7757_v60, 0.0  ;;  %v13857_v29 = vsel %vm7242_vm1, %v7756_v16, 0.0  ;;  %v13860_v1 = vsel %vm7242_vm1, %v7758_v13, 0.0  ;;  %v13872_v10 = vsel %vm7242_vm1, %v7755_v46, 0.0  ;;  %v7896_v9 = vld [vmem:[%s10387_s21 + $0x98] sm:$0xff]  ;;  %7980 = vmatpush.msra.mxu0 %v7897_v7  ;;  %v7879_v16 = vld [vmem:[%s10387_s21 + $0x10] sm:$0xff]  ;;  %7958 = vmatpush.msra.mxu3 %v7880_v48 }
0x13d5   : > { %7823 = vrot.lane.b32.xlu1 %v13854_v20, %s14329_s7  ;;  %v7780_v41 = vrot.slane %v13854_v20, 2  ;;  %7821 = vrot.lane.b32.xlu0 %v13857_v29, %s14329_s7  ;;  %v7779_v49 = vrot.slane %v13857_v29, 2  ;;  %v7808_v4 = vrot.slane %v13860_v1, 2  ;;  %v7766_v0 = vrot.slane %v13872_v10, 1  ;;  %v7878_v13 = vld [vmem:[%s10387_s21 + $0x8] sm:$0xff] }
0x13d6   : > { %v13884_v37 = vrot.slane %v13857_v29, 1  ;;  %v7778_v47 = vrot.slane %v13872_v10, 2  ;;  %v13897_v45 = vrot.slane %v13854_v20, 1  ;;  %v7803_v23 = vrot.slane %v13860_v1, 1  ;;  %7981 = vmatpush.msra.mxu0 %v7896_v9  ;;  %7959 = vmatpush.msra.mxu3 %v7879_v16 }
0x13d7   : > { %7923 = vst [vmem:[#allocation1 + $0x11] ss:$2 sm:$0xff] %v7780_v41  ;;  %7811 = vrot.lane.b32.xlu2 %v7779_v49, %s14330_s23 }
0x13d8   : > { %7921 = vst [vmem:[#allocation1 + $0x10] ss:$2 sm:$0xff] %v7779_v49  ;;  %7982 = vmatpush.msra.mxu0 %v7895_v42  ;;  %7960 = vmatpush.msra.mxu3 %v7878_v13 }
0x13d9   : > { %7929 = vst [vmem:[#allocation1 + $0x30] ss:$2 sm:$0xff] %v7808_v4 }
0x13dd   : > { %7793 = vrot.lane.b32.xlu1 %v13857_v29, %s14328_s10  ;;  %7791 = vrot.lane.b32.xlu0 %v13872_v10, %s14328_s10 }
0x13df   : > { %v7934_v34 = vld.sshfl [vmem:[#allocation1 + $0x10] sm:$0xff pattern:$0x75316420]  ;;  %7769 = vrot.lane.b32.xlu2 %v7766_v0, %s14330_s23 }
0x13e0   : > { %8749 = vmatmul.msk.f32.vlgmr.msra.gmra.mxu1 %vm2706_vm11, %v7934_v34  ;;  %v7937_v44 = vld.sshfl [vmem:[#allocation1 + $0x30] sm:$0xff pattern:$0x75316420] }
0x13e5   : > { %7825 = vrot.lane.b32.xlu1 %v13860_v1, %s14329_s7  ;;  %7830 = vrot.lane.b32.xlu0 %v13884_v37, %s14328_s10 }
0x13e7   : > { %7781 = vrot.lane.b32.xlu2 %v7778_v47, %s14329_s7 }
0x13e8   : > { %8750 = vmatmul.msk.f32.gmra.mxu1 %vm2706_vm11, %v7937_v44 }
0x13ed   : > { %7815 = vrot.lane.b32.xlu0 %v7808_v4, %s14330_s23  ;;  %7809 = vrot.lane.b32.xlu1 %v7778_v47, %s14330_s23  ;;  %v7893_v4 = vld [vmem:[%s10387_s21 + $0x80] sm:$0xff] }
0x13ef   : > { %7813 = vrot.lane.b32.xlu2 %v7780_v41, %s14330_s23 }
0x13f5   : > { %7773 = vrot.lane.b32.xlu0 %v13897_v45, %s14330_s23  ;;  %7832 = vrot.lane.b32.xlu1 %v13897_v45, %s14328_s10 }
0x13f7   : > { %7771 = vrot.lane.b32.xlu2 %v13884_v37, %s14330_s23 }
0x13fd   : > { %7785 = vrot.lane.b32.xlu0 %v7780_v41, %s14329_s7  ;;  %7834 = vrot.lane.b32.xlu1 %v7803_v23, %s14328_s10  ;;  %v7894_v41 = vld [vmem:[%s10387_s21 + $0x88] sm:$0xff] }
0x13fe   : > { %7983 = vmatpush.msra.mxu0 %v7894_v41 }
0x13ff   : > { %7783 = vrot.lane.b32.xlu2 %v7779_v49, %s14329_s7  ;;  %v7877_v49 = vld [vmem:[%s10387_s21] sm:$0xff] }
0x1400   : > { %7961 = vmatpush.msra.mxu3 %v7877_v49  ;;  %7984 = vmatpush.msra.mxu0 %v7893_v4 }
0x1402   : > { %8291 = vmatpush.msrb.mxu3 %v8270_v50 }
0x1404   : > { %8292 = vmatpush.msrb.mxu3 %v8269_v19 }
0x1405   : > { %7795 = vrot.lane.b32.xlu1 %v13854_v20, %s14328_s10  ;;  %8045 = vrot.lane.b32.xlu0 %v13652_v36, %s14366_s22 }
0x1406   : > { %8293 = vmatpush.msrb.mxu3 %v8268_v35 }
0x1407   : > { %7797 = vrot.lane.b32.xlu2 %v13860_v1, %s14328_s10 }
0x1408   : > { %8294 = vmatpush.msrb.mxu3 %v8267_v6 }
0x140f   : > { %8060 = vrot.lane.b32.xlu2 %v13649_v51, %s14330_s23 }
0x1431   : > { %v13923_v62 = vpop.permute.xlu2 %7811 }
0x1432   : > { %v7850_v11 = vsel %vm2706_vm11, %v13884_v37, %v13923_v62 }
0x1439   : > { %v13932_v55 = vpop.permute.xlu2 %7769 }
0x1441   : > { %v13941_v61 = vpop.permute.xlu2 %7781 }
0x1447   : > { %v13938_v58 = vpop.permute.xlu1 %7823  ;;  %v7822_v22 = vpop.permute.xlu0 %7821 }
0x1448   : > { %v7854_v28 = vsel %vm3181_vm13, %v7850_v11, %v13938_v58 }
0x1449   : > { %v7814_v60 = vpop.permute.xlu2 %7813 }
0x144a   : > { %v7851_v18 = vsel %vm2706_vm11, %v13897_v45, %v7814_v60 }
0x144f   : > { %v7794_v2 = vpop.permute.xlu1 %7793  ;;  %v7792_v8 = vpop.permute.xlu0 %7791 }
0x1450   : > { %v7845_v25 = vsel %vm3190_vm14, %v13756_v39, %v7792_v8 }
0x1451   : > { %v7772_v47 = vpop.permute.xlu2 %7771 }
0x1452   : > { %v7840_v7 = vsel %vm2706_vm11, %v13857_v29, %v7772_v47  ;;  %v9728_v29 = vld [vmem:[#allocation9] ss:$0 sm:$0xff] }
0x1457   : > { %v7826_v46 = vpop.permute.xlu1 %7825  ;;  %v7831_v34 = vpop.permute.xlu0 %7830 }
0x1458   : > { %v7855_v12 = vsel %vm3181_vm13, %v7851_v18, %v7826_v46 }
0x145d   : > { %v8009_v4 = vpop.f32.mrf.mxu1 }
0x145f   : > { %v7816_v44 = vpop.permute.xlu0 %7815  ;;  %v7810_v5 = vpop.permute.xlu1 %7809 }
0x1460   : > { %v7849_v27 = vsel %vm2706_vm11, %v7766_v0, %v7810_v5  ;;  %v7784_v0 = vpop.permute.xlu2 %7783  ;;  %v7852_v24 = vsel %vm2706_vm11, %v7803_v23, %v7816_v44 }
0x1461   : > { %v7853_v38 = vsel %vm3181_vm13, %v7849_v27, %v7822_v22  ;;  %v7839_v22 = vsel %vm2706_vm11, %v13872_v10, %v13932_v55  ;;  %v7856_v1 = vsel %vm3181_vm13, %v7852_v24, %v9713_v57 }
0x1462   : > { %v7857_v53 = vsel %vm3190_vm14, %v7853_v38, %v7831_v34  ;;  %v7842_v37 = vsel %vm3181_vm13, %v7839_v22, %v13941_v61  ;;  %v7860_v17 = vsel %vm3190_vm14, %v7856_v1, %v13731_v33 }
0x1463   : > { %v7869_v56 = vrot.slane %v7857_v53, 4  ;;  %v7846_v58 = vsel %vm3190_vm14, %v7842_v37, %v7794_v2  ;;  %v7872_v61 = vrot.slane %v7860_v17, 4  ;;  %v7843_v2 = vsel %vm3181_vm13, %v7840_v7, %v7784_v0 }
0x1465   : > { %v7873_v3 = vsel %vm2777_vm3, %v7845_v25, %v7869_v56  ;;  %v8012_v35 = vpop.f32.mrf.mxu1 }
0x1466   : > { %7917 = vst [vmem:[#allocation1] ss:$2 sm:$0xff] %v7873_v3 }
0x1467   : > { %v7774_v26 = vpop.permute.xlu0 %7773  ;;  %v7833_v39 = vpop.permute.xlu1 %7832 }
0x1468   : > { %v7858_v63 = vsel %vm3190_vm14, %v7854_v28, %v7833_v39  ;;  %v7841_v10 = vsel %vm2706_vm11, %v13854_v20, %v7774_v26  ;;  %v7798_v52 = vpop.permute.xlu2 %7797 }
0x1469   : > { %v7870_v62 = vrot.slane %v7858_v63, 4 }
0x146b   : > { %v7874_v23 = vsel %vm2777_vm3, %v7846_v58, %v7870_v62 }
0x146c   : > { %7919 = vst [vmem:[#allocation1 + $0x1] ss:$2 sm:$0xff] %v7874_v23 }
0x146f   : > { %v7786_v55 = vpop.permute.xlu0 %7785  ;;  %v7835_v40 = vpop.permute.xlu1 %7834 }
0x1470   : > { %v7844_v59 = vsel %vm3181_vm13, %v7841_v10, %v7786_v55  ;;  %v7859_v14 = vsel %vm3190_vm14, %v7855_v12, %v7835_v40  ;;  %v8061_v10 = vpop.permute.xlu2 %8060 }
0x1471   : > { %v7848_v30 = vsel %vm3190_vm14, %v7844_v59, %v7798_v52  ;;  %v7871_v8 = vrot.slane %v7859_v14, 4  ;;  %v8192_v52 = vld [vmem:[%s10392_s19 + $0x70] sm:$0xff]  ;;  %v8187_v14 = vld [vmem:[%s10392_s19 + $0x48] sm:$0xff] }
0x1472   : > { %v7876_v57 = vsel %vm2777_vm3, %v7848_v30, %v7872_v61  ;;  %v8193_v61 = vld [vmem:[%s10392_s19 + $0x78] sm:$0xff]  ;;  %v8191_v30 = vld [vmem:[%s10392_s19 + $0x68] sm:$0xff] }
0x1473   : > { %7927 = vst [vmem:[#allocation1 + $0x21] ss:$2 sm:$0xff] %v7876_v57  ;;  %v7932_v33 = vld.sshfl [vmem:[#allocation1] sm:$0xff pattern:$0x75316420]  ;;  %8217 = vmatpush.msra.mxu2 %v8193_v61 }
0x1474   : > { %7962 = vmatmul.f32.vlgmr.msra.gmra.mxu3 %v7932_v33  ;;  %v7933_v20 = vld.sshfl [vmem:[#allocation1 + $0x8] sm:$0xff pattern:$0x75316420]  ;;  %v8190_v57 = vld [vmem:[%s10392_s19 + $0x60] sm:$0xff]  ;;  %v8188_v33 = vld [vmem:[%s10392_s19 + $0x50] sm:$0xff] }
0x1475   : > { %7985 = vmatmul.f32.vlgmr.msra.gmra.mxu0 %v7933_v20  ;;  %8218 = vmatpush.msra.mxu2 %v8192_v52 }
0x1477   : > { %v7796_v48 = vpop.permute.xlu1 %7795  ;;  %v8046_v40 = vpop.permute.xlu0 %8045  ;;  %8219 = vmatpush.msra.mxu2 %v8191_v30 }
0x1478   : > { %v7847_v45 = vsel %vm3190_vm14, %v7843_v2, %v7796_v48  ;;  %v8186_v2 = vld [vmem:[%s10392_s19 + $0x40] sm:$0xff]  ;;  %v8185_v48 = vld [vmem:[%s10392_s19 + $0x38] sm:$0xff] }
0x1479   : > { %v7875_v9 = vsel %vm2777_vm3, %v7847_v45, %v7871_v8  ;;  %8220 = vmatpush.msra.mxu2 %v8190_v57  ;;  %v8184_v45 = vld [vmem:[%s10392_s19 + $0x30] sm:$0xff] }
0x147a   : > { %7925 = vst [vmem:[#allocation1 + $0x20] ss:$2 sm:$0xff] %v7875_v9  ;;  %v8135_v9 = vsel %vm2638_vm7, %v13646_v21, %v8046_v40 }
0x1481   : > { %v7935_v60 = vld.sshfl [vmem:[#allocation1 + $0x20] sm:$0xff pattern:$0x75316420]  ;;  %v7936_v16 = vld.sshfl [vmem:[#allocation1 + $0x28] sm:$0xff pattern:$0x75316420] }
0x1482   : > { %7965 = vmatmul.f32.gmra.mxu3 %v7935_v60  ;;  %7988 = vmatmul.f32.gmra.mxu0 %v7936_v16  ;;  %v8183_v60 = vld [vmem:[%s10392_s19 + $0x28] sm:$0xff] }
0x148a   : > { %8755 = vmatmul.msk.f32.vlgmr.msrb.gmra.mxu3 %vm2706_vm11, %v13844_v54 }
0x1492   : > { %8756 = vmatmul.msk.f32.gmra.mxu3 %vm2706_vm11, %v13841_v43 }
0x14f2   : > { %v7986_v41 = vpop.f32.mrf.mxu0 }
0x14f7   : > { %v7963_v42 = vpop.f32.mrf.mxu3 }
0x14f8   : > { %v7964_v13 = vadd.f32 %v9728_v29, %v7963_v42 }
0x14fa   : > { %v7987_v49 = vadd.f32 %v7986_v41, %v7964_v13 }
0x14fc   : > { %v8010_v46 = vadd.f32 %v8009_v4, %v7987_v49  ;;  %v8182_v49 = vld [vmem:[%s10392_s19 + $0x20] sm:$0xff] }
0x14fe   : > { %v8015_v34 = vmul.f32 0.01, %v8010_v46 }
0x14ff   : > { %v7989_v56 = vpop.f32.mrf.mxu0 }
0x1500   : > { %v8017_v47 = vmax.f32 %v8010_v46, %v8015_v34  ;;  %v8181_v46 = vld [vmem:[%s10392_s19 + $0x18] sm:$0xff]  ;;  %v8195_v34 = vld [vmem:[%s10392_s19 + $0x88] sm:$0xff] }
0x1501   : > { %8254 = vmatpush.msrb.mxu1 %v8195_v34 }
0x1502   : > { %v8751_v44 = vrot.slane %v8017_v47, 11  ;;  %v8023_v5 = vrot.slane %v8017_v47, 7 }
0x1504   : > { %v8032_v27 = vsel %vm1871_vm0, 0.0, %v8751_v44  ;;  %v8031_v38 = vsel %vm1871_vm0, 0.0, %v8023_v5  ;;  %v8179_v44 = vld [vmem:[%s10392_s19 + $0x8] sm:$0xff] }
0x1505   : > { %v7966_v53 = vpop.f32.mrf.mxu3  ;;  %v14013_v54 = vsel %vm7242_vm1, %v8032_v27, 0.0  ;;  %v14016_v43 = vsel %vm7242_vm1, %v8031_v38, 0.0 }
0x1506   : > { %v7967_v50 = vadd.f32 %v9728_v29, %v7966_v53  ;;  %8075 = vrot.lane.b32.xlu2 %v14013_v54, %s10101_s16  ;;  %8073 = vrot.lane.b32.xlu1 %v14016_v43, %s10101_s16  ;;  %v8057_v19 = vrot.slane %v14016_v43, 2  ;;  %v8042_v0 = vrot.slane %v14016_v43, 1  ;;  %v8043_v28 = vrot.slane %v14013_v54, 1 }
0x1507   : > { %v14033_v26 = vrot.slane %v14013_v54, 2  ;;  %v8139_v29 = vsel %vm2706_vm11, %v8135_v9, %v8061_v10  ;;  %v8173_v9 = vrot.slane %v13649_v51, 4 }
0x1508   : > { %v7990_v25 = vadd.f32 %v7989_v56, %v7967_v50  ;;  %8062 = vrot.lane.b32.xlu0 %v8057_v19, %s14330_s23 }
0x1509   : > { %v8170_v38 = vrot.slane %v14033_v26, 4 }
0x150a   : > { %v8013_v3 = vadd.f32 %v8012_v35, %v7990_v25  ;;  %v8178_v25 = vld [vmem:[%s10392_s19] sm:$0xff] }
0x150b   : > { %v8194_v35 = vld [vmem:[%s10392_s19 + $0x80] sm:$0xff] }
0x150c   : > { %v8016_v11 = vmul.f32 0.01, %v8013_v3  ;;  %8255 = vmatpush.msrb.mxu1 %v8194_v35 }
0x150e   : > { %8111 = vrot.lane.b32.xlu1 %v14013_v54, %s14328_s10  ;;  %8099 = vrot.lane.b32.xlu2 %v8057_v19, %s10102_s15  ;;  %v8018_v6 = vmax.f32 %v8013_v3, %v8016_v11 }
0x1510   : > { %8086 = vrot.lane.b32.xlu0 %v8042_v0, %s14329_s7  ;;  %v8025_v24 = vrot.slane %v8018_v6, 7  ;;  %v8752_v37 = vrot.slane %v8018_v6, 11 }
0x1512   : > { %v8033_v39 = vsel %vm1871_vm0, 0.0, %v8025_v24  ;;  %v8034_v62 = vsel %vm1871_vm0, 0.0, %v8752_v37  ;;  %vm8143_vm0 = vcmask 392192  }
0x1513   : > { %v14039_v22 = vsel %vm7242_vm1, %v8033_v39, 0.0  ;;  %v14056_v1 = vsel %vm7242_vm1, %v8034_v62, 0.0  ;;  %vm8152_vm1 = vcmask 654336  }
0x1514   : > { %v14045_v63 = vrot.slane %v14039_v22, 2  ;;  %v8044_v58 = vrot.slane %v14039_v22, 1  ;;  %v8098_v23 = vrot.slane %v14056_v1, 2  ;;  %v8085_v17 = vrot.slane %v14056_v1, 1 }
0x1516   : > { %8049 = vrot.lane.b32.xlu2 %v8043_v28, %s14366_s22  ;;  %8047 = vrot.lane.b32.xlu1 %v8042_v0, %s14366_s22  ;;  %v8171_v10 = vrot.slane %v14045_v63, 4 }
0x1518   : > { %8101 = vrot.lane.b32.xlu0 %v14033_v26, %s10102_s15 }
0x151e   : > { %8113 = vrot.lane.b32.xlu2 %v14039_v22, %s14328_s10  ;;  %8088 = vrot.lane.b32.xlu1 %v8043_v28, %s14329_s7 }
0x1520   : > { %8123 = vrot.lane.b32.xlu0 %v8043_v28, %s10103_s18 }
0x1526   : > { %8066 = vrot.lane.b32.xlu2 %v14045_v63, %s14330_s23  ;;  %8064 = vrot.lane.b32.xlu1 %v14033_v26, %s14330_s23  ;;  %s14368_s23 = sld [smem:[#allocation40_spill]] }
0x1528   : > { %8077 = vrot.lane.b32.xlu0 %v14039_v22, %s10101_s16 }
0x152e   : > { %8090 = vrot.lane.b32.xlu2 %v8044_v58, %s14329_s7  ;;  %8079 = vrot.lane.b32.xlu1 %v14056_v1, %s10101_s16  ;;  %s14370_s16 = sld [smem:[#allocation36_spill]] }
0x1530   : > { %8115 = vrot.lane.b32.xlu0 %v14056_v1, %s14328_s10 }
0x1536   : > { %8105 = vrot.lane.b32.xlu2 %v8098_v23, %s10102_s15  ;;  %8125 = vrot.lane.b32.xlu1 %v8044_v58, %s10103_s18 }
0x1538   : > { %8051 = vrot.lane.b32.xlu0 %v8044_v58, %s14366_s22  ;;  %s14369_s22 = sld [smem:[#allocation38_spill]] }
0x153e   : > { %8127 = vrot.lane.b32.xlu2 %v8085_v17, %s10103_s18  ;;  %8103 = vrot.lane.b32.xlu1 %v14045_v63, %s10102_s15  ;;  %s14371_s15 = sld [smem:[#allocation37_spill]] }
0x1540   : > { %8092 = vrot.lane.b32.xlu0 %v8085_v17, %s14329_s7 }
0x1546   : > { %8117 = vrot.lane.b32.xlu1 %v13646_v21, %s14328_s10  ;;  %v8180_v21 = vld [vmem:[%s10392_s19 + $0x10] sm:$0xff]  ;;  %s14367_s10 = sld [smem:[#allocation39_spill]] }
0x1548   : > { %8129 = vrot.lane.b32.xlu0 %v13652_v36, %s10103_s18  ;;  %v8189_v36 = vld [vmem:[%s10392_s19 + $0x58] sm:$0xff]  ;;  %s14372_s18 = sld [smem:[#allocation68_spill]] }
0x1549   : > { %8221 = vmatpush.msra.mxu2 %v8189_v36 }
0x154b   : > { %8222 = vmatpush.msra.mxu2 %v8188_v33 }
0x154c   : > { %v8316_v34 = vld [vmem:[%s14367_s10 + $0x8] sm:$0xff] }
0x154d   : > { %8223 = vmatpush.msra.mxu2 %v8187_v14  ;;  %8335 = vmatpush.msrb.mxu0 %v8316_v34 }
0x154f   : > { %8224 = vmatpush.msra.mxu2 %v8186_v2 }
0x1551   : > { %8225 = vmatpush.msra.mxu2 %v8185_v48 }
0x1553   : > { %8226 = vmatpush.msra.mxu2 %v8184_v45 }
0x1555   : > { %8227 = vmatpush.msra.mxu2 %v8183_v60 }
0x1557   : > { %8228 = vmatpush.msra.mxu2 %v8182_v49  ;;  %v9730_v49 = vld [vmem:[#allocation10] ss:$0 sm:$0xff] }
0x1559   : > { %8229 = vmatpush.msra.mxu2 %v8181_v46 }
0x155b   : > { %8230 = vmatpush.msra.mxu2 %v8180_v21  ;;  %v8296_v21 = vpop.f32.mrf.mxu3 }
0x155d   : > { %8231 = vmatpush.msra.mxu2 %v8179_v44 }
0x155f   : > { %8232 = vmatpush.msra.mxu2 %v8178_v25 }
0x1560   : > { %v14075_v55 = vpop.permute.xlu2 %8075 }
0x1563   : > { %v8299_v35 = vpop.f32.mrf.mxu3 }
0x1568   : > { %v8100_v59 = vpop.permute.xlu2 %8099 }
0x1570   : > { %v8050_v20 = vpop.permute.xlu2 %8049 }
0x1578   : > { %v8074_v18 = vpop.permute.xlu1 %8073  ;;  %v8114_v42 = vpop.permute.xlu2 %8113 }
0x1579   : > { %v8144_v41 = vsel %vm8143_vm0, %v8139_v29, %v8074_v18 }
0x157a   : > { %v8063_v12 = vpop.permute.xlu0 %8062 }
0x1580   : > { %v8112_v7 = vpop.permute.xlu1 %8111  ;;  %v8067_v19 = vpop.permute.xlu2 %8066 }
0x1582   : > { %v8087_v8 = vpop.permute.xlu0 %8086 }
0x1583   : > { %v8148_v4 = vsel %vm3181_vm13, %v8144_v41, %v8087_v8 }
0x1584   : > { %v8153_v47 = vsel %vm8152_vm1, %v8148_v4, %v8100_v59 }
0x1585   : > { %v8157_v27 = vsel %vm3190_vm14, %v8153_v47, %v8112_v7  ;;  %v8315_v47 = vld [vmem:[%s14367_s10] sm:$0xff] }
0x1586   : > { %8336 = vmatpush.msrb.mxu0 %v8315_v47 }
0x1588   : > { %v8048_v16 = vpop.permute.xlu1 %8047  ;;  %v8091_v6 = vpop.permute.xlu2 %8090 }
0x1589   : > { %v8136_v0 = vsel %vm2638_vm7, %v14016_v43, %v8048_v16  ;;  %v8137_v43 = vsel %vm2638_vm7, %v14013_v54, %v8050_v20 }
0x158a   : > { %v8102_v13 = vpop.permute.xlu0 %8101  ;;  %v8140_v28 = vsel %vm2706_vm11, %v8136_v0, %v8063_v12  ;;  %v8172_v12 = vrot.slane %v8098_v23, 4 }
0x158b   : > { %v8145_v26 = vsel %vm8143_vm0, %v8140_v28, %v14075_v55 }
0x1590   : > { %v8089_v5 = vpop.permute.xlu1 %8088  ;;  %v8106_v58 = vpop.permute.xlu2 %8105 }
0x1591   : > { %v8149_v39 = vsel %vm3181_vm13, %v8145_v26, %v8089_v5  ;;  %v8356_v5 = vld [vmem:[%s14368_s23 + $0x8] sm:$0xff] }
0x1592   : > { %v8124_v53 = vpop.permute.xlu0 %8123  ;;  %v8154_v62 = vsel %vm8152_vm1, %v8149_v39, %v8102_v13  ;;  %8375 = vmatpush.msra.mxu1 %v8356_v5 }
0x1593   : > { %v8162_v50 = vsel %vm8161_vm15, %v8157_v27, %v8124_v53  ;;  %v8158_v17 = vsel %vm3190_vm14, %v8154_v62, %v8114_v42  ;;  %v9729_v53 = vld [vmem:[#allocation12] ss:$0 sm:$0xff] }
0x1594   : > { %v8174_v56 = vsel %vm2777_vm3, %v8162_v50, %v8170_v38  ;;  %v8300_v0 = vadd.f32 %v9729_v53, %v8299_v35 }
0x1595   : > { %8200 = vst [vmem:[#allocation1] ss:$2 sm:$0xff] %v8174_v56 }
0x1598   : > { %v8065_v3 = vpop.permute.xlu1 %8064  ;;  %v8128_v33 = vpop.permute.xlu2 %8127 }
0x1599   : > { %v8141_v52 = vsel %vm2706_vm11, %v8137_v43, %v8065_v3  ;;  %v8297_v3 = vadd.f32 %v9729_v53, %v8296_v21 }
0x159a   : > { %v8078_v11 = vpop.permute.xlu0 %8077 }
0x159b   : > { %v8146_v30 = vsel %vm8143_vm0, %v8141_v52, %v8078_v11  ;;  %v8355_v52 = vld [vmem:[%s14368_s23] sm:$0xff] }
0x159c   : > { %v8150_v57 = vsel %vm3181_vm13, %v8146_v30, %v8091_v6  ;;  %8376 = vmatpush.msra.mxu1 %v8355_v52 }
0x15a0   : > { %v8080_v24 = vpop.permute.xlu1 %8079 }
0x15a2   : > { %v8116_v37 = vpop.permute.xlu0 %8115 }
0x15a8   : > { %v8126_v40 = vpop.permute.xlu1 %8125 }
0x15a9   : > { %v8163_v61 = vsel %vm8161_vm15, %v8158_v17, %v8126_v40 }
0x15aa   : > { %v8175_v55 = vsel %vm2777_vm3, %v8163_v61, %v8171_v10  ;;  %v8052_v59 = vpop.permute.xlu0 %8051 }
0x15ab   : > { %8202 = vst [vmem:[#allocation1 + $0x1] ss:$2 sm:$0xff] %v8175_v55  ;;  %v8138_v18 = vsel %vm2638_vm7, %v14039_v22, %v8052_v59  ;;  %v8314_v55 = vld [vmem:[%s14369_s22] sm:$0x7]  ;;  %s14373_s22 = sld [smem:[#allocation66_spill]] }
0x15ac   : > { %v8142_v54 = vsel %vm2706_vm11, %v8138_v18, %v8067_v19  ;;  %v8341_v59 = vmul.f32 %v8314_v55, %v12283_v32  ;;  %v8317_v30 = vmul.f32 %v8314_v55, %v12285_v31  ;;  %v8346_v18 = vmul.f32 %v8314_v55, %v12287_v15 }
0x15ad   : > { %v8147_v1 = vsel %vm8143_vm0, %v8142_v54, %v8080_v24 }
0x15ae   : > { %v8348_v54 = vrot.slane %v8346_v18, 2 }
0x15b0   : > { %v8104_v63 = vpop.permute.xlu1 %8103 }
0x15b1   : > { %v8155_v36 = vsel %vm8152_vm1, %v8150_v57, %v8104_v63  ;;  %v8343_v57 = vrot.slane %v8341_v59, 1  ;;  %s14374_s1 = smov %s14373_s22  ;;  %s8426_s3 = scalar_lea.hbm %s14373_s22, %s8766_s2 }
0x15b2   : > { %v8159_v14 = vsel %vm3190_vm14, %v8155_v36, %v8116_v37  ;;  %v8093_v20 = vpop.permute.xlu0 %8092  ;;  %v8207_v7 = vld.sshfl [vmem:[#allocation1] sm:$0xff pattern:$0x75316420]  ;;  %v8208_v2 = vld.sshfl [vmem:[#allocation1 + $0x8] sm:$0xff pattern:$0x75316420] }
0x15b3   : > { %v8164_v8 = vsel %vm8161_vm15, %v8159_v14, %v8128_v33  ;;  %8233 = vmatmul.f32.vlgmr.msra.gmra.mxu2 %v8207_v7  ;;  %8753 = vmatmul.msk.f32.vlgmr.msrb.gmra.mxu1 %vm2638_vm7, %v8208_v2  ;;  %v8151_v23 = vsel %vm3181_vm13, %v8147_v1, %v8093_v20  ;;  %v8351_v33 = vld [vmem:[%s14370_s16] sm:$0x1]  ;;  %s1792_s16 = sand.u32 1, %s14372_s18   ;;  %s8429_s6 = sshll.u32 %s8426_s3, 4  ;;  %s8430_s6 = int_to_ptr.hbm [resolvable:$true] %s8429_s6 }
0x15b4   : > { %v8176_v22 = vsel %vm2777_vm3, %v8164_v8, %v8172_v12  ;;  %v8156_v48 = vsel %vm8152_vm1, %v8151_v23, %v8106_v58  ;;  %v8357_v8 = vld [vmem:[%s14371_s15] sm:$0x1]  ;;  %s8628_s15 = sshll.u32 %s1792_s16, 4  ;;  %s8415_s0 = scalar_lea.sflag [#allocation4], %s1792_s16 }
0x15b5   : > { %8204 = vst [vmem:[#allocation1 + $0x10] ss:$2 sm:$0xff] %v8176_v22  ;;  %s1794_s4 = scalar_lea.vmem [#allocation13], %s8628_s15  ;;  %s9960_s2 = sshra.s32 %s8430_s6, 4  ;;  %s9961_s2 = int_to_ptr.hbm [resolvable:$true] %s9960_s2 }
0x15b6   : > { %s8427_s18 = sshll.u32 %s1794_s4, 4  ;;  %s9962_s22 = scalar_lea.hbm %s9961_s2, 16  ;;  %s8428_s18 = int_to_ptr.vmem [resolvable:$true] %s8427_s18 }
0x15b7   : > { %p9963_p9 = scmp.ne.s32.totalorder %s9961_s2, %s9962_s22  ;;  %s9966_s15 = scalar_lea.hbm %s14374_s1, 32 }
0x15b8   : > { %v8118_v45 = vpop.permute.xlu1 %8117  ;;  %p9967_p1 = scmp.lt.s32.totalorder %s9961_s2, %s14374_s1  ;;  %p9968_p3 = scmp.lt.s32.totalorder %s9966_s15, %s9962_s22 }
0x15b9   : > { %v8160_v60 = vsel %vm3190_vm14, %v8156_v48, %v8118_v45  ;;  %vm8409_vm14 = vcmask 125952   ;;  %p9964_p12 = pnand %p9963_p9, %p10442_p5 }
0x15ba   : > { %v8130_v16 = vpop.permute.xlu0 %8129  ;;  %p9969_p4 = por %p9968_p3, %p9967_p1 }
0x15bb   : > { %v8165_v29 = vsel %vm8161_vm15, %v8160_v60, %v8130_v16  ;;  %p9965_p0 = pneg %p9964_p12 }
0x15bc   : > { %v8177_v42 = vsel %vm2777_vm3, %v8165_v29, %v8173_v9 }
0x15bd   : > { %8206 = vst [vmem:[#allocation1 + $0x11] ss:$2 sm:$0xff] %v8177_v42  ;;  %p9970_p7 = pnand %p9969_p4, %p9965_p0 }
0x15c4   : > { %v8209_v13 = vld.sshfl [vmem:[#allocation1 + $0x10] sm:$0xff pattern:$0x75316420]  ;;  %v8210_v41 = vld.sshfl [vmem:[#allocation1 + $0x18] sm:$0xff pattern:$0x75316420] }
0x15c5   : > { %8236 = vmatmul.f32.gmra.mxu2 %v8209_v13  ;;  %8754 = vmatmul.msk.f32.gmra.mxu1 %vm2638_vm7, %v8210_v41 }
0x1630   : > { %v8257_v51 = vpop.f32.mrf.mxu1 }
0x1636   : > { %v8234_v4 = vpop.f32.mrf.mxu2 }
0x1637   : > { %v8235_v46 = vadd.f32 %v9730_v49, %v8234_v4 }
0x1639   : > { %v8258_v44 = vadd.f32 %v8257_v51, %v8235_v46 }
0x163b   : > { %v8263_v27 = vmul.f32 0.01, %v8258_v44 }
0x163d   : > { %v8265_v56 = vmax.f32 %v8258_v44, %v8263_v27 }
0x163f   : > { %v8302_v6 = vadd.f32 %v8297_v3, %v8265_v56 }
0x1641   : > { %v8304_v26 = vsel %vm2638_vm7, %v8302_v6, 0.0 }
0x1642   : > { %v8260_v19 = vpop.f32.mrf.mxu1 }
0x1648   : > { %v8237_v38 = vpop.f32.mrf.mxu2 }
0x1649   : > { %v8238_v50 = vadd.f32 %v9730_v49, %v8237_v38 }
0x164b   : > { %v8261_v25 = vadd.f32 %v8260_v19, %v8238_v50 }
0x164d   : > { %v8264_v11 = vmul.f32 0.01, %v8261_v25 }
0x164f   : > { %v8266_v28 = vmax.f32 %v8261_v25, %v8264_v11 }
0x1651   : > { %v8303_v24 = vadd.f32 %v8300_v0, %v8266_v28 }
0x1653   : > { %v8305_v39 = vsel %vm2638_vm7, %v8303_v24, 0.0 }
0x1654   : > { %v8306_v37 = vadd.f32 %v8305_v39, %v8304_v26 }
0x1656   : > { %v8307_v62 = vrot.slane %v8306_v37, 4 }
0x1658   : > { %v8308_v58 = vadd.f32 %v8307_v62, %v8306_v37 }
0x165a   : > { %v8309_v17 = vrot.slane %v8308_v58, 2 }
0x165c   : > { %v8310_v10 = vadd.f32 %v8309_v17, %v8308_v58 }
0x165e   : > { %v8311_v40 = vrot.slane %v8310_v10, 1 }
0x1660   : > { %v8312_v43 = vadd.f32 %v8311_v40, %v8310_v10 }
0x1662   : > { %v8313_v61 = vmul.f32 0.0625, %v8312_v43 }
0x1664   : > { %8757 = vmatmul.msk.f32.vlgmr.msrb.gmra.mxu0 %vm2638_vm7, %v8313_v61 }
0x16e1   : > { %v8338_v63 = vpop.f32.mrf.mxu0 }
0x16e2   : > { %v8339_v12 = vadd.f32 %v8338_v63, %v8317_v30 }
0x16e4   : > { %v8345_v36 = vadd.f32 %v8343_v57, %v8339_v12 }
0x16e6   : > { %v8350_v14 = vadd.f32 %v8348_v54, %v8345_v36 }
0x16e8   : > { %v8352_v20 = vadd.f32 %v8351_v33, %v8350_v14 }
0x16ea   : > { %v8353_v7 = vmul.f32 0.01, %v8352_v20 }
0x16ec   : > { %v8354_v2 = vmax.f32 %v8352_v20, %v8353_v7 }
0x16ee   : > { %8758 = vmatmul.msk.f32.vlgmr.msra.gmra.mxu1 %vm2638_vm7, %v8354_v2 }
0x176b   : > { %v8378_v22 = vpop.f32.mrf.mxu1 }
0x176c   : > { %v8379_v32 = vadd.f32 %v8378_v22, %v8357_v8 }
0x176e   : > { %v8759_v1 = vmul.f32 -1.442695, %v8379_v32 }
0x1770   : > { %9763 = vpow2.f32 %v8759_v1 }
0x1776   : > { %v9764_v31 = vpop.eup %9763 }
0x1777   : > { %v8384_v15 = vadd.f32 1.0, %v9764_v31 }
0x1779   : > { %9765 = vrcp.f32 %v8384_v15  ;;  %v8396_v9 = vand.u32 2147483648, %v8384_v15  ;;  %v8394_v16 = vand.u32 2147483647, %v8384_v15  ;;  %vm8390_vm7 = vweird.f32 %v8384_v15 }
0x177b   : > { %v8397_v42 = vor.u32 1.1754944e-38, %v8396_v9  ;;  %vm8395_vm13 = vcmp.eq.f32.partialorder %v8394_v16, 8.507059e+37 }
0x177f   : > { %v9766_v23 = vpop.eup %9765 }
0x1780   : > { %v8386_v48 = vmul.f32 %v9766_v23, %v8384_v15  ;;  %vm8391_vm3 = vweird.f32 %v9766_v23 }
0x1781   : > { %vm8392_vm11 = vmor %vm8390_vm7, %vm8391_vm3 }
0x1782   : > { %v8387_v45 = vsub.f32 1.0, %v8386_v48 }
0x1784   : > { %v8388_v60 = vmul.f32 %v9766_v23, %v8387_v45 }
0x1786   : > { %v8389_v29 = vadd.f32 %v9766_v23, %v8388_v60 }
0x1788   : > { %v8393_v13 = vsel %vm8392_vm11, %v9766_v23, %v8389_v29 }
0x1789   : > { %v8398_v41 = vsel %vm8395_vm13, %v8397_v42, %v8393_v13 }
0x178a   : > { %v8400_v49 = vperm.slane %v8398_v41, 0 }
0x178c   : > { %v8401_v4 = vmul.f32 %v8400_v49, %v8302_v6  ;;  %v8402_v46 = vmul.f32 %v8400_v49, %v8303_v24 }
0x178e   : > { %v8405_v21 = vrot.slane %v8401_v4, 4  ;;  %v8406_v51 = vrot.slane %v8402_v46, 4  ;;  %8410 = vst.msk [vmem:[%s1794_s4] sm:$0xf] %vm8409_vm14, %v8401_v4 }
0x178f   : > { %8412 = vst.msk [vmem:[%s1794_s4 + $0x8] sm:$0xf] %vm8409_vm14, %v8402_v46 }
0x1790   : > { %8411 = vst.msk [vmem:[%s1794_s4 + $0x4] sm:$0xf] %vm8409_vm14, %v8405_v21 }
0x1791   : > { %8413 = vst.msk [vmem:[%s1794_s4 + $0xc] sm:$0xf] %vm8409_vm14, %v8406_v51 }
0x1792   : > { %9973 = shalt.err (!%p9970_p7)
}
0x1793   : > { %s14376_s3 = smov 4  }
0x1794   : > { %8791 = dma.vmem_to_hbm [thread:$0]  (%p10442_p5), %s8428_s18, 256, %s8430_s6, %s8415_s0, %s14329_s7, %s14329_s7, %s14376_s3  }
0x1795 PF: > { %s14377_s4 = sld [smem:[#allocation70_spill]] }
0x1796   : > { %s14378_s16 = sld [smem:[#allocation67_spill]] }
0x179b   : > { %p8828_p8 = scmp.ge.s32.totalorder %s14377_s4, 2 }
0x179c   : > { %s8444_s9 = sand.u32 1, %s14378_s16  }
0x179d   : > { %p8813_p11 = pnand %p8828_p8, %p10446_p6  ;;  %s8445_s2 = scalar_lea.sflag [#allocation4], %s8444_s9 }
0x179f   : > { %p8814_p13 = pneg %p8813_p11 }
0x17a1   : > { %10007 = dma.done.wait (%p8814_p13), %s8445_s2, 256  }
0x17a2   : > { %10009 = vsyncadd (%p8814_p13), %s8445_s2, 4294967040  ;;  %s14380_s22 = sld [smem:[#allocation71_spill]] }
0x17a3   : > { %s14381_s15 = sld [smem:[#allocation68_spill]] }
0x17a4   : > { %s14382_s16 = sld [smem:[#allocation69_spill]] }
0x17a5   : > { %s14383_s18 = sld [smem:[#allocation72_spill]] }
0x17a8   : > { %p131_p2 = scmp.ge.s32.totalorder %s14380_s22, 4  }
0x17aa   :  { %133 = sbr.rel (!%p131_p2) target bundleno = 124 (0x7c), region = 388 }
0x17af   :  { %8451 = vsyncpa [#allocation3], 1 }
0x17b0   :  { %8453 = vsyncpa [#allocation3 + $0x1], 1 }
0x17b1   :  { %8454 = vsyncpa [#allocation8], 1 }
0x17b2   :  { %8455 = vsyncpa [#allocation11], 1 }
0x17b3   :  { %8456 = vsyncpa [#allocation4], 1 }
0x17b4   :  { %8458 = vsyncpa [#allocation4 + $0x1], 1 }
0x17b5   :  { %8459 = vsyncpa [#allocation5], 1 }
0x17b6   :  { %8461 = vsyncpa [#allocation5 + $0x1], 1 }

</bundles_post_ra>
